<compile_context>
chip_gen: v7x
topology: tpu7x:2x2x1
jax: 0.10.0
libtpu: 0.0.40
codegen_flags: <defaults>
</compile_context>

<pallas_src>
import jax
import jax.numpy as jnp
from jax.experimental import pallas as pl
from jax.experimental.pallas import tpu as pltpu


# ---------------------------------------------------------------------------
# Kernel 1: fused tiled  out = relu(A @ W + bias)      (conv1 / conv2 im2col)
#   A: (M, K) bf16, tiled over M; W: (K, Cout) bf16, VMEM-resident; bias f32.
# ---------------------------------------------------------------------------
def _matmul_bias_relu_kernel(a_ref, w_ref, b_ref, o_ref):
    acc = jnp.dot(a_ref[...], w_ref[...], preferred_element_type=jnp.float32)
    acc = jnp.maximum(acc + b_ref[...], 0.0)          # bias (1, Cout) broadcasts
    o_ref[...] = acc.astype(o_ref.dtype)


def matmul_bias_relu(a, w, b, *, out_dtype=jnp.bfloat16, tm_max=1024):
    M, K = a.shape
    K2, Nout = w.shape
    assert K == K2
    tm = M if M <= tm_max else tm_max                 # full dim or 8-aligned tile
    bias2d = b.reshape(1, Nout).astype(jnp.float32)
    return pl.pallas_call(
        _matmul_bias_relu_kernel,
        out_shape=jax.ShapeDtypeStruct((M, Nout), out_dtype),
        grid=(pl.cdiv(M, tm),),
        in_specs=[
            pl.BlockSpec((tm, K), lambda i: (i, 0)),      # A tiles stream (pipelined)
            pl.BlockSpec((K, Nout), lambda i: (0, 0)),    # weights stay resident
            pl.BlockSpec((1, Nout), lambda i: (0, 0)),
        ],
        out_specs=pl.BlockSpec((tm, Nout), lambda i: (i, 0)),
        compiler_params=pltpu.CompilerParams(
            dimension_semantics=("parallel",),
        ),
    )(a, w, bias2d)


# ---------------------------------------------------------------------------
# Kernel 2: fused MLP head
#   out = log_softmax(relu(X @ W1 + b1) @ W2 + b2)
#   X tiled over rows; W1 (bf16) / W2 (f32) / biases VMEM-resident.
# ---------------------------------------------------------------------------
def _mlp_head_kernel(x_ref, w1_ref, b1_ref, w2_ref, b2_ref, o_ref):
    h = jnp.dot(x_ref[...], w1_ref[...], preferred_element_type=jnp.float32)
    h = jnp.maximum(h + b1_ref[...], 0.0)                      # fc1 + ReLU (f32)
    y = jnp.dot(h, w2_ref[...], preferred_element_type=jnp.float32) + b2_ref[...]
    y = y - jnp.max(y, axis=-1, keepdims=True)                 # log_softmax (f32)
    y = y - jnp.log(jnp.sum(jnp.exp(y), axis=-1, keepdims=True))
    o_ref[...] = y.astype(o_ref.dtype)


def mlp_head(x, w1, b1, w2, b2, *, tm_max=256):
    M, K = x.shape
    K1, H = w1.shape
    H2, C = w2.shape
    assert K == K1 and H == H2
    tm = M if M <= tm_max else tm_max
    b1_2d = b1.reshape(1, H).astype(jnp.float32)
    b2_2d = b2.reshape(1, C).astype(jnp.float32)
    return pl.pallas_call(
        _mlp_head_kernel,
        out_shape=jax.ShapeDtypeStruct((M, C), jnp.float32),
        grid=(pl.cdiv(M, tm),),
        in_specs=[
            pl.BlockSpec((tm, K), lambda i: (i, 0)),
            pl.BlockSpec((K, H), lambda i: (0, 0)),
            pl.BlockSpec((1, H), lambda i: (0, 0)),
            pl.BlockSpec((H, C), lambda i: (0, 0)),
            pl.BlockSpec((1, C), lambda i: (0, 0)),
        ],
        out_specs=pl.BlockSpec((tm, C), lambda i: (i, 0)),
        compiler_params=pltpu.CompilerParams(
            dimension_semantics=("parallel",),
        ),
    )(x, w1, b1_2d, w2, b2_2d)


# ---------------------------------------------------------------------------
# Kernel 3: 2x2 max pool, stride 2.
#   Input is pre-shaped (glue, free reshape) to (N*Hp, 2, Wp, 2, C) so the two
#   pooled elements sit in tiny explicit dims; the kernel reduces them with
#   static slices + jnp.maximum (no strided / integer ref indexing).
# ---------------------------------------------------------------------------
def _maxpool2x2_kernel(x_ref, o_ref):
    x = x_ref[...]                                    # (TB, 2, Wp, 2, C)
    m = jnp.maximum(x[:, 0:1], x[:, 1:2])             # pool over H pair
    o_ref[...] = jnp.maximum(m[:, :, :, 0:1, :],      # pool over W pair
                             m[:, :, :, 1:2, :])      # (TB, 1, Wp, 1, C)


def maxpool2x2(x_pairs, *, tb_max=128):
    R, _, Wp, _, C = x_pairs.shape
    tb = R if R <= tb_max else tb_max
    return pl.pallas_call(
        _maxpool2x2_kernel,
        out_shape=jax.ShapeDtypeStruct((R, 1, Wp, 1, C), x_pairs.dtype),
        grid=(pl.cdiv(R, tb),),
        in_specs=[pl.BlockSpec((tb, 2, Wp, 2, C), lambda i: (i, 0, 0, 0, 0))],
        out_specs=pl.BlockSpec((tb, 1, Wp, 1, C), lambda i: (i, 0, 0, 0, 0)),
        compiler_params=pltpu.CompilerParams(
            dimension_semantics=("parallel",),
        ),
    )(x_pairs)


# ---------------------------------------------------------------------------
# Glue: im2col for 3x3 / stride-1 / VALID conv on NHWC input (bf16).
# Column order (kh, kw, cin) matches the weight reshape below.
# ---------------------------------------------------------------------------
def im2col_3x3(x):
    N, H, W, C = x.shape
    Ho, Wo = H - 2, W - 2
    cols = [x[:, kh:kh + Ho, kw:kw + Wo, :] for kh in range(3) for kw in range(3)]
    patches = jnp.concatenate(cols, axis=-1)          # (N, Ho, Wo, 9*C)
    return patches.reshape(N * Ho * Wo, 9 * C), (Ho, Wo)


# ---------------------------------------------------------------------------
# Deterministic parameter init (shapes follow the PyTorch module).
# Matmul weights stored in bf16; biases and fc2 weights stay f32.
# ---------------------------------------------------------------------------
def init_params(key):
    ks = jax.random.split(key, 8)

    def u(k, shape, fan_in):
        bound = fan_in ** -0.5
        return jax.random.uniform(k, shape, jnp.float32, -bound, bound)

    # conv1: torch weight (32, 1, 3, 3) -> (kh, kw, cin, cout) -> (9, 32)
    w1_t = u(ks[0], (32, 1, 3, 3), 9)
    b1 = u(ks[1], (32,), 9)
    w1 = jnp.transpose(w1_t, (2, 3, 1, 0)).reshape(9, 32)

    # conv2: torch weight (64, 32, 3, 3) -> (9*32, 64)
    w2_t = u(ks[2], (64, 32, 3, 3), 288)
    b2 = u(ks[3], (64,), 288)
    w2 = jnp.transpose(w2_t, (2, 3, 1, 0)).reshape(288, 64)

    # fc1: torch weight (128, 9216); rows are in NCHW-flatten order c*144 + p.
    # Permute once to NHWC-flatten order p*64 + c so no runtime transpose.
    wf1_t = u(ks[4], (128, 9216), 9216)
    bf1 = u(ks[5], (128,), 9216)
    wf1 = wf1_t.T.reshape(64, 144, 128).transpose(1, 0, 2).reshape(9216, 128)

    # fc2: torch weight (10, 128) -> (128, 10)
    wf2_t = u(ks[6], (10, 128), 128)
    bf2 = u(ks[7], (10,), 128)
    wf2 = wf2_t.T

    return dict(
        w1=w1.astype(jnp.bfloat16), b1=b1,
        w2=w2.astype(jnp.bfloat16), b2=b2,
        wf1=wf1.astype(jnp.bfloat16), bf1=bf1,
        wf2=wf2, bf2=bf2,
    )


# ---------------------------------------------------------------------------
# Forward pass (matches torch Net.forward, eval-mode dropout).
# ---------------------------------------------------------------------------
@jax.jit
def net_forward(params, x_nchw):
    N = x_nchw.shape[0]
    x = jnp.transpose(x_nchw, (0, 2, 3, 1)).astype(jnp.bfloat16)   # NCHW -> NHWC

    # conv1 + relu   (28 -> 26)
    p1, (h1, w1d) = im2col_3x3(x)                                  # (N*676, 9)
    y1 = matmul_bias_relu(p1, params["w1"], params["b1"])          # (N*676, 32)
    y1 = y1.reshape(N, h1, w1d, 32)

    # conv2 + relu   (26 -> 24)
    p2, (h2, w2d) = im2col_3x3(y1)                                 # (N*576, 288)
    y2 = matmul_bias_relu(p2, params["w2"], params["b2"])          # (N*576, 64)

    # max_pool2d(2)  (24 -> 12); expose 2x2 pool pairs via free reshape
    hp, wp = h2 // 2, w2d // 2
    y2 = y2.reshape(N * hp, 2, wp, 2, 64)
    y3 = maxpool2x2(y2)                                            # (N*hp, 1, wp, 1, 64)

    # dropout1: eval-mode identity
    # flatten in NHWC order (fc1 rows were permuted at init to match)
    y3 = y3.reshape(N, hp * wp * 64)                               # (N, 9216)

    # fc1 + relu + (dropout2 identity) + fc2 + log_softmax, fused
    return mlp_head(y3, params["wf1"], params["bf1"],
                    params["wf2"], params["bf2"])                  # (N, 10)


if __name__ == "__main__":
    key = jax.random.PRNGKey(0)
    k_x, k_p = jax.random.split(key)
    # Input must be 28x28 so that 64*12*12 == 9216 matches fc1.
    x = jax.random.normal(k_x, (2, 1, 28, 28), jnp.float32)
    params = init_params(k_p)

    out = jax.block_until_ready(net_forward(params, x))

    assert out.shape == (2, 10)
    assert bool(jnp.all(jnp.isfinite(out)))
    # log_softmax rows must exponentiate-sum to ~1
    assert bool(jnp.allclose(jnp.sum(jnp.exp(out), axis=1), 1.0, atol=1e-4))
    print("KERNEL_OK")
</pallas_src>

<mosaic_0001>
module attributes {stable_mosaic.version = 11 : i64} {
  func.func @_matmul_bias_relu_kernel(%arg0: i32, %arg1: memref<1024x9xbf16, #tpu.memory_space<vmem>>, %arg2: memref<9x32xbf16, #tpu.memory_space<vmem>>, %arg3: memref<1x32xf32, #tpu.memory_space<vmem>>, %arg4: memref<1024x32xbf16, #tpu.memory_space<vmem>>) attributes {dimension_semantics = [#tpu.dimension_semantics<parallel>], iteration_bounds = array<i64: 2>, scalar_prefetch = 0 : i64, scratch_operands = 0 : i64, tpu.core_type = #tpu.core_type<tc>, window_params = [{transform_indices = @transform_0, window_bounds = array<i64: 1024, 9>}, {pipeline_mode = #tpu.pipeline_mode<synchronous>, transform_indices = @transform_1, window_bounds = array<i64: 9, 32>}, {pipeline_mode = #tpu.pipeline_mode<synchronous>, transform_indices = @transform_2, window_bounds = array<i64: 1, 32>}, {transform_indices = @transform_3, window_bounds = array<i64: 1024, 32>}]} {
    %c0 = arith.constant 0 : index
    %c0_0 = arith.constant 0 : index
    %0 = vector.load %arg1[%c0, %c0_0] : memref<1024x9xbf16, #tpu.memory_space<vmem>>, vector<1024x9xbf16>
    %c0_1 = arith.constant 0 : index
    %c0_2 = arith.constant 0 : index
    %1 = vector.load %arg2[%c0_1, %c0_2] : memref<9x32xbf16, #tpu.memory_space<vmem>>, vector<9x32xbf16>
    %cst = arith.constant dense<0.000000e+00> : vector<1024x32xf32>
    %2 = tpu.matmul %0, %1, %cst {dimension_numbers = #tpu.dot_dimension_numbers<[1], [0], [0], [1], [0, 0, 1, 1], [], []>} : vector<1024x9xbf16>, vector<9x32xbf16>, vector<1024x32xf32> -> vector<1024x32xf32>
    %c0_3 = arith.constant 0 : index
    %c0_4 = arith.constant 0 : index
    %3 = vector.load %arg3[%c0_3, %c0_4] : memref<1x32xf32, #tpu.memory_space<vmem>>, vector<1x32xf32>
    %4 = vector.broadcast %3 : vector<1x32xf32> to vector<1024x32xf32>
    %5 = arith.addf %2, %4 : vector<1024x32xf32>
    %cst_5 = arith.constant 0.000000e+00 : f32
    %6 = vector.broadcast %cst_5 : f32 to vector<1024x32xf32>
    %7 = arith.maximumf %5, %6 : vector<1024x32xf32>
    %8 = arith.truncf %7 : vector<1024x32xf32> to vector<1024x32xbf16>
    %c0_6 = arith.constant 0 : index
    %c0_7 = arith.constant 0 : index
    %9 = vector.load %arg4[%c0_6, %c0_7] : memref<1024x32xbf16, #tpu.memory_space<vmem>>, vector<1024x32xbf16>
    tpu.vector_store %arg4[%c0_6, %c0_7], %8 {strides = array<i32>} : memref<1024x32xbf16, #tpu.memory_space<vmem>>, vector<1024x32xbf16>,
    return
  }
  func.func @transform_0(%arg0: i32) -> (i32, i32) {
    %c0_i32 = arith.constant 0 : i32
    %c0_i32_0 = arith.constant 0 : i32
    return %arg0, %c0_i32 : i32, i32
  }
  func.func @transform_1(%arg0: i32) -> (i32, i32) {
    %c0_i32 = arith.constant 0 : i32
    %c0_i32_0 = arith.constant 0 : i32
    %c0_i32_1 = arith.constant 0 : i32
    return %c0_i32, %c0_i32_0 : i32, i32
  }
  func.func @transform_2(%arg0: i32) -> (i32, i32) {
    %c0_i32 = arith.constant 0 : i32
    %c0_i32_0 = arith.constant 0 : i32
    %c0_i32_1 = arith.constant 0 : i32
    return %c0_i32, %c0_i32_0 : i32, i32
  }
  func.func @transform_3(%arg0: i32) -> (i32, i32) {
    %c0_i32 = arith.constant 0 : i32
    %c0_i32_0 = arith.constant 0 : i32
    return %arg0, %c0_i32 : i32, i32
  }
}

module attributes {stable_mosaic.version = 11 : i64} {
  func.func @_matmul_bias_relu_kernel(%arg0: i32, %arg1: memref<1024x288xbf16, #tpu.memory_space<vmem>>, %arg2: memref<288x64xbf16, #tpu.memory_space<vmem>>, %arg3: memref<1x64xf32, #tpu.memory_space<vmem>>, %arg4: memref<1024x64xbf16, #tpu.memory_space<vmem>>) attributes {dimension_semantics = [#tpu.dimension_semantics<parallel>], iteration_bounds = array<i64: 2>, scalar_prefetch = 0 : i64, scratch_operands = 0 : i64, tpu.core_type = #tpu.core_type<tc>, window_params = [{transform_indices = @transform_0, window_bounds = array<i64: 1024, 288>}, {pipeline_mode = #tpu.pipeline_mode<synchronous>, transform_indices = @transform_1, window_bounds = array<i64: 288, 64>}, {pipeline_mode = #tpu.pipeline_mode<synchronous>, transform_indices = @transform_2, window_bounds = array<i64: 1, 64>}, {transform_indices = @transform_3, window_bounds = array<i64: 1024, 64>}]} {
    %c0 = arith.constant 0 : index
    %c0_0 = arith.constant 0 : index
    %0 = vector.load %arg1[%c0, %c0_0] : memref<1024x288xbf16, #tpu.memory_space<vmem>>, vector<1024x288xbf16>
    %c0_1 = arith.constant 0 : index
    %c0_2 = arith.constant 0 : index
    %1 = vector.load %arg2[%c0_1, %c0_2] : memref<288x64xbf16, #tpu.memory_space<vmem>>, vector<288x64xbf16>
    %cst = arith.constant dense<0.000000e+00> : vector<1024x64xf32>
    %2 = tpu.matmul %0, %1, %cst {dimension_numbers = #tpu.dot_dimension_numbers<[1], [0], [0], [1], [0, 0, 1, 1], [], []>} : vector<1024x288xbf16>, vector<288x64xbf16>, vector<1024x64xf32> -> vector<1024x64xf32>
    %c0_3 = arith.constant 0 : index
    %c0_4 = arith.constant 0 : index
    %3 = vector.load %arg3[%c0_3, %c0_4] : memref<1x64xf32, #tpu.memory_space<vmem>>, vector<1x64xf32>
    %4 = vector.broadcast %3 : vector<1x64xf32> to vector<1024x64xf32>
    %5 = arith.addf %2, %4 : vector<1024x64xf32>
    %cst_5 = arith.constant 0.000000e+00 : f32
    %6 = vector.broadcast %cst_5 : f32 to vector<1024x64xf32>
    %7 = arith.maximumf %5, %6 : vector<1024x64xf32>
    %8 = arith.truncf %7 : vector<1024x64xf32> to vector<1024x64xbf16>
    %c0_6 = arith.constant 0 : index
    %c0_7 = arith.constant 0 : index
    %9 = vector.load %arg4[%c0_6, %c0_7] : memref<1024x64xbf16, #tpu.memory_space<vmem>>, vector<1024x64xbf16>
    tpu.vector_store %arg4[%c0_6, %c0_7], %8 {strides = array<i32>} : memref<1024x64xbf16, #tpu.memory_space<vmem>>, vector<1024x64xbf16>,
    return
  }
  func.func @transform_0(%arg0: i32) -> (i32, i32) {
    %c0_i32 = arith.constant 0 : i32
    %c0_i32_0 = arith.constant 0 : i32
    return %arg0, %c0_i32 : i32, i32
  }
  func.func @transform_1(%arg0: i32) -> (i32, i32) {
    %c0_i32 = arith.constant 0 : i32
    %c0_i32_0 = arith.constant 0 : i32
    %c0_i32_1 = arith.constant 0 : i32
    return %c0_i32, %c0_i32_0 : i32, i32
  }
  func.func @transform_2(%arg0: i32) -> (i32, i32) {
    %c0_i32 = arith.constant 0 : i32
    %c0_i32_0 = arith.constant 0 : i32
    %c0_i32_1 = arith.constant 0 : i32
    return %c0_i32, %c0_i32_0 : i32, i32
  }
  func.func @transform_3(%arg0: i32) -> (i32, i32) {
    %c0_i32 = arith.constant 0 : i32
    %c0_i32_0 = arith.constant 0 : i32
    return %arg0, %c0_i32 : i32, i32
  }
}

module attributes {stable_mosaic.version = 11 : i64} {
  func.func @_maxpool2x2_kernel(%arg0: i32, %arg1: memref<24x2x12x2x64xbf16, #tpu.memory_space<vmem>>, %arg2: memref<24x1x12x1x64xbf16, #tpu.memory_space<vmem>>) attributes {dimension_semantics = [#tpu.dimension_semantics<parallel>], iteration_bounds = array<i64: 1>, scalar_prefetch = 0 : i64, scratch_operands = 0 : i64, tpu.core_type = #tpu.core_type<tc>, window_params = [{transform_indices = @transform_0, window_bounds = array<i64: 24, 2, 12, 2, 64>}, {transform_indices = @transform_1, window_bounds = array<i64: 24, 1, 12, 1, 64>}]} {
    %c0 = arith.constant 0 : index
    %c0_0 = arith.constant 0 : index
    %c0_1 = arith.constant 0 : index
    %c0_2 = arith.constant 0 : index
    %c0_3 = arith.constant 0 : index
    %0 = vector.load %arg1[%c0, %c0_0, %c0_1, %c0_2, %c0_3] : memref<24x2x12x2x64xbf16, #tpu.memory_space<vmem>>, vector<24x2x12x2x64xbf16>
    %1 = vector.extract_strided_slice %0 {offsets = [0, 0, 0, 0, 0], sizes = [24, 1, 12, 2, 64], strides = [1, 1, 1, 1, 1]} : vector<24x2x12x2x64xbf16> to vector<24x1x12x2x64xbf16>
    %2 = vector.extract_strided_slice %0 {offsets = [0, 1, 0, 0, 0], sizes = [24, 1, 12, 2, 64], strides = [1, 1, 1, 1, 1]} : vector<24x2x12x2x64xbf16> to vector<24x1x12x2x64xbf16>
    %3 = arith.maximumf %1, %2 : vector<24x1x12x2x64xbf16>
    %4 = vector.extract_strided_slice %3 {offsets = [0, 0, 0, 0, 0], sizes = [24, 1, 12, 1, 64], strides = [1, 1, 1, 1, 1]} : vector<24x1x12x2x64xbf16> to vector<24x1x12x1x64xbf16>
    %5 = vector.extract_strided_slice %3 {offsets = [0, 0, 0, 1, 0], sizes = [24, 1, 12, 1, 64], strides = [1, 1, 1, 1, 1]} : vector<24x1x12x2x64xbf16> to vector<24x1x12x1x64xbf16>
    %6 = arith.maximumf %4, %5 : vector<24x1x12x1x64xbf16>
    %c0_4 = arith.constant 0 : index
    %c0_5 = arith.constant 0 : index
    %c0_6 = arith.constant 0 : index
    %c0_7 = arith.constant 0 : index
    %c0_8 = arith.constant 0 : index
    %7 = vector.load %arg2[%c0_4, %c0_5, %c0_6, %c0_7, %c0_8] : memref<24x1x12x1x64xbf16, #tpu.memory_space<vmem>>, vector<24x1x12x1x64xbf16>
    tpu.vector_store %arg2[%c0_4, %c0_5, %c0_6, %c0_7, %c0_8], %6 {strides = array<i32>} : memref<24x1x12x1x64xbf16, #tpu.memory_space<vmem>>, vector<24x1x12x1x64xbf16>,
    return
  }
  func.func @transform_0(%arg0: i32) -> (i32, i32, i32, i32, i32) {
    %c0_i32 = arith.constant 0 : i32
    %c0_i32_0 = arith.constant 0 : i32
    %c0_i32_1 = arith.constant 0 : i32
    %c0_i32_2 = arith.constant 0 : i32
    %c0_i32_3 = arith.constant 0 : i32
    return %arg0, %c0_i32, %c0_i32_0, %c0_i32_1, %c0_i32_2 : i32, i32, i32, i32, i32
  }
  func.func @transform_1(%arg0: i32) -> (i32, i32, i32, i32, i32) {
    %c0_i32 = arith.constant 0 : i32
    %c0_i32_0 = arith.constant 0 : i32
    %c0_i32_1 = arith.constant 0 : i32
    %c0_i32_2 = arith.constant 0 : i32
    %c0_i32_3 = arith.constant 0 : i32
    return %arg0, %c0_i32, %c0_i32_0, %c0_i32_1, %c0_i32_2 : i32, i32, i32, i32, i32
  }
}

module attributes {stable_mosaic.version = 11 : i64} {
  func.func @_mlp_head_kernel(%arg0: i32, %arg1: memref<2x9216xbf16, #tpu.memory_space<vmem>>, %arg2: memref<9216x128xbf16, #tpu.memory_space<vmem>>, %arg3: memref<1x128xf32, #tpu.memory_space<vmem>>, %arg4: memref<128x10xf32, #tpu.memory_space<vmem>>, %arg5: memref<1x10xf32, #tpu.memory_space<vmem>>, %arg6: memref<2x10xf32, #tpu.memory_space<vmem>>) attributes {dimension_semantics = [#tpu.dimension_semantics<parallel>], iteration_bounds = array<i64: 1>, scalar_prefetch = 0 : i64, scratch_operands = 0 : i64, tpu.core_type = #tpu.core_type<tc>, window_params = [{transform_indices = @transform_0, window_bounds = array<i64: 2, 9216>}, {pipeline_mode = #tpu.pipeline_mode<synchronous>, transform_indices = @transform_1, window_bounds = array<i64: 9216, 128>}, {pipeline_mode = #tpu.pipeline_mode<synchronous>, transform_indices = @transform_2, window_bounds = array<i64: 1, 128>}, {pipeline_mode = #tpu.pipeline_mode<synchronous>, transform_indices = @transform_3, window_bounds = array<i64: 128, 10>}, {pipeline_mode = #tpu.pipeline_mode<synchronous>, transform_indices = @transform_4, window_bounds = array<i64: 1, 10>}, {transform_indices = @transform_5, window_bounds = array<i64: 2, 10>}]} {
    %c0 = arith.constant 0 : index
    %c0_0 = arith.constant 0 : index
    %0 = vector.load %arg1[%c0, %c0_0] : memref<2x9216xbf16, #tpu.memory_space<vmem>>, vector<2x9216xbf16>
    %c0_1 = arith.constant 0 : index
    %c0_2 = arith.constant 0 : index
    %1 = vector.load %arg2[%c0_1, %c0_2] : memref<9216x128xbf16, #tpu.memory_space<vmem>>, vector<9216x128xbf16>
    %cst = arith.constant dense<0.000000e+00> : vector<2x128xf32>
    %2 = tpu.matmul %0, %1, %cst {dimension_numbers = #tpu.dot_dimension_numbers<[1], [0], [0], [1], [0, 0, 1, 1], [], []>} : vector<2x9216xbf16>, vector<9216x128xbf16>, vector<2x128xf32> -> vector<2x128xf32>
    %c0_3 = arith.constant 0 : index
    %c0_4 = arith.constant 0 : index
    %3 = vector.load %arg3[%c0_3, %c0_4] : memref<1x128xf32, #tpu.memory_space<vmem>>, vector<1x128xf32>
    %4 = vector.broadcast %3 : vector<1x128xf32> to vector<2x128xf32>
    %5 = arith.addf %2, %4 : vector<2x128xf32>
    %cst_5 = arith.constant 0.000000e+00 : f32
    %6 = vector.broadcast %cst_5 : f32 to vector<2x128xf32>
    %7 = arith.maximumf %5, %6 : vector<2x128xf32>
    %c0_6 = arith.constant 0 : index
    %c0_7 = arith.constant 0 : index
    %8 = vector.load %arg4[%c0_6, %c0_7] : memref<128x10xf32, #tpu.memory_space<vmem>>, vector<128x10xf32>
    %cst_8 = arith.constant dense<0.000000e+00> : vector<2x10xf32>
    %9 = tpu.matmul %7, %8, %cst_8 {dimension_numbers = #tpu.dot_dimension_numbers<[1], [0], [0], [1], [0, 0, 1, 1], [], []>} : vector<2x128xf32>, vector<128x10xf32>, vector<2x10xf32> -> vector<2x10xf32>
    %c0_9 = arith.constant 0 : index
    %c0_10 = arith.constant 0 : index
    %10 = vector.load %arg5[%c0_9, %c0_10] : memref<1x10xf32, #tpu.memory_space<vmem>>, vector<1x10xf32>
    %11 = vector.broadcast %10 : vector<1x10xf32> to vector<2x10xf32>
    %12 = arith.addf %9, %11 : vector<2x10xf32>
    %cst_11 = arith.constant dense<0xFF800000> : vector<2xf32>
    %13 = vector.multi_reduction <maximumf>, %12, %cst_11 [1] : vector<2x10xf32> to vector<2xf32>
    %14 = vector.shape_cast %13 : vector<2xf32> to vector<2x1xf32>
    %15 = vector.broadcast %14 : vector<2x1xf32> to vector<2x10xf32>
    %16 = arith.subf %12, %15 : vector<2x10xf32>
    %17 = math.exp %16 : vector<2x10xf32>
    %cst_12 = arith.constant dense<0.000000e+00> : vector<2xf32>
    %18 = vector.multi_reduction <add>, %17, %cst_12 [1] : vector<2x10xf32> to vector<2xf32>
    %19 = vector.shape_cast %18 : vector<2xf32> to vector<2x1xf32>
    %20 = math.log %19 : vector<2x1xf32>
    %21 = vector.broadcast %20 : vector<2x1xf32> to vector<2x10xf32>
    %22 = arith.subf %16, %21 : vector<2x10xf32>
    %c0_13 = arith.constant 0 : index
    %c0_14 = arith.constant 0 : index
    %23 = vector.load %arg6[%c0_13, %c0_14] : memref<2x10xf32, #tpu.memory_space<vmem>>, vector<2x10xf32>
    tpu.vector_store %arg6[%c0_13, %c0_14], %22 {strides = array<i32>} : memref<2x10xf32, #tpu.memory_space<vmem>>, vector<2x10xf32>,
    return
  }
  func.func @transform_0(%arg0: i32) -> (i32, i32) {
    %c0_i32 = arith.constant 0 : i32
    %c0_i32_0 = arith.constant 0 : i32
    return %arg0, %c0_i32 : i32, i32
  }
  func.func @transform_1(%arg0: i32) -> (i32, i32) {
    %c0_i32 = arith.constant 0 : i32
    %c0_i32_0 = arith.constant 0 : i32
    %c0_i32_1 = arith.constant 0 : i32
    return %c0_i32, %c0_i32_0 : i32, i32
  }
  func.func @transform_2(%arg0: i32) -> (i32, i32) {
    %c0_i32 = arith.constant 0 : i32
    %c0_i32_0 = arith.constant 0 : i32
    %c0_i32_1 = arith.constant 0 : i32
    return %c0_i32, %c0_i32_0 : i32, i32
  }
  func.func @transform_3(%arg0: i32) -> (i32, i32) {
    %c0_i32 = arith.constant 0 : i32
    %c0_i32_0 = arith.constant 0 : i32
    %c0_i32_1 = arith.constant 0 : i32
    return %c0_i32, %c0_i32_0 : i32, i32
  }
  func.func @transform_4(%arg0: i32) -> (i32, i32) {
    %c0_i32 = arith.constant 0 : i32
    %c0_i32_0 = arith.constant 0 : i32
    %c0_i32_1 = arith.constant 0 : i32
    return %c0_i32, %c0_i32_0 : i32, i32
  }
  func.func @transform_5(%arg0: i32) -> (i32, i32) {
    %c0_i32 = arith.constant 0 : i32
    %c0_i32_0 = arith.constant 0 : i32
    return %arg0, %c0_i32 : i32, i32
  }
}

</mosaic_0001>

<bundles_post_ra>
// kernel: net_forward.4
= control target key start
LH: loop header
LB: loop body
LE: loop exit
PB: predicated region body
PF: predicated region fallthrough
CT: control target
= control target key end

     0   :  { %8 = vsyncpa [#allocation3], 0  ;;  %s4484_s0 = inlined_call_operand.vmem [shape: bf16[1352,9], index: 0, kind: input, shape index: {}]   ;;  %s4485_s1 = inlined_call_operand.hbm [shape: bf16[9,32], index: 1, kind: input, shape index: {}]   ;;  %s4486_s2 = inlined_call_operand.hbm [shape: f32[1,32], index: 2, kind: input, shape index: {}]   ;;  %s4487_s3 = inlined_call_operand.vmem [shape: bf16[1352,32], index: 3, kind: output, shape index: {}]  }
   0x1   :  { %9 = vsyncpa [#allocation5], 0  ;;  %s3654_s12 = smov 0   ;;  %s3656_s13 = smov 0  }
   0x2   :  { %s3658_s14 = smov 0  }
   0x3 LB: > { %s3667_s15 = sadd.s32 4294967295, %s3595_s14   ;;  %s3669_s16 = sadd.s32 1, %s3595_s14   ;;  %s3595_s14 = sphi %s3658_s14, %s4504_s14   ;;  %s3591_s13 = sphi %s3656_s13, %s4503_s13   ;;  %s3587_s12 = sphi %s3654_s12, %s4502_s12  }
   0x4   : > { %s87_s17 = ssub.s32 %s3595_s14, %s3669_s16  ;;  %s90_s18 = sadd.s32 1, %s3591_s13 }
   0x5   : > { %p88_p0 = scmp.eq.s32.totalorder %s87_s17, 0  ;;  %p100_p1 = scmp.ne.s32.totalorder %s3591_s13, %s3587_s12 }
   0x6   : > { %p101_p2 = scmp.eq.s32.totalorder %s3667_s15, 1  ;;  %p2686_p3 = scmp.ge.s32.totalorder %s3595_s14, 1 }
   0x7   : > { %s3677_s19 = scalar_select %p88_p0, %s3591_s13, %s90_s18  }
   0x8   : > { %p3679_p4 = por %p101_p2, %p100_p1  ;;  %p114_p5 = scmp.lt.s32.totalorder %s3595_s14, 3 }
   0x9   : > { %p4488_p6 = scmp.eq.s32.totalorder %s3667_s15, 0  ;;  %s3629_s22 = smov [#allocation2]  }
   0xa   : > { %s4490_s20 = scalar_select %p3679_p4, 1, 0 }
   0xb   : > { %p3684_p7 = pnand %p2686_p3, %p114_p5  ;;  %s126_s23 = sshll.u32 %s3629_s22, 4  ;;  %s127_s23 = int_to_ptr.vmem [resolvable:$true] %s126_s23 }
   0xc   : > { %s3630_s25 = smov [#allocation4]   ;;  %s3477_s29 = scalar_lea.hbm %s4485_s1, 128 }
   0xd   : > { %s4491_s21 = scalar_select %p3684_p7, 1, 0 }
   0xe   : > { %p3307_p8 = pneg %p3684_p7  ;;  %s140_s26 = sshll.u32 %s3630_s25, 4  ;;  %s3696_s26 = int_to_ptr.vmem [resolvable:$true] %s140_s26 }
   0xf   : > { %p3478_p10 = scmp.ne.s32.totalorder %s4485_s1, %s3477_s29  ;;  %p3484_p0 = scmp.lt.u32.totalorder %s3477_s29, %s4485_s1 }
  0x10   : > { %p3692_p9 = pnand %p4488_p6, %p3307_p8 }
  0x12   : > { %p3479_p11 = pneg %p3692_p9 }
  0x14   : > { %p3480_p12 = pnand %p3479_p11, %p3478_p10 }
  0x16   : > { %p3481_p13 = pneg %p3480_p12 }
  0x18   : > { %p3486_p1 = pnand %p3484_p0, %p3481_p13 }
  0x1a   : > { %3489 = shalt.err (!%p3486_p1)
}
  0x1b   : > { %s3490_s7 = scalar_lea.vmem %s127_s23, 128  ;;  %p3498_p8 = scmp.lt.s32.totalorder %s127_s23, %s127_s23 }
  0x1c   : > { %p3491_p2 = scmp.ne.s32.totalorder %s127_s23, %s3490_s7  ;;  %p3499_p6 = scmp.lt.s32.totalorder %s3490_s7, %s3490_s7 }
  0x1e   : > { %p3493_p3 = pnand %p3491_p2, %p3479_p11  ;;  %p3500_p4 = por %p3499_p6, %p3498_p8 }
  0x20   : > { %p3494_p5 = pneg %p3493_p3 }
  0x22   : > { %p3501_p7 = pnand %p3500_p4, %p3494_p5 }
  0x24   : > { %3504 = shalt.err (!%p3501_p7)
}
  0x25   : > { %s3631_s8 = smov 64   ;;  %s3632_s9 = smov 4  }
  0x26   : > { %3310 = dma.hbm_to_vmem [thread:$0]  (!%p3692_p9), %s4485_s1, 128, %s127_s23, [#allocation3], %s3631_s8, %s3631_s8, %s3632_s9  }
  0x27   : > { %s3505_s18 = scalar_lea.hbm %s4486_s2, 16 }
  0x28   : > { %p3506_p10 = scmp.ne.s32.totalorder %s4486_s2, %s3505_s18  ;;  %p3512_p7 = scmp.lt.u32.totalorder %s3505_s18, %s4486_s2 }
  0x2a   : > { %p3508_p4 = pnand %p3506_p10, %p3479_p11 }
  0x2c   : > { %p3509_p6 = pneg %p3508_p4 }
  0x2e   : > { %p3514_p12 = pnand %p3512_p7, %p3509_p6 }
  0x30   : > { %3517 = shalt.err (!%p3514_p12)
}
  0x31   : > { %s3518_s23 = scalar_lea.vmem %s3696_s26, 16  ;;  %s3525_s29 = scalar_lea.vmem %s3696_s26, 32 }
  0x32   : > { %p3519_p13 = scmp.ne.s32.totalorder %s3696_s26, %s3518_s23  ;;  %p3526_p2 = scmp.lt.s32.totalorder %s3696_s26, %s3696_s26 }
  0x33   : > { %p3527_p3 = scmp.lt.s32.totalorder %s3525_s29, %s3518_s23 }
  0x34   : > { %p3521_p0 = pnand %p3519_p13, %p3479_p11 }
  0x35   : > { %p3528_p5 = por %p3527_p3, %p3526_p2 }
  0x36   : > { %p3522_p1 = pneg %p3521_p0 }
  0x38   : > { %p3529_p8 = pnand %p3528_p5, %p3522_p1 }
  0x3a   : > { %3532 = shalt.err (!%p3529_p8)
}
  0x3b   : > { %3313 = dma.hbm_to_vmem [thread:$0]  (!%p3692_p9), %s4486_s2, 16, %s3696_s26, [#allocation5]  }
  0x3c   : > { %p4493_p10 = scmp.ne.s32.totalorder %s4491_s21, 0 }
  0x3d   : > { %p4494_p11 = scmp.eq.s32.totalorder (!%p4493_p10), %s3667_s15, 0 }
  0x3e   : > { %170 = sbr.rel (%p4493_p10) target bundleno = 517 (0x205), region = 32 }
  0x45   : > { %3578 = dma.done.wait (%p4494_p11), [#allocation3], 128   ;;  %p4495_p4 = pmov %p4494_p11 }
  0x47   : > { %3580 = vsyncadd (%p4495_p4), [#allocation3], 4294967168  ;;  %p4496_p6 = pmov %p4495_p4 }
  0x48   : > { %p4497_p7 = pmov %p4495_p4 }
  0x49   : > { %3582 = dma.done.wait (%p4496_p6), [#allocation5], 16  }
  0x4a   : > { %3584 = vsyncadd (%p4497_p7), [#allocation5], 4294967280  ;;  %vm876_vm0 = vcmask 1043456   ;;  %s3757_s24 = sshll.u32 %s3667_s15, 7  ;;  %vm877_vm1 = vcmask 1044480   ;;  %v3633_v0 = vmov 65535  }
  0x4b   : > { %p206_p9 = scmp.lt.s32.totalorder %s3757_s24, 168  ;;  %v878_v1 = vsel %vm876_vm0, 4294967295, %v3633_v0  ;;  %vm683_vm2 = vcmask 72704   ;;  %v3411_v3 = vld [vmem:[#allocation2] sm:$0x1f]   ;;  %s198_s8 = sand.u32 1, %s3587_s12  }
  0x4c   : > { %v879_v2 = vsel %vm877_vm1, %v878_v1, 0  ;;  %s2693_s9 = sshll.u32 %s198_s8, 9  ;;  %vm2068_vm3 = vcmask 257024   ;;  %p4498_p12 = scmp.ne.s32.totalorder %s4490_s20, 0 }
  0x4d   : > { %s207_s21 = scalar_select %p206_p9, %s3757_s24, 168  ;;  %v881_v5 = vand.u32 %v3411_v3, %v879_v2 }
  0x4e   : > { %s3905_s12 = scalar_lea.vmem [#allocation6], %s2693_s9   ;;  %s2205_s10 = ssub.s32 (%p4498_p12), 169, %s3757_s24 }
  0x4f   : > { %s2695_s26 = sshll.u32 %s207_s21, 2  ;;  %3167 = vmatprep.subr.bf16.mxu0 %v881_v5  ;;  %3297 = vmatprep.subr.bf16.mxu1 %v881_v5  ;;  %s3099_s11 = sshll.u32 (%p4498_p12), %s3667_s15, 9 }
  0x50   : > { %s3764_s7 = scalar_lea.vmem %s4484_s0, %s2695_s26  ;;  %3168 = vmatpush3.bf16.msra.mxu0 %v881_v5  ;;  %3298 = vmatpush3.bf16.msra.mxu1 %v881_v5  ;;  %v3895_v5 = vld [vmem:[#allocation4] ss:$0 sm:$0xff]  ;;  %p2206_p13 = scmp.lt.s32.totalorder (%p4498_p12), %s2205_s10, 128 }
  0x51   : > { %v3412_v4 = vld [vmem:[%s3764_s7] sm:$0xff]   ;;  %v3414_v7 = vld [vmem:[%s3764_s7 + $0x8] sm:$0xff]   ;;  %v3416_v9 = vld [vmem:[%s3764_s7 + $0x10] sm:$0xff]   ;;  %s4292_s18 = scalar_lea.vmem (%p4498_p12), %s4487_s3, %s3099_s11  }
  0x52   : > { %v3413_v6 = vld [vmem:[%s3764_s7 + $0x100] sm:$0xff]   ;;  %3169 = vmatprep.mubr.msk.bf16.mxu0 %vm683_vm2, %v3412_v4  ;;  %v3415_v8 = vld [vmem:[%s3764_s7 + $0x108] sm:$0xff]   ;;  %v3417_v10 = vld [vmem:[%s3764_s7 + $0x110] sm:$0xff]  }
  0x53   : > { %3233 = vmatprep.mubr.msk.bf16.mxu1 %vm683_vm2, %v3413_v6  ;;  %3170 = vmatmul.mubr.msk.bf16.vlgmr.msra.gmra.mrb[0].mxu0 %vm683_vm2, %v3414_v7  ;;  %v3418_v11 = vld [vmem:[%s3764_s7 + $0x18] sm:$0xff]   ;;  %v3420_v13 = vld [vmem:[%s3764_s7 + $0x20] sm:$0xff]   ;;  %v3422_v15 = vld [vmem:[%s3764_s7 + $0x28] sm:$0xff]  }
  0x54   : > { %3234 = vmatmul.mubr.msk.bf16.vlgmr.msra.gmra.mrb[0].mxu1 %vm683_vm2, %v3415_v8  ;;  %3173 = vmatprep.mubr.msk.bf16.mxu0 %vm683_vm2, %v3416_v9  ;;  %v3419_v12 = vld [vmem:[%s3764_s7 + $0x118] sm:$0xff]   ;;  %v3421_v14 = vld [vmem:[%s3764_s7 + $0x120] sm:$0xff]   ;;  %v3423_v16 = vld [vmem:[%s3764_s7 + $0x128] sm:$0xff]  }
  0x55   : > { %3237 = vmatprep.mubr.msk.bf16.mxu1 %vm683_vm2, %v3417_v10  ;;  %v3424_v17 = vld [vmem:[%s3764_s7 + $0x30] sm:$0xff]   ;;  %v3426_v19 = vld [vmem:[%s3764_s7 + $0x38] sm:$0xff]   ;;  %v3428_v21 = vld [vmem:[%s3764_s7 + $0x40] sm:$0xff]  }
  0x56   : > { %v3425_v18 = vld [vmem:[%s3764_s7 + $0x130] sm:$0xff]   ;;  %v3427_v20 = vld [vmem:[%s3764_s7 + $0x138] sm:$0xff]   ;;  %v3429_v22 = vld [vmem:[%s3764_s7 + $0x140] sm:$0xff]  }
  0x57   : > { %v3430_v23 = vld [vmem:[%s3764_s7 + $0x48] sm:$0xff]   ;;  %v3432_v25 = vld [vmem:[%s3764_s7 + $0x50] sm:$0xff]   ;;  %v3434_v27 = vld [vmem:[%s3764_s7 + $0x58] sm:$0xff]  }
  0x58   : > { %v3431_v24 = vld [vmem:[%s3764_s7 + $0x148] sm:$0xff]   ;;  %v3433_v26 = vld [vmem:[%s3764_s7 + $0x150] sm:$0xff]   ;;  %v3435_v28 = vld [vmem:[%s3764_s7 + $0x158] sm:$0xff]  }
  0x59   : > { %v3436_v29 = vld [vmem:[%s3764_s7 + $0x60] sm:$0xff]   ;;  %v3438_v31 = vld [vmem:[%s3764_s7 + $0x68] sm:$0xff]   ;;  %v3440_v33 = vld [vmem:[%s3764_s7 + $0x70] sm:$0xff]  }
  0x5a   : > { %v3437_v30 = vld [vmem:[%s3764_s7 + $0x160] sm:$0xff]   ;;  %v3439_v32 = vld [vmem:[%s3764_s7 + $0x168] sm:$0xff]   ;;  %v3441_v34 = vld [vmem:[%s3764_s7 + $0x170] sm:$0xff]  }
  0x5b   : > { %3174 = vmatmul.mubr.msk.bf16.gmra.mrb[4].mxu0 %vm683_vm2, %v3418_v11  ;;  %v3442_v35 = vld [vmem:[%s3764_s7 + $0x78] sm:$0xff]   ;;  %v3444_v37 = vld [vmem:[%s3764_s7 + $0x80] sm:$0xff]   ;;  %v3446_v39 = vld [vmem:[%s3764_s7 + $0x88] sm:$0xff]  }
  0x5c   : > { %3238 = vmatmul.mubr.msk.bf16.gmra.mrb[4].mxu1 %vm683_vm2, %v3419_v12  ;;  %3177 = vmatprep.mubr.msk.bf16.mxu0 %vm683_vm2, %v3420_v13  ;;  %v3443_v36 = vld [vmem:[%s3764_s7 + $0x178] sm:$0xff]   ;;  %v3445_v38 = vld [vmem:[%s3764_s7 + $0x180] sm:$0xff]   ;;  %v3447_v40 = vld [vmem:[%s3764_s7 + $0x188] sm:$0xff]  }
  0x5d   : > { %3241 = vmatprep.mubr.msk.bf16.mxu1 %vm683_vm2, %v3421_v14  ;;  %v3448_v41 = vld [vmem:[%s3764_s7 + $0x90] sm:$0xff]   ;;  %v3450_v43 = vld [vmem:[%s3764_s7 + $0x98] sm:$0xff]   ;;  %v3452_v45 = vld [vmem:[%s3764_s7 + $0xa0] sm:$0xff]  }
  0x5e   : > { %v3449_v42 = vld [vmem:[%s3764_s7 + $0x190] sm:$0xff]   ;;  %v3451_v44 = vld [vmem:[%s3764_s7 + $0x198] sm:$0xff]   ;;  %v3453_v46 = vld [vmem:[%s3764_s7 + $0x1a0] sm:$0xff]  }
  0x5f   : > { %v3454_v47 = vld [vmem:[%s3764_s7 + $0xa8] sm:$0xff]   ;;  %v3456_v49 = vld [vmem:[%s3764_s7 + $0xb0] sm:$0xff]   ;;  %v3458_v51 = vld [vmem:[%s3764_s7 + $0xb8] sm:$0xff]  }
  0x60   : > { %v3455_v48 = vld [vmem:[%s3764_s7 + $0x1a8] sm:$0xff]   ;;  %v3457_v50 = vld [vmem:[%s3764_s7 + $0x1b0] sm:$0xff]   ;;  %v3459_v52 = vld [vmem:[%s3764_s7 + $0x1b8] sm:$0xff]  }
  0x61   : > { %v3460_v53 = vld [vmem:[%s3764_s7 + $0xc0] sm:$0xff]   ;;  %v3462_v55 = vld [vmem:[%s3764_s7 + $0xc8] sm:$0xff]   ;;  %v3464_v57 = vld [vmem:[%s3764_s7 + $0xd0] sm:$0xff]  }
  0x62   : > { %v3461_v54 = vld [vmem:[%s3764_s7 + $0x1c0] sm:$0xff]   ;;  %v3463_v56 = vld [vmem:[%s3764_s7 + $0x1c8] sm:$0xff]   ;;  %v3465_v58 = vld [vmem:[%s3764_s7 + $0x1d0] sm:$0xff]  }
  0x63   : > { %3178 = vmatmul.mubr.msk.bf16.gmra.mrb[8].mxu0 %vm683_vm2, %v3422_v15  ;;  %v3466_v59 = vld [vmem:[%s3764_s7 + $0xd8] sm:$0xff]   ;;  %v3468_v61 = vld [vmem:[%s3764_s7 + $0xe0] sm:$0xff]   ;;  %v3470_v63 = vld [vmem:[%s3764_s7 + $0xe8] sm:$0xff]  }
  0x64   : > { %3242 = vmatmul.mubr.msk.bf16.gmra.mrb[8].mxu1 %vm683_vm2, %v3423_v16  ;;  %3181 = vmatprep.mubr.msk.bf16.mxu0 %vm683_vm2, %v3424_v17  ;;  %v3467_v60 = vld [vmem:[%s3764_s7 + $0x1d8] sm:$0xff]   ;;  %v3469_v62 = vld [vmem:[%s3764_s7 + $0x1e0] sm:$0xff]   ;;  %v3471_v0 = vld [vmem:[%s3764_s7 + $0x1e8] sm:$0xff]  }
  0x65   : > { %3245 = vmatprep.mubr.msk.bf16.mxu1 %vm683_vm2, %v3425_v18  ;;  %v3472_v1 = vld [vmem:[%s3764_s7 + $0xf0] sm:$0xff]   ;;  %v3474_v3 = vld [vmem:[%s3764_s7 + $0xf8] sm:$0xff]  }
  0x66   : > { %v3473_v2 = vld [vmem:[%s3764_s7 + $0x1f0] sm:$0xff]   ;;  %v3475_v4 = vld [vmem:[%s3764_s7 + $0x1f8] sm:$0xff]  }
  0x6b   : > { %3182 = vmatmul.mubr.msk.bf16.gmra.mrb[12].mxu0 %vm683_vm2, %v3426_v19 }
  0x6c   : > { %3246 = vmatmul.mubr.msk.bf16.gmra.mrb[12].mxu1 %vm683_vm2, %v3427_v20  ;;  %3185 = vmatprep.mubr.msk.bf16.mxu0 %vm683_vm2, %v3428_v21 }
  0x6d   : > { %3249 = vmatprep.mubr.msk.bf16.mxu1 %vm683_vm2, %v3429_v22 }
  0x73   : > { %3186 = vmatmul.mubr.msk.bf16.gmra.mrb[16].mxu0 %vm683_vm2, %v3430_v23 }
  0x74   : > { %3250 = vmatmul.mubr.msk.bf16.gmra.mrb[16].mxu1 %vm683_vm2, %v3431_v24  ;;  %3189 = vmatprep.mubr.msk.bf16.mxu0 %vm683_vm2, %v3432_v25 }
  0x75   : > { %3253 = vmatprep.mubr.msk.bf16.mxu1 %vm683_vm2, %v3433_v26 }
  0x7b   : > { %3190 = vmatmul.mubr.msk.bf16.gmra.mrb[20].mxu0 %vm683_vm2, %v3434_v27 }
  0x7c   : > { %3254 = vmatmul.mubr.msk.bf16.gmra.mrb[20].mxu1 %vm683_vm2, %v3435_v28  ;;  %3193 = vmatprep.mubr.msk.bf16.mxu0 %vm683_vm2, %v3436_v29 }
  0x7d   : > { %3257 = vmatprep.mubr.msk.bf16.mxu1 %vm683_vm2, %v3437_v30 }
  0x83   : > { %3194 = vmatmul.mubr.msk.bf16.gmra.mrb[24].mxu0 %vm683_vm2, %v3438_v31 }
  0x84   : > { %3258 = vmatmul.mubr.msk.bf16.gmra.mrb[24].mxu1 %vm683_vm2, %v3439_v32  ;;  %3197 = vmatprep.mubr.msk.bf16.mxu0 %vm683_vm2, %v3440_v33 }
  0x85   : > { %3261 = vmatprep.mubr.msk.bf16.mxu1 %vm683_vm2, %v3441_v34 }
  0x8b   : > { %3198 = vmatmul.mubr.msk.bf16.gmra.mrb[28].mxu0 %vm683_vm2, %v3442_v35 }
  0x8c   : > { %3262 = vmatmul.mubr.msk.bf16.gmra.mrb[28].mxu1 %vm683_vm2, %v3443_v36  ;;  %3201 = vmatprep.mubr.msk.bf16.mxu0 %vm683_vm2, %v3444_v37 }
  0x8d   : > { %3265 = vmatprep.mubr.msk.bf16.mxu1 %vm683_vm2, %v3445_v38 }
  0x93   : > { %3202 = vmatmul.mubr.msk.bf16.gmra.mrb[32].mxu0 %vm683_vm2, %v3446_v39 }
  0x94   : > { %3266 = vmatmul.mubr.msk.bf16.gmra.mrb[32].mxu1 %vm683_vm2, %v3447_v40  ;;  %3205 = vmatprep.mubr.msk.bf16.mxu0 %vm683_vm2, %v3448_v41 }
  0x95   : > { %3269 = vmatprep.mubr.msk.bf16.mxu1 %vm683_vm2, %v3449_v42 }
  0x9b   : > { %3206 = vmatmul.mubr.msk.bf16.gmra.mrb[36].mxu0 %vm683_vm2, %v3450_v43 }
  0x9c   : > { %3270 = vmatmul.mubr.msk.bf16.gmra.mrb[36].mxu1 %vm683_vm2, %v3451_v44  ;;  %3209 = vmatprep.mubr.msk.bf16.mxu0 %vm683_vm2, %v3452_v45 }
  0x9d   : > { %3273 = vmatprep.mubr.msk.bf16.mxu1 %vm683_vm2, %v3453_v46 }
  0xa3   : > { %3210 = vmatmul.mubr.msk.bf16.gmra.mrb[40].mxu0 %vm683_vm2, %v3454_v47 }
  0xa4   : > { %3274 = vmatmul.mubr.msk.bf16.gmra.mrb[40].mxu1 %vm683_vm2, %v3455_v48  ;;  %3213 = vmatprep.mubr.msk.bf16.mxu0 %vm683_vm2, %v3456_v49 }
  0xa5   : > { %3277 = vmatprep.mubr.msk.bf16.mxu1 %vm683_vm2, %v3457_v50 }
  0xab   : > { %3214 = vmatmul.mubr.msk.bf16.gmra.mrb[44].mxu0 %vm683_vm2, %v3458_v51 }
  0xac   : > { %3278 = vmatmul.mubr.msk.bf16.gmra.mrb[44].mxu1 %vm683_vm2, %v3459_v52  ;;  %3217 = vmatprep.mubr.msk.bf16.mxu0 %vm683_vm2, %v3460_v53 }
  0xad   : > { %3281 = vmatprep.mubr.msk.bf16.mxu1 %vm683_vm2, %v3461_v54 }
  0xb3   : > { %3218 = vmatmul.mubr.msk.bf16.gmra.mrb[48].mxu0 %vm683_vm2, %v3462_v55 }
  0xb4   : > { %3282 = vmatmul.mubr.msk.bf16.gmra.mrb[48].mxu1 %vm683_vm2, %v3463_v56  ;;  %3221 = vmatprep.mubr.msk.bf16.mxu0 %vm683_vm2, %v3464_v57 }
  0xb5   : > { %3285 = vmatprep.mubr.msk.bf16.mxu1 %vm683_vm2, %v3465_v58 }
  0xbb   : > { %3222 = vmatmul.mubr.msk.bf16.gmra.mrb[52].mxu0 %vm683_vm2, %v3466_v59 }
  0xbc   : > { %3286 = vmatmul.mubr.msk.bf16.gmra.mrb[52].mxu1 %vm683_vm2, %v3467_v60  ;;  %3225 = vmatprep.mubr.msk.bf16.mxu0 %vm683_vm2, %v3468_v61 }
  0xbd   : > { %3289 = vmatprep.mubr.msk.bf16.mxu1 %vm683_vm2, %v3469_v62 }
  0xc3   : > { %3226 = vmatmul.mubr.msk.bf16.gmra.mrb[56].mxu0 %vm683_vm2, %v3470_v63 }
  0xc4   : > { %3290 = vmatmul.mubr.msk.bf16.gmra.mrb[56].mxu1 %vm683_vm2, %v3471_v0  ;;  %3229 = vmatprep.mubr.msk.bf16.mxu0 %vm683_vm2, %v3472_v1 }
  0xc5   : > { %3293 = vmatprep.mubr.msk.bf16.mxu1 %vm683_vm2, %v3473_v2 }
  0xcb   : > { %3230 = vmatmul.mubr.msk.bf16.gmra.mrb[60].mxu0 %vm683_vm2, %v3474_v3 }
  0xcc   : > { %3294 = vmatmul.mubr.msk.bf16.gmra.mrb[60].mxu1 %vm683_vm2, %v3475_v4 }
 0x126   : > { %v3171_v6 = vpop.f32.mrb[0].mxu0 }
 0x127   : > { %v3235_v7 = vpop.f32.mrb[0].mxu1  ;;  %v926_v8 = vadd.f32 %v3171_v6, %v3895_v5  ;;  %v917_v10 = vpop.f32.mrb[1].mxu0 }
 0x128   : > { %v1182_v9 = vadd.f32 %v3235_v7, %v3895_v5  ;;  %v1173_v11 = vpop.f32.mrb[1].mxu1  ;;  %v918_v12 = vadd.f32 %v3895_v5, %v917_v10  ;;  %v3172_v14 = vpop.f32.mrb[2].mxu0 }
 0x129   : > { %v1174_v13 = vadd.f32 %v3895_v5, %v1173_v11  ;;  %v3236_v15 = vpop.f32.mrb[2].mxu1  ;;  %v1430_v16 = vmax.f32 %v926_v8, 0.0  ;;  %v929_v18 = vadd.f32 %v3172_v14, %v3895_v5  ;;  %v920_v20 = vpop.f32.mrb[3].mxu0 }
 0x12a   : > { %v1494_v17 = vmax.f32 %v1182_v9, 0.0  ;;  %v1185_v19 = vadd.f32 %v3236_v15, %v3895_v5  ;;  %v1176_v21 = vpop.f32.mrb[3].mxu1  ;;  %v1428_v22 = vmax.f32 %v918_v12, 0.0  ;;  %v921_v24 = vadd.f32 %v3895_v5, %v920_v20 }
 0x12b   : > { %v1492_v23 = vmax.f32 %v1174_v13, 0.0  ;;  %v1177_v25 = vadd.f32 %v3895_v5, %v1176_v21  ;;  %v2973_v26 = vpack.c.bf16 %v1430_v16, %v1430_v16  ;;  %v1431_v28 = vmax.f32 %v929_v18, 0.0 }
 0x12c   : > { %v3037_v27 = vpack.c.bf16 %v1494_v17, %v1494_v17  ;;  %v1495_v29 = vmax.f32 %v1185_v19, 0.0  ;;  %v2971_v30 = vpack.c.bf16 %v1428_v22, %v1428_v22  ;;  %v1429_v32 = vmax.f32 %v921_v24, 0.0 }
 0x12d   : > { %v3035_v31 = vpack.c.bf16 %v1492_v23, %v1492_v23  ;;  %v1493_v33 = vmax.f32 %v1177_v25, 0.0  ;;  %2071 = vst.msk [vmem:[%s3905_s12 + $0x8] sm:$0xf] %vm2068_vm3, %v2973_v26  ;;  %v2974_v34 = vpack.c.bf16 %v1431_v28, %v1431_v28 }
 0x12e   : > { %2135 = vst.msk [vmem:[%s3905_s12 + $0x108] sm:$0xf] %vm2068_vm3, %v3037_v27  ;;  %v3038_v35 = vpack.c.bf16 %v1495_v29, %v1495_v29  ;;  %2069 = vst.msk [vmem:[%s3905_s12] sm:$0xf] %vm2068_vm3, %v2971_v30  ;;  %v2972_v36 = vpack.c.bf16 %v1429_v32, %v1429_v32  ;;  %v3175_v38 = vpop.f32.mrb[4].mxu0 }
 0x12f   : > { %2133 = vst.msk [vmem:[%s3905_s12 + $0x100] sm:$0xf] %vm2068_vm3, %v3035_v31  ;;  %v3036_v37 = vpack.c.bf16 %v1493_v33, %v1493_v33  ;;  %v3239_v39 = vpop.f32.mrb[4].mxu1  ;;  %2072 = vst.msk [vmem:[%s3905_s12 + $0xc] sm:$0xf] %vm2068_vm3, %v2974_v34  ;;  %v942_v40 = vadd.f32 %v3175_v38, %v3895_v5  ;;  %v933_v42 = vpop.f32.mrb[5].mxu0 }
 0x130   : > { %2136 = vst.msk [vmem:[%s3905_s12 + $0x10c] sm:$0xf] %vm2068_vm3, %v3038_v35  ;;  %v1198_v41 = vadd.f32 %v3239_v39, %v3895_v5  ;;  %v1189_v43 = vpop.f32.mrb[5].mxu1  ;;  %2070 = vst.msk [vmem:[%s3905_s12 + $0x4] sm:$0xf] %vm2068_vm3, %v2972_v36  ;;  %v934_v44 = vadd.f32 %v3895_v5, %v933_v42  ;;  %v3176_v46 = vpop.f32.mrb[6].mxu0 }
 0x131   : > { %2134 = vst.msk [vmem:[%s3905_s12 + $0x104] sm:$0xf] %vm2068_vm3, %v3036_v37  ;;  %v1190_v45 = vadd.f32 %v3895_v5, %v1189_v43  ;;  %v3240_v47 = vpop.f32.mrb[6].mxu1  ;;  %v1434_v48 = vmax.f32 %v942_v40, 0.0  ;;  %v945_v50 = vadd.f32 %v3176_v46, %v3895_v5  ;;  %v936_v52 = vpop.f32.mrb[7].mxu0 }
 0x132   : > { %v1498_v49 = vmax.f32 %v1198_v41, 0.0  ;;  %v1201_v51 = vadd.f32 %v3240_v47, %v3895_v5  ;;  %v1192_v53 = vpop.f32.mrb[7].mxu1  ;;  %v1432_v54 = vmax.f32 %v934_v44, 0.0  ;;  %v937_v56 = vadd.f32 %v3895_v5, %v936_v52 }
 0x133   : > { %v1496_v55 = vmax.f32 %v1190_v45, 0.0  ;;  %v1193_v57 = vadd.f32 %v3895_v5, %v1192_v53  ;;  %v2977_v58 = vpack.c.bf16 %v1434_v48, %v1434_v48  ;;  %v1435_v60 = vmax.f32 %v945_v50, 0.0 }
 0x134   : > { %v3041_v59 = vpack.c.bf16 %v1498_v49, %v1498_v49  ;;  %v1499_v61 = vmax.f32 %v1201_v51, 0.0  ;;  %v2975_v62 = vpack.c.bf16 %v1432_v54, %v1432_v54  ;;  %v1433_v0 = vmax.f32 %v937_v56, 0.0 }
 0x135   : > { %v3039_v63 = vpack.c.bf16 %v1496_v55, %v1496_v55  ;;  %v1497_v1 = vmax.f32 %v1193_v57, 0.0  ;;  %2075 = vst.msk [vmem:[%s3905_s12 + $0x18] sm:$0xf] %vm2068_vm3, %v2977_v58  ;;  %v2978_v2 = vpack.c.bf16 %v1435_v60, %v1435_v60 }
 0x136   : > { %2139 = vst.msk [vmem:[%s3905_s12 + $0x118] sm:$0xf] %vm2068_vm3, %v3041_v59  ;;  %v3042_v3 = vpack.c.bf16 %v1499_v61, %v1499_v61  ;;  %2073 = vst.msk [vmem:[%s3905_s12 + $0x10] sm:$0xf] %vm2068_vm3, %v2975_v62  ;;  %v2976_v4 = vpack.c.bf16 %v1433_v0, %v1433_v0  ;;  %v3179_v7 = vpop.f32.mrb[8].mxu0 }
 0x137   : > { %2137 = vst.msk [vmem:[%s3905_s12 + $0x110] sm:$0xf] %vm2068_vm3, %v3039_v63  ;;  %v3040_v6 = vpack.c.bf16 %v1497_v1, %v1497_v1  ;;  %v3243_v8 = vpop.f32.mrb[8].mxu1  ;;  %2076 = vst.msk [vmem:[%s3905_s12 + $0x1c] sm:$0xf] %vm2068_vm3, %v2978_v2  ;;  %v958_v9 = vadd.f32 %v3179_v7, %v3895_v5  ;;  %v949_v11 = vpop.f32.mrb[9].mxu0 }
 0x138   : > { %2140 = vst.msk [vmem:[%s3905_s12 + $0x11c] sm:$0xf] %vm2068_vm3, %v3042_v3  ;;  %v1214_v10 = vadd.f32 %v3243_v8, %v3895_v5  ;;  %v1205_v12 = vpop.f32.mrb[9].mxu1  ;;  %2074 = vst.msk [vmem:[%s3905_s12 + $0x14] sm:$0xf] %vm2068_vm3, %v2976_v4  ;;  %v950_v13 = vadd.f32 %v3895_v5, %v949_v11  ;;  %v3180_v15 = vpop.f32.mrb[10].mxu0 }
 0x139   : > { %2138 = vst.msk [vmem:[%s3905_s12 + $0x114] sm:$0xf] %vm2068_vm3, %v3040_v6  ;;  %v1206_v14 = vadd.f32 %v3895_v5, %v1205_v12  ;;  %v3244_v16 = vpop.f32.mrb[10].mxu1  ;;  %v1438_v17 = vmax.f32 %v958_v9, 0.0  ;;  %v961_v19 = vadd.f32 %v3180_v15, %v3895_v5  ;;  %v952_v21 = vpop.f32.mrb[11].mxu0 }
 0x13a   : > { %v1502_v18 = vmax.f32 %v1214_v10, 0.0  ;;  %v1217_v20 = vadd.f32 %v3244_v16, %v3895_v5  ;;  %v1208_v22 = vpop.f32.mrb[11].mxu1  ;;  %v1436_v23 = vmax.f32 %v950_v13, 0.0  ;;  %v953_v25 = vadd.f32 %v3895_v5, %v952_v21 }
 0x13b   : > { %v1500_v24 = vmax.f32 %v1206_v14, 0.0  ;;  %v1209_v26 = vadd.f32 %v3895_v5, %v1208_v22  ;;  %v2981_v27 = vpack.c.bf16 %v1438_v17, %v1438_v17  ;;  %v1439_v29 = vmax.f32 %v961_v19, 0.0 }
 0x13c   : > { %v3045_v28 = vpack.c.bf16 %v1502_v18, %v1502_v18  ;;  %v1503_v30 = vmax.f32 %v1217_v20, 0.0  ;;  %v2979_v31 = vpack.c.bf16 %v1436_v23, %v1436_v23  ;;  %v1437_v33 = vmax.f32 %v953_v25, 0.0 }
 0x13d   : > { %v3043_v32 = vpack.c.bf16 %v1500_v24, %v1500_v24  ;;  %v1501_v34 = vmax.f32 %v1209_v26, 0.0  ;;  %2079 = vst.msk [vmem:[%s3905_s12 + $0x28] sm:$0xf] %vm2068_vm3, %v2981_v27  ;;  %v2982_v35 = vpack.c.bf16 %v1439_v29, %v1439_v29 }
 0x13e   : > { %2143 = vst.msk [vmem:[%s3905_s12 + $0x128] sm:$0xf] %vm2068_vm3, %v3045_v28  ;;  %v3046_v36 = vpack.c.bf16 %v1503_v30, %v1503_v30  ;;  %2077 = vst.msk [vmem:[%s3905_s12 + $0x20] sm:$0xf] %vm2068_vm3, %v2979_v31  ;;  %v2980_v37 = vpack.c.bf16 %v1437_v33, %v1437_v33  ;;  %v3183_v39 = vpop.f32.mrb[12].mxu0 }
 0x13f   : > { %2141 = vst.msk [vmem:[%s3905_s12 + $0x120] sm:$0xf] %vm2068_vm3, %v3043_v32  ;;  %v3044_v38 = vpack.c.bf16 %v1501_v34, %v1501_v34  ;;  %v3247_v40 = vpop.f32.mrb[12].mxu1  ;;  %2080 = vst.msk [vmem:[%s3905_s12 + $0x2c] sm:$0xf] %vm2068_vm3, %v2982_v35  ;;  %v974_v41 = vadd.f32 %v3183_v39, %v3895_v5  ;;  %v965_v43 = vpop.f32.mrb[13].mxu0 }
 0x140   : > { %2144 = vst.msk [vmem:[%s3905_s12 + $0x12c] sm:$0xf] %vm2068_vm3, %v3046_v36  ;;  %v1230_v42 = vadd.f32 %v3247_v40, %v3895_v5  ;;  %v1221_v44 = vpop.f32.mrb[13].mxu1  ;;  %2078 = vst.msk [vmem:[%s3905_s12 + $0x24] sm:$0xf] %vm2068_vm3, %v2980_v37  ;;  %v966_v45 = vadd.f32 %v3895_v5, %v965_v43  ;;  %v3184_v47 = vpop.f32.mrb[14].mxu0 }
 0x141   : > { %2142 = vst.msk [vmem:[%s3905_s12 + $0x124] sm:$0xf] %vm2068_vm3, %v3044_v38  ;;  %v1222_v46 = vadd.f32 %v3895_v5, %v1221_v44  ;;  %v3248_v48 = vpop.f32.mrb[14].mxu1  ;;  %v1442_v49 = vmax.f32 %v974_v41, 0.0  ;;  %v977_v51 = vadd.f32 %v3184_v47, %v3895_v5  ;;  %v968_v53 = vpop.f32.mrb[15].mxu0 }
 0x142   : > { %v1506_v50 = vmax.f32 %v1230_v42, 0.0  ;;  %v1233_v52 = vadd.f32 %v3248_v48, %v3895_v5  ;;  %v1224_v54 = vpop.f32.mrb[15].mxu1  ;;  %v1440_v55 = vmax.f32 %v966_v45, 0.0  ;;  %v969_v57 = vadd.f32 %v3895_v5, %v968_v53 }
 0x143   : > { %v1504_v56 = vmax.f32 %v1222_v46, 0.0  ;;  %v1225_v58 = vadd.f32 %v3895_v5, %v1224_v54  ;;  %v2985_v59 = vpack.c.bf16 %v1442_v49, %v1442_v49  ;;  %v1443_v61 = vmax.f32 %v977_v51, 0.0 }
 0x144   : > { %v3049_v60 = vpack.c.bf16 %v1506_v50, %v1506_v50  ;;  %v1507_v62 = vmax.f32 %v1233_v52, 0.0  ;;  %v2983_v63 = vpack.c.bf16 %v1440_v55, %v1440_v55  ;;  %v1441_v1 = vmax.f32 %v969_v57, 0.0 }
 0x145   : > { %v3047_v0 = vpack.c.bf16 %v1504_v56, %v1504_v56  ;;  %v1505_v2 = vmax.f32 %v1225_v58, 0.0  ;;  %2083 = vst.msk [vmem:[%s3905_s12 + $0x38] sm:$0xf] %vm2068_vm3, %v2985_v59  ;;  %v2986_v3 = vpack.c.bf16 %v1443_v61, %v1443_v61 }
 0x146   : > { %2147 = vst.msk [vmem:[%s3905_s12 + $0x138] sm:$0xf] %vm2068_vm3, %v3049_v60  ;;  %v3050_v4 = vpack.c.bf16 %v1507_v62, %v1507_v62  ;;  %2081 = vst.msk [vmem:[%s3905_s12 + $0x30] sm:$0xf] %vm2068_vm3, %v2983_v63  ;;  %v2984_v6 = vpack.c.bf16 %v1441_v1, %v1441_v1  ;;  %v3187_v8 = vpop.f32.mrb[16].mxu0 }
 0x147   : > { %2145 = vst.msk [vmem:[%s3905_s12 + $0x130] sm:$0xf] %vm2068_vm3, %v3047_v0  ;;  %v3048_v7 = vpack.c.bf16 %v1505_v2, %v1505_v2  ;;  %v3251_v9 = vpop.f32.mrb[16].mxu1  ;;  %2084 = vst.msk [vmem:[%s3905_s12 + $0x3c] sm:$0xf] %vm2068_vm3, %v2986_v3  ;;  %v990_v10 = vadd.f32 %v3187_v8, %v3895_v5  ;;  %v981_v12 = vpop.f32.mrb[17].mxu0 }
 0x148   : > { %2148 = vst.msk [vmem:[%s3905_s12 + $0x13c] sm:$0xf] %vm2068_vm3, %v3050_v4  ;;  %v1246_v11 = vadd.f32 %v3251_v9, %v3895_v5  ;;  %v1237_v13 = vpop.f32.mrb[17].mxu1  ;;  %2082 = vst.msk [vmem:[%s3905_s12 + $0x34] sm:$0xf] %vm2068_vm3, %v2984_v6  ;;  %v982_v14 = vadd.f32 %v3895_v5, %v981_v12  ;;  %v3188_v16 = vpop.f32.mrb[18].mxu0 }
 0x149   : > { %2146 = vst.msk [vmem:[%s3905_s12 + $0x134] sm:$0xf] %vm2068_vm3, %v3048_v7  ;;  %v1238_v15 = vadd.f32 %v3895_v5, %v1237_v13  ;;  %v3252_v17 = vpop.f32.mrb[18].mxu1  ;;  %v1446_v18 = vmax.f32 %v990_v10, 0.0  ;;  %v993_v20 = vadd.f32 %v3188_v16, %v3895_v5  ;;  %v984_v22 = vpop.f32.mrb[19].mxu0 }
 0x14a   : > { %v1510_v19 = vmax.f32 %v1246_v11, 0.0  ;;  %v1249_v21 = vadd.f32 %v3252_v17, %v3895_v5  ;;  %v1240_v23 = vpop.f32.mrb[19].mxu1  ;;  %v1444_v24 = vmax.f32 %v982_v14, 0.0  ;;  %v985_v26 = vadd.f32 %v3895_v5, %v984_v22 }
 0x14b   : > { %v1508_v25 = vmax.f32 %v1238_v15, 0.0  ;;  %v1241_v27 = vadd.f32 %v3895_v5, %v1240_v23  ;;  %v2989_v28 = vpack.c.bf16 %v1446_v18, %v1446_v18  ;;  %v1447_v30 = vmax.f32 %v993_v20, 0.0 }
 0x14c   : > { %v3053_v29 = vpack.c.bf16 %v1510_v19, %v1510_v19  ;;  %v1511_v31 = vmax.f32 %v1249_v21, 0.0  ;;  %v2987_v32 = vpack.c.bf16 %v1444_v24, %v1444_v24  ;;  %v1445_v34 = vmax.f32 %v985_v26, 0.0 }
 0x14d   : > { %v3051_v33 = vpack.c.bf16 %v1508_v25, %v1508_v25  ;;  %v1509_v35 = vmax.f32 %v1241_v27, 0.0  ;;  %2087 = vst.msk [vmem:[%s3905_s12 + $0x48] sm:$0xf] %vm2068_vm3, %v2989_v28  ;;  %v2990_v36 = vpack.c.bf16 %v1447_v30, %v1447_v30 }
 0x14e   : > { %2151 = vst.msk [vmem:[%s3905_s12 + $0x148] sm:$0xf] %vm2068_vm3, %v3053_v29  ;;  %v3054_v37 = vpack.c.bf16 %v1511_v31, %v1511_v31  ;;  %2085 = vst.msk [vmem:[%s3905_s12 + $0x40] sm:$0xf] %vm2068_vm3, %v2987_v32  ;;  %v2988_v38 = vpack.c.bf16 %v1445_v34, %v1445_v34  ;;  %v3191_v40 = vpop.f32.mrb[20].mxu0 }
 0x14f   : > { %2149 = vst.msk [vmem:[%s3905_s12 + $0x140] sm:$0xf] %vm2068_vm3, %v3051_v33  ;;  %v3052_v39 = vpack.c.bf16 %v1509_v35, %v1509_v35  ;;  %v3255_v41 = vpop.f32.mrb[20].mxu1  ;;  %2088 = vst.msk [vmem:[%s3905_s12 + $0x4c] sm:$0xf] %vm2068_vm3, %v2990_v36  ;;  %v1006_v42 = vadd.f32 %v3191_v40, %v3895_v5  ;;  %v997_v44 = vpop.f32.mrb[21].mxu0 }
 0x150   : > { %2152 = vst.msk [vmem:[%s3905_s12 + $0x14c] sm:$0xf] %vm2068_vm3, %v3054_v37  ;;  %v1262_v43 = vadd.f32 %v3255_v41, %v3895_v5  ;;  %v1253_v45 = vpop.f32.mrb[21].mxu1  ;;  %2086 = vst.msk [vmem:[%s3905_s12 + $0x44] sm:$0xf] %vm2068_vm3, %v2988_v38  ;;  %v998_v46 = vadd.f32 %v3895_v5, %v997_v44  ;;  %v3192_v48 = vpop.f32.mrb[22].mxu0 }
 0x151   : > { %2150 = vst.msk [vmem:[%s3905_s12 + $0x144] sm:$0xf] %vm2068_vm3, %v3052_v39  ;;  %v1254_v47 = vadd.f32 %v3895_v5, %v1253_v45  ;;  %v3256_v49 = vpop.f32.mrb[22].mxu1  ;;  %v1450_v50 = vmax.f32 %v1006_v42, 0.0  ;;  %v1009_v52 = vadd.f32 %v3192_v48, %v3895_v5  ;;  %v1000_v54 = vpop.f32.mrb[23].mxu0 }
 0x152   : > { %v1514_v51 = vmax.f32 %v1262_v43, 0.0  ;;  %v1265_v53 = vadd.f32 %v3256_v49, %v3895_v5  ;;  %v1256_v55 = vpop.f32.mrb[23].mxu1  ;;  %v1448_v56 = vmax.f32 %v998_v46, 0.0  ;;  %v1001_v58 = vadd.f32 %v3895_v5, %v1000_v54 }
 0x153   : > { %v1512_v57 = vmax.f32 %v1254_v47, 0.0  ;;  %v1257_v59 = vadd.f32 %v3895_v5, %v1256_v55  ;;  %v2993_v60 = vpack.c.bf16 %v1450_v50, %v1450_v50  ;;  %v1451_v62 = vmax.f32 %v1009_v52, 0.0 }
 0x154   : > { %v3057_v61 = vpack.c.bf16 %v1514_v51, %v1514_v51  ;;  %v1515_v63 = vmax.f32 %v1265_v53, 0.0  ;;  %v2991_v0 = vpack.c.bf16 %v1448_v56, %v1448_v56  ;;  %v1449_v2 = vmax.f32 %v1001_v58, 0.0 }
 0x155   : > { %v3055_v1 = vpack.c.bf16 %v1512_v57, %v1512_v57  ;;  %v1513_v3 = vmax.f32 %v1257_v59, 0.0  ;;  %2091 = vst.msk [vmem:[%s3905_s12 + $0x58] sm:$0xf] %vm2068_vm3, %v2993_v60  ;;  %v2994_v4 = vpack.c.bf16 %v1451_v62, %v1451_v62 }
 0x156   : > { %2155 = vst.msk [vmem:[%s3905_s12 + $0x158] sm:$0xf] %vm2068_vm3, %v3057_v61  ;;  %v3058_v6 = vpack.c.bf16 %v1515_v63, %v1515_v63  ;;  %2089 = vst.msk [vmem:[%s3905_s12 + $0x50] sm:$0xf] %vm2068_vm3, %v2991_v0  ;;  %v2992_v7 = vpack.c.bf16 %v1449_v2, %v1449_v2  ;;  %v3195_v9 = vpop.f32.mrb[24].mxu0 }
 0x157   : > { %2153 = vst.msk [vmem:[%s3905_s12 + $0x150] sm:$0xf] %vm2068_vm3, %v3055_v1  ;;  %v3056_v8 = vpack.c.bf16 %v1513_v3, %v1513_v3  ;;  %v3259_v10 = vpop.f32.mrb[24].mxu1  ;;  %2092 = vst.msk [vmem:[%s3905_s12 + $0x5c] sm:$0xf] %vm2068_vm3, %v2994_v4  ;;  %v1022_v11 = vadd.f32 %v3195_v9, %v3895_v5  ;;  %v1013_v13 = vpop.f32.mrb[25].mxu0 }
 0x158   : > { %2156 = vst.msk [vmem:[%s3905_s12 + $0x15c] sm:$0xf] %vm2068_vm3, %v3058_v6  ;;  %v1278_v12 = vadd.f32 %v3259_v10, %v3895_v5  ;;  %v1269_v14 = vpop.f32.mrb[25].mxu1  ;;  %2090 = vst.msk [vmem:[%s3905_s12 + $0x54] sm:$0xf] %vm2068_vm3, %v2992_v7  ;;  %v1014_v15 = vadd.f32 %v3895_v5, %v1013_v13  ;;  %v3196_v17 = vpop.f32.mrb[26].mxu0 }
 0x159   : > { %2154 = vst.msk [vmem:[%s3905_s12 + $0x154] sm:$0xf] %vm2068_vm3, %v3056_v8  ;;  %v1270_v16 = vadd.f32 %v3895_v5, %v1269_v14  ;;  %v3260_v18 = vpop.f32.mrb[26].mxu1  ;;  %v1454_v19 = vmax.f32 %v1022_v11, 0.0  ;;  %v1025_v21 = vadd.f32 %v3196_v17, %v3895_v5  ;;  %v1016_v23 = vpop.f32.mrb[27].mxu0 }
 0x15a   : > { %v1518_v20 = vmax.f32 %v1278_v12, 0.0  ;;  %v1281_v22 = vadd.f32 %v3260_v18, %v3895_v5  ;;  %v1272_v24 = vpop.f32.mrb[27].mxu1  ;;  %v1452_v25 = vmax.f32 %v1014_v15, 0.0  ;;  %v1017_v27 = vadd.f32 %v3895_v5, %v1016_v23 }
 0x15b   : > { %v1516_v26 = vmax.f32 %v1270_v16, 0.0  ;;  %v1273_v28 = vadd.f32 %v3895_v5, %v1272_v24  ;;  %v2997_v29 = vpack.c.bf16 %v1454_v19, %v1454_v19  ;;  %v1455_v31 = vmax.f32 %v1025_v21, 0.0 }
 0x15c   : > { %v3061_v30 = vpack.c.bf16 %v1518_v20, %v1518_v20  ;;  %v1519_v32 = vmax.f32 %v1281_v22, 0.0  ;;  %v2995_v33 = vpack.c.bf16 %v1452_v25, %v1452_v25  ;;  %v1453_v35 = vmax.f32 %v1017_v27, 0.0 }
 0x15d   : > { %v3059_v34 = vpack.c.bf16 %v1516_v26, %v1516_v26  ;;  %v1517_v36 = vmax.f32 %v1273_v28, 0.0  ;;  %2095 = vst.msk [vmem:[%s3905_s12 + $0x68] sm:$0xf] %vm2068_vm3, %v2997_v29  ;;  %v2998_v37 = vpack.c.bf16 %v1455_v31, %v1455_v31 }
 0x15e   : > { %2159 = vst.msk [vmem:[%s3905_s12 + $0x168] sm:$0xf] %vm2068_vm3, %v3061_v30  ;;  %v3062_v38 = vpack.c.bf16 %v1519_v32, %v1519_v32  ;;  %2093 = vst.msk [vmem:[%s3905_s12 + $0x60] sm:$0xf] %vm2068_vm3, %v2995_v33  ;;  %v2996_v39 = vpack.c.bf16 %v1453_v35, %v1453_v35  ;;  %v3199_v41 = vpop.f32.mrb[28].mxu0 }
 0x15f   : > { %2157 = vst.msk [vmem:[%s3905_s12 + $0x160] sm:$0xf] %vm2068_vm3, %v3059_v34  ;;  %v3060_v40 = vpack.c.bf16 %v1517_v36, %v1517_v36  ;;  %v3263_v42 = vpop.f32.mrb[28].mxu1  ;;  %2096 = vst.msk [vmem:[%s3905_s12 + $0x6c] sm:$0xf] %vm2068_vm3, %v2998_v37  ;;  %v1038_v43 = vadd.f32 %v3199_v41, %v3895_v5  ;;  %v1029_v45 = vpop.f32.mrb[29].mxu0 }
 0x160   : > { %2160 = vst.msk [vmem:[%s3905_s12 + $0x16c] sm:$0xf] %vm2068_vm3, %v3062_v38  ;;  %v1294_v44 = vadd.f32 %v3263_v42, %v3895_v5  ;;  %v1285_v46 = vpop.f32.mrb[29].mxu1  ;;  %2094 = vst.msk [vmem:[%s3905_s12 + $0x64] sm:$0xf] %vm2068_vm3, %v2996_v39  ;;  %v1030_v47 = vadd.f32 %v3895_v5, %v1029_v45  ;;  %v3200_v49 = vpop.f32.mrb[30].mxu0 }
 0x161   : > { %2158 = vst.msk [vmem:[%s3905_s12 + $0x164] sm:$0xf] %vm2068_vm3, %v3060_v40  ;;  %v1286_v48 = vadd.f32 %v3895_v5, %v1285_v46  ;;  %v3264_v50 = vpop.f32.mrb[30].mxu1  ;;  %v1458_v51 = vmax.f32 %v1038_v43, 0.0  ;;  %v1041_v53 = vadd.f32 %v3200_v49, %v3895_v5  ;;  %v1032_v55 = vpop.f32.mrb[31].mxu0 }
 0x162   : > { %v1522_v52 = vmax.f32 %v1294_v44, 0.0  ;;  %v1297_v54 = vadd.f32 %v3264_v50, %v3895_v5  ;;  %v1288_v56 = vpop.f32.mrb[31].mxu1  ;;  %v1456_v57 = vmax.f32 %v1030_v47, 0.0  ;;  %v1033_v59 = vadd.f32 %v3895_v5, %v1032_v55 }
 0x163   : > { %v1520_v58 = vmax.f32 %v1286_v48, 0.0  ;;  %v1289_v60 = vadd.f32 %v3895_v5, %v1288_v56  ;;  %v3001_v61 = vpack.c.bf16 %v1458_v51, %v1458_v51  ;;  %v1459_v63 = vmax.f32 %v1041_v53, 0.0 }
 0x164   : > { %v3065_v62 = vpack.c.bf16 %v1522_v52, %v1522_v52  ;;  %v1523_v0 = vmax.f32 %v1297_v54, 0.0  ;;  %v2999_v1 = vpack.c.bf16 %v1456_v57, %v1456_v57  ;;  %v1457_v3 = vmax.f32 %v1033_v59, 0.0 }
 0x165   : > { %v3063_v2 = vpack.c.bf16 %v1520_v58, %v1520_v58  ;;  %v1521_v4 = vmax.f32 %v1289_v60, 0.0  ;;  %2099 = vst.msk [vmem:[%s3905_s12 + $0x78] sm:$0xf] %vm2068_vm3, %v3001_v61  ;;  %v3002_v6 = vpack.c.bf16 %v1459_v63, %v1459_v63 }
 0x166   : > { %2163 = vst.msk [vmem:[%s3905_s12 + $0x178] sm:$0xf] %vm2068_vm3, %v3065_v62  ;;  %v3066_v7 = vpack.c.bf16 %v1523_v0, %v1523_v0  ;;  %2097 = vst.msk [vmem:[%s3905_s12 + $0x70] sm:$0xf] %vm2068_vm3, %v2999_v1  ;;  %v3000_v8 = vpack.c.bf16 %v1457_v3, %v1457_v3  ;;  %v3203_v10 = vpop.f32.mrb[32].mxu0 }
 0x167   : > { %2161 = vst.msk [vmem:[%s3905_s12 + $0x170] sm:$0xf] %vm2068_vm3, %v3063_v2  ;;  %v3064_v9 = vpack.c.bf16 %v1521_v4, %v1521_v4  ;;  %v3267_v11 = vpop.f32.mrb[32].mxu1  ;;  %2100 = vst.msk [vmem:[%s3905_s12 + $0x7c] sm:$0xf] %vm2068_vm3, %v3002_v6  ;;  %v1054_v12 = vadd.f32 %v3203_v10, %v3895_v5  ;;  %v1045_v14 = vpop.f32.mrb[33].mxu0 }
 0x168   : > { %2164 = vst.msk [vmem:[%s3905_s12 + $0x17c] sm:$0xf] %vm2068_vm3, %v3066_v7  ;;  %v1310_v13 = vadd.f32 %v3267_v11, %v3895_v5  ;;  %v1301_v15 = vpop.f32.mrb[33].mxu1  ;;  %2098 = vst.msk [vmem:[%s3905_s12 + $0x74] sm:$0xf] %vm2068_vm3, %v3000_v8  ;;  %v1046_v16 = vadd.f32 %v3895_v5, %v1045_v14  ;;  %v3204_v18 = vpop.f32.mrb[34].mxu0 }
 0x169   : > { %2162 = vst.msk [vmem:[%s3905_s12 + $0x174] sm:$0xf] %vm2068_vm3, %v3064_v9  ;;  %v1302_v17 = vadd.f32 %v3895_v5, %v1301_v15  ;;  %v3268_v19 = vpop.f32.mrb[34].mxu1  ;;  %v1462_v20 = vmax.f32 %v1054_v12, 0.0  ;;  %v1057_v22 = vadd.f32 %v3204_v18, %v3895_v5  ;;  %v1048_v24 = vpop.f32.mrb[35].mxu0 }
 0x16a   : > { %v1526_v21 = vmax.f32 %v1310_v13, 0.0  ;;  %v1313_v23 = vadd.f32 %v3268_v19, %v3895_v5  ;;  %v1304_v25 = vpop.f32.mrb[35].mxu1  ;;  %v1460_v26 = vmax.f32 %v1046_v16, 0.0  ;;  %v1049_v28 = vadd.f32 %v3895_v5, %v1048_v24 }
 0x16b   : > { %v1524_v27 = vmax.f32 %v1302_v17, 0.0  ;;  %v1305_v29 = vadd.f32 %v3895_v5, %v1304_v25  ;;  %v3005_v30 = vpack.c.bf16 %v1462_v20, %v1462_v20  ;;  %v1463_v32 = vmax.f32 %v1057_v22, 0.0 }
 0x16c   : > { %v3069_v31 = vpack.c.bf16 %v1526_v21, %v1526_v21  ;;  %v1527_v33 = vmax.f32 %v1313_v23, 0.0  ;;  %v3003_v34 = vpack.c.bf16 %v1460_v26, %v1460_v26  ;;  %v1461_v36 = vmax.f32 %v1049_v28, 0.0 }
 0x16d   : > { %v3067_v35 = vpack.c.bf16 %v1524_v27, %v1524_v27  ;;  %v1525_v37 = vmax.f32 %v1305_v29, 0.0  ;;  %2103 = vst.msk [vmem:[%s3905_s12 + $0x88] sm:$0xf] %vm2068_vm3, %v3005_v30  ;;  %v3006_v38 = vpack.c.bf16 %v1463_v32, %v1463_v32 }
 0x16e   : > { %2167 = vst.msk [vmem:[%s3905_s12 + $0x188] sm:$0xf] %vm2068_vm3, %v3069_v31  ;;  %v3070_v39 = vpack.c.bf16 %v1527_v33, %v1527_v33  ;;  %2101 = vst.msk [vmem:[%s3905_s12 + $0x80] sm:$0xf] %vm2068_vm3, %v3003_v34  ;;  %v3004_v40 = vpack.c.bf16 %v1461_v36, %v1461_v36  ;;  %v3207_v42 = vpop.f32.mrb[36].mxu0 }
 0x16f   : > { %2165 = vst.msk [vmem:[%s3905_s12 + $0x180] sm:$0xf] %vm2068_vm3, %v3067_v35  ;;  %v3068_v41 = vpack.c.bf16 %v1525_v37, %v1525_v37  ;;  %v3271_v43 = vpop.f32.mrb[36].mxu1  ;;  %2104 = vst.msk [vmem:[%s3905_s12 + $0x8c] sm:$0xf] %vm2068_vm3, %v3006_v38  ;;  %v1070_v44 = vadd.f32 %v3207_v42, %v3895_v5  ;;  %v1061_v46 = vpop.f32.mrb[37].mxu0 }
 0x170   : > { %2168 = vst.msk [vmem:[%s3905_s12 + $0x18c] sm:$0xf] %vm2068_vm3, %v3070_v39  ;;  %v1326_v45 = vadd.f32 %v3271_v43, %v3895_v5  ;;  %v1317_v47 = vpop.f32.mrb[37].mxu1  ;;  %2102 = vst.msk [vmem:[%s3905_s12 + $0x84] sm:$0xf] %vm2068_vm3, %v3004_v40  ;;  %v1062_v48 = vadd.f32 %v3895_v5, %v1061_v46  ;;  %v3208_v50 = vpop.f32.mrb[38].mxu0 }
 0x171   : > { %2166 = vst.msk [vmem:[%s3905_s12 + $0x184] sm:$0xf] %vm2068_vm3, %v3068_v41  ;;  %v1318_v49 = vadd.f32 %v3895_v5, %v1317_v47  ;;  %v3272_v51 = vpop.f32.mrb[38].mxu1  ;;  %v1466_v52 = vmax.f32 %v1070_v44, 0.0  ;;  %v1073_v54 = vadd.f32 %v3208_v50, %v3895_v5  ;;  %v1064_v56 = vpop.f32.mrb[39].mxu0 }
 0x172   : > { %v1530_v53 = vmax.f32 %v1326_v45, 0.0  ;;  %v1329_v55 = vadd.f32 %v3272_v51, %v3895_v5  ;;  %v1320_v57 = vpop.f32.mrb[39].mxu1  ;;  %v1464_v58 = vmax.f32 %v1062_v48, 0.0  ;;  %v1065_v60 = vadd.f32 %v3895_v5, %v1064_v56 }
 0x173   : > { %v1528_v59 = vmax.f32 %v1318_v49, 0.0  ;;  %v1321_v61 = vadd.f32 %v3895_v5, %v1320_v57  ;;  %v3009_v62 = vpack.c.bf16 %v1466_v52, %v1466_v52  ;;  %v1467_v0 = vmax.f32 %v1073_v54, 0.0 }
 0x174   : > { %v3073_v63 = vpack.c.bf16 %v1530_v53, %v1530_v53  ;;  %v1531_v1 = vmax.f32 %v1329_v55, 0.0  ;;  %v3007_v2 = vpack.c.bf16 %v1464_v58, %v1464_v58  ;;  %v1465_v4 = vmax.f32 %v1065_v60, 0.0 }
 0x175   : > { %v3071_v3 = vpack.c.bf16 %v1528_v59, %v1528_v59  ;;  %v1529_v6 = vmax.f32 %v1321_v61, 0.0  ;;  %2107 = vst.msk [vmem:[%s3905_s12 + $0x98] sm:$0xf] %vm2068_vm3, %v3009_v62  ;;  %v3010_v7 = vpack.c.bf16 %v1467_v0, %v1467_v0 }
 0x176   : > { %2171 = vst.msk [vmem:[%s3905_s12 + $0x198] sm:$0xf] %vm2068_vm3, %v3073_v63  ;;  %v3074_v8 = vpack.c.bf16 %v1531_v1, %v1531_v1  ;;  %2105 = vst.msk [vmem:[%s3905_s12 + $0x90] sm:$0xf] %vm2068_vm3, %v3007_v2  ;;  %v3008_v9 = vpack.c.bf16 %v1465_v4, %v1465_v4  ;;  %v3211_v11 = vpop.f32.mrb[40].mxu0 }
 0x177   : > { %2169 = vst.msk [vmem:[%s3905_s12 + $0x190] sm:$0xf] %vm2068_vm3, %v3071_v3  ;;  %v3072_v10 = vpack.c.bf16 %v1529_v6, %v1529_v6  ;;  %v3275_v12 = vpop.f32.mrb[40].mxu1  ;;  %2108 = vst.msk [vmem:[%s3905_s12 + $0x9c] sm:$0xf] %vm2068_vm3, %v3010_v7  ;;  %v1086_v13 = vadd.f32 %v3211_v11, %v3895_v5  ;;  %v1077_v15 = vpop.f32.mrb[41].mxu0 }
 0x178   : > { %2172 = vst.msk [vmem:[%s3905_s12 + $0x19c] sm:$0xf] %vm2068_vm3, %v3074_v8  ;;  %v1342_v14 = vadd.f32 %v3275_v12, %v3895_v5  ;;  %v1333_v16 = vpop.f32.mrb[41].mxu1  ;;  %2106 = vst.msk [vmem:[%s3905_s12 + $0x94] sm:$0xf] %vm2068_vm3, %v3008_v9  ;;  %v1078_v17 = vadd.f32 %v3895_v5, %v1077_v15  ;;  %v3212_v19 = vpop.f32.mrb[42].mxu0 }
 0x179   : > { %2170 = vst.msk [vmem:[%s3905_s12 + $0x194] sm:$0xf] %vm2068_vm3, %v3072_v10  ;;  %v1334_v18 = vadd.f32 %v3895_v5, %v1333_v16  ;;  %v3276_v20 = vpop.f32.mrb[42].mxu1  ;;  %v1470_v21 = vmax.f32 %v1086_v13, 0.0  ;;  %v1089_v23 = vadd.f32 %v3212_v19, %v3895_v5  ;;  %v1080_v25 = vpop.f32.mrb[43].mxu0 }
 0x17a   : > { %v1534_v22 = vmax.f32 %v1342_v14, 0.0  ;;  %v1345_v24 = vadd.f32 %v3276_v20, %v3895_v5  ;;  %v1336_v26 = vpop.f32.mrb[43].mxu1  ;;  %v1468_v27 = vmax.f32 %v1078_v17, 0.0  ;;  %v1081_v29 = vadd.f32 %v3895_v5, %v1080_v25 }
 0x17b   : > { %v1532_v28 = vmax.f32 %v1334_v18, 0.0  ;;  %v1337_v30 = vadd.f32 %v3895_v5, %v1336_v26  ;;  %v3013_v31 = vpack.c.bf16 %v1470_v21, %v1470_v21  ;;  %v1471_v33 = vmax.f32 %v1089_v23, 0.0 }
 0x17c   : > { %v3077_v32 = vpack.c.bf16 %v1534_v22, %v1534_v22  ;;  %v1535_v34 = vmax.f32 %v1345_v24, 0.0  ;;  %v3011_v35 = vpack.c.bf16 %v1468_v27, %v1468_v27  ;;  %v1469_v37 = vmax.f32 %v1081_v29, 0.0 }
 0x17d   : > { %v3075_v36 = vpack.c.bf16 %v1532_v28, %v1532_v28  ;;  %v1533_v38 = vmax.f32 %v1337_v30, 0.0  ;;  %2111 = vst.msk [vmem:[%s3905_s12 + $0xa8] sm:$0xf] %vm2068_vm3, %v3013_v31  ;;  %v3014_v39 = vpack.c.bf16 %v1471_v33, %v1471_v33 }
 0x17e   : > { %2175 = vst.msk [vmem:[%s3905_s12 + $0x1a8] sm:$0xf] %vm2068_vm3, %v3077_v32  ;;  %v3078_v40 = vpack.c.bf16 %v1535_v34, %v1535_v34  ;;  %2109 = vst.msk [vmem:[%s3905_s12 + $0xa0] sm:$0xf] %vm2068_vm3, %v3011_v35  ;;  %v3012_v41 = vpack.c.bf16 %v1469_v37, %v1469_v37  ;;  %v3215_v43 = vpop.f32.mrb[44].mxu0 }
 0x17f   : > { %2173 = vst.msk [vmem:[%s3905_s12 + $0x1a0] sm:$0xf] %vm2068_vm3, %v3075_v36  ;;  %v3076_v42 = vpack.c.bf16 %v1533_v38, %v1533_v38  ;;  %v3279_v44 = vpop.f32.mrb[44].mxu1  ;;  %2112 = vst.msk [vmem:[%s3905_s12 + $0xac] sm:$0xf] %vm2068_vm3, %v3014_v39  ;;  %v1102_v45 = vadd.f32 %v3215_v43, %v3895_v5  ;;  %v1093_v47 = vpop.f32.mrb[45].mxu0 }
 0x180   : > { %2176 = vst.msk [vmem:[%s3905_s12 + $0x1ac] sm:$0xf] %vm2068_vm3, %v3078_v40  ;;  %v1358_v46 = vadd.f32 %v3279_v44, %v3895_v5  ;;  %v1349_v48 = vpop.f32.mrb[45].mxu1  ;;  %2110 = vst.msk [vmem:[%s3905_s12 + $0xa4] sm:$0xf] %vm2068_vm3, %v3012_v41  ;;  %v1094_v49 = vadd.f32 %v3895_v5, %v1093_v47  ;;  %v3216_v51 = vpop.f32.mrb[46].mxu0 }
 0x181   : > { %2174 = vst.msk [vmem:[%s3905_s12 + $0x1a4] sm:$0xf] %vm2068_vm3, %v3076_v42  ;;  %v1350_v50 = vadd.f32 %v3895_v5, %v1349_v48  ;;  %v3280_v52 = vpop.f32.mrb[46].mxu1  ;;  %v1474_v53 = vmax.f32 %v1102_v45, 0.0  ;;  %v1105_v55 = vadd.f32 %v3216_v51, %v3895_v5  ;;  %v1096_v57 = vpop.f32.mrb[47].mxu0 }
 0x182   : > { %v1538_v54 = vmax.f32 %v1358_v46, 0.0  ;;  %v1361_v56 = vadd.f32 %v3280_v52, %v3895_v5  ;;  %v1352_v58 = vpop.f32.mrb[47].mxu1  ;;  %v1472_v59 = vmax.f32 %v1094_v49, 0.0  ;;  %v1097_v61 = vadd.f32 %v3895_v5, %v1096_v57  ;;  %v4207_v45 = vld [vmem:[#allocation4] ss:$0 sm:$0xff] }
 0x183   : > { %v1536_v60 = vmax.f32 %v1350_v50, 0.0  ;;  %v1353_v62 = vadd.f32 %v3895_v5, %v1352_v58  ;;  %v3017_v63 = vpack.c.bf16 %v1474_v53, %v1474_v53  ;;  %v1475_v1 = vmax.f32 %v1105_v55, 0.0 }
 0x184   : > { %v3081_v0 = vpack.c.bf16 %v1538_v54, %v1538_v54  ;;  %v1539_v2 = vmax.f32 %v1361_v56, 0.0  ;;  %v3015_v3 = vpack.c.bf16 %v1472_v59, %v1472_v59  ;;  %v1473_v6 = vmax.f32 %v1097_v61, 0.0 }
 0x185   : > { %v3079_v4 = vpack.c.bf16 %v1536_v60, %v1536_v60  ;;  %v1537_v7 = vmax.f32 %v1353_v62, 0.0  ;;  %2115 = vst.msk [vmem:[%s3905_s12 + $0xb8] sm:$0xf] %vm2068_vm3, %v3017_v63  ;;  %v3018_v8 = vpack.c.bf16 %v1475_v1, %v1475_v1 }
 0x186   : > { %2179 = vst.msk [vmem:[%s3905_s12 + $0x1b8] sm:$0xf] %vm2068_vm3, %v3081_v0  ;;  %v3082_v9 = vpack.c.bf16 %v1539_v2, %v1539_v2  ;;  %2113 = vst.msk [vmem:[%s3905_s12 + $0xb0] sm:$0xf] %vm2068_vm3, %v3015_v3  ;;  %v3016_v10 = vpack.c.bf16 %v1473_v6, %v1473_v6  ;;  %v3219_v12 = vpop.f32.mrb[48].mxu0 }
 0x187   : > { %2177 = vst.msk [vmem:[%s3905_s12 + $0x1b0] sm:$0xf] %vm2068_vm3, %v3079_v4  ;;  %v3080_v11 = vpack.c.bf16 %v1537_v7, %v1537_v7  ;;  %v3283_v13 = vpop.f32.mrb[48].mxu1  ;;  %2116 = vst.msk [vmem:[%s3905_s12 + $0xbc] sm:$0xf] %vm2068_vm3, %v3018_v8  ;;  %v1118_v14 = vadd.f32 %v3219_v12, %v3895_v5  ;;  %v1109_v16 = vpop.f32.mrb[49].mxu0 }
 0x188   : > { %2180 = vst.msk [vmem:[%s3905_s12 + $0x1bc] sm:$0xf] %vm2068_vm3, %v3082_v9  ;;  %v1374_v15 = vadd.f32 %v3283_v13, %v3895_v5  ;;  %v1365_v17 = vpop.f32.mrb[49].mxu1  ;;  %2114 = vst.msk [vmem:[%s3905_s12 + $0xb4] sm:$0xf] %vm2068_vm3, %v3016_v10  ;;  %v1110_v18 = vadd.f32 %v3895_v5, %v1109_v16  ;;  %v3220_v20 = vpop.f32.mrb[50].mxu0 }
 0x189   : > { %2178 = vst.msk [vmem:[%s3905_s12 + $0x1b4] sm:$0xf] %vm2068_vm3, %v3080_v11  ;;  %v1366_v19 = vadd.f32 %v3895_v5, %v1365_v17  ;;  %v3284_v21 = vpop.f32.mrb[50].mxu1  ;;  %v1478_v22 = vmax.f32 %v1118_v14, 0.0  ;;  %v1121_v24 = vadd.f32 %v3220_v20, %v3895_v5  ;;  %v1112_v26 = vpop.f32.mrb[51].mxu0 }
 0x18a   : > { %v1542_v23 = vmax.f32 %v1374_v15, 0.0  ;;  %v1377_v25 = vadd.f32 %v3284_v21, %v3895_v5  ;;  %v1368_v27 = vpop.f32.mrb[51].mxu1  ;;  %v1476_v28 = vmax.f32 %v1110_v18, 0.0  ;;  %v1113_v30 = vadd.f32 %v3895_v5, %v1112_v26 }
 0x18b   : > { %v1540_v29 = vmax.f32 %v1366_v19, 0.0  ;;  %v1369_v31 = vadd.f32 %v3895_v5, %v1368_v27  ;;  %v3021_v32 = vpack.c.bf16 %v1478_v22, %v1478_v22  ;;  %v1479_v34 = vmax.f32 %v1121_v24, 0.0 }
 0x18c   : > { %v3085_v33 = vpack.c.bf16 %v1542_v23, %v1542_v23  ;;  %v1543_v35 = vmax.f32 %v1377_v25, 0.0  ;;  %v3019_v36 = vpack.c.bf16 %v1476_v28, %v1476_v28  ;;  %v1477_v38 = vmax.f32 %v1113_v30, 0.0 }
 0x18d   : > { %v3083_v37 = vpack.c.bf16 %v1540_v29, %v1540_v29  ;;  %v1541_v39 = vmax.f32 %v1369_v31, 0.0  ;;  %2119 = vst.msk [vmem:[%s3905_s12 + $0xc8] sm:$0xf] %vm2068_vm3, %v3021_v32  ;;  %v3022_v40 = vpack.c.bf16 %v1479_v34, %v1479_v34 }
 0x18e   : > { %2183 = vst.msk [vmem:[%s3905_s12 + $0x1c8] sm:$0xf] %vm2068_vm3, %v3085_v33  ;;  %v3086_v41 = vpack.c.bf16 %v1543_v35, %v1543_v35  ;;  %2117 = vst.msk [vmem:[%s3905_s12 + $0xc0] sm:$0xf] %vm2068_vm3, %v3019_v36  ;;  %v3020_v5 = vpack.c.bf16 %v1477_v38, %v1477_v38  ;;  %v3223_v43 = vpop.f32.mrb[52].mxu0 }
 0x18f   : > { %2181 = vst.msk [vmem:[%s3905_s12 + $0x1c0] sm:$0xf] %vm2068_vm3, %v3083_v37  ;;  %v3084_v42 = vpack.c.bf16 %v1541_v39, %v1541_v39  ;;  %v3287_v44 = vpop.f32.mrb[52].mxu1  ;;  %2120 = vst.msk [vmem:[%s3905_s12 + $0xcc] sm:$0xf] %vm2068_vm3, %v3022_v40  ;;  %v1134_v46 = vadd.f32 %v4207_v45, %v3223_v43  ;;  %v1125_v48 = vpop.f32.mrb[53].mxu0 }
 0x190   : > { %2184 = vst.msk [vmem:[%s3905_s12 + $0x1cc] sm:$0xf] %vm2068_vm3, %v3086_v41  ;;  %v1390_v47 = vadd.f32 %v4207_v45, %v3287_v44  ;;  %v1381_v49 = vpop.f32.mrb[53].mxu1  ;;  %2118 = vst.msk [vmem:[%s3905_s12 + $0xc4] sm:$0xf] %vm2068_vm3, %v3020_v5  ;;  %v1126_v50 = vadd.f32 %v4207_v45, %v1125_v48  ;;  %v3224_v52 = vpop.f32.mrb[54].mxu0 }
 0x191   : > { %2182 = vst.msk [vmem:[%s3905_s12 + $0x1c4] sm:$0xf] %vm2068_vm3, %v3084_v42  ;;  %v1382_v51 = vadd.f32 %v4207_v45, %v1381_v49  ;;  %v3288_v53 = vpop.f32.mrb[54].mxu1  ;;  %v1482_v54 = vmax.f32 %v1134_v46, 0.0  ;;  %v1137_v56 = vadd.f32 %v4207_v45, %v3224_v52  ;;  %v1128_v58 = vpop.f32.mrb[55].mxu0 }
 0x192   : > { %v1546_v55 = vmax.f32 %v1390_v47, 0.0  ;;  %v1393_v57 = vadd.f32 %v4207_v45, %v3288_v53  ;;  %v1384_v59 = vpop.f32.mrb[55].mxu1  ;;  %v1480_v60 = vmax.f32 %v1126_v50, 0.0  ;;  %v1129_v62 = vadd.f32 %v4207_v45, %v1128_v58 }
 0x193   : > { %v1544_v61 = vmax.f32 %v1382_v51, 0.0  ;;  %v1385_v63 = vadd.f32 %v4207_v45, %v1384_v59  ;;  %v3025_v0 = vpack.c.bf16 %v1482_v54, %v1482_v54  ;;  %v1483_v2 = vmax.f32 %v1137_v56, 0.0 }
 0x194   : > { %v3089_v1 = vpack.c.bf16 %v1546_v55, %v1546_v55  ;;  %v1547_v3 = vmax.f32 %v1393_v57, 0.0  ;;  %v3023_v4 = vpack.c.bf16 %v1480_v60, %v1480_v60  ;;  %v1481_v7 = vmax.f32 %v1129_v62, 0.0 }
 0x195   : > { %v3087_v6 = vpack.c.bf16 %v1544_v61, %v1544_v61  ;;  %v1545_v8 = vmax.f32 %v1385_v63, 0.0  ;;  %2123 = vst.msk [vmem:[%s3905_s12 + $0xd8] sm:$0xf] %vm2068_vm3, %v3025_v0  ;;  %v3026_v9 = vpack.c.bf16 %v1483_v2, %v1483_v2 }
 0x196   : > { %2187 = vst.msk [vmem:[%s3905_s12 + $0x1d8] sm:$0xf] %vm2068_vm3, %v3089_v1  ;;  %v3090_v10 = vpack.c.bf16 %v1547_v3, %v1547_v3  ;;  %2121 = vst.msk [vmem:[%s3905_s12 + $0xd0] sm:$0xf] %vm2068_vm3, %v3023_v4  ;;  %v3024_v11 = vpack.c.bf16 %v1481_v7, %v1481_v7  ;;  %v3227_v13 = vpop.f32.mrb[56].mxu0 }
 0x197   : > { %2185 = vst.msk [vmem:[%s3905_s12 + $0x1d0] sm:$0xf] %vm2068_vm3, %v3087_v6  ;;  %v3088_v12 = vpack.c.bf16 %v1545_v8, %v1545_v8  ;;  %v3291_v14 = vpop.f32.mrb[56].mxu1  ;;  %2124 = vst.msk [vmem:[%s3905_s12 + $0xdc] sm:$0xf] %vm2068_vm3, %v3026_v9  ;;  %v1150_v15 = vadd.f32 %v4207_v45, %v3227_v13  ;;  %v1141_v17 = vpop.f32.mrb[57].mxu0 }
 0x198   : > { %2188 = vst.msk [vmem:[%s3905_s12 + $0x1dc] sm:$0xf] %vm2068_vm3, %v3090_v10  ;;  %v1406_v16 = vadd.f32 %v4207_v45, %v3291_v14  ;;  %v1397_v18 = vpop.f32.mrb[57].mxu1  ;;  %2122 = vst.msk [vmem:[%s3905_s12 + $0xd4] sm:$0xf] %vm2068_vm3, %v3024_v11  ;;  %v1142_v19 = vadd.f32 %v4207_v45, %v1141_v17  ;;  %v3228_v21 = vpop.f32.mrb[58].mxu0 }
 0x199   : > { %2186 = vst.msk [vmem:[%s3905_s12 + $0x1d4] sm:$0xf] %vm2068_vm3, %v3088_v12  ;;  %v1398_v20 = vadd.f32 %v4207_v45, %v1397_v18  ;;  %v3292_v22 = vpop.f32.mrb[58].mxu1  ;;  %v1486_v23 = vmax.f32 %v1150_v15, 0.0  ;;  %v1153_v25 = vadd.f32 %v4207_v45, %v3228_v21  ;;  %v1144_v27 = vpop.f32.mrb[59].mxu0 }
 0x19a   : > { %v1550_v24 = vmax.f32 %v1406_v16, 0.0  ;;  %v1409_v26 = vadd.f32 %v4207_v45, %v3292_v22  ;;  %v1400_v28 = vpop.f32.mrb[59].mxu1  ;;  %v1484_v29 = vmax.f32 %v1142_v19, 0.0  ;;  %v1145_v31 = vadd.f32 %v4207_v45, %v1144_v27 }
 0x19b   : > { %v1548_v30 = vmax.f32 %v1398_v20, 0.0  ;;  %v1401_v32 = vadd.f32 %v4207_v45, %v1400_v28  ;;  %v3029_v33 = vpack.c.bf16 %v1486_v23, %v1486_v23  ;;  %v1487_v35 = vmax.f32 %v1153_v25, 0.0 }
 0x19c   : > { %v3093_v34 = vpack.c.bf16 %v1550_v24, %v1550_v24  ;;  %v1551_v36 = vmax.f32 %v1409_v26, 0.0  ;;  %v3027_v37 = vpack.c.bf16 %v1484_v29, %v1484_v29  ;;  %v1485_v39 = vmax.f32 %v1145_v31, 0.0 }
 0x19d   : > { %v3091_v38 = vpack.c.bf16 %v1548_v30, %v1548_v30  ;;  %v1549_v40 = vmax.f32 %v1401_v32, 0.0  ;;  %2127 = vst.msk [vmem:[%s3905_s12 + $0xe8] sm:$0xf] %vm2068_vm3, %v3029_v33  ;;  %v3030_v41 = vpack.c.bf16 %v1487_v35, %v1487_v35 }
 0x19e   : > { %2191 = vst.msk [vmem:[%s3905_s12 + $0x1e8] sm:$0xf] %vm2068_vm3, %v3093_v34  ;;  %v3094_v5 = vpack.c.bf16 %v1551_v36, %v1551_v36  ;;  %2125 = vst.msk [vmem:[%s3905_s12 + $0xe0] sm:$0xf] %vm2068_vm3, %v3027_v37  ;;  %v3028_v42 = vpack.c.bf16 %v1485_v39, %v1485_v39  ;;  %v3231_v44 = vpop.f32.mrb[60].mxu0 }
 0x19f   : > { %2189 = vst.msk [vmem:[%s3905_s12 + $0x1e0] sm:$0xf] %vm2068_vm3, %v3091_v38  ;;  %v3092_v43 = vpack.c.bf16 %v1549_v40, %v1549_v40  ;;  %v3295_v46 = vpop.f32.mrb[60].mxu1  ;;  %2128 = vst.msk [vmem:[%s3905_s12 + $0xec] sm:$0xf] %vm2068_vm3, %v3030_v41  ;;  %v1166_v47 = vadd.f32 %v4207_v45, %v3231_v44  ;;  %v1157_v49 = vpop.f32.mrb[61].mxu0 }
 0x1a0   : > { %2192 = vst.msk [vmem:[%s3905_s12 + $0x1ec] sm:$0xf] %vm2068_vm3, %v3094_v5  ;;  %v1422_v48 = vadd.f32 %v4207_v45, %v3295_v46  ;;  %v1413_v50 = vpop.f32.mrb[61].mxu1  ;;  %2126 = vst.msk [vmem:[%s3905_s12 + $0xe4] sm:$0xf] %vm2068_vm3, %v3028_v42  ;;  %v1158_v51 = vadd.f32 %v4207_v45, %v1157_v49  ;;  %v3232_v53 = vpop.f32.mrb[62].mxu0 }
 0x1a1   : > { %2190 = vst.msk [vmem:[%s3905_s12 + $0x1e4] sm:$0xf] %vm2068_vm3, %v3092_v43  ;;  %v1414_v52 = vadd.f32 %v4207_v45, %v1413_v50  ;;  %v3296_v54 = vpop.f32.mrb[62].mxu1  ;;  %v1490_v55 = vmax.f32 %v1166_v47, 0.0  ;;  %v1169_v57 = vadd.f32 %v4207_v45, %v3232_v53  ;;  %v1160_v59 = vpop.f32.mrb[63].mxu0 }
 0x1a2   : > { %v1554_v56 = vmax.f32 %v1422_v48, 0.0  ;;  %v1425_v58 = vadd.f32 %v4207_v45, %v3296_v54  ;;  %v1416_v60 = vpop.f32.mrb[63].mxu1  ;;  %v1488_v61 = vmax.f32 %v1158_v51, 0.0  ;;  %v1161_v63 = vadd.f32 %v4207_v45, %v1160_v59 }
 0x1a3   : > { %v1552_v62 = vmax.f32 %v1414_v52, 0.0  ;;  %v1417_v0 = vadd.f32 %v4207_v45, %v1416_v60  ;;  %v3033_v1 = vpack.c.bf16 %v1490_v55, %v1490_v55  ;;  %v1491_v3 = vmax.f32 %v1169_v57, 0.0  ;;  %2203 = sbr.rel (!%p4498_p12) target bundleno = 517 (0x205), region = 44 }
 0x1a4   : > { %v3097_v2 = vpack.c.bf16 %v1554_v56, %v1554_v56  ;;  %v1555_v4 = vmax.f32 %v1425_v58, 0.0  ;;  %v3031_v6 = vpack.c.bf16 %v1488_v61, %v1488_v61  ;;  %v1489_v8 = vmax.f32 %v1161_v63, 0.0 }
 0x1a5   : > { %v3095_v7 = vpack.c.bf16 %v1552_v62, %v1552_v62  ;;  %v1553_v9 = vmax.f32 %v1417_v0, 0.0  ;;  %2131 = vst.msk [vmem:[%s3905_s12 + $0xf8] sm:$0xf] %vm2068_vm3, %v3033_v1  ;;  %v3034_v10 = vpack.c.bf16 %v1491_v3, %v1491_v3 }
 0x1a6   : > { %2195 = vst.msk [vmem:[%s3905_s12 + $0x1f8] sm:$0xf] %vm2068_vm3, %v3097_v2  ;;  %v3098_v11 = vpack.c.bf16 %v1555_v4, %v1555_v4  ;;  %2129 = vst.msk [vmem:[%s3905_s12 + $0xf0] sm:$0xf] %vm2068_vm3, %v3031_v6  ;;  %v3032_v45 = vpack.c.bf16 %v1489_v8, %v1489_v8 }
 0x1a7   : > { %2193 = vst.msk [vmem:[%s3905_s12 + $0x1f0] sm:$0xf] %vm2068_vm3, %v3095_v7  ;;  %v3096_v12 = vpack.c.bf16 %v1553_v9, %v1553_v9  ;;  %2132 = vst.msk [vmem:[%s3905_s12 + $0xfc] sm:$0xf] %vm2068_vm3, %v3034_v10 }
 0x1a8   : > { %2196 = vst.msk [vmem:[%s3905_s12 + $0x1fc] sm:$0xf] %vm2068_vm3, %v3098_v11  ;;  %2130 = vst.msk [vmem:[%s3905_s12 + $0xf4] sm:$0xf] %vm2068_vm3, %v3032_v45 }
 0x1a9   : > { %2194 = vst.msk [vmem:[%s3905_s12 + $0x1f4] sm:$0xf] %vm2068_vm3, %v3096_v12 }
 0x1aa   : > { %s4506_s10 = smov (!%p2206_p13, %s2205_s10), 128 }
 0x1ab   : > { %s2956_s22 = sshll.u32 %s4506_s10, 6 }
 0x1ac   : > { %p2959_p0 = scmp.eq.s32.totalorder %s2956_s22, 0 }
 0x1ad   : > { %s4298_s25 = sshrl.u32 (!%p2959_p0), %s4506_s10, 6 }
 0x1ae   : > { %2214 = sbr.rel (%p2959_p0) target bundleno = 517 (0x205), region = 48  ;;  %p2960_p1 = scmp.le.s32.totalorder (!%p2959_p0), %s4298_s25, 0 }
 0x1b5   : > { %2623 = sbr.rel (%p2960_p1) target bundleno = 496 (0x1f0), region = 121  ;;  %s4499_s15 = smov (!%p2960_p1), %s4292_s18 }
 0x1b6   : > { %s4500_s20 = smov (!%p2960_p1), %s3905_s12  ;;  %s4307_s27 = smov (!%p2960_p1), 0  }
 0x1b7   : > { %s4309_s28 = smov (!%p2960_p1), 0  }
 0x1bc LB: >> { %v2230_v13 = vld [vmem:[%s3603_s20] sm:$0xf]  ;;  %v2232_v14 = vld [vmem:[%s3603_s20 + $0x4] sm:$0xf]  ;;  %v2234_v15 = vld [vmem:[%s3603_s20 + $0x8] sm:$0xf]  ;;  %s3611_s28 = sphi %s4309_s28, %s2224_s28   ;;  %s3607_s27 = sphi %s4307_s27, %s4501_s27   ;;  %s3603_s20 = sphi %s4500_s20, %s2363_s20   ;;  %s3599_s15 = sphi %s4499_s15, %s2364_s15  }
 0x1bd   : >> { %2231 = vst [vmem:[%s3599_s15] sm:$0xf] %v2230_v13  ;;  %2233 = vst [vmem:[%s3599_s15 + $0x4] sm:$0xf] %v2232_v14  ;;  %v2236_v16 = vld [vmem:[%s3603_s20 + $0xc] sm:$0xf]  ;;  %s2358_s23 = sadd.s32 1, %s3607_s27 }
 0x1be   : >> { %2235 = vst [vmem:[%s3599_s15 + $0x8] sm:$0xf] %v2234_v15  ;;  %v2238_v17 = vld [vmem:[%s3603_s20 + $0x10] sm:$0xf]  ;;  %v2240_v18 = vld [vmem:[%s3603_s20 + $0x14] sm:$0xf]  ;;  %p2359_p2 = scmp.ge.s32.totalorder %s2358_s23, %s4298_s25 }
 0x1bf   : >> { %2237 = vst [vmem:[%s3599_s15 + $0xc] sm:$0xf] %v2236_v16  ;;  %2239 = vst [vmem:[%s3599_s15 + $0x10] sm:$0xf] %v2238_v17  ;;  %v2242_v19 = vld [vmem:[%s3603_s20 + $0x18] sm:$0xf] }
 0x1c0   : >> { %2241 = vst [vmem:[%s3599_s15 + $0x14] sm:$0xf] %v2240_v18  ;;  %v2244_v20 = vld [vmem:[%s3603_s20 + $0x1c] sm:$0xf]  ;;  %v2246_v21 = vld [vmem:[%s3603_s20 + $0x20] sm:$0xf] }
 0x1c1   : >> { %2243 = vst [vmem:[%s3599_s15 + $0x18] sm:$0xf] %v2242_v19  ;;  %2245 = vst [vmem:[%s3599_s15 + $0x1c] sm:$0xf] %v2244_v20  ;;  %v2248_v22 = vld [vmem:[%s3603_s20 + $0x24] sm:$0xf] }
 0x1c2   : >> { %2247 = vst [vmem:[%s3599_s15 + $0x20] sm:$0xf] %v2246_v21  ;;  %v2250_v23 = vld [vmem:[%s3603_s20 + $0x28] sm:$0xf]  ;;  %v2252_v24 = vld [vmem:[%s3603_s20 + $0x2c] sm:$0xf] }
 0x1c3   : >> { %2249 = vst [vmem:[%s3599_s15 + $0x24] sm:$0xf] %v2248_v22  ;;  %2251 = vst [vmem:[%s3599_s15 + $0x28] sm:$0xf] %v2250_v23  ;;  %v2254_v25 = vld [vmem:[%s3603_s20 + $0x30] sm:$0xf] }
 0x1c4   : >> { %2253 = vst [vmem:[%s3599_s15 + $0x2c] sm:$0xf] %v2252_v24  ;;  %v2256_v26 = vld [vmem:[%s3603_s20 + $0x34] sm:$0xf]  ;;  %v2258_v27 = vld [vmem:[%s3603_s20 + $0x38] sm:$0xf] }
 0x1c5   : >> { %2255 = vst [vmem:[%s3599_s15 + $0x30] sm:$0xf] %v2254_v25  ;;  %2257 = vst [vmem:[%s3599_s15 + $0x34] sm:$0xf] %v2256_v26  ;;  %v2260_v28 = vld [vmem:[%s3603_s20 + $0x3c] sm:$0xf] }
 0x1c6   : >> { %2259 = vst [vmem:[%s3599_s15 + $0x38] sm:$0xf] %v2258_v27  ;;  %v2262_v29 = vld [vmem:[%s3603_s20 + $0x40] sm:$0xf]  ;;  %v2264_v30 = vld [vmem:[%s3603_s20 + $0x44] sm:$0xf] }
 0x1c7   : >> { %2261 = vst [vmem:[%s3599_s15 + $0x3c] sm:$0xf] %v2260_v28  ;;  %2263 = vst [vmem:[%s3599_s15 + $0x40] sm:$0xf] %v2262_v29  ;;  %v2266_v31 = vld [vmem:[%s3603_s20 + $0x48] sm:$0xf] }
 0x1c8   : >> { %2265 = vst [vmem:[%s3599_s15 + $0x44] sm:$0xf] %v2264_v30  ;;  %v2268_v32 = vld [vmem:[%s3603_s20 + $0x4c] sm:$0xf]  ;;  %v2270_v33 = vld [vmem:[%s3603_s20 + $0x50] sm:$0xf] }
 0x1c9   : >> { %2267 = vst [vmem:[%s3599_s15 + $0x48] sm:$0xf] %v2266_v31  ;;  %2269 = vst [vmem:[%s3599_s15 + $0x4c] sm:$0xf] %v2268_v32  ;;  %v2272_v34 = vld [vmem:[%s3603_s20 + $0x54] sm:$0xf] }
 0x1ca   : >> { %2271 = vst [vmem:[%s3599_s15 + $0x50] sm:$0xf] %v2270_v33  ;;  %v2274_v35 = vld [vmem:[%s3603_s20 + $0x58] sm:$0xf]  ;;  %v2276_v36 = vld [vmem:[%s3603_s20 + $0x5c] sm:$0xf] }
 0x1cb   : >> { %2273 = vst [vmem:[%s3599_s15 + $0x54] sm:$0xf] %v2272_v34  ;;  %2275 = vst [vmem:[%s3599_s15 + $0x58] sm:$0xf] %v2274_v35  ;;  %v2278_v37 = vld [vmem:[%s3603_s20 + $0x60] sm:$0xf] }
 0x1cc   : >> { %2277 = vst [vmem:[%s3599_s15 + $0x5c] sm:$0xf] %v2276_v36  ;;  %v2280_v38 = vld [vmem:[%s3603_s20 + $0x64] sm:$0xf]  ;;  %v2282_v39 = vld [vmem:[%s3603_s20 + $0x68] sm:$0xf] }
 0x1cd   : >> { %2279 = vst [vmem:[%s3599_s15 + $0x60] sm:$0xf] %v2278_v37  ;;  %2281 = vst [vmem:[%s3599_s15 + $0x64] sm:$0xf] %v2280_v38  ;;  %v2284_v40 = vld [vmem:[%s3603_s20 + $0x6c] sm:$0xf] }
 0x1ce   : >> { %2283 = vst [vmem:[%s3599_s15 + $0x68] sm:$0xf] %v2282_v39  ;;  %v2286_v41 = vld [vmem:[%s3603_s20 + $0x70] sm:$0xf]  ;;  %v2288_v5 = vld [vmem:[%s3603_s20 + $0x74] sm:$0xf] }
 0x1cf   : >> { %2285 = vst [vmem:[%s3599_s15 + $0x6c] sm:$0xf] %v2284_v40  ;;  %2287 = vst [vmem:[%s3599_s15 + $0x70] sm:$0xf] %v2286_v41  ;;  %v2290_v42 = vld [vmem:[%s3603_s20 + $0x78] sm:$0xf] }
 0x1d0   : >> { %2289 = vst [vmem:[%s3599_s15 + $0x74] sm:$0xf] %v2288_v5  ;;  %v2292_v43 = vld [vmem:[%s3603_s20 + $0x7c] sm:$0xf]  ;;  %v2294_v44 = vld [vmem:[%s3603_s20 + $0x80] sm:$0xf] }
 0x1d1   : >> { %2291 = vst [vmem:[%s3599_s15 + $0x78] sm:$0xf] %v2290_v42  ;;  %2293 = vst [vmem:[%s3599_s15 + $0x7c] sm:$0xf] %v2292_v43  ;;  %v2296_v46 = vld [vmem:[%s3603_s20 + $0x84] sm:$0xf] }
 0x1d2   : >> { %2295 = vst [vmem:[%s3599_s15 + $0x80] sm:$0xf] %v2294_v44  ;;  %v2298_v47 = vld [vmem:[%s3603_s20 + $0x88] sm:$0xf]  ;;  %v2300_v48 = vld [vmem:[%s3603_s20 + $0x8c] sm:$0xf] }
 0x1d3   : >> { %2297 = vst [vmem:[%s3599_s15 + $0x84] sm:$0xf] %v2296_v46  ;;  %2299 = vst [vmem:[%s3599_s15 + $0x88] sm:$0xf] %v2298_v47  ;;  %v2302_v49 = vld [vmem:[%s3603_s20 + $0x90] sm:$0xf] }
 0x1d4   : >> { %2301 = vst [vmem:[%s3599_s15 + $0x8c] sm:$0xf] %v2300_v48  ;;  %v2304_v50 = vld [vmem:[%s3603_s20 + $0x94] sm:$0xf]  ;;  %v2306_v51 = vld [vmem:[%s3603_s20 + $0x98] sm:$0xf] }
 0x1d5   : >> { %2303 = vst [vmem:[%s3599_s15 + $0x90] sm:$0xf] %v2302_v49  ;;  %2305 = vst [vmem:[%s3599_s15 + $0x94] sm:$0xf] %v2304_v50  ;;  %v2308_v52 = vld [vmem:[%s3603_s20 + $0x9c] sm:$0xf] }
 0x1d6   : >> { %2307 = vst [vmem:[%s3599_s15 + $0x98] sm:$0xf] %v2306_v51  ;;  %v2310_v53 = vld [vmem:[%s3603_s20 + $0xa0] sm:$0xf]  ;;  %v2312_v54 = vld [vmem:[%s3603_s20 + $0xa4] sm:$0xf] }
 0x1d7   : >> { %2309 = vst [vmem:[%s3599_s15 + $0x9c] sm:$0xf] %v2308_v52  ;;  %2311 = vst [vmem:[%s3599_s15 + $0xa0] sm:$0xf] %v2310_v53  ;;  %v2314_v55 = vld [vmem:[%s3603_s20 + $0xa8] sm:$0xf] }
 0x1d8   : >> { %2313 = vst [vmem:[%s3599_s15 + $0xa4] sm:$0xf] %v2312_v54  ;;  %v2316_v56 = vld [vmem:[%s3603_s20 + $0xac] sm:$0xf]  ;;  %v2318_v57 = vld [vmem:[%s3603_s20 + $0xb0] sm:$0xf] }
 0x1d9   : >> { %2315 = vst [vmem:[%s3599_s15 + $0xa8] sm:$0xf] %v2314_v55  ;;  %2317 = vst [vmem:[%s3599_s15 + $0xac] sm:$0xf] %v2316_v56  ;;  %v2320_v58 = vld [vmem:[%s3603_s20 + $0xb4] sm:$0xf] }
 0x1da   : >> { %2319 = vst [vmem:[%s3599_s15 + $0xb0] sm:$0xf] %v2318_v57  ;;  %v2322_v59 = vld [vmem:[%s3603_s20 + $0xb8] sm:$0xf]  ;;  %v2324_v60 = vld [vmem:[%s3603_s20 + $0xbc] sm:$0xf] }
 0x1db   : >> { %2321 = vst [vmem:[%s3599_s15 + $0xb4] sm:$0xf] %v2320_v58  ;;  %2323 = vst [vmem:[%s3599_s15 + $0xb8] sm:$0xf] %v2322_v59  ;;  %v2326_v61 = vld [vmem:[%s3603_s20 + $0xc0] sm:$0xf] }
 0x1dc   : >> { %2325 = vst [vmem:[%s3599_s15 + $0xbc] sm:$0xf] %v2324_v60  ;;  %v2328_v62 = vld [vmem:[%s3603_s20 + $0xc4] sm:$0xf]  ;;  %v2330_v63 = vld [vmem:[%s3603_s20 + $0xc8] sm:$0xf] }
 0x1dd   : >> { %2327 = vst [vmem:[%s3599_s15 + $0xc0] sm:$0xf] %v2326_v61  ;;  %2329 = vst [vmem:[%s3599_s15 + $0xc4] sm:$0xf] %v2328_v62  ;;  %v2332_v0 = vld [vmem:[%s3603_s20 + $0xcc] sm:$0xf] }
 0x1de   : >> { %2331 = vst [vmem:[%s3599_s15 + $0xc8] sm:$0xf] %v2330_v63  ;;  %v2334_v1 = vld [vmem:[%s3603_s20 + $0xd0] sm:$0xf]  ;;  %v2336_v2 = vld [vmem:[%s3603_s20 + $0xd4] sm:$0xf] }
 0x1df   : >> { %2333 = vst [vmem:[%s3599_s15 + $0xcc] sm:$0xf] %v2332_v0  ;;  %2335 = vst [vmem:[%s3599_s15 + $0xd0] sm:$0xf] %v2334_v1  ;;  %v2338_v3 = vld [vmem:[%s3603_s20 + $0xd8] sm:$0xf] }
 0x1e0   : >> { %2337 = vst [vmem:[%s3599_s15 + $0xd4] sm:$0xf] %v2336_v2  ;;  %v2340_v4 = vld [vmem:[%s3603_s20 + $0xdc] sm:$0xf]  ;;  %v2342_v6 = vld [vmem:[%s3603_s20 + $0xe0] sm:$0xf] }
 0x1e1   : >> { %2339 = vst [vmem:[%s3599_s15 + $0xd8] sm:$0xf] %v2338_v3  ;;  %2341 = vst [vmem:[%s3599_s15 + $0xdc] sm:$0xf] %v2340_v4  ;;  %v2344_v7 = vld [vmem:[%s3603_s20 + $0xe4] sm:$0xf] }
 0x1e2   : >> { %2343 = vst [vmem:[%s3599_s15 + $0xe0] sm:$0xf] %v2342_v6  ;;  %v2346_v8 = vld [vmem:[%s3603_s20 + $0xe8] sm:$0xf]  ;;  %v2348_v9 = vld [vmem:[%s3603_s20 + $0xec] sm:$0xf] }
 0x1e3   : >> { %2345 = vst [vmem:[%s3599_s15 + $0xe4] sm:$0xf] %v2344_v7  ;;  %2347 = vst [vmem:[%s3599_s15 + $0xe8] sm:$0xf] %v2346_v8  ;;  %v2350_v10 = vld [vmem:[%s3603_s20 + $0xf0] sm:$0xf] }
 0x1e4   : >> { %2349 = vst [vmem:[%s3599_s15 + $0xec] sm:$0xf] %v2348_v9  ;;  %v2352_v11 = vld [vmem:[%s3603_s20 + $0xf4] sm:$0xf]  ;;  %v2354_v45 = vld [vmem:[%s3603_s20 + $0xf8] sm:$0xf] }
 0x1e5   : >> { %2351 = vst [vmem:[%s3599_s15 + $0xf0] sm:$0xf] %v2350_v10  ;;  %2353 = vst [vmem:[%s3599_s15 + $0xf4] sm:$0xf] %v2352_v11  ;;  %v2356_v12 = vld [vmem:[%s3603_s20 + $0xfc] sm:$0xf] }
 0x1e6   : >> { %2355 = vst [vmem:[%s3599_s15 + $0xf8] sm:$0xf] %v2354_v45  ;;  %2357 = vst [vmem:[%s3599_s15 + $0xfc] sm:$0xf] %v2356_v12  ;;  %s4508_s23 = smov (%p2359_p2, %s2358_s23), 0  ;;  %s2224_s28 = sadd.s32 1, %s3611_s28  }
 0x1e7   : >> { %s2961_s29 = sshll.u32 %s4508_s23, 8  ;;  %p2223_p3 = scmp.ge.s32.totalorder %s2224_s28, %s4298_s25 }
 0x1e8   : >> { %s2363_s20 = scalar_lea.vmem %s3905_s12, %s2961_s29 [#allocation6]   ;;  %s2364_s15 = scalar_lea.vmem %s4292_s18, %s2961_s29  }
 0x1e9   : >> { %s4501_s27 = smov %s4508_s23  ;;  %2226 = sbr.rel (!%p2223_p3) target bundleno = 444 (0x1bc), region = 127 }
 0x1f0 PF: > { %s4466_s30 = sand.u32 63, %s4506_s10   ;;  %s3100_s4 = sshll.u32 %s4298_s25, 8 }
 0x1f1   : > { %s2369_s24 = scalar_lea.vmem %s3905_s12, %s3100_s4 [#allocation6]   ;;  %s2371_s21 = scalar_lea.vmem %s4292_s18, %s3100_s4  }
 0x1f2   : > { %p2966_p5 = scmp.le.s32.totalorder %s4466_s30, 0 }
 0x1f3   : > { %s3613_s26 = smov (!%p2966_p5), %s2371_s21   ;;  %s3617_s5 = smov (!%p2966_p5), %s2369_s24  }
 0x1f4   : > { %2637 = sbr.rel (%p2966_p5) target bundleno = 517 (0x205), region = 132  ;;  %s3621_s6 = smov (!%p2966_p5), 0  }
 0x1f5   : > { %s3625_s7 = smov (!%p2966_p5), 0  }
 0x1fb LB: >> { %v2381_v13 = vld [vmem:[%s3619_s5] sm:$0xf]  ;;  %s2383_s8 = sadd.s32 1, %s3623_s6  ;;  %s2375_s7 = sadd.s32 1, %s3627_s7   ;;  %s3627_s7 = sphi %s3625_s7, %s2375_s7   ;;  %s3623_s6 = sphi %s3621_s6, %s3622_s6   ;;  %s3619_s5 = sphi %s3617_s5, %s2388_s5   ;;  %s3615_s26 = sphi %s3613_s26, %s2389_s26  }
 0x1fc   : >> { %2382 = vst [vmem:[%s3615_s26] sm:$0xf] %v2381_v13  ;;  %p2384_p8 = scmp.ge.s32.totalorder %s2383_s8, %s4466_s30  ;;  %p2374_p10 = scmp.ge.s32.totalorder %s2375_s7, %s4466_s30 }
 0x1fe   : >> { %s4510_s8 = smov (%p2384_p8, %s2383_s8), 0  ;;  %2377 = sbr.rel (!%p2374_p10) target bundleno = 507 (0x1fb), region = 138 }
 0x1ff   : >> { %s2967_s9 = sshll.u32 %s4510_s8, 2  ;;  %s3622_s6 = smov %s4510_s8  }
 0x200   : >> { %s2388_s5 = scalar_lea.vmem %s2369_s24, %s2967_s9 [#allocation6]   ;;  %s2389_s26 = scalar_lea.vmem %s2371_s21, %s2967_s9  }
 0x205 PF: > { %p12_p11 = scmp.ge.s32.totalorder %s3669_s16, 4   ;;  %s4502_s12 = smov %s3591_s13 }
 0x206   : > { %s4503_s13 = smov %s3677_s19  ;;  %s4504_s14 = smov %s3669_s16 }
 0x207   :  { %14 = sbr.rel (!%p12_p11) target bundleno = 3 (0x3), region = 149 }
 0x20e   :  { %2576 = vsyncpa [#allocation3], 1 }
 0x20f   :  { %2578 = vsyncpa [#allocation3 + $0x1], 1 }
 0x210   :  { %2579 = vsyncpa [#allocation5], 1 }

// kernel: net_forward.5
= control target key start
LH: loop header
LB: loop body
LE: loop exit
PB: predicated region body
PF: predicated region fallthrough
CT: control target
= control target key end

     0   :  { %s5348_s12 = smov 0   ;;  %s5350_s13 = smov 0   ;;  %s6640_s0 = inlined_call_operand.vmem [shape: bf16[1152,288], index: 0, kind: input, shape index: {}]   ;;  %s6641_s1 = inlined_call_operand.vmem [shape: bf16[288,64], index: 1, kind: input, shape index: {}]   ;;  %s6642_s2 = inlined_call_operand.vmem [shape: f32[1,64], index: 2, kind: input, shape index: {}]   ;;  %s6643_s3 = inlined_call_operand.vmem [shape: bf16[1152,64], index: 3, kind: output, shape index: {}]  }
   0x1   :  { %s5352_s14 = smov 0  }
   0x2 LB: > { %s5361_s15 = sadd.s32 4294967295, %s5293_s14   ;;  %s5363_s16 = sadd.s32 1, %s5293_s14   ;;  %s5293_s14 = sphi %s5352_s14, %s6690_s14   ;;  %s5289_s13 = sphi %s5350_s13, %s6689_s13   ;;  %s5285_s12 = sphi %s5348_s12, %s6688_s12  }
   0x3   : > { %s85_s17 = ssub.s32 %s5293_s14, %s5363_s16  ;;  %s88_s18 = sadd.s32 1, %s5289_s13 }
   0x4   : > { %p86_p0 = scmp.eq.s32.totalorder %s85_s17, 0  ;;  %p98_p1 = scmp.ne.s32.totalorder %s5289_s13, %s5285_s12 }
   0x5   : > { %p99_p2 = scmp.eq.s32.totalorder %s5361_s15, 1  ;;  %p4089_p3 = scmp.ge.s32.totalorder %s5293_s14, 1 }
   0x6   : > { %s5371_s19 = scalar_select %p86_p0, %s5289_s13, %s88_s18  }
   0x7   : > { %p5373_p4 = por %p99_p2, %p98_p1  ;;  %p149_p5 = scmp.lt.s32.totalorder %s5293_s14, 3 }
   0x9   : > { %p150_p6 = pnand %p4089_p3, %p149_p5 }
   0xb   : > { %153 = sbr.rel (%p150_p6) target bundleno = 773 (0x305), region = 32 }
  0x12   : > { %v4964_v0 = vld [vmem:[%s6641_s1] sm:$0xff]   ;;  %v5327_v1 = vmov 0   ;;  %s5383_s23 = sshll.u32 %s5361_s15, 7  ;;  %v4965_v2 = vld [vmem:[%s6641_s1 + $0x8] sm:$0xff]   ;;  %v4966_v3 = vld [vmem:[%s6641_s1 + $0x10] sm:$0xff]   ;;  %vm1568_vm0 = vcmask 261120  }
  0x13   : > { %1761 = vmatprep.subr.bf16.mxu0 %v5327_v1  ;;  %4842 = vmatprep.subr.bf16.mxu1 %v5327_v1  ;;  %p184_p7 = scmp.lt.s32.totalorder %s5383_s23, 143  ;;  %v4967_v4 = vld [vmem:[%s6641_s1 + $0x18] sm:$0xff]   ;;  %v4968_v5 = vld [vmem:[%s6641_s1 + $0x20] sm:$0xff]   ;;  %v4969_v7 = vld [vmem:[%s6641_s1 + $0x28] sm:$0xff]   ;;  %s175_s26 = sand.u32 1, %s5285_s12   ;;  %vm3491_vm1 = vcmask 519168  }
  0x14   : > { %1762 = vmatpush1.bf16.msra.mxu0 %v4964_v0  ;;  %4858 = vmatpush1.bf16.msra.mxu1 %v4964_v0  ;;  %v4970_v9 = vld [vmem:[%s6641_s1 + $0x30] sm:$0xff]   ;;  %v4971_v10 = vld [vmem:[%s6641_s1 + $0x38] sm:$0xff]   ;;  %v4972_v11 = vld [vmem:[%s6641_s1 + $0x40] sm:$0xff]   ;;  %s4090_s27 = sshll.u32 %s175_s26, 9  ;;  %s3628_s29 = ssub.s32 (%p5373_p4), 144, %s5383_s23 }
  0x15   : > { %1763 = vmatprep.subr.bf16.mxu0 %v5327_v1  ;;  %4843 = vmatprep.subr.bf16.mxu1 %v5327_v1  ;;  %s185_s28 = scalar_select %p184_p7, %s5383_s23, 143  ;;  %v4973_v12 = vld [vmem:[%s6641_s1 + $0x48] sm:$0xff]   ;;  %v4974_v13 = vld [vmem:[%s6641_s1 + $0x50] sm:$0xff]   ;;  %v4975_v14 = vld [vmem:[%s6641_s1 + $0x58] sm:$0xff]  }
  0x16   : > { %v4976_v15 = vld [vmem:[%s6641_s1 + $0x60] sm:$0xff]   ;;  %v4977_v16 = vld [vmem:[%s6641_s1 + $0x68] sm:$0xff]   ;;  %v4978_v17 = vld [vmem:[%s6641_s1 + $0x70] sm:$0xff]   ;;  %s5856_s12 = scalar_lea.vmem [#allocation2], %s4090_s27   ;;  %s4641_s30 = sshll.u32 (%p5373_p4), %s5361_s15, 9 }
  0x17   : > { %s4874_s4 = smul.u32 12, %s185_s28  ;;  %v4979_v18 = vld [vmem:[%s6641_s1 + $0x78] sm:$0xff]   ;;  %v4986_v19 = vld [vmem:[%s6641_s1 + $0x80] sm:$0xff]   ;;  %v5035_v24 = vld [vmem:[%s6641_s1 + $0x88] sm:$0xff]   ;;  %p3629_p8 = scmp.lt.s32.totalorder (%p5373_p4), %s3628_s29, 128 }
  0x18   : > { %1764 = vmatpush1.bf16.msra.mxu0 %v4965_v2  ;;  %4859 = vmatpush1.bf16.msra.mxu1 %v4965_v2  ;;  %s6448_s6 = scalar_lea.vmem (%p5373_p4), %s6643_s3, %s4641_s30  }
  0x19   : > { %1765 = vmatprep.subr.bf16.mxu0 %v5327_v1  ;;  %4844 = vmatprep.subr.bf16.mxu1 %v5327_v1  ;;  %s5408_s9 = scalar_lea.vmem %s6640_s0, %s4874_s4 }
  0x1a   : > { %v4982_v6 = vld [vmem:[%s5408_s9 + $0x4] ss:$12 sps:$4 sm:$0xff]   ;;  %v4980_v20 = vld [vmem:[%s5408_s9] ss:$12 sps:$4 sm:$0xff]   ;;  %v4987_v22 = vld [vmem:[%s5408_s9 + $0x1c] ss:$12 sps:$4 sm:$0xff]  }
  0x1b   : > { %v4985_v8 = vld [vmem:[%s5408_s9 + $0x484] ss:$12 sps:$4 sm:$0xff]   ;;  %1793 = vmatprep.mubr.bf16.mxu0 %v4982_v6  ;;  %v4983_v21 = vld [vmem:[%s5408_s9 + $0x480] ss:$12 sps:$4 sm:$0xff]   ;;  %v4989_v23 = vld [vmem:[%s5408_s9 + $0x49c] ss:$12 sps:$4 sm:$0xff]  }
  0x1c   : > { %1766 = vmatpush1.bf16.msra.mxu0 %v4966_v3  ;;  %4860 = vmatpush1.bf16.msra.mxu1 %v4966_v3  ;;  %v4991_v25 = vld [vmem:[%s5408_s9 + $0x18] ss:$12 sps:$4 sm:$0xff]   ;;  %v4993_v27 = vld [vmem:[%s5408_s9 + $0x34] ss:$12 sps:$4 sm:$0xff]   ;;  %v4997_v29 = vld [vmem:[%s5408_s9 + $0x30] ss:$12 sps:$4 sm:$0xff]  }
  0x1d   : > { %1767 = vmatprep.subr.bf16.mxu0 %v5327_v1  ;;  %4845 = vmatprep.subr.bf16.mxu1 %v5327_v1  ;;  %v4992_v26 = vld [vmem:[%s5408_s9 + $0x498] ss:$12 sps:$4 sm:$0xff]   ;;  %v4995_v28 = vld [vmem:[%s5408_s9 + $0x4b4] ss:$12 sps:$4 sm:$0xff]   ;;  %v4998_v30 = vld [vmem:[%s5408_s9 + $0x4b0] ss:$12 sps:$4 sm:$0xff]  }
  0x1e   : > { %2177 = vmatprep.mubr.bf16.mxu1 %v4985_v8  ;;  %v4999_v31 = vld [vmem:[%s5408_s9 + $0x4c] ss:$12 sps:$4 sm:$0xff]   ;;  %v5003_v33 = vld [vmem:[%s5408_s9 + $0x48] ss:$12 sps:$4 sm:$0xff]   ;;  %v5005_v35 = vld [vmem:[%s5408_s9 + $0x64] ss:$12 sps:$4 sm:$0xff]  }
  0x1f   : > { %v5001_v32 = vld [vmem:[%s5408_s9 + $0x4cc] ss:$12 sps:$4 sm:$0xff]   ;;  %v5004_v34 = vld [vmem:[%s5408_s9 + $0x4c8] ss:$12 sps:$4 sm:$0xff]   ;;  %v5007_v36 = vld [vmem:[%s5408_s9 + $0x4e4] ss:$12 sps:$4 sm:$0xff]  }
  0x20   : > { %1768 = vmatpush1.bf16.msra.mxu0 %v4967_v4  ;;  %4861 = vmatpush1.bf16.msra.mxu1 %v4967_v4  ;;  %v5009_v37 = vld [vmem:[%s5408_s9 + $0x60] ss:$12 sps:$4 sm:$0xff]   ;;  %v5011_v39 = vld [vmem:[%s5408_s9 + $0x7c] ss:$12 sps:$4 sm:$0xff]   ;;  %v5015_v41 = vld [vmem:[%s5408_s9 + $0x78] ss:$12 sps:$4 sm:$0xff]  }
  0x21   : > { %1769 = vmatprep.subr.bf16.mxu0 %v5327_v1  ;;  %4846 = vmatprep.subr.bf16.mxu1 %v5327_v1  ;;  %v5010_v38 = vld [vmem:[%s5408_s9 + $0x4e0] ss:$12 sps:$4 sm:$0xff]   ;;  %v5013_v40 = vld [vmem:[%s5408_s9 + $0x4fc] ss:$12 sps:$4 sm:$0xff]   ;;  %v5016_v42 = vld [vmem:[%s5408_s9 + $0x4f8] ss:$12 sps:$4 sm:$0xff]  }
  0x22   : > { %v5017_v43 = vld [vmem:[%s5408_s9 + $0x94] ss:$12 sps:$4 sm:$0xff]   ;;  %v5021_v45 = vld [vmem:[%s5408_s9 + $0x90] ss:$12 sps:$4 sm:$0xff]   ;;  %v5023_v47 = vld [vmem:[%s5408_s9 + $0xac] ss:$12 sps:$4 sm:$0xff]  }
  0x23   : > { %v5019_v44 = vld [vmem:[%s5408_s9 + $0x514] ss:$12 sps:$4 sm:$0xff]   ;;  %v5022_v46 = vld [vmem:[%s5408_s9 + $0x510] ss:$12 sps:$4 sm:$0xff]   ;;  %v5025_v48 = vld [vmem:[%s5408_s9 + $0x52c] ss:$12 sps:$4 sm:$0xff]  }
  0x24   : > { %1770 = vmatpush1.bf16.msra.mxu0 %v4968_v5  ;;  %4862 = vmatpush1.bf16.msra.mxu1 %v4968_v5  ;;  %v5027_v49 = vld [vmem:[%s5408_s9 + $0xa8] ss:$12 sps:$4 sm:$0xff]   ;;  %v5029_v51 = vld [vmem:[%s5408_s9 + $0xc4] ss:$12 sps:$4 sm:$0xff]   ;;  %v5033_v53 = vld [vmem:[%s5408_s9 + $0xc0] ss:$12 sps:$4 sm:$0xff]  }
  0x25   : > { %1771 = vmatprep.subr.bf16.mxu0 %v5327_v1  ;;  %4847 = vmatprep.subr.bf16.mxu1 %v5327_v1  ;;  %v5028_v50 = vld [vmem:[%s5408_s9 + $0x528] ss:$12 sps:$4 sm:$0xff]   ;;  %v5031_v52 = vld [vmem:[%s5408_s9 + $0x544] ss:$12 sps:$4 sm:$0xff]   ;;  %v5034_v54 = vld [vmem:[%s5408_s9 + $0x540] ss:$12 sps:$4 sm:$0xff]  }
  0x26   : > { %v5036_v55 = vld [vmem:[%s5408_s9 + $0xdc] ss:$12 sps:$4 sm:$0xff]   ;;  %v5040_v57 = vld [vmem:[%s5408_s9 + $0xd8] ss:$12 sps:$4 sm:$0xff]   ;;  %v5042_v59 = vld [vmem:[%s5408_s9 + $0xf4] ss:$12 sps:$4 sm:$0xff]  }
  0x27   : > { %v5038_v56 = vld [vmem:[%s5408_s9 + $0x55c] ss:$12 sps:$4 sm:$0xff]   ;;  %v5041_v58 = vld [vmem:[%s5408_s9 + $0x558] ss:$12 sps:$4 sm:$0xff]   ;;  %v5044_v60 = vld [vmem:[%s5408_s9 + $0x574] ss:$12 sps:$4 sm:$0xff]  }
  0x28   : > { %1772 = vmatpush1.bf16.msra.mxu0 %v4969_v7  ;;  %4863 = vmatpush1.bf16.msra.mxu1 %v4969_v7  ;;  %v5046_v61 = vld [vmem:[%s5408_s9 + $0xf0] ss:$12 sps:$4 sm:$0xff]   ;;  %v5048_v63 = vld [vmem:[%s5408_s9 + $0x10c] ss:$12 sps:$4 sm:$0xff]   ;;  %v5053_v2 = vld [vmem:[%s5408_s9 + $0x588] ss:$12 sps:$4 sm:$0xff]  }
  0x29   : > { %1773 = vmatprep.subr.bf16.mxu0 %v5327_v1  ;;  %4848 = vmatprep.subr.bf16.mxu1 %v5327_v1  ;;  %v5047_v62 = vld [vmem:[%s5408_s9 + $0x570] ss:$12 sps:$4 sm:$0xff]   ;;  %v5050_v0 = vld [vmem:[%s5408_s9 + $0x58c] ss:$12 sps:$4 sm:$0xff]  }
  0x2a   : > { %v5054_v3 = vld [vmem:[%s5408_s9 + $0x124] ss:$12 sps:$4 sm:$0xff]   ;;  %v5058_v5 = vld [vmem:[%s5408_s9 + $0x120] ss:$12 sps:$4 sm:$0xff]   ;;  %v5060_v7 = vld [vmem:[%s5408_s9 + $0x13c] ss:$12 sps:$4 sm:$0xff]  }
  0x2b   : > { %v5056_v4 = vld [vmem:[%s5408_s9 + $0x5a4] ss:$12 sps:$4 sm:$0xff]   ;;  %v5059_v6 = vld [vmem:[%s5408_s9 + $0x5a0] ss:$12 sps:$4 sm:$0xff]   ;;  %v5062_v8 = vld [vmem:[%s5408_s9 + $0x5bc] ss:$12 sps:$4 sm:$0xff]  }
  0x2c   : > { %1774 = vmatpush1.bf16.msra.mxu0 %v4970_v9  ;;  %4864 = vmatpush1.bf16.msra.mxu1 %v4970_v9  ;;  %v5064_v9 = vld [vmem:[%s5408_s9 + $0x138] ss:$12 sps:$4 sm:$0xff]  }
  0x2d   : > { %1775 = vmatprep.subr.bf16.mxu0 %v5327_v1  ;;  %4849 = vmatprep.subr.bf16.mxu1 %v5327_v1 }
  0x30   : > { %1776 = vmatpush1.bf16.msra.mxu0 %v4971_v10  ;;  %4865 = vmatpush1.bf16.msra.mxu1 %v4971_v10  ;;  %v5065_v10 = vld [vmem:[%s5408_s9 + $0x5b8] ss:$12 sps:$4 sm:$0xff]  }
  0x31   : > { %1777 = vmatprep.subr.bf16.mxu0 %v5327_v1  ;;  %4850 = vmatprep.subr.bf16.mxu1 %v5327_v1 }
  0x34   : > { %1778 = vmatpush1.bf16.msra.mxu0 %v4972_v11  ;;  %4866 = vmatpush1.bf16.msra.mxu1 %v4972_v11  ;;  %v5066_v11 = vld [vmem:[%s5408_s9 + $0x154] ss:$12 sps:$4 sm:$0xff]  }
  0x35   : > { %1779 = vmatprep.subr.bf16.mxu0 %v5327_v1  ;;  %4851 = vmatprep.subr.bf16.mxu1 %v5327_v1 }
  0x38   : > { %1780 = vmatpush1.bf16.msra.mxu0 %v4973_v12  ;;  %4867 = vmatpush1.bf16.msra.mxu1 %v4973_v12  ;;  %v5068_v12 = vld [vmem:[%s5408_s9 + $0x5d4] ss:$12 sps:$4 sm:$0xff]  }
  0x39   : > { %1781 = vmatprep.subr.bf16.mxu0 %v5327_v1  ;;  %4852 = vmatprep.subr.bf16.mxu1 %v5327_v1 }
  0x3c   : > { %1782 = vmatpush1.bf16.msra.mxu0 %v4974_v13  ;;  %4868 = vmatpush1.bf16.msra.mxu1 %v4974_v13  ;;  %v5070_v13 = vld [vmem:[%s5408_s9 + $0x150] ss:$12 sps:$4 sm:$0xff]  }
  0x3d   : > { %1783 = vmatprep.subr.bf16.mxu0 %v5327_v1  ;;  %4853 = vmatprep.subr.bf16.mxu1 %v5327_v1 }
  0x40   : > { %1784 = vmatpush1.bf16.msra.mxu0 %v4975_v14  ;;  %4869 = vmatpush1.bf16.msra.mxu1 %v4975_v14  ;;  %v5071_v14 = vld [vmem:[%s5408_s9 + $0x5d0] ss:$12 sps:$4 sm:$0xff]  }
  0x41   : > { %1785 = vmatprep.subr.bf16.mxu0 %v5327_v1  ;;  %4854 = vmatprep.subr.bf16.mxu1 %v5327_v1 }
  0x44   : > { %1786 = vmatpush1.bf16.msra.mxu0 %v4976_v15  ;;  %4870 = vmatpush1.bf16.msra.mxu1 %v4976_v15  ;;  %v5072_v15 = vld [vmem:[%s5408_s9 + $0x16c] ss:$12 sps:$4 sm:$0xff]  }
  0x45   : > { %1787 = vmatprep.subr.bf16.mxu0 %v5327_v1  ;;  %4855 = vmatprep.subr.bf16.mxu1 %v5327_v1 }
  0x48   : > { %1788 = vmatpush1.bf16.msra.mxu0 %v4977_v16  ;;  %4871 = vmatpush1.bf16.msra.mxu1 %v4977_v16  ;;  %v5074_v16 = vld [vmem:[%s5408_s9 + $0x5ec] ss:$12 sps:$4 sm:$0xff]  }
  0x49   : > { %1789 = vmatprep.subr.bf16.mxu0 %v5327_v1  ;;  %4856 = vmatprep.subr.bf16.mxu1 %v5327_v1 }
  0x4c   : > { %1790 = vmatpush1.bf16.msra.mxu0 %v4978_v17  ;;  %4872 = vmatpush1.bf16.msra.mxu1 %v4978_v17  ;;  %v5076_v17 = vld [vmem:[%s5408_s9 + $0x168] ss:$12 sps:$4 sm:$0xff]  }
  0x4d   : > { %1791 = vmatprep.subr.bf16.mxu0 %v5327_v1  ;;  %4857 = vmatprep.subr.bf16.mxu1 %v5327_v1  ;;  %v5052_v1 = vld [vmem:[%s5408_s9 + $0x108] ss:$12 sps:$4 sm:$0xff]  }
  0x50   : > { %1792 = vmatpush1.bf16.msra.mxu0 %v4979_v18  ;;  %4873 = vmatpush1.bf16.msra.mxu1 %v4979_v18  ;;  %v5077_v18 = vld [vmem:[%s5408_s9 + $0x5e8] ss:$12 sps:$4 sm:$0xff]  }
  0x51   : > { %4710 = vmatprep.subr.bf16.mxu1 %v4986_v19 }
  0x53   : > { %1794 = vmatmul.mubr.bf16.vlgmr.msra.gmra.mrb[0].mxu0 %v4980_v20  ;;  %2178 = vmatmul.mubr.bf16.vlgmr.msra.gmra.mrb[0].mxu1 %v4983_v21  ;;  %v5080_v20 = vld [vmem:[%s5408_s9 + $0x8] ss:$12 sps:$4 sm:$0xff]   ;;  %v5081_v21 = vld [vmem:[%s5408_s9 + $0x180] ss:$12 sps:$4 sm:$0xff]  }
  0x54   : > { %4711 = vmatpush3.bf16.msra.mxu1 %v4986_v19  ;;  %1801 = vmatprep.mubr.bf16.mxu0 %v4987_v22  ;;  %v5078_v19 = vld [vmem:[%s5408_s9 + $0x184] ss:$12 sps:$4 sm:$0xff]   ;;  %v5082_v22 = vld [vmem:[%s5408_s9 + $0x20] ss:$12 sps:$4 sm:$0xff]  }
  0x55   : > { %2185 = vmatprep.mubr.bf16.mxu1 %v4989_v23  ;;  %4712 = vmatprep.subr.bf16.mxu1 %v5035_v24  ;;  %v5083_v23 = vld [vmem:[%s5408_s9 + $0x19c] ss:$12 sps:$4 sm:$0xff]  }
  0x58   : > { %4713 = vmatpush3.bf16.msra.mxu1 %v5035_v24  ;;  %v5085_v24 = vld [vmem:[%s5408_s9 + $0x38] ss:$12 sps:$4 sm:$0xff]  }
  0x5b   : > { %1802 = vmatmul.mubr.bf16.gmra.mrb[4].mxu0 %v4991_v25  ;;  %2186 = vmatmul.mubr.bf16.gmra.mrb[4].mxu1 %v4992_v26  ;;  %v5086_v25 = vld [vmem:[%s5408_s9 + $0x198] ss:$12 sps:$4 sm:$0xff]   ;;  %v5087_v26 = vld [vmem:[%s5408_s9 + $0x50] ss:$12 sps:$4 sm:$0xff]  }
  0x5c   : > { %1809 = vmatprep.mubr.bf16.mxu0 %v4993_v27  ;;  %2193 = vmatprep.mubr.bf16.mxu1 %v4995_v28  ;;  %v5088_v27 = vld [vmem:[%s5408_s9 + $0x1b4] ss:$12 sps:$4 sm:$0xff]  }
  0x5d   : > { %v5090_v28 = vld [vmem:[%s5408_s9 + $0x68] ss:$12 sps:$4 sm:$0xff]  }
  0x63   : > { %1810 = vmatmul.mubr.bf16.gmra.mrb[8].mxu0 %v4997_v29  ;;  %2194 = vmatmul.mubr.bf16.gmra.mrb[8].mxu1 %v4998_v30  ;;  %v5091_v29 = vld [vmem:[%s5408_s9 + $0x1b0] ss:$12 sps:$4 sm:$0xff]   ;;  %v5092_v30 = vld [vmem:[%s5408_s9 + $0x80] ss:$12 sps:$4 sm:$0xff]  }
  0x64   : > { %1817 = vmatprep.mubr.bf16.mxu0 %v4999_v31  ;;  %2201 = vmatprep.mubr.bf16.mxu1 %v5001_v32  ;;  %v5093_v31 = vld [vmem:[%s5408_s9 + $0x1cc] ss:$12 sps:$4 sm:$0xff]  }
  0x65   : > { %v5095_v32 = vld [vmem:[%s5408_s9 + $0x98] ss:$12 sps:$4 sm:$0xff]  }
  0x6b   : > { %1818 = vmatmul.mubr.bf16.gmra.mrb[12].mxu0 %v5003_v33  ;;  %2202 = vmatmul.mubr.bf16.gmra.mrb[12].mxu1 %v5004_v34  ;;  %v5096_v33 = vld [vmem:[%s5408_s9 + $0x1c8] ss:$12 sps:$4 sm:$0xff]   ;;  %v5097_v34 = vld [vmem:[%s5408_s9 + $0xb0] ss:$12 sps:$4 sm:$0xff]  }
  0x6c   : > { %1825 = vmatprep.mubr.bf16.mxu0 %v5005_v35  ;;  %2209 = vmatprep.mubr.bf16.mxu1 %v5007_v36  ;;  %v5098_v35 = vld [vmem:[%s5408_s9 + $0x1e4] ss:$12 sps:$4 sm:$0xff]   ;;  %v5100_v36 = vld [vmem:[%s5408_s9 + $0xc8] ss:$12 sps:$4 sm:$0xff]  }
  0x73   : > { %1826 = vmatmul.mubr.bf16.gmra.mrb[16].mxu0 %v5009_v37  ;;  %2210 = vmatmul.mubr.bf16.gmra.mrb[16].mxu1 %v5010_v38  ;;  %v5101_v37 = vld [vmem:[%s5408_s9 + $0x1e0] ss:$12 sps:$4 sm:$0xff]  }
  0x74   : > { %1833 = vmatprep.mubr.bf16.mxu0 %v5011_v39  ;;  %2217 = vmatprep.mubr.bf16.mxu1 %v5013_v40  ;;  %v5102_v38 = vld [vmem:[%s5408_s9 + $0xe0] ss:$12 sps:$4 sm:$0xff]   ;;  %v5103_v39 = vld [vmem:[%s5408_s9 + $0x1fc] ss:$12 sps:$4 sm:$0xff]   ;;  %v5105_v40 = vld [vmem:[%s5408_s9 + $0xf8] ss:$12 sps:$4 sm:$0xff]  }
  0x7b   : > { %1834 = vmatmul.mubr.bf16.gmra.mrb[20].mxu0 %v5015_v41  ;;  %2218 = vmatmul.mubr.bf16.gmra.mrb[20].mxu1 %v5016_v42  ;;  %v5106_v41 = vld [vmem:[%s5408_s9 + $0x1f8] ss:$12 sps:$4 sm:$0xff]   ;;  %v5107_v42 = vld [vmem:[%s5408_s9 + $0x110] ss:$12 sps:$4 sm:$0xff]  }
  0x7c   : > { %1841 = vmatprep.mubr.bf16.mxu0 %v5017_v43  ;;  %2225 = vmatprep.mubr.bf16.mxu1 %v5019_v44  ;;  %v5108_v43 = vld [vmem:[%s5408_s9 + $0x214] ss:$12 sps:$4 sm:$0xff]  }
  0x7d   : > { %v5110_v44 = vld [vmem:[%s5408_s9 + $0x128] ss:$12 sps:$4 sm:$0xff]  }
  0x83   : > { %1842 = vmatmul.mubr.bf16.gmra.mrb[24].mxu0 %v5021_v45  ;;  %2226 = vmatmul.mubr.bf16.gmra.mrb[24].mxu1 %v5022_v46  ;;  %v5111_v45 = vld [vmem:[%s5408_s9 + $0x210] ss:$12 sps:$4 sm:$0xff]   ;;  %v5112_v46 = vld [vmem:[%s5408_s9 + $0x140] ss:$12 sps:$4 sm:$0xff]  }
  0x84   : > { %1849 = vmatprep.mubr.bf16.mxu0 %v5023_v47  ;;  %2233 = vmatprep.mubr.bf16.mxu1 %v5025_v48  ;;  %v5113_v47 = vld [vmem:[%s5408_s9 + $0x22c] ss:$12 sps:$4 sm:$0xff]  }
  0x85   : > { %v5115_v48 = vld [vmem:[%s5408_s9 + $0x158] ss:$12 sps:$4 sm:$0xff]  }
  0x8b   : > { %1850 = vmatmul.mubr.bf16.gmra.mrb[28].mxu0 %v5027_v49  ;;  %2234 = vmatmul.mubr.bf16.gmra.mrb[28].mxu1 %v5028_v50  ;;  %v5116_v49 = vld [vmem:[%s5408_s9 + $0x228] ss:$12 sps:$4 sm:$0xff]   ;;  %v5117_v50 = vld [vmem:[%s5408_s9 + $0x170] ss:$12 sps:$4 sm:$0xff]  }
  0x8c   : > { %1857 = vmatprep.mubr.bf16.mxu0 %v5029_v51  ;;  %2241 = vmatprep.mubr.bf16.mxu1 %v5031_v52  ;;  %v5118_v51 = vld [vmem:[%s5408_s9 + $0x244] ss:$12 sps:$4 sm:$0xff]   ;;  %v5120_v52 = vld [vmem:[%s5408_s9 + $0x188] ss:$12 sps:$4 sm:$0xff]  }
  0x93   : > { %1858 = vmatmul.mubr.bf16.gmra.mrb[32].mxu0 %v5033_v53  ;;  %2242 = vmatmul.mubr.bf16.gmra.mrb[32].mxu1 %v5034_v54  ;;  %v5121_v53 = vld [vmem:[%s5408_s9 + $0x240] ss:$12 sps:$4 sm:$0xff]  }
  0x94   : > { %1865 = vmatprep.mubr.bf16.mxu0 %v5036_v55  ;;  %2249 = vmatprep.mubr.bf16.mxu1 %v5038_v56  ;;  %v5122_v54 = vld [vmem:[%s5408_s9 + $0x1a0] ss:$12 sps:$4 sm:$0xff]   ;;  %v5123_v55 = vld [vmem:[%s5408_s9 + $0x25c] ss:$12 sps:$4 sm:$0xff]   ;;  %v5125_v56 = vld [vmem:[%s5408_s9 + $0x1b8] ss:$12 sps:$4 sm:$0xff]  }
  0x9b   : > { %1866 = vmatmul.mubr.bf16.gmra.mrb[36].mxu0 %v5040_v57  ;;  %2250 = vmatmul.mubr.bf16.gmra.mrb[36].mxu1 %v5041_v58  ;;  %v5126_v57 = vld [vmem:[%s5408_s9 + $0x258] ss:$12 sps:$4 sm:$0xff]   ;;  %v5127_v58 = vld [vmem:[%s5408_s9 + $0x1d0] ss:$12 sps:$4 sm:$0xff]  }
  0x9c   : > { %1873 = vmatprep.mubr.bf16.mxu0 %v5042_v59  ;;  %2257 = vmatprep.mubr.bf16.mxu1 %v5044_v60  ;;  %v5128_v59 = vld [vmem:[%s5408_s9 + $0x274] ss:$12 sps:$4 sm:$0xff]  }
  0x9d   : > { %v5130_v60 = vld [vmem:[%s5408_s9 + $0x1e8] ss:$12 sps:$4 sm:$0xff]  }
  0xa3   : > { %1874 = vmatmul.mubr.bf16.gmra.mrb[40].mxu0 %v5046_v61  ;;  %2258 = vmatmul.mubr.bf16.gmra.mrb[40].mxu1 %v5047_v62  ;;  %v5131_v61 = vld [vmem:[%s5408_s9 + $0x270] ss:$12 sps:$4 sm:$0xff]   ;;  %v5132_v62 = vld [vmem:[%s5408_s9 + $0x200] ss:$12 sps:$4 sm:$0xff]  }
  0xa4   : > { %1881 = vmatprep.mubr.bf16.mxu0 %v5048_v63  ;;  %2265 = vmatprep.mubr.bf16.mxu1 %v5050_v0  ;;  %v5133_v63 = vld [vmem:[%s5408_s9 + $0x28c] ss:$12 sps:$4 sm:$0xff]  }
  0xa5   : > { %v5135_v0 = vld [vmem:[%s5408_s9 + $0x218] ss:$12 sps:$4 sm:$0xff]  }
  0xab   : > { %1882 = vmatmul.mubr.bf16.gmra.mrb[44].mxu0 %v5052_v1  ;;  %2266 = vmatmul.mubr.bf16.gmra.mrb[44].mxu1 %v5053_v2 }
  0xac   : > { %1889 = vmatprep.mubr.bf16.mxu0 %v5054_v3  ;;  %2273 = vmatprep.mubr.bf16.mxu1 %v5056_v4 }
  0xb3   : > { %1890 = vmatmul.mubr.bf16.gmra.mrb[48].mxu0 %v5058_v5  ;;  %2274 = vmatmul.mubr.bf16.gmra.mrb[48].mxu1 %v5059_v6  ;;  %v5136_v5 = vld [vmem:[%s5408_s9 + $0x288] ss:$12 sps:$4 sm:$0xff]   ;;  %v5137_v6 = vld [vmem:[%s5408_s9 + $0x230] ss:$12 sps:$4 sm:$0xff]  }
  0xb4   : > { %1897 = vmatprep.mubr.bf16.mxu0 %v5060_v7  ;;  %2281 = vmatprep.mubr.bf16.mxu1 %v5062_v8 }
  0xbb   : > { %1898 = vmatmul.mubr.bf16.gmra.mrb[52].mxu0 %v5064_v9  ;;  %2282 = vmatmul.mubr.bf16.gmra.mrb[52].mxu1 %v5065_v10  ;;  %v5138_v9 = vld [vmem:[%s5408_s9 + $0x2a4] ss:$12 sps:$4 sm:$0xff]   ;;  %v5140_v10 = vld [vmem:[%s5408_s9 + $0x248] ss:$12 sps:$4 sm:$0xff]  }
  0xbc   : > { %1905 = vmatprep.mubr.bf16.mxu0 %v5066_v11  ;;  %2289 = vmatprep.mubr.bf16.mxu1 %v5068_v12 }
  0xc3   : > { %1906 = vmatmul.mubr.bf16.gmra.mrb[56].mxu0 %v5070_v13  ;;  %2290 = vmatmul.mubr.bf16.gmra.mrb[56].mxu1 %v5071_v14 }
  0xc4   : > { %1913 = vmatprep.mubr.bf16.mxu0 %v5072_v15  ;;  %2297 = vmatprep.mubr.bf16.mxu1 %v5074_v16 }
  0xcb   : > { %1914 = vmatmul.mubr.bf16.gmra.mrb[60].mxu0 %v5076_v17  ;;  %2298 = vmatmul.mubr.bf16.gmra.mrb[60].mxu1 %v5077_v18  ;;  %v5141_v17 = vld [vmem:[%s5408_s9 + $0x2a0] ss:$12 sps:$4 sm:$0xff]  }
  0xcc   : > { %1921 = vmatprep.mubr.bf16.mxu0 %v5078_v19  ;;  %4714 = vmatprep.mubr.msk.bf16.mxu1 %vm1568_vm0, %v5080_v20  ;;  %v5142_v18 = vld [vmem:[%s5408_s9 + $0x260] ss:$12 sps:$4 sm:$0xff]  }
  0xd3   : > { %1922 = vmatmul.mubr.bf16.gmra.mrb[64].mxu0 %v5081_v21  ;;  %4715 = vmatmul.mubr.msk.bf16.vlgmr.msra.gmra.mrb[64].mxu1 %vm1568_vm0, %v5082_v22  ;;  %v5143_v21 = vld [vmem:[%s5408_s9 + $0x2bc] ss:$12 sps:$4 sm:$0xff]   ;;  %v5145_v22 = vld [vmem:[%s5408_s9 + $0x278] ss:$12 sps:$4 sm:$0xff]  }
  0xd4   : > { %1929 = vmatprep.mubr.bf16.mxu0 %v5083_v23  ;;  %4718 = vmatprep.mubr.msk.bf16.mxu1 %vm1568_vm0, %v5085_v24 }
  0xdb   : > { %1930 = vmatmul.mubr.bf16.gmra.mrb[68].mxu0 %v5086_v25  ;;  %4719 = vmatmul.mubr.msk.bf16.gmra.mrb[68].mxu1 %vm1568_vm0, %v5087_v26 }
  0xdc   : > { %1937 = vmatprep.mubr.bf16.mxu0 %v5088_v27  ;;  %4722 = vmatprep.mubr.msk.bf16.mxu1 %vm1568_vm0, %v5090_v28 }
  0xe3   : > { %1938 = vmatmul.mubr.bf16.gmra.mrb[72].mxu0 %v5091_v29  ;;  %4723 = vmatmul.mubr.msk.bf16.gmra.mrb[72].mxu1 %vm1568_vm0, %v5092_v30  ;;  %v5146_v29 = vld [vmem:[%s5408_s9 + $0x2b8] ss:$12 sps:$4 sm:$0xff]   ;;  %v5147_v30 = vld [vmem:[%s5408_s9 + $0x290] ss:$12 sps:$4 sm:$0xff]  }
  0xe4   : > { %1945 = vmatprep.mubr.bf16.mxu0 %v5093_v31  ;;  %4726 = vmatprep.mubr.msk.bf16.mxu1 %vm1568_vm0, %v5095_v32 }
  0xeb   : > { %1946 = vmatmul.mubr.bf16.gmra.mrb[76].mxu0 %v5096_v33  ;;  %4727 = vmatmul.mubr.msk.bf16.gmra.mrb[76].mxu1 %vm1568_vm0, %v5097_v34  ;;  %v5148_v33 = vld [vmem:[%s5408_s9 + $0x2d4] ss:$12 sps:$4 sm:$0xff]  }
  0xec   : > { %1953 = vmatprep.mubr.bf16.mxu0 %v5098_v35  ;;  %4730 = vmatprep.mubr.msk.bf16.mxu1 %vm1568_vm0, %v5100_v36  ;;  %v5150_v34 = vld [vmem:[%s5408_s9 + $0x2a8] ss:$12 sps:$4 sm:$0xff]  }
  0xf3   : > { %1954 = vmatmul.mubr.bf16.gmra.mrb[80].mxu0 %v5101_v37  ;;  %4731 = vmatmul.mubr.msk.bf16.gmra.mrb[80].mxu1 %vm1568_vm0, %v5102_v38 }
  0xf4   : > { %1961 = vmatprep.mubr.bf16.mxu0 %v5103_v39  ;;  %4734 = vmatprep.mubr.msk.bf16.mxu1 %vm1568_vm0, %v5105_v40 }
  0xfb   : > { %1962 = vmatmul.mubr.bf16.gmra.mrb[84].mxu0 %v5106_v41  ;;  %4735 = vmatmul.mubr.msk.bf16.gmra.mrb[84].mxu1 %vm1568_vm0, %v5107_v42  ;;  %v5151_v41 = vld [vmem:[%s5408_s9 + $0x2d0] ss:$12 sps:$4 sm:$0xff]   ;;  %v5152_v42 = vld [vmem:[%s5408_s9 + $0x2c0] ss:$12 sps:$4 sm:$0xff]  }
  0xfc   : > { %1969 = vmatprep.mubr.bf16.mxu0 %v5108_v43  ;;  %4738 = vmatprep.mubr.msk.bf16.mxu1 %vm1568_vm0, %v5110_v44 }
 0x103   : > { %1970 = vmatmul.mubr.bf16.gmra.mrb[88].mxu0 %v5111_v45  ;;  %4739 = vmatmul.mubr.msk.bf16.gmra.mrb[88].mxu1 %vm1568_vm0, %v5112_v46  ;;  %v5153_v45 = vld [vmem:[%s5408_s9 + $0x2ec] ss:$12 sps:$4 sm:$0xff]  }
 0x104   : > { %1977 = vmatprep.mubr.bf16.mxu0 %v5113_v47  ;;  %4742 = vmatprep.mubr.msk.bf16.mxu1 %vm1568_vm0, %v5115_v48  ;;  %v5155_v46 = vld [vmem:[%s5408_s9 + $0x2d8] ss:$12 sps:$4 sm:$0xff]  }
 0x10b   : > { %1978 = vmatmul.mubr.bf16.gmra.mrb[92].mxu0 %v5116_v49  ;;  %4743 = vmatmul.mubr.msk.bf16.gmra.mrb[92].mxu1 %vm1568_vm0, %v5117_v50 }
 0x10c   : > { %1985 = vmatprep.mubr.bf16.mxu0 %v5118_v51  ;;  %4746 = vmatprep.mubr.msk.bf16.mxu1 %vm1568_vm0, %v5120_v52 }
 0x113   : > { %1986 = vmatmul.mubr.bf16.gmra.mrb[96].mxu0 %v5121_v53  ;;  %4747 = vmatmul.mubr.msk.bf16.gmra.mrb[96].mxu1 %vm1568_vm0, %v5122_v54  ;;  %v5156_v53 = vld [vmem:[%s5408_s9 + $0x2e8] ss:$12 sps:$4 sm:$0xff]   ;;  %v5157_v54 = vld [vmem:[%s5408_s9 + $0x2f0] ss:$12 sps:$4 sm:$0xff]  }
 0x114   : > { %1993 = vmatprep.mubr.bf16.mxu0 %v5123_v55  ;;  %4750 = vmatprep.mubr.msk.bf16.mxu1 %vm1568_vm0, %v5125_v56 }
 0x11b   : > { %1994 = vmatmul.mubr.bf16.gmra.mrb[100].mxu0 %v5126_v57  ;;  %4751 = vmatmul.mubr.msk.bf16.gmra.mrb[100].mxu1 %vm1568_vm0, %v5127_v58  ;;  %v5158_v57 = vld [vmem:[%s5408_s9 + $0x304] ss:$12 sps:$4 sm:$0xff]   ;;  %v5160_v58 = vld [vmem:[%s5408_s9 + $0x308] ss:$12 sps:$4 sm:$0xff]  }
 0x11c   : > { %2001 = vmatprep.mubr.bf16.mxu0 %v5128_v59  ;;  %4754 = vmatprep.mubr.msk.bf16.mxu1 %vm1568_vm0, %v5130_v60 }
 0x123   : > { %2002 = vmatmul.mubr.bf16.gmra.mrb[104].mxu0 %v5131_v61  ;;  %4755 = vmatmul.mubr.msk.bf16.gmra.mrb[104].mxu1 %vm1568_vm0, %v5132_v62 }
 0x124   : > { %2009 = vmatprep.mubr.bf16.mxu0 %v5133_v63  ;;  %4758 = vmatprep.mubr.msk.bf16.mxu1 %vm1568_vm0, %v5135_v0 }
 0x126   : > { %v5606_v1 = vpop.f32.mrb[0].mxu0  ;;  %v5608_v2 = vpop.f32.mrb[0].mxu1 }
 0x127   : > { %v1797_v3 = vpop.f32.mrb[1].mxu0  ;;  %v2181_v4 = vpop.f32.mrb[1].mxu1 }
 0x128   : > { %v5612_v7 = vpop.f32.mrb[2].mxu0  ;;  %v5614_v8 = vpop.f32.mrb[2].mxu1  ;;  %v5161_v3 = vld [vmem:[%s5408_s9 + $0x300] ss:$12 sps:$4 sm:$0xff]  }
 0x129   : > { %v1800_v11 = vpop.f32.mrb[3].mxu0  ;;  %v2184_v12 = vpop.f32.mrb[3].mxu1  ;;  %v5162_v4 = vld [vmem:[%s5408_s9 + $0x320] ss:$12 sps:$4 sm:$0xff]  }
 0x12b   : > { %2010 = vmatmul.mubr.bf16.gmra.mrb[108].mxu0 %v5136_v5  ;;  %4759 = vmatmul.mubr.msk.bf16.gmra.mrb[108].mxu1 %vm1568_vm0, %v5137_v6 }
 0x12c   : > { %2017 = vmatprep.mubr.bf16.mxu0 %v5138_v9  ;;  %4762 = vmatprep.mubr.msk.bf16.mxu1 %vm1568_vm0, %v5140_v10  ;;  %v5163_v9 = vld [vmem:[%s5408_s9 + $0x31c] ss:$12 sps:$4 sm:$0xff]   ;;  %v5165_v10 = vld [vmem:[%s5408_s9 + $0x338] ss:$12 sps:$4 sm:$0xff]  }
 0x12e   : > { %v5620_v13 = vpop.f32.mrb[4].mxu0  ;;  %v5622_v14 = vpop.f32.mrb[4].mxu1 }
 0x12f   : > { %v1805_v15 = vpop.f32.mrb[5].mxu0  ;;  %v2189_v16 = vpop.f32.mrb[5].mxu1 }
 0x130   : > { %v5626_v19 = vpop.f32.mrb[6].mxu0  ;;  %v5628_v20 = vpop.f32.mrb[6].mxu1 }
 0x131   : > { %v1808_v23 = vpop.f32.mrb[7].mxu0  ;;  %v2192_v24 = vpop.f32.mrb[7].mxu1 }
 0x133   : > { %2018 = vmatmul.mubr.bf16.gmra.mrb[112].mxu0 %v5141_v17  ;;  %4763 = vmatmul.mubr.msk.bf16.gmra.mrb[112].mxu1 %vm1568_vm0, %v5142_v18 }
 0x134   : > { %2025 = vmatprep.mubr.bf16.mxu0 %v5143_v21  ;;  %4766 = vmatprep.mubr.msk.bf16.mxu1 %vm1568_vm0, %v5145_v22  ;;  %v5166_v21 = vld [vmem:[%s5408_s9 + $0x318] ss:$12 sps:$4 sm:$0xff]   ;;  %v5167_v22 = vld [vmem:[%s5408_s9 + $0x350] ss:$12 sps:$4 sm:$0xff]  }
 0x136   : > { %v5634_v25 = vpop.f32.mrb[8].mxu0  ;;  %v5636_v26 = vpop.f32.mrb[8].mxu1 }
 0x137   : > { %v1813_v27 = vpop.f32.mrb[9].mxu0  ;;  %v2197_v28 = vpop.f32.mrb[9].mxu1 }
 0x138   : > { %v5640_v31 = vpop.f32.mrb[10].mxu0  ;;  %v5642_v32 = vpop.f32.mrb[10].mxu1  ;;  %v5168_v27 = vld [vmem:[%s5408_s9 + $0x334] ss:$12 sps:$4 sm:$0xff]  }
 0x139   : > { %v1816_v35 = vpop.f32.mrb[11].mxu0  ;;  %v2200_v36 = vpop.f32.mrb[11].mxu1  ;;  %v5170_v28 = vld [vmem:[%s5408_s9 + $0x368] ss:$12 sps:$4 sm:$0xff]  }
 0x13b   : > { %2026 = vmatmul.mubr.bf16.gmra.mrb[116].mxu0 %v5146_v29  ;;  %4767 = vmatmul.mubr.msk.bf16.gmra.mrb[116].mxu1 %vm1568_vm0, %v5147_v30 }
 0x13c   : > { %2033 = vmatprep.mubr.bf16.mxu0 %v5148_v33  ;;  %4770 = vmatprep.mubr.msk.bf16.mxu1 %vm1568_vm0, %v5150_v34 }
 0x13e   : > { %v5648_v37 = vpop.f32.mrb[12].mxu0  ;;  %v5650_v38 = vpop.f32.mrb[12].mxu1 }
 0x13f   : > { %v1821_v39 = vpop.f32.mrb[13].mxu0  ;;  %v2205_v40 = vpop.f32.mrb[13].mxu1 }
 0x140   : > { %v5654_v43 = vpop.f32.mrb[14].mxu0  ;;  %v5656_v44 = vpop.f32.mrb[14].mxu1  ;;  %v5171_v39 = vld [vmem:[%s5408_s9 + $0x330] ss:$12 sps:$4 sm:$0xff]   ;;  %v5172_v40 = vld [vmem:[%s5408_s9 + $0x380] ss:$12 sps:$4 sm:$0xff]  }
 0x141   : > { %v1824_v47 = vpop.f32.mrb[15].mxu0  ;;  %v2208_v48 = vpop.f32.mrb[15].mxu1 }
 0x143   : > { %2034 = vmatmul.mubr.bf16.gmra.mrb[120].mxu0 %v5151_v41  ;;  %4771 = vmatmul.mubr.msk.bf16.gmra.mrb[120].mxu1 %vm1568_vm0, %v5152_v42 }
 0x144   : > { %2041 = vmatprep.mubr.bf16.mxu0 %v5153_v45  ;;  %4774 = vmatprep.mubr.msk.bf16.mxu1 %vm1568_vm0, %v5155_v46  ;;  %v5173_v45 = vld [vmem:[%s5408_s9 + $0x34c] ss:$12 sps:$4 sm:$0xff]  }
 0x145   : > { %v5175_v46 = vld [vmem:[%s5408_s9 + $0x398] ss:$12 sps:$4 sm:$0xff]  }
 0x146   : > { %v5662_v49 = vpop.f32.mrb[16].mxu0  ;;  %v5664_v50 = vpop.f32.mrb[16].mxu1 }
 0x147   : > { %v1829_v51 = vpop.f32.mrb[17].mxu0  ;;  %v2213_v52 = vpop.f32.mrb[17].mxu1 }
 0x148   : > { %v5668_v55 = vpop.f32.mrb[18].mxu0  ;;  %v5670_v56 = vpop.f32.mrb[18].mxu1 }
 0x149   : > { %v1832_v59 = vpop.f32.mrb[19].mxu0  ;;  %v2216_v60 = vpop.f32.mrb[19].mxu1 }
 0x14b   : > { %2042 = vmatmul.mubr.bf16.gmra.mrb[124].mxu0 %v5156_v53  ;;  %4775 = vmatmul.mubr.msk.bf16.gmra.mrb[124].mxu1 %vm1568_vm0, %v5157_v54 }
 0x14c   : > { %2049 = vmatprep.mubr.bf16.mxu0 %v5158_v57  ;;  %4778 = vmatprep.mubr.msk.bf16.mxu1 %vm1568_vm0, %v5160_v58  ;;  %v5176_v57 = vld [vmem:[%s5408_s9 + $0x348] ss:$12 sps:$4 sm:$0xff]   ;;  %v5177_v58 = vld [vmem:[%s5408_s9 + $0x3b0] ss:$12 sps:$4 sm:$0xff]  }
 0x14e   : > { %v5676_v61 = vpop.f32.mrb[20].mxu0  ;;  %v5678_v62 = vpop.f32.mrb[20].mxu1 }
 0x14f   : > { %v1837_v63 = vpop.f32.mrb[21].mxu0  ;;  %v2221_v0 = vpop.f32.mrb[21].mxu1 }
 0x150   : > { %v5682_v5 = vpop.f32.mrb[22].mxu0  ;;  %v5684_v6 = vpop.f32.mrb[22].mxu1  ;;  %v5178_v63 = vld [vmem:[%s5408_s9 + $0x364] ss:$12 sps:$4 sm:$0xff]   ;;  %v5180_v0 = vld [vmem:[%s5408_s9 + $0x3c8] ss:$12 sps:$4 sm:$0xff]  }
 0x151   : > { %v1840_v11 = vpop.f32.mrb[23].mxu0  ;;  %v2224_v12 = vpop.f32.mrb[23].mxu1 }
 0x153   : > { %2050 = vmatmul.mubr.bf16.gmra.mrb[128].mxu0 %v5161_v3  ;;  %4779 = vmatmul.mubr.msk.bf16.gmra.mrb[128].mxu1 %vm1568_vm0, %v5162_v4 }
 0x154   : > { %2057 = vmatprep.mubr.bf16.mxu0 %v5163_v9  ;;  %4782 = vmatprep.mubr.msk.bf16.mxu1 %vm1568_vm0, %v5165_v10 }
 0x156   : > { %v5690_v15 = vpop.f32.mrb[24].mxu0  ;;  %v5692_v16 = vpop.f32.mrb[24].mxu1 }
 0x157   : > { %6645 = vst [vmem:[#allocation3_spill] sm:$0xff] %v5692_v16  ;;  %v1845_v17 = vpop.f32.mrb[25].mxu0  ;;  %v2229_v18 = vpop.f32.mrb[25].mxu1 }
 0x158   : > { %v5696_v23 = vpop.f32.mrb[26].mxu0  ;;  %v5698_v24 = vpop.f32.mrb[26].mxu1  ;;  %v5181_v17 = vld [vmem:[%s5408_s9 + $0x360] ss:$12 sps:$4 sm:$0xff]  }
 0x159   : > { %6646 = vst [vmem:[#allocation4_spill] sm:$0xff] %v5698_v24  ;;  %v1848_v29 = vpop.f32.mrb[27].mxu0  ;;  %v2232_v30 = vpop.f32.mrb[27].mxu1  ;;  %v5182_v18 = vld [vmem:[%s5408_s9 + $0x3e0] ss:$12 sps:$4 sm:$0xff]  }
 0x15b   : > { %2058 = vmatmul.mubr.bf16.gmra.mrb[132].mxu0 %v5166_v21  ;;  %4783 = vmatmul.mubr.msk.bf16.gmra.mrb[132].mxu1 %vm1568_vm0, %v5167_v22 }
 0x15c   : > { %2065 = vmatprep.mubr.bf16.mxu0 %v5168_v27  ;;  %4786 = vmatprep.mubr.msk.bf16.mxu1 %vm1568_vm0, %v5170_v28  ;;  %v5183_v27 = vld [vmem:[%s5408_s9 + $0x37c] ss:$12 sps:$4 sm:$0xff]   ;;  %v5185_v28 = vld [vmem:[%s5408_s9 + $0x3f8] ss:$12 sps:$4 sm:$0xff]  }
 0x15e   : > { %v5704_v33 = vpop.f32.mrb[28].mxu0  ;;  %v5706_v34 = vpop.f32.mrb[28].mxu1 }
 0x15f   : > { %6647 = vst [vmem:[#allocation5_spill] sm:$0xff] %v5706_v34  ;;  %v1853_v35 = vpop.f32.mrb[29].mxu0  ;;  %v2237_v36 = vpop.f32.mrb[29].mxu1 }
 0x160   : > { %v5710_v41 = vpop.f32.mrb[30].mxu0  ;;  %v5712_v42 = vpop.f32.mrb[30].mxu1 }
 0x161   : > { %6648 = vst [vmem:[#allocation6_spill] sm:$0xff] %v5712_v42  ;;  %v1856_v47 = vpop.f32.mrb[31].mxu0  ;;  %v2240_v48 = vpop.f32.mrb[31].mxu1 }
 0x163   : > { %2066 = vmatmul.mubr.bf16.gmra.mrb[136].mxu0 %v5171_v39  ;;  %4787 = vmatmul.mubr.msk.bf16.gmra.mrb[136].mxu1 %vm1568_vm0, %v5172_v40 }
 0x164   : > { %2073 = vmatprep.mubr.bf16.mxu0 %v5173_v45  ;;  %4790 = vmatprep.mubr.msk.bf16.mxu1 %vm1568_vm0, %v5175_v46  ;;  %v5186_v45 = vld [vmem:[%s5408_s9 + $0x378] ss:$12 sps:$4 sm:$0xff]   ;;  %v5187_v46 = vld [vmem:[%s5408_s9 + $0x410] ss:$12 sps:$4 sm:$0xff]  }
 0x166   : > { %v5718_v51 = vpop.f32.mrb[32].mxu0  ;;  %v5720_v52 = vpop.f32.mrb[32].mxu1 }
 0x167   : > { %6649 = vst [vmem:[#allocation7_spill] sm:$0xff] %v5720_v52  ;;  %v1861_v53 = vpop.f32.mrb[33].mxu0  ;;  %v2245_v54 = vpop.f32.mrb[33].mxu1  ;;  %v5220_v52 = vld [vmem:[%s5408_s9 + $0x548] ss:$12 sps:$4 sm:$0xff]  }
 0x168   : > { %v5724_v59 = vpop.f32.mrb[34].mxu0  ;;  %v5726_v60 = vpop.f32.mrb[34].mxu1  ;;  %v5188_v53 = vld [vmem:[%s5408_s9 + $0x394] ss:$12 sps:$4 sm:$0xff]  }
 0x169   : > { %6650 = vst [vmem:[#allocation8_spill] sm:$0xff] %v5726_v60  ;;  %v1864_v3 = vpop.f32.mrb[35].mxu0  ;;  %v2248_v4 = vpop.f32.mrb[35].mxu1  ;;  %v5190_v54 = vld [vmem:[%s5408_s9 + $0x428] ss:$12 sps:$4 sm:$0xff]  }
 0x16b   : > { %2074 = vmatmul.mubr.bf16.gmra.mrb[140].mxu0 %v5176_v57  ;;  %4791 = vmatmul.mubr.msk.bf16.gmra.mrb[140].mxu1 %vm1568_vm0, %v5177_v58 }
 0x16c   : > { %2081 = vmatprep.mubr.bf16.mxu0 %v5178_v63  ;;  %4794 = vmatprep.mubr.msk.bf16.mxu1 %vm1568_vm0, %v5180_v0 }
 0x16e   : > { %v5732_v9 = vpop.f32.mrb[36].mxu0  ;;  %v5734_v10 = vpop.f32.mrb[36].mxu1 }
 0x16f   : > { %6651 = vst [vmem:[#allocation9_spill] sm:$0xff] %v5734_v10  ;;  %v1869_v11 = vpop.f32.mrb[37].mxu0  ;;  %v2253_v12 = vpop.f32.mrb[37].mxu1 }
 0x170   : > { %v5738_v21 = vpop.f32.mrb[38].mxu0  ;;  %v5740_v22 = vpop.f32.mrb[38].mxu1  ;;  %v5191_v11 = vld [vmem:[%s5408_s9 + $0x390] ss:$12 sps:$4 sm:$0xff]   ;;  %v5192_v12 = vld [vmem:[%s5408_s9 + $0x440] ss:$12 sps:$4 sm:$0xff]  }
 0x171   : > { %6652 = vst [vmem:[#allocation10_spill] sm:$0xff] %v5740_v22  ;;  %v1872_v29 = vpop.f32.mrb[39].mxu0  ;;  %v2256_v30 = vpop.f32.mrb[39].mxu1 }
 0x173   : > { %2082 = vmatmul.mubr.bf16.gmra.mrb[144].mxu0 %v5181_v17  ;;  %4795 = vmatmul.mubr.msk.bf16.gmra.mrb[144].mxu1 %vm1568_vm0, %v5182_v18 }
 0x174   : > { %2089 = vmatprep.mubr.bf16.mxu0 %v5183_v27  ;;  %4798 = vmatprep.mubr.msk.bf16.mxu1 %vm1568_vm0, %v5185_v28  ;;  %v5193_v27 = vld [vmem:[%s5408_s9 + $0x3ac] ss:$12 sps:$4 sm:$0xff]  }
 0x175   : > { %v5195_v28 = vld [vmem:[%s5408_s9 + $0x458] ss:$12 sps:$4 sm:$0xff]  }
 0x176   : > { %v5746_v35 = vpop.f32.mrb[40].mxu0  ;;  %v5748_v36 = vpop.f32.mrb[40].mxu1 }
 0x177   : > { %6653 = vst [vmem:[#allocation11_spill] sm:$0xff] %v5748_v36  ;;  %v1877_v39 = vpop.f32.mrb[41].mxu0  ;;  %v2261_v40 = vpop.f32.mrb[41].mxu1 }
 0x178   : > { %v5752_v47 = vpop.f32.mrb[42].mxu0  ;;  %v5754_v48 = vpop.f32.mrb[42].mxu1 }
 0x179   : > { %6654 = vst [vmem:[#allocation12_spill] sm:$0xff] %v5754_v48  ;;  %v1880_v57 = vpop.f32.mrb[43].mxu0  ;;  %v2264_v58 = vpop.f32.mrb[43].mxu1 }
 0x17b   : > { %2090 = vmatmul.mubr.bf16.gmra.mrb[148].mxu0 %v5186_v45  ;;  %4799 = vmatmul.mubr.msk.bf16.gmra.mrb[148].mxu1 %vm1568_vm0, %v5187_v46 }
 0x17c   : > { %2097 = vmatprep.mubr.bf16.mxu0 %v5188_v53  ;;  %4802 = vmatprep.mubr.msk.bf16.mxu1 %vm1568_vm0, %v5190_v54  ;;  %v5196_v53 = vld [vmem:[%s5408_s9 + $0x3a8] ss:$12 sps:$4 sm:$0xff]   ;;  %v5197_v54 = vld [vmem:[%s5408_s9 + $0x470] ss:$12 sps:$4 sm:$0xff]  }
 0x17e   : > { %v5760_v63 = vpop.f32.mrb[44].mxu0  ;;  %v5762_v0 = vpop.f32.mrb[44].mxu1 }
 0x17f   : > { %6655 = vst [vmem:[#allocation13_spill] sm:$0xff] %v5762_v0  ;;  %v1885_v3 = vpop.f32.mrb[45].mxu0  ;;  %v2269_v4 = vpop.f32.mrb[45].mxu1 }
 0x180   : > { %v5766_v17 = vpop.f32.mrb[46].mxu0  ;;  %v5768_v18 = vpop.f32.mrb[46].mxu1  ;;  %v5198_v3 = vld [vmem:[%s5408_s9 + $0x3c4] ss:$12 sps:$4 sm:$0xff]   ;;  %v5200_v4 = vld [vmem:[%s5408_s9 + $0x488] ss:$12 sps:$4 sm:$0xff]  }
 0x181   : > { %6656 = vst [vmem:[#allocation14_spill] sm:$0xff] %v5768_v18  ;;  %v1888_v29 = vpop.f32.mrb[47].mxu0  ;;  %v2272_v30 = vpop.f32.mrb[47].mxu1  ;;  %v5212_v18 = vld [vmem:[%s5408_s9 + $0x500] ss:$12 sps:$4 sm:$0xff]  }
 0x183   : > { %2098 = vmatmul.mubr.bf16.gmra.mrb[152].mxu0 %v5191_v11  ;;  %4803 = vmatmul.mubr.msk.bf16.gmra.mrb[152].mxu1 %vm1568_vm0, %v5192_v12 }
 0x184   : > { %2105 = vmatprep.mubr.bf16.mxu0 %v5193_v27  ;;  %4806 = vmatprep.mubr.msk.bf16.mxu1 %vm1568_vm0, %v5195_v28 }
 0x186   : > { %v5774_v39 = vpop.f32.mrb[48].mxu0  ;;  %v5776_v40 = vpop.f32.mrb[48].mxu1 }
 0x187   : > { %6657 = vst [vmem:[#allocation15_spill] sm:$0xff] %v5776_v40  ;;  %v1893_v45 = vpop.f32.mrb[49].mxu0  ;;  %v2277_v46 = vpop.f32.mrb[49].mxu1 }
 0x188   : > { %v5780_v57 = vpop.f32.mrb[50].mxu0  ;;  %v5782_v58 = vpop.f32.mrb[50].mxu1  ;;  %v5201_v45 = vld [vmem:[%s5408_s9 + $0x3c0] ss:$12 sps:$4 sm:$0xff]  }
 0x189   : > { %6658 = vst [vmem:[#allocation16_spill] sm:$0xff] %v5782_v58  ;;  %v1896_v11 = vpop.f32.mrb[51].mxu0  ;;  %v2280_v12 = vpop.f32.mrb[51].mxu1  ;;  %v5202_v46 = vld [vmem:[%s5408_s9 + $0x4a0] ss:$12 sps:$4 sm:$0xff]  }
 0x18b   : > { %2106 = vmatmul.mubr.bf16.gmra.mrb[156].mxu0 %v5196_v53  ;;  %4807 = vmatmul.mubr.msk.bf16.gmra.mrb[156].mxu1 %vm1568_vm0, %v5197_v54  ;;  %v5203_v53 = vld [vmem:[%s5408_s9 + $0x3dc] ss:$12 sps:$4 sm:$0xff]   ;;  %v5205_v54 = vld [vmem:[%s5408_s9 + $0x4b8] ss:$12 sps:$4 sm:$0xff]  }
 0x18c   : > { %2113 = vmatprep.mubr.bf16.mxu0 %v5198_v3  ;;  %4810 = vmatprep.mubr.msk.bf16.mxu1 %vm1568_vm0, %v5200_v4 }
 0x18e   : > { %v5788_v27 = vpop.f32.mrb[52].mxu0  ;;  %v5790_v28 = vpop.f32.mrb[52].mxu1 }
 0x18f   : > { %6659 = vst [vmem:[#allocation17_spill] sm:$0xff] %v5790_v28  ;;  %v1901_v29 = vpop.f32.mrb[53].mxu0  ;;  %v2285_v30 = vpop.f32.mrb[53].mxu1  ;;  %v5206_v28 = vld [vmem:[%s5408_s9 + $0x3d8] ss:$12 sps:$4 sm:$0xff]  }
 0x190   : > { %v5794_v58 = vpop.f32.mrb[54].mxu0  ;;  %v5796_v11 = vpop.f32.mrb[54].mxu1 }
 0x191   : > { %6660 = vst [vmem:[#allocation18_spill] sm:$0xff] %v5796_v11  ;;  %v1904_v3 = vpop.f32.mrb[55].mxu0  ;;  %v2288_v4 = vpop.f32.mrb[55].mxu1  ;;  %v5207_v11 = vld [vmem:[%s5408_s9 + $0x4d0] ss:$12 sps:$4 sm:$0xff]  }
 0x193   : > { %2114 = vmatmul.mubr.bf16.gmra.mrb[160].mxu0 %v5201_v45  ;;  %4811 = vmatmul.mubr.msk.bf16.gmra.mrb[160].mxu1 %vm1568_vm0, %v5202_v46  ;;  %v5208_v45 = vld [vmem:[%s5408_s9 + $0x3f4] ss:$12 sps:$4 sm:$0xff]  }
 0x194   : > { %2121 = vmatprep.mubr.bf16.mxu0 %v5203_v53  ;;  %4814 = vmatprep.mubr.msk.bf16.mxu1 %vm1568_vm0, %v5205_v54  ;;  %v5210_v46 = vld [vmem:[%s5408_s9 + $0x4e8] ss:$12 sps:$4 sm:$0xff]  }
 0x196   : > { %v5802_v12 = vpop.f32.mrb[56].mxu0  ;;  %v5804_v29 = vpop.f32.mrb[56].mxu1 }
 0x197   : > { %6661 = vst [vmem:[#allocation19_spill] sm:$0xff] %v5804_v29  ;;  %v1909_v30 = vpop.f32.mrb[57].mxu0  ;;  %v2293_v40 = vpop.f32.mrb[57].mxu1 }
 0x198   : > { %v5808_v48 = vpop.f32.mrb[58].mxu0  ;;  %v5810_v3 = vpop.f32.mrb[58].mxu1 }
 0x199   : > { %6662 = vst [vmem:[#allocation20_spill] sm:$0xff] %v5810_v3  ;;  %v1912_v53 = vpop.f32.mrb[59].mxu0  ;;  %v2296_v54 = vpop.f32.mrb[59].mxu1  ;;  %v5211_v3 = vld [vmem:[%s5408_s9 + $0x3f0] ss:$12 sps:$4 sm:$0xff]  }
 0x19a   : > { %v5213_v53 = vld [vmem:[%s5408_s9 + $0x40c] ss:$12 sps:$4 sm:$0xff]  }
 0x19b   : > { %2122 = vmatmul.mubr.bf16.gmra.mrb[164].mxu0 %v5206_v28  ;;  %4815 = vmatmul.mubr.msk.bf16.gmra.mrb[164].mxu1 %vm1568_vm0, %v5207_v11  ;;  %v5215_v28 = vld [vmem:[%s5408_s9 + $0x518] ss:$12 sps:$4 sm:$0xff]  }
 0x19c   : > { %2129 = vmatprep.mubr.bf16.mxu0 %v5208_v45  ;;  %4818 = vmatprep.mubr.msk.bf16.mxu1 %vm1568_vm0, %v5210_v46  ;;  %v5831_v45 = vld [vmem:[%s6642_s2] ss:$0 sm:$0xff] }
 0x19d   : > { %v1796_v46 = vadd.f32 %v5831_v45, %v5606_v1  ;;  %v5218_v1 = vld [vmem:[%s5408_s9 + $0x424] ss:$12 sps:$4 sm:$0xff]  }
 0x19e   : > { %v5816_v40 = vpop.f32.mrb[60].mxu0  ;;  %v5818_v4 = vpop.f32.mrb[60].mxu1 }
 0x19f   : > { %6663 = vst [vmem:[#allocation21_spill] sm:$0xff] %v5818_v4  ;;  %v1917_v30 = vpop.f32.mrb[61].mxu0  ;;  %v2301_v29 = vpop.f32.mrb[61].mxu1  ;;  %v1799_v4 = vadd.f32 %v5831_v45, %v5612_v7 }
 0x1a0   : > { %v5822_v36 = vpop.f32.mrb[62].mxu0  ;;  %v5824_v0 = vpop.f32.mrb[62].mxu1  ;;  %v1804_v29 = vadd.f32 %v5831_v45, %v5620_v13 }
 0x1a1   : > { %6664 = vst [vmem:[#allocation22_spill] sm:$0xff] %v5824_v0  ;;  %v1920_v54 = vpop.f32.mrb[63].mxu0  ;;  %v2304_v11 = vpop.f32.mrb[63].mxu1  ;;  %v5216_v0 = vld [vmem:[%s5408_s9 + $0x408] ss:$12 sps:$4 sm:$0xff]  }
 0x1a3   : > { %2130 = vmatmul.mubr.bf16.gmra.mrb[168].mxu0 %v5211_v3  ;;  %4819 = vmatmul.mubr.msk.bf16.gmra.mrb[168].mxu1 %vm1568_vm0, %v5212_v18  ;;  %v1807_v3 = vadd.f32 %v5831_v45, %v5626_v19 }
 0x1a4   : > { %2137 = vmatprep.mubr.bf16.mxu0 %v5213_v53  ;;  %4822 = vmatprep.mubr.msk.bf16.mxu1 %vm1568_vm0, %v5215_v28  ;;  %v5217_v28 = vld [vmem:[%s5408_s9 + $0x530] ss:$12 sps:$4 sm:$0xff]  }
 0x1a6   : > { %v5840_v30 = vpop.f32.mrb[64].mxu0  ;;  %v4716_v54 = vpop.f32.mrb[64].mxu1 }
 0x1a7   : > { %v2349_v18 = vadd.f32 %v4716_v54, %v1804_v29  ;;  %v1925_v11 = vpop.f32.mrb[65].mxu0  ;;  %v2340_v53 = vpop.f32.mrb[65].mxu1 }
 0x1a8   : > { %v2341_v13 = vadd.f32 %v2340_v53, %v1796_v46  ;;  %v5848_v60 = vpop.f32.mrb[66].mxu0  ;;  %v4717_v22 = vpop.f32.mrb[66].mxu1 }
 0x1a9   : > { %v2853_v10 = vmax.f32 %v2349_v18, 0.0  ;;  %v2352_v24 = vadd.f32 %v4717_v22, %v1807_v3  ;;  %v1928_v42 = vpop.f32.mrb[67].mxu0  ;;  %v2343_v16 = vpop.f32.mrb[67].mxu1  ;;  %v1820_v22 = vadd.f32 %v5831_v45, %v5648_v37  ;;  %v5221_v3 = vld [vmem:[%s5408_s9 + $0x420] ss:$12 sps:$4 sm:$0xff]  }
 0x1aa   : > { %v2851_v19 = vmax.f32 %v2341_v13, 0.0  ;;  %v2344_v29 = vadd.f32 %v2343_v16, %v1799_v4  ;;  %v5222_v18 = vld [vmem:[%s5408_s9 + $0x560] ss:$12 sps:$4 sm:$0xff]   ;;  %v5223_v13 = vld [vmem:[%s5408_s9 + $0x43c] ss:$12 sps:$4 sm:$0xff]  }
 0x1ab   : > { %v4515_v54 = vpack.c.bf16 %v2853_v10, %v2853_v10  ;;  %v2854_v11 = vmax.f32 %v2352_v24, 0.0  ;;  %2138 = vmatmul.mubr.bf16.gmra.mrb[172].mxu0 %v5216_v0  ;;  %4823 = vmatmul.mubr.msk.bf16.gmra.mrb[172].mxu1 %vm1568_vm0, %v5217_v28  ;;  %v1812_v24 = vadd.f32 %v5831_v45, %v5634_v25  ;;  %v1823_v10 = vadd.f32 %v5831_v45, %v5654_v43 }
 0x1ac   : > { %v4513_v34 = vpack.c.bf16 %v2851_v19, %v2851_v19  ;;  %v2852_v7 = vmax.f32 %v2344_v29, 0.0  ;;  %2145 = vmatprep.mubr.bf16.mxu0 %v5218_v1  ;;  %4826 = vmatprep.mubr.msk.bf16.mxu1 %vm1568_vm0, %v5220_v52  ;;  %v1815_v25 = vadd.f32 %v5831_v45, %v5640_v31  ;;  %v5225_v1 = vld [vmem:[%s5408_s9 + $0x578] ss:$12 sps:$4 sm:$0xff]  }
 0x1ad   : > { %3494 = vst.msk [vmem:[%s5856_s12 + $0x8] sm:$0xf] %vm3491_vm1, %v4515_v54  ;;  %v4516_v16 = vpack.c.bf16 %v2854_v11, %v2854_v11 }
 0x1ae   : > { %3492 = vst.msk [vmem:[%s5856_s12] sm:$0xf] %vm3491_vm1, %v4513_v34  ;;  %v4514_v42 = vpack.c.bf16 %v2852_v7, %v2852_v7  ;;  %v5864_v52 = vpop.f32.mrb[68].mxu0  ;;  %v4720_v37 = vpop.f32.mrb[68].mxu1 }
 0x1af   : > { %3495 = vst.msk [vmem:[%s5856_s12 + $0xc] sm:$0xf] %vm3491_vm1, %v4516_v16  ;;  %v2365_v0 = vadd.f32 %v4720_v37, %v1820_v22  ;;  %v1933_v4 = vpop.f32.mrb[69].mxu0  ;;  %v2356_v46 = vpop.f32.mrb[69].mxu1 }
 0x1b0   : > { %3493 = vst.msk [vmem:[%s5856_s12 + $0x4] sm:$0xf] %vm3491_vm1, %v4514_v42  ;;  %v2357_v34 = vadd.f32 %v2356_v46, %v1812_v24  ;;  %v5876_v53 = vpop.f32.mrb[70].mxu0  ;;  %v4721_v28 = vpop.f32.mrb[70].mxu1  ;;  %v1836_v42 = vadd.f32 %v5831_v45, %v5676_v61 }
 0x1b1   : > { %v2857_v43 = vmax.f32 %v2365_v0, 0.0  ;;  %v2368_v19 = vadd.f32 %v4721_v28, %v1823_v10  ;;  %v1936_v29 = vpop.f32.mrb[71].mxu0  ;;  %v2359_v54 = vpop.f32.mrb[71].mxu1  ;;  %v1828_v10 = vadd.f32 %v5831_v45, %v5662_v49  ;;  %v5227_v28 = vld [vmem:[%s5408_s9 + $0x590] ss:$12 sps:$4 sm:$0xff]   ;;  %v1831_v49 = vadd.f32 %v5831_v45, %v5668_v55 }
 0x1b2   : > { %v2855_v11 = vmax.f32 %v2357_v34, 0.0  ;;  %v2360_v7 = vadd.f32 %v2359_v54, %v1815_v25  ;;  %v5226_v34 = vld [vmem:[%s5408_s9 + $0x438] ss:$12 sps:$4 sm:$0xff]   ;;  %v5230_v29 = vld [vmem:[%s5408_s9 + $0x5a8] ss:$12 sps:$4 sm:$0xff]  }
 0x1b3   : > { %v4519_v22 = vpack.c.bf16 %v2857_v43, %v2857_v43  ;;  %v2858_v16 = vmax.f32 %v2368_v19, 0.0  ;;  %2146 = vmatmul.mubr.bf16.gmra.mrb[176].mxu0 %v5221_v3  ;;  %4827 = vmatmul.mubr.msk.bf16.gmra.mrb[176].mxu1 %vm1568_vm0, %v5222_v18  ;;  %v1839_v3 = vadd.f32 %v5831_v45, %v5682_v5  ;;  %v5228_v19 = vld [vmem:[%s5408_s9 + $0x454] ss:$12 sps:$4 sm:$0xff]  }
 0x1b4   : > { %v4517_v31 = vpack.c.bf16 %v2855_v11, %v2855_v11  ;;  %v2856_v24 = vmax.f32 %v2360_v7, 0.0  ;;  %2153 = vmatprep.mubr.bf16.mxu0 %v5223_v13  ;;  %4830 = vmatprep.mubr.msk.bf16.mxu1 %vm1568_vm0, %v5225_v1 }
 0x1b5   : > { %3498 = vst.msk [vmem:[%s5856_s12 + $0x18] sm:$0xf] %vm3491_vm1, %v4519_v22  ;;  %v4520_v37 = vpack.c.bf16 %v2858_v16, %v2858_v16 }
 0x1b6   : > { %3496 = vst.msk [vmem:[%s5856_s12 + $0x10] sm:$0xf] %vm3491_vm1, %v4517_v31  ;;  %v4518_v0 = vpack.c.bf16 %v2856_v24, %v2856_v24  ;;  %v5890_v4 = vpop.f32.mrb[72].mxu0  ;;  %v4724_v46 = vpop.f32.mrb[72].mxu1 }
 0x1b7   : > { %3499 = vst.msk [vmem:[%s5856_s12 + $0x1c] sm:$0xf] %vm3491_vm1, %v4520_v37  ;;  %v2381_v61 = vadd.f32 %v4724_v46, %v1836_v42  ;;  %v1941_v18 = vpop.f32.mrb[73].mxu0  ;;  %v2372_v25 = vpop.f32.mrb[73].mxu1  ;;  %v1852_v37 = vadd.f32 %v5831_v45, %v5704_v33 }
 0x1b8   : > { %3497 = vst.msk [vmem:[%s5856_s12 + $0x14] sm:$0xf] %vm3491_vm1, %v4518_v0  ;;  %v2373_v13 = vadd.f32 %v2372_v25, %v1828_v10  ;;  %v5902_v1 = vpop.f32.mrb[74].mxu0  ;;  %v4725_v43 = vpop.f32.mrb[74].mxu1  ;;  %v1844_v0 = vadd.f32 %v5831_v45, %v5690_v15  ;;  %v1855_v18 = vadd.f32 %v5831_v45, %v5710_v41  ;;  %v1847_v15 = vadd.f32 %v5831_v45, %v5696_v23 }
 0x1b9   : > { %v2861_v5 = vmax.f32 %v2381_v61, 0.0  ;;  %v2384_v54 = vadd.f32 %v4725_v43, %v1839_v3  ;;  %v1944_v11 = vpop.f32.mrb[75].mxu0  ;;  %v2375_v7 = vpop.f32.mrb[75].mxu1 }
 0x1ba   : > { %v2859_v22 = vmax.f32 %v2373_v13, 0.0  ;;  %v2376_v16 = vadd.f32 %v2375_v7, %v1831_v49  ;;  %v5232_v49 = vld [vmem:[%s5408_s9 + $0x5c0] ss:$12 sps:$4 sm:$0xff]  }
 0x1bb   : > { %v4523_v31 = vpack.c.bf16 %v2861_v5, %v2861_v5  ;;  %v2862_v24 = vmax.f32 %v2384_v54, 0.0  ;;  %2154 = vmatmul.mubr.bf16.gmra.mrb[180].mxu0 %v5226_v34  ;;  %4831 = vmatmul.mubr.msk.bf16.gmra.mrb[180].mxu1 %vm1568_vm0, %v5227_v28  ;;  %v5231_v28 = vld [vmem:[%s5408_s9 + $0x450] ss:$12 sps:$4 sm:$0xff]   ;;  %v5235_v5 = vld [vmem:[%s5408_s9 + $0x5d8] ss:$12 sps:$4 sm:$0xff]  }
 0x1bc   : > { %v4521_v55 = vpack.c.bf16 %v2859_v22, %v2859_v22  ;;  %v2860_v42 = vmax.f32 %v2376_v16, 0.0  ;;  %2161 = vmatprep.mubr.bf16.mxu0 %v5228_v19  ;;  %4834 = vmatprep.mubr.msk.bf16.mxu1 %vm1568_vm0, %v5230_v29  ;;  %v5233_v29 = vld [vmem:[%s5408_s9 + $0x46c] ss:$12 sps:$4 sm:$0xff]  }
 0x1bd   : > { %3502 = vst.msk [vmem:[%s5856_s12 + $0x28] sm:$0xf] %vm3491_vm1, %v4523_v31  ;;  %v4524_v10 = vpack.c.bf16 %v2862_v24, %v2862_v24 }
 0x1be   : > { %3500 = vst.msk [vmem:[%s5856_s12 + $0x20] sm:$0xf] %vm3491_vm1, %v4521_v55  ;;  %v4522_v46 = vpack.c.bf16 %v2860_v42, %v2860_v42  ;;  %v5916_v3 = vpop.f32.mrb[76].mxu0  ;;  %v4728_v61 = vpop.f32.mrb[76].mxu1  ;;  %v1868_v42 = vadd.f32 %v5831_v45, %v5732_v9 }
 0x1bf   : > { %3503 = vst.msk [vmem:[%s5856_s12 + $0x2c] sm:$0xf] %vm3491_vm1, %v4524_v10  ;;  %v2397_v33 = vadd.f32 %v4728_v61, %v1852_v37  ;;  %v1949_v25 = vpop.f32.mrb[77].mxu0  ;;  %v2388_v34 = vpop.f32.mrb[77].mxu1  ;;  %v1860_v10 = vadd.f32 %v5831_v45, %v5718_v51 }
 0x1c0   : > { %3501 = vst.msk [vmem:[%s5856_s12 + $0x24] sm:$0xf] %vm3491_vm1, %v4522_v46  ;;  %v2389_v13 = vadd.f32 %v2388_v34, %v1844_v0  ;;  %v5928_v43 = vpop.f32.mrb[78].mxu0  ;;  %v4729_v19 = vpop.f32.mrb[78].mxu1  ;;  %v5236_v34 = vld [vmem:[%s5408_s9 + $0x468] ss:$12 sps:$4 sm:$0xff]  }
 0x1c1   : > { %v2865_v41 = vmax.f32 %v2397_v33, 0.0  ;;  %v2400_v54 = vadd.f32 %v4729_v19, %v1855_v18  ;;  %v1952_v11 = vpop.f32.mrb[79].mxu0  ;;  %v2391_v7 = vpop.f32.mrb[79].mxu1  ;;  %v1871_v18 = vadd.f32 %v5831_v45, %v5738_v21 }
 0x1c2   : > { %v2863_v22 = vmax.f32 %v2389_v13, 0.0  ;;  %v2392_v16 = vadd.f32 %v2391_v7, %v1847_v15 }
 0x1c3   : > { %v4527_v31 = vpack.c.bf16 %v2865_v41, %v2865_v41  ;;  %v2866_v24 = vmax.f32 %v2400_v54, 0.0  ;;  %2162 = vmatmul.mubr.bf16.gmra.mrb[184].mxu0 %v5231_v28  ;;  %4835 = vmatmul.mubr.msk.bf16.gmra.mrb[184].mxu1 %vm1568_vm0, %v5232_v49  ;;  %v5237_v28 = vld [vmem:[%s5408_s9 + $0x5f0] ss:$12 sps:$4 sm:$0xff]   ;;  %v1863_v49 = vadd.f32 %v5831_v45, %v5724_v59 }
 0x1c4   : > { %v4525_v23 = vpack.c.bf16 %v2863_v22, %v2863_v22  ;;  %v2864_v55 = vmax.f32 %v2392_v16, 0.0  ;;  %2169 = vmatprep.mubr.bf16.mxu0 %v5233_v29  ;;  %4838 = vmatprep.mubr.msk.bf16.mxu1 %vm1568_vm0, %v5235_v5  ;;  %v1884_v16 = vadd.f32 %v5831_v45, %v5760_v63 }
 0x1c5   : > { %3506 = vst.msk [vmem:[%s5856_s12 + $0x38] sm:$0xf] %vm3491_vm1, %v4527_v31  ;;  %v4528_v37 = vpack.c.bf16 %v2866_v24, %v2866_v24  ;;  %v1876_v24 = vadd.f32 %v5831_v45, %v5746_v35 }
 0x1c6   : > { %3504 = vst.msk [vmem:[%s5856_s12 + $0x30] sm:$0xf] %vm3491_vm1, %v4525_v23  ;;  %v4526_v0 = vpack.c.bf16 %v2864_v55, %v2864_v55  ;;  %v5942_v46 = vpop.f32.mrb[80].mxu0  ;;  %v4732_v61 = vpop.f32.mrb[80].mxu1 }
 0x1c7   : > { %3507 = vst.msk [vmem:[%s5856_s12 + $0x3c] sm:$0xf] %vm3491_vm1, %v4528_v37  ;;  %v2413_v33 = vadd.f32 %v4732_v61, %v1868_v42  ;;  %v1957_v9 = vpop.f32.mrb[81].mxu0  ;;  %v2404_v25 = vpop.f32.mrb[81].mxu1  ;;  %v1887_v37 = vadd.f32 %v5831_v45, %v5766_v17  ;;  %v1879_v61 = vadd.f32 %v5831_v45, %v5752_v47 }
 0x1c8   : > { %3505 = vst.msk [vmem:[%s5856_s12 + $0x34] sm:$0xf] %vm3491_vm1, %v4526_v0  ;;  %v2405_v51 = vadd.f32 %v2404_v25, %v1860_v10  ;;  %v5954_v15 = vpop.f32.mrb[82].mxu0  ;;  %v4733_v13 = vpop.f32.mrb[82].mxu1 }
 0x1c9   : > { %v2869_v19 = vmax.f32 %v2413_v33, 0.0  ;;  %v2416_v21 = vadd.f32 %v4733_v13, %v1871_v18  ;;  %v1960_v29 = vpop.f32.mrb[83].mxu0  ;;  %v2407_v5 = vpop.f32.mrb[83].mxu1 }
 0x1ca   : > { %v2867_v41 = vmax.f32 %v2405_v51, 0.0  ;;  %v2408_v54 = vadd.f32 %v2407_v5, %v1863_v49  ;;  %v1892_v5 = vadd.f32 %v5831_v45, %v5774_v39 }
 0x1cb   : > { %v4531_v11 = vpack.c.bf16 %v2869_v19, %v2869_v19  ;;  %v2870_v7 = vmax.f32 %v2416_v21, 0.0  ;;  %2170 = vmatmul.mubr.bf16.gmra.mrb[188].mxu0 %v5236_v34  ;;  %4839 = vmatmul.mubr.msk.bf16.gmra.mrb[188].mxu1 %vm1568_vm0, %v5237_v28  ;;  %v1900_v21 = vadd.f32 %v5831_v45, %v5788_v27 }
 0x1cc   : > { %v4529_v59 = vpack.c.bf16 %v2867_v41, %v2867_v41  ;;  %v2868_v22 = vmax.f32 %v2408_v54, 0.0 }
 0x1cd   : > { %3510 = vst.msk [vmem:[%s5856_s12 + $0x48] sm:$0xf] %vm3491_vm1, %v4531_v11  ;;  %v4532_v31 = vpack.c.bf16 %v2870_v7, %v2870_v7  ;;  %v1903_v7 = vadd.f32 %v5831_v45, %v5794_v58 }
 0x1ce   : > { %3508 = vst.msk [vmem:[%s5856_s12 + $0x40] sm:$0xf] %vm3491_vm1, %v4529_v59  ;;  %v4530_v23 = vpack.c.bf16 %v2868_v22, %v2868_v22  ;;  %v5965_v55 = vpop.f32.mrb[84].mxu0  ;;  %v4736_v42 = vpop.f32.mrb[84].mxu1 }
 0x1cf   : > { %3511 = vst.msk [vmem:[%s5856_s12 + $0x4c] sm:$0xf] %vm3491_vm1, %v4532_v31  ;;  %v2429_v10 = vadd.f32 %v4736_v42, %v1884_v16  ;;  %v1965_v0 = vpop.f32.mrb[85].mxu0  ;;  %v2420_v63 = vpop.f32.mrb[85].mxu1  ;;  %v1895_v16 = vadd.f32 %v5831_v45, %v5780_v57 }
 0x1d0   : > { %3509 = vst.msk [vmem:[%s5856_s12 + $0x44] sm:$0xf] %vm3491_vm1, %v4530_v23  ;;  %v2421_v35 = vadd.f32 %v2420_v63, %v1876_v24  ;;  %v5975_v18 = vpop.f32.mrb[86].mxu0  ;;  %v4737_v33 = vpop.f32.mrb[86].mxu1 }
 0x1d1   : > { %v2873_v9 = vmax.f32 %v2429_v10, 0.0  ;;  %v2432_v25 = vadd.f32 %v4737_v33, %v1887_v37  ;;  %v1968_v34 = vpop.f32.mrb[87].mxu0  ;;  %v2423_v17 = vpop.f32.mrb[87].mxu1  ;;  %v1916_v33 = vadd.f32 %v5831_v45, %v5816_v40 }
 0x1d2   : > { %v2871_v28 = vmax.f32 %v2421_v35, 0.0  ;;  %v2424_v49 = vadd.f32 %v2423_v17, %v1879_v61 }
 0x1d3   : > { %v4535_v51 = vpack.c.bf16 %v2873_v9, %v2873_v9  ;;  %v2874_v13 = vmax.f32 %v2432_v25, 0.0  ;;  %v1908_v25 = vadd.f32 %v5831_v45, %v5802_v12 }
 0x1d4   : > { %v4533_v19 = vpack.c.bf16 %v2871_v28, %v2871_v28  ;;  %v2872_v47 = vmax.f32 %v2424_v49, 0.0  ;;  %v1919_v49 = vadd.f32 %v5831_v45, %v5822_v36 }
 0x1d5   : > { %3514 = vst.msk [vmem:[%s5856_s12 + $0x58] sm:$0xf] %vm3491_vm1, %v4535_v51  ;;  %v4536_v29 = vpack.c.bf16 %v2874_v13, %v2874_v13 }
 0x1d6   : > { %3512 = vst.msk [vmem:[%s5856_s12 + $0x50] sm:$0xf] %vm3491_vm1, %v4533_v19  ;;  %v4534_v41 = vpack.c.bf16 %v2872_v47, %v2872_v47  ;;  %v5985_v54 = vpop.f32.mrb[88].mxu0  ;;  %v4740_v11 = vpop.f32.mrb[88].mxu1  ;;  %v1911_v19 = vadd.f32 %v5831_v45, %v5808_v48 }
 0x1d7   : > { %3515 = vst.msk [vmem:[%s5856_s12 + $0x5c] sm:$0xf] %vm3491_vm1, %v4536_v29  ;;  %v2445_v59 = vadd.f32 %v4740_v11, %v1900_v21  ;;  %v1973_v22 = vpop.f32.mrb[89].mxu0  ;;  %v2436_v27 = vpop.f32.mrb[89].mxu1 }
 0x1d8   : > { %3513 = vst.msk [vmem:[%s5856_s12 + $0x54] sm:$0xf] %vm3491_vm1, %v4534_v41  ;;  %v2437_v39 = vadd.f32 %v2436_v27, %v1892_v5  ;;  %v5995_v31 = vpop.f32.mrb[90].mxu0  ;;  %v4741_v24 = vpop.f32.mrb[90].mxu1 }
 0x1d9   : > { %v2877_v23 = vmax.f32 %v2445_v59, 0.0  ;;  %v2448_v42 = vadd.f32 %v4741_v24, %v1903_v7  ;;  %v1976_v37 = vpop.f32.mrb[91].mxu0  ;;  %v2439_v58 = vpop.f32.mrb[91].mxu1  ;;  %v1924_v24 = vadd.f32 %v5831_v45, %v5840_v30 }
 0x1da   : > { %v2875_v10 = vmax.f32 %v2437_v39, 0.0  ;;  %v2440_v0 = vadd.f32 %v2439_v58, %v1895_v16  ;;  %v1932_v16 = vadd.f32 %v5831_v45, %v5864_v52  ;;  %v1935_v58 = vadd.f32 %v5831_v45, %v5876_v53 }
 0x1db   : > { %v4539_v63 = vpack.c.bf16 %v2877_v23, %v2877_v23  ;;  %v2878_v61 = vmax.f32 %v2448_v42, 0.0 }
 0x1dc   : > { %v4537_v35 = vpack.c.bf16 %v2875_v10, %v2875_v10  ;;  %v2876_v57 = vmax.f32 %v2440_v0, 0.0 }
 0x1dd   : > { %3518 = vst.msk [vmem:[%s5856_s12 + $0x68] sm:$0xf] %vm3491_vm1, %v4539_v63  ;;  %v4540_v9 = vpack.c.bf16 %v2878_v61, %v2878_v61  ;;  %v1927_v63 = vadd.f32 %v5831_v45, %v5848_v60 }
 0x1de   : > { %3516 = vst.msk [vmem:[%s5856_s12 + $0x60] sm:$0xf] %vm3491_vm1, %v4537_v35  ;;  %v4538_v34 = vpack.c.bf16 %v2876_v57, %v2876_v57  ;;  %v6005_v17 = vpop.f32.mrb[92].mxu0  ;;  %v4744_v28 = vpop.f32.mrb[92].mxu1 }
 0x1df   : > { %3519 = vst.msk [vmem:[%s5856_s12 + $0x6c] sm:$0xf] %vm3491_vm1, %v4540_v9  ;;  %v2461_v51 = vadd.f32 %v4744_v28, %v1916_v33  ;;  %v1981_v13 = vpop.f32.mrb[93].mxu0  ;;  %v2452_v40 = vpop.f32.mrb[93].mxu1 }
 0x1e0   : > { %3517 = vst.msk [vmem:[%s5856_s12 + $0x64] sm:$0xf] %vm3491_vm1, %v4538_v34  ;;  %v2453_v12 = vadd.f32 %v2452_v40, %v1908_v25  ;;  %v6015_v47 = vpop.f32.mrb[94].mxu0  ;;  %v4745_v21 = vpop.f32.mrb[94].mxu1  ;;  %v1948_v13 = vadd.f32 %v5831_v45, %v5916_v3 }
 0x1e1   : > { %v2881_v29 = vmax.f32 %v2461_v51, 0.0  ;;  %v2464_v5 = vadd.f32 %v4745_v21, %v1919_v49  ;;  %v1984_v41 = vpop.f32.mrb[95].mxu0  ;;  %v2455_v36 = vpop.f32.mrb[95].mxu1 }
 0x1e2   : > { %v2879_v11 = vmax.f32 %v2453_v12, 0.0  ;;  %v2456_v7 = vadd.f32 %v2455_v36, %v1911_v19  ;;  %v1940_v19 = vadd.f32 %v5831_v45, %v5890_v4 }
 0x1e3   : > { %v4543_v59 = vpack.c.bf16 %v2881_v29, %v2881_v29  ;;  %v2882_v22 = vmax.f32 %v2464_v5, 0.0  ;;  %v1951_v5 = vadd.f32 %v5831_v45, %v5928_v43 }
 0x1e4   : > { %v4541_v27 = vpack.c.bf16 %v2879_v11, %v2879_v11  ;;  %v2880_v48 = vmax.f32 %v2456_v7, 0.0  ;;  %v1943_v11 = vadd.f32 %v5831_v45, %v5902_v1 }
 0x1e5   : > { %3522 = vst.msk [vmem:[%s5856_s12 + $0x78] sm:$0xf] %vm3491_vm1, %v4543_v59  ;;  %v4544_v39 = vpack.c.bf16 %v2882_v22, %v2882_v22 }
 0x1e6   : > { %3520 = vst.msk [vmem:[%s5856_s12 + $0x70] sm:$0xf] %vm3491_vm1, %v4541_v27  ;;  %v4542_v23 = vpack.c.bf16 %v2880_v48, %v2880_v48  ;;  %v6025_v42 = vpop.f32.mrb[96].mxu0  ;;  %v4748_v37 = vpop.f32.mrb[96].mxu1 }
 0x1e7   : > { %3523 = vst.msk [vmem:[%s5856_s12 + $0x7c] sm:$0xf] %vm3491_vm1, %v4544_v39  ;;  %v2477_v10 = vadd.f32 %v4748_v37, %v1932_v16  ;;  %v1989_v0 = vpop.f32.mrb[97].mxu0  ;;  %v2468_v52 = vpop.f32.mrb[97].mxu1 }
 0x1e8   : > { %3521 = vst.msk [vmem:[%s5856_s12 + $0x74] sm:$0xf] %vm3491_vm1, %v4542_v23  ;;  %v2469_v30 = vadd.f32 %v2468_v52, %v1924_v24  ;;  %v6035_v61 = vpop.f32.mrb[98].mxu0  ;;  %v4749_v35 = vpop.f32.mrb[98].mxu1  ;;  %v1956_v0 = vadd.f32 %v5831_v45, %v5942_v46 }
 0x1e9   : > { %v2885_v57 = vmax.f32 %v2477_v10, 0.0  ;;  %v2480_v33 = vadd.f32 %v4749_v35, %v1935_v58  ;;  %v1992_v9 = vpop.f32.mrb[99].mxu0  ;;  %v2471_v53 = vpop.f32.mrb[99].mxu1  ;;  %v1964_v58 = vadd.f32 %v5831_v45, %v5965_v55  ;;  %v1967_v35 = vadd.f32 %v5831_v45, %v5975_v18 }
 0x1ea   : > { %v2883_v25 = vmax.f32 %v2469_v30, 0.0  ;;  %v2472_v34 = vadd.f32 %v2471_v53, %v1927_v63  ;;  %v1959_v9 = vadd.f32 %v5831_v45, %v5954_v15 }
 0x1eb   : > { %v4547_v28 = vpack.c.bf16 %v2885_v57, %v2885_v57  ;;  %v2886_v49 = vmax.f32 %v2480_v33, 0.0 }
 0x1ec   : > { %v4545_v51 = vpack.c.bf16 %v2883_v25, %v2883_v25  ;;  %v2884_v60 = vmax.f32 %v2472_v34, 0.0 }
 0x1ed   : > { %3526 = vst.msk [vmem:[%s5856_s12 + $0x88] sm:$0xf] %vm3491_vm1, %v4547_v28  ;;  %v4548_v40 = vpack.c.bf16 %v2886_v49, %v2886_v49 }
 0x1ee   : > { %3524 = vst.msk [vmem:[%s5856_s12 + $0x80] sm:$0xf] %vm3491_vm1, %v4545_v51  ;;  %v4546_v12 = vpack.c.bf16 %v2884_v60, %v2884_v60  ;;  %v6045_v21 = vpop.f32.mrb[100].mxu0  ;;  %v4752_v29 = vpop.f32.mrb[100].mxu1 }
 0x1ef   : > { %3527 = vst.msk [vmem:[%s5856_s12 + $0x8c] sm:$0xf] %vm3491_vm1, %v4548_v40  ;;  %v2493_v41 = vadd.f32 %v4752_v29, %v1948_v13  ;;  %v1997_v36 = vpop.f32.mrb[101].mxu0  ;;  %v2484_v3 = vpop.f32.mrb[101].mxu1 }
 0x1f0   : > { %3525 = vst.msk [vmem:[%s5856_s12 + $0x84] sm:$0xf] %vm3491_vm1, %v4546_v12  ;;  %v2485_v4 = vadd.f32 %v2484_v3, %v1940_v19  ;;  %v6055_v7 = vpop.f32.mrb[102].mxu0  ;;  %v4753_v59 = vpop.f32.mrb[102].mxu1  ;;  %v1980_v12 = vadd.f32 %v5831_v45, %v6005_v17  ;;  %v1975_v17 = vadd.f32 %v5831_v45, %v5995_v31  ;;  %v1996_v31 = vadd.f32 %v5831_v45, %v6045_v21 }
 0x1f1   : > { %v2889_v22 = vmax.f32 %v2493_v41, 0.0  ;;  %v2496_v27 = vadd.f32 %v4753_v59, %v1951_v5  ;;  %v2000_v48 = vpop.f32.mrb[103].mxu0  ;;  %v2487_v43 = vpop.f32.mrb[103].mxu1  ;;  %v1972_v5 = vadd.f32 %v5831_v45, %v5985_v54  ;;  %v1991_v21 = vadd.f32 %v5831_v45, %v6035_v61 }
 0x1f2   : > { %v2887_v16 = vmax.f32 %v2485_v4, 0.0  ;;  %v2488_v39 = vadd.f32 %v2487_v43, %v1943_v11  ;;  %v1983_v11 = vadd.f32 %v5831_v45, %v6015_v47 }
 0x1f3   : > { %v4551_v24 = vpack.c.bf16 %v2889_v22, %v2889_v22  ;;  %v2890_v23 = vmax.f32 %v2496_v27, 0.0 }
 0x1f4   : > { %v4549_v37 = vpack.c.bf16 %v2887_v16, %v2887_v16  ;;  %v2888_v1 = vmax.f32 %v2488_v39, 0.0 }
 0x1f5   : > { %3530 = vst.msk [vmem:[%s5856_s12 + $0x98] sm:$0xf] %vm3491_vm1, %v4551_v24  ;;  %v4552_v10 = vpack.c.bf16 %v2890_v23, %v2890_v23 }
 0x1f6   : > { %3528 = vst.msk [vmem:[%s5856_s12 + $0x90] sm:$0xf] %vm3491_vm1, %v4549_v37  ;;  %v4550_v52 = vpack.c.bf16 %v2888_v1, %v2888_v1  ;;  %v6065_v63 = vpop.f32.mrb[104].mxu0  ;;  %v4756_v30 = vpop.f32.mrb[104].mxu1 }
 0x1f7   : > { %3531 = vst.msk [vmem:[%s5856_s12 + $0x9c] sm:$0xf] %vm3491_vm1, %v4552_v10  ;;  %v2509_v57 = vadd.f32 %v4756_v30, %v1964_v58  ;;  %v2005_v33 = vpop.f32.mrb[105].mxu0  ;;  %v2500_v55 = vpop.f32.mrb[105].mxu1 }
 0x1f8   : > { %3529 = vst.msk [vmem:[%s5856_s12 + $0x94] sm:$0xf] %vm3491_vm1, %v4550_v52  ;;  %v2501_v46 = vadd.f32 %v2500_v55, %v1956_v0  ;;  %v6075_v53 = vpop.f32.mrb[106].mxu0  ;;  %v4757_v25 = vpop.f32.mrb[106].mxu1  ;;  %v1988_v52 = vadd.f32 %v5831_v45, %v6025_v42  ;;  %v1999_v33 = vadd.f32 %v5831_v45, %v6055_v7 }
 0x1f9   : > { %v2893_v34 = vmax.f32 %v2509_v57, 0.0  ;;  %v2512_v28 = vadd.f32 %v4757_v25, %v1967_v35  ;;  %v2008_v49 = vpop.f32.mrb[107].mxu0  ;;  %v2503_v18 = vpop.f32.mrb[107].mxu1 }
 0x1fa   : > { %v2891_v51 = vmax.f32 %v2501_v46, 0.0  ;;  %v2504_v60 = vadd.f32 %v2503_v18, %v1959_v9 }
 0x1fb   : > { %v4555_v13 = vpack.c.bf16 %v2893_v34, %v2893_v34  ;;  %v2894_v40 = vmax.f32 %v2512_v28, 0.0 }
 0x1fc   : > { %v4553_v19 = vpack.c.bf16 %v2891_v51, %v2891_v51  ;;  %v2892_v15 = vmax.f32 %v2504_v60, 0.0 }
 0x1fd   : > { %3534 = vst.msk [vmem:[%s5856_s12 + $0xa8] sm:$0xf] %vm3491_vm1, %v4555_v13  ;;  %v4556_v29 = vpack.c.bf16 %v2894_v40, %v2894_v40 }
 0x1fe   : > { %3532 = vst.msk [vmem:[%s5856_s12 + $0xa0] sm:$0xf] %vm3491_vm1, %v4553_v19  ;;  %v4554_v41 = vpack.c.bf16 %v2892_v15, %v2892_v15  ;;  %v2011_v36 = vpop.f32.mrb[108].mxu0  ;;  %v4760_v3 = vpop.f32.mrb[108].mxu1 }
 0x1ff   : > { %3535 = vst.msk [vmem:[%s5856_s12 + $0xac] sm:$0xf] %vm3491_vm1, %v4556_v29  ;;  %v2525_v4 = vadd.f32 %v4760_v3, %v1980_v12  ;;  %v2013_v59 = vpop.f32.mrb[109].mxu0  ;;  %v2516_v22 = vpop.f32.mrb[109].mxu1  ;;  %v2012_v61 = vadd.f32 %v5831_v45, %v2011_v36  ;;  %v2004_v29 = vadd.f32 %v5831_v45, %v6065_v63  ;;  %v2007_v36 = vadd.f32 %v5831_v45, %v6075_v53 }
 0x200   : > { %3533 = vst.msk [vmem:[%s5856_s12 + $0xa4] sm:$0xf] %vm3491_vm1, %v4554_v41  ;;  %v2517_v54 = vadd.f32 %v2516_v22, %v1972_v5  ;;  %v2014_v27 = vpop.f32.mrb[110].mxu0  ;;  %v4761_v48 = vpop.f32.mrb[110].mxu1 }
 0x201   : > { %v2897_v43 = vmax.f32 %v2525_v4, 0.0  ;;  %v2528_v16 = vadd.f32 %v4761_v48, %v1983_v11  ;;  %v2016_v39 = vpop.f32.mrb[111].mxu0  ;;  %v2519_v24 = vpop.f32.mrb[111].mxu1  ;;  %v2015_v11 = vadd.f32 %v5831_v45, %v2014_v27 }
 0x202   : > { %v2895_v47 = vmax.f32 %v2517_v54, 0.0  ;;  %v2520_v23 = vadd.f32 %v2519_v24, %v1975_v17 }
 0x203   : > { %v4559_v37 = vpack.c.bf16 %v2897_v43, %v2897_v43  ;;  %v2898_v1 = vmax.f32 %v2528_v16, 0.0 }
 0x204   : > { %v4557_v58 = vpack.c.bf16 %v2895_v47, %v2895_v47  ;;  %v2896_v10 = vmax.f32 %v2520_v23, 0.0 }
 0x205   : > { %3538 = vst.msk [vmem:[%s5856_s12 + $0xb8] sm:$0xf] %vm3491_vm1, %v4559_v37  ;;  %v4560_v0 = vpack.c.bf16 %v2898_v1, %v2898_v1 }
 0x206   : > { %3536 = vst.msk [vmem:[%s5856_s12 + $0xb0] sm:$0xf] %vm3491_vm1, %v4557_v58  ;;  %v4558_v30 = vpack.c.bf16 %v2896_v10, %v2896_v10  ;;  %v2019_v35 = vpop.f32.mrb[112].mxu0  ;;  %v4764_v57 = vpop.f32.mrb[112].mxu1 }
 0x207   : > { %3539 = vst.msk [vmem:[%s5856_s12 + $0xbc] sm:$0xf] %vm3491_vm1, %v4560_v0  ;;  %v2541_v55 = vadd.f32 %v4764_v57, %v1996_v31  ;;  %v2021_v9 = vpop.f32.mrb[113].mxu0  ;;  %v2532_v46 = vpop.f32.mrb[113].mxu1  ;;  %v2020_v10 = vadd.f32 %v5831_v45, %v2019_v35 }
 0x208   : > { %3537 = vst.msk [vmem:[%s5856_s12 + $0xb4] sm:$0xf] %vm3491_vm1, %v4558_v30  ;;  %v2533_v42 = vadd.f32 %v2532_v46, %v1988_v52  ;;  %v2022_v25 = vpop.f32.mrb[114].mxu0  ;;  %v4765_v34 = vpop.f32.mrb[114].mxu1 }
 0x209   : > { %v2901_v28 = vmax.f32 %v2541_v55, 0.0  ;;  %v2544_v49 = vadd.f32 %v4765_v34, %v1999_v33  ;;  %v2024_v18 = vpop.f32.mrb[115].mxu0  ;;  %v2535_v51 = vpop.f32.mrb[115].mxu1  ;;  %v2023_v9 = vadd.f32 %v5831_v45, %v2022_v25 }
 0x20a   : > { %v2899_v7 = vmax.f32 %v2533_v42, 0.0  ;;  %v2536_v60 = vadd.f32 %v2535_v51, %v1991_v21 }
 0x20b   : > { %v4563_v13 = vpack.c.bf16 %v2901_v28, %v2901_v28  ;;  %v2902_v40 = vmax.f32 %v2544_v49, 0.0 }
 0x20c   : > { %v4561_v19 = vpack.c.bf16 %v2899_v7, %v2899_v7  ;;  %v2900_v15 = vmax.f32 %v2536_v60, 0.0 }
 0x20d   : > { %3542 = vst.msk [vmem:[%s5856_s12 + $0xc8] sm:$0xf] %vm3491_vm1, %v4563_v13  ;;  %v4564_v12 = vpack.c.bf16 %v2902_v40, %v2902_v40 }
 0x20e   : > { %3540 = vst.msk [vmem:[%s5856_s12 + $0xc0] sm:$0xf] %vm3491_vm1, %v4561_v19  ;;  %v4562_v5 = vpack.c.bf16 %v2900_v15, %v2900_v15  ;;  %v2027_v41 = vpop.f32.mrb[116].mxu0  ;;  %v4768_v3 = vpop.f32.mrb[116].mxu1 }
 0x20f   : > { %3543 = vst.msk [vmem:[%s5856_s12 + $0xcc] sm:$0xf] %vm3491_vm1, %v4564_v12  ;;  %v2557_v4 = vadd.f32 %v4768_v3, %v2012_v61  ;;  %v2029_v59 = vpop.f32.mrb[117].mxu0  ;;  %v2548_v22 = vpop.f32.mrb[117].mxu1  ;;  %v2028_v53 = vadd.f32 %v5831_v45, %v2027_v41 }
 0x210   : > { %3541 = vst.msk [vmem:[%s5856_s12 + $0xc4] sm:$0xf] %vm3491_vm1, %v4562_v5  ;;  %v2549_v17 = vadd.f32 %v2548_v22, %v2004_v29  ;;  %v2030_v63 = vpop.f32.mrb[118].mxu0  ;;  %v4769_v54 = vpop.f32.mrb[118].mxu1 }
 0x211   : > { %v2905_v48 = vmax.f32 %v2557_v4, 0.0  ;;  %v2560_v43 = vadd.f32 %v4769_v54, %v2015_v11  ;;  %v2032_v16 = vpop.f32.mrb[119].mxu0  ;;  %v2551_v39 = vpop.f32.mrb[119].mxu1  ;;  %v2031_v30 = vadd.f32 %v5831_v45, %v2030_v63 }
 0x212   : > { %v2903_v27 = vmax.f32 %v2549_v17, 0.0  ;;  %v2552_v24 = vadd.f32 %v2551_v39, %v2007_v36 }
 0x213   : > { %v4567_v47 = vpack.c.bf16 %v2905_v48, %v2905_v48  ;;  %v2906_v23 = vmax.f32 %v2560_v43, 0.0 }
 0x214   : > { %v4565_v37 = vpack.c.bf16 %v2903_v27, %v2903_v27  ;;  %v2904_v1 = vmax.f32 %v2552_v24, 0.0 }
 0x215   : > { %3546 = vst.msk [vmem:[%s5856_s12 + $0xd8] sm:$0xf] %vm3491_vm1, %v4567_v47  ;;  %v4568_v58 = vpack.c.bf16 %v2906_v23, %v2906_v23 }
 0x216   : > { %3544 = vst.msk [vmem:[%s5856_s12 + $0xd0] sm:$0xf] %vm3491_vm1, %v4565_v37  ;;  %v4566_v31 = vpack.c.bf16 %v2904_v1, %v2904_v1  ;;  %v2035_v0 = vpop.f32.mrb[120].mxu0  ;;  %v4772_v52 = vpop.f32.mrb[120].mxu1 }
 0x217   : > { %3547 = vst.msk [vmem:[%s5856_s12 + $0xdc] sm:$0xf] %vm3491_vm1, %v4568_v58  ;;  %v2573_v57 = vadd.f32 %v4772_v52, %v2028_v53  ;;  %v2037_v33 = vpop.f32.mrb[121].mxu0  ;;  %v2564_v55 = vpop.f32.mrb[121].mxu1  ;;  %v2036_v19 = vadd.f32 %v5831_v45, %v2035_v0 }
 0x218   : > { %3545 = vst.msk [vmem:[%s5856_s12 + $0xd4] sm:$0xf] %vm3491_vm1, %v4566_v31  ;;  %v2565_v46 = vadd.f32 %v2564_v55, %v2020_v10  ;;  %v2038_v35 = vpop.f32.mrb[122].mxu0  ;;  %v4773_v21 = vpop.f32.mrb[122].mxu1 }
 0x219   : > { %v2909_v42 = vmax.f32 %v2573_v57, 0.0  ;;  %v2576_v34 = vadd.f32 %v4773_v21, %v2031_v30  ;;  %v2040_v28 = vpop.f32.mrb[123].mxu0  ;;  %v2567_v49 = vpop.f32.mrb[123].mxu1  ;;  %v2039_v3 = vadd.f32 %v5831_v45, %v2038_v35 }
 0x21a   : > { %v2907_v18 = vmax.f32 %v2565_v46, 0.0  ;;  %v2568_v51 = vadd.f32 %v2567_v49, %v2023_v9  ;;  %v6162_v49 = vld [vmem:[%s6642_s2] ss:$0 sm:$0xff] }
 0x21b   : > { %v4571_v7 = vpack.c.bf16 %v2909_v42, %v2909_v42  ;;  %v2910_v60 = vmax.f32 %v2576_v34, 0.0 }
 0x21c   : > { %v4569_v13 = vpack.c.bf16 %v2907_v18, %v2907_v18  ;;  %v2908_v40 = vmax.f32 %v2568_v51, 0.0 }
 0x21d   : > { %3550 = vst.msk [vmem:[%s5856_s12 + $0xe8] sm:$0xf] %vm3491_vm1, %v4571_v7  ;;  %v4572_v25 = vpack.c.bf16 %v2910_v60, %v2910_v60 }
 0x21e   : > { %3548 = vst.msk [vmem:[%s5856_s12 + $0xe0] sm:$0xf] %vm3491_vm1, %v4569_v13  ;;  %v4570_v15 = vpack.c.bf16 %v2908_v40, %v2908_v40  ;;  %v2043_v61 = vpop.f32.mrb[124].mxu0  ;;  %v4776_v12 = vpop.f32.mrb[124].mxu1 }
 0x21f   : > { %3551 = vst.msk [vmem:[%s5856_s12 + $0xec] sm:$0xf] %vm3491_vm1, %v4572_v25  ;;  %v2044_v29 = vadd.f32 %v5831_v45, %v2043_v61  ;;  %v2045_v5 = vpop.f32.mrb[125].mxu0  ;;  %v2580_v41 = vpop.f32.mrb[125].mxu1 }
 0x220   : > { %3549 = vst.msk [vmem:[%s5856_s12 + $0xe4] sm:$0xf] %vm3491_vm1, %v4570_v15  ;;  %v2581_v11 = vadd.f32 %v2580_v41, %v2036_v19  ;;  %v2046_v4 = vpop.f32.mrb[126].mxu0  ;;  %v4777_v59 = vpop.f32.mrb[126].mxu1 }
 0x221   : > { %v2589_v22 = vadd.f32 %v4776_v12, %v2044_v29  ;;  %v2047_v36 = vadd.f32 %v5831_v45, %v2046_v4  ;;  %v2048_v17 = vpop.f32.mrb[127].mxu0  ;;  %v2583_v63 = vpop.f32.mrb[127].mxu1 }
 0x222   : > { %v2911_v54 = vmax.f32 %v2581_v11, 0.0  ;;  %v2584_v48 = vadd.f32 %v2583_v63, %v2039_v3 }
 0x223   : > { %v2913_v43 = vmax.f32 %v2589_v22, 0.0  ;;  %v2592_v16 = vadd.f32 %v4777_v59, %v2047_v36 }
 0x224   : > { %v4573_v39 = vpack.c.bf16 %v2911_v54, %v2911_v54  ;;  %v2912_v27 = vmax.f32 %v2584_v48, 0.0 }
 0x225   : > { %v4575_v24 = vpack.c.bf16 %v2913_v43, %v2913_v43  ;;  %v2914_v47 = vmax.f32 %v2592_v16, 0.0 }
 0x226   : > { %3552 = vst.msk [vmem:[%s5856_s12 + $0xf0] sm:$0xf] %vm3491_vm1, %v4573_v39  ;;  %v4574_v23 = vpack.c.bf16 %v2912_v27, %v2912_v27  ;;  %v2051_v37 = vpop.f32.mrb[128].mxu0  ;;  %v4780_v1 = vpop.f32.mrb[128].mxu1 }
 0x227   : > { %3554 = vst.msk [vmem:[%s5856_s12 + $0xf8] sm:$0xf] %vm3491_vm1, %v4575_v24  ;;  %v4576_v53 = vpack.c.bf16 %v2914_v47, %v2914_v47  ;;  %v2052_v58 = vadd.f32 %v5831_v45, %v2051_v37  ;;  %v2053_v10 = vpop.f32.mrb[129].mxu0  ;;  %v2596_v31 = vpop.f32.mrb[129].mxu1 }
 0x228   : > { %3553 = vst.msk [vmem:[%s5856_s12 + $0xf4] sm:$0xf] %vm3491_vm1, %v4574_v23  ;;  %v2054_v0 = vpop.f32.mrb[130].mxu0  ;;  %v4781_v52 = vpop.f32.mrb[130].mxu1 }
 0x229   : > { %3555 = vst.msk [vmem:[%s5856_s12 + $0xfc] sm:$0xf] %vm3491_vm1, %v4576_v53  ;;  %v2597_v30 = vadd.f32 %v2596_v31, %v2052_v58  ;;  %v2055_v57 = vadd.f32 %v5831_v45, %v2054_v0  ;;  %v2056_v33 = vpop.f32.mrb[131].mxu0  ;;  %v2599_v55 = vpop.f32.mrb[131].mxu1 }
 0x22b   : > { %v2915_v9 = vmax.f32 %v2597_v30, 0.0  ;;  %v2600_v46 = vadd.f32 %v2599_v55, %v2055_v57 }
 0x22d   : > { %v4577_v35 = vpack.c.bf16 %v2915_v9, %v2915_v9  ;;  %v2916_v21 = vmax.f32 %v2600_v46, 0.0 }
 0x22e   : > { %v2059_v42 = vpop.f32.mrb[132].mxu0  ;;  %v4784_v34 = vpop.f32.mrb[132].mxu1 }
 0x22f   : > { %3556 = vst.msk [vmem:[%s5856_s12 + $0x100] sm:$0xf] %vm3491_vm1, %v4577_v35  ;;  %v4578_v28 = vpack.c.bf16 %v2916_v21, %v2916_v21  ;;  %v2060_v18 = vadd.f32 %v6162_v49, %v2059_v42  ;;  %v2061_v45 = vpop.f32.mrb[133].mxu0  ;;  %v2612_v51 = vpop.f32.mrb[133].mxu1 }
 0x230   : > { %v2062_v7 = vpop.f32.mrb[134].mxu0  ;;  %v4785_v60 = vpop.f32.mrb[134].mxu1 }
 0x231   : > { %3557 = vst.msk [vmem:[%s5856_s12 + $0x104] sm:$0xf] %vm3491_vm1, %v4578_v28  ;;  %v2605_v13 = vadd.f32 %v4780_v1, %v2060_v18  ;;  %v2063_v40 = vadd.f32 %v6162_v49, %v2062_v7  ;;  %v2064_v25 = vpop.f32.mrb[135].mxu0  ;;  %v2615_v19 = vpop.f32.mrb[135].mxu1 }
 0x233   : > { %v2917_v15 = vmax.f32 %v2605_v13, 0.0  ;;  %v2608_v61 = vadd.f32 %v4781_v52, %v2063_v40 }
 0x235   : > { %v4579_v12 = vpack.c.bf16 %v2917_v15, %v2917_v15  ;;  %v2918_v29 = vmax.f32 %v2608_v61, 0.0 }
 0x236   : > { %v2067_v5 = vpop.f32.mrb[136].mxu0  ;;  %v6168_v41 = vpop.f32.mrb[136].mxu1 }
 0x237   : > { %3558 = vst.msk [vmem:[%s5856_s12 + $0x108] sm:$0xf] %vm3491_vm1, %v4579_v12  ;;  %v4580_v3 = vpack.c.bf16 %v2918_v29, %v2918_v29  ;;  %v2068_v11 = vadd.f32 %v6162_v49, %v2067_v5  ;;  %v2069_v4 = vpop.f32.mrb[137].mxu0  ;;  %v2628_v59 = vpop.f32.mrb[137].mxu1 }
 0x238   : > { %v2070_v22 = vpop.f32.mrb[138].mxu0  ;;  %v4789_v36 = vpop.f32.mrb[138].mxu1 }
 0x239   : > { %3559 = vst.msk [vmem:[%s5856_s12 + $0x10c] sm:$0xf] %vm3491_vm1, %v4580_v3  ;;  %v2613_v17 = vadd.f32 %v2612_v51, %v2068_v11  ;;  %v2071_v63 = vadd.f32 %v6162_v49, %v2070_v22  ;;  %v2072_v54 = vpop.f32.mrb[139].mxu0  ;;  %v2631_v48 = vpop.f32.mrb[139].mxu1 }
 0x23b   : > { %v2919_v43 = vmax.f32 %v2613_v17, 0.0  ;;  %v2616_v16 = vadd.f32 %v2615_v19, %v2071_v63 }
 0x23d   : > { %v4581_v39 = vpack.c.bf16 %v2919_v43, %v2919_v43  ;;  %v2920_v27 = vmax.f32 %v2616_v16, 0.0 }
 0x23e   : > { %v2075_v24 = vpop.f32.mrb[140].mxu0  ;;  %v6176_v47 = vpop.f32.mrb[140].mxu1 }
 0x23f   : > { %3560 = vst.msk [vmem:[%s5856_s12 + $0x110] sm:$0xf] %vm3491_vm1, %v4581_v39  ;;  %v4582_v23 = vpack.c.bf16 %v2920_v27, %v2920_v27  ;;  %v2076_v37 = vadd.f32 %v6162_v49, %v2075_v24  ;;  %v2077_v1 = vpop.f32.mrb[141].mxu0  ;;  %v2644_v53 = vpop.f32.mrb[141].mxu1 }
 0x240   : > { %v2078_v58 = vpop.f32.mrb[142].mxu0  ;;  %v6181_v10 = vpop.f32.mrb[142].mxu1 }
 0x241   : > { %3561 = vst.msk [vmem:[%s5856_s12 + $0x114] sm:$0xf] %vm3491_vm1, %v4582_v23  ;;  %v2621_v31 = vadd.f32 %v4784_v34, %v2076_v37  ;;  %v2079_v0 = vadd.f32 %v6162_v49, %v2078_v58  ;;  %v2080_v52 = vpop.f32.mrb[143].mxu0  ;;  %v2647_v30 = vpop.f32.mrb[143].mxu1 }
 0x243   : > { %v2921_v57 = vmax.f32 %v2621_v31, 0.0  ;;  %v2624_v33 = vadd.f32 %v4785_v60, %v2079_v0 }
 0x245   : > { %v4583_v55 = vpack.c.bf16 %v2921_v57, %v2921_v57  ;;  %v2922_v9 = vmax.f32 %v2624_v33, 0.0 }
 0x246   : > { %v2083_v46 = vpop.f32.mrb[144].mxu0  ;;  %v6186_v35 = vpop.f32.mrb[144].mxu1 }
 0x247   : > { %3562 = vst.msk [vmem:[%s5856_s12 + $0x118] sm:$0xf] %vm3491_vm1, %v4583_v55  ;;  %v4584_v21 = vpack.c.bf16 %v2922_v9, %v2922_v9  ;;  %v2084_v42 = vadd.f32 %v6162_v49, %v2083_v46  ;;  %v2085_v28 = vpop.f32.mrb[145].mxu0  ;;  %v6191_v34 = vpop.f32.mrb[145].mxu1 }
 0x248   : > { %v2086_v18 = vpop.f32.mrb[146].mxu0  ;;  %v6193_v45 = vpop.f32.mrb[146].mxu1 }
 0x249   : > { %3563 = vst.msk [vmem:[%s5856_s12 + $0x11c] sm:$0xf] %vm3491_vm1, %v4584_v21  ;;  %v2629_v51 = vadd.f32 %v2628_v59, %v2084_v42  ;;  %v2087_v7 = vadd.f32 %v6162_v49, %v2086_v18  ;;  %v2088_v60 = vpop.f32.mrb[147].mxu0  ;;  %v6198_v13 = vpop.f32.mrb[147].mxu1 }
 0x24b   : > { %v2923_v40 = vmax.f32 %v2629_v51, 0.0  ;;  %v2632_v25 = vadd.f32 %v2631_v48, %v2087_v7 }
 0x24d   : > { %v4585_v19 = vpack.c.bf16 %v2923_v40, %v2923_v40  ;;  %v2924_v15 = vmax.f32 %v2632_v25, 0.0 }
 0x24e   : > { %v2091_v61 = vpop.f32.mrb[148].mxu0  ;;  %v6200_v12 = vpop.f32.mrb[148].mxu1 }
 0x24f   : > { %3564 = vst.msk [vmem:[%s5856_s12 + $0x120] sm:$0xf] %vm3491_vm1, %v4585_v19  ;;  %v4586_v29 = vpack.c.bf16 %v2924_v15, %v2924_v15  ;;  %v2092_v5 = vadd.f32 %v6162_v49, %v2091_v61  ;;  %v2093_v3 = vpop.f32.mrb[149].mxu0  ;;  %v6205_v11 = vpop.f32.mrb[149].mxu1 }
 0x250   : > { %v2094_v4 = vpop.f32.mrb[150].mxu0  ;;  %v6207_v59 = vpop.f32.mrb[150].mxu1 }
 0x251   : > { %3565 = vst.msk [vmem:[%s5856_s12 + $0x124] sm:$0xf] %vm3491_vm1, %v4586_v29  ;;  %v2637_v22 = vadd.f32 %v6168_v41, %v2092_v5  ;;  %v2095_v17 = vadd.f32 %v6162_v49, %v2094_v4  ;;  %v2096_v63 = vpop.f32.mrb[151].mxu0  ;;  %v6213_v54 = vpop.f32.mrb[151].mxu1  ;;  %v2188_v29 = vadd.f32 %v6162_v49, %v5622_v14  ;;  %v2180_v4 = vadd.f32 %v6162_v49, %v5608_v2 }
 0x252   : > { %v2183_v14 = vadd.f32 %v6162_v49, %v5614_v8 }
 0x253   : > { %v2925_v48 = vmax.f32 %v2637_v22, 0.0  ;;  %v2640_v43 = vadd.f32 %v4789_v36, %v2095_v17 }
 0x255   : > { %v4587_v16 = vpack.c.bf16 %v2925_v48, %v2925_v48  ;;  %v2926_v39 = vmax.f32 %v2640_v43, 0.0 }
 0x256   : > { %v2099_v27 = vpop.f32.mrb[152].mxu0  ;;  %v6215_v24 = vpop.f32.mrb[152].mxu1 }
 0x257   : > { %3566 = vst.msk [vmem:[%s5856_s12 + $0x128] sm:$0xf] %vm3491_vm1, %v4587_v16  ;;  %v4588_v23 = vpack.c.bf16 %v2926_v39, %v2926_v39  ;;  %v2100_v37 = vadd.f32 %v6162_v49, %v2099_v27  ;;  %v2101_v41 = vpop.f32.mrb[153].mxu0  ;;  %v6220_v1 = vpop.f32.mrb[153].mxu1 }
 0x258   : > { %v2102_v58 = vpop.f32.mrb[154].mxu0  ;;  %v6222_v31 = vpop.f32.mrb[154].mxu1 }
 0x259   : > { %3567 = vst.msk [vmem:[%s5856_s12 + $0x12c] sm:$0xf] %vm3491_vm1, %v4588_v23  ;;  %v2645_v36 = vadd.f32 %v2644_v53, %v2100_v37  ;;  %v2103_v0 = vadd.f32 %v6162_v49, %v2102_v58  ;;  %v2104_v52 = vpop.f32.mrb[155].mxu0  ;;  %v6227_v57 = vpop.f32.mrb[155].mxu1 }
 0x25b   : > { %v2927_v33 = vmax.f32 %v2645_v36, 0.0  ;;  %v2648_v55 = vadd.f32 %v2647_v30, %v2103_v0 }
 0x25d   : > { %v4589_v9 = vpack.c.bf16 %v2927_v33, %v2927_v33  ;;  %v2928_v46 = vmax.f32 %v2648_v55, 0.0 }
 0x25e   : > { %v2107_v21 = vpop.f32.mrb[156].mxu0  ;;  %v6229_v42 = vpop.f32.mrb[156].mxu1 }
 0x25f   : > { %3568 = vst.msk [vmem:[%s5856_s12 + $0x130] sm:$0xf] %vm3491_vm1, %v4589_v9  ;;  %v4590_v28 = vpack.c.bf16 %v2928_v46, %v2928_v46  ;;  %v2108_v18 = vadd.f32 %v6162_v49, %v2107_v21  ;;  %v2109_v51 = vpop.f32.mrb[157].mxu0  ;;  %v6234_v53 = vpop.f32.mrb[157].mxu1 }
 0x260   : > { %v2110_v7 = vpop.f32.mrb[158].mxu0  ;;  %v6236_v60 = vpop.f32.mrb[158].mxu1 }
 0x261   : > { %3569 = vst.msk [vmem:[%s5856_s12 + $0x134] sm:$0xf] %vm3491_vm1, %v4590_v28  ;;  %v2653_v30 = vadd.f32 %v6176_v47, %v2108_v18  ;;  %v2111_v40 = vadd.f32 %v6162_v49, %v2110_v7  ;;  %v2112_v25 = vpop.f32.mrb[159].mxu0  ;;  %v6242_v19 = vpop.f32.mrb[159].mxu1  ;;  %v2191_v47 = vadd.f32 %v6162_v49, %v5628_v20  ;;  %v2196_v7 = vadd.f32 %v6162_v49, %v5636_v26 }
 0x262   : > { %v2207_v25 = vadd.f32 %v6162_v49, %v5656_v44  ;;  %v2199_v26 = vadd.f32 %v6162_v49, %v5642_v32 }
 0x263   : > { %v2929_v15 = vmax.f32 %v2653_v30, 0.0  ;;  %v2656_v61 = vadd.f32 %v6181_v10, %v2111_v40 }
 0x265   : > { %v4591_v5 = vpack.c.bf16 %v2929_v15, %v2929_v15  ;;  %v2930_v3 = vmax.f32 %v2656_v61, 0.0 }
 0x266   : > { %v2115_v22 = vpop.f32.mrb[160].mxu0  ;;  %v4812_v17 = vpop.f32.mrb[160].mxu1 }
 0x267   : > { %3570 = vst.msk [vmem:[%s5856_s12 + $0x138] sm:$0xf] %vm3491_vm1, %v4591_v5  ;;  %v4592_v63 = vpack.c.bf16 %v2930_v3, %v2930_v3  ;;  %v2116_v48 = vadd.f32 %v6162_v49, %v2115_v22  ;;  %v2733_v10 = vadd.f32 %v4812_v17, %v2188_v29  ;;  %v2117_v43 = vpop.f32.mrb[161].mxu0  ;;  %v2724_v16 = vpop.f32.mrb[161].mxu1 }
 0x268   : > { %v2725_v39 = vadd.f32 %v2724_v16, %v2180_v4  ;;  %v2118_v27 = vpop.f32.mrb[162].mxu0  ;;  %v4813_v23 = vpop.f32.mrb[162].mxu1 }
 0x269   : > { %3571 = vst.msk [vmem:[%s5856_s12 + $0x13c] sm:$0xf] %vm3491_vm1, %v4592_v63  ;;  %v2661_v2 = vadd.f32 %v6191_v34, %v2116_v48  ;;  %v2949_v20 = vmax.f32 %v2733_v10, 0.0  ;;  %v2119_v37 = vadd.f32 %v6162_v49, %v2118_v27  ;;  %v2736_v41 = vadd.f32 %v4813_v23, %v2191_v47  ;;  %v2120_v58 = vpop.f32.mrb[163].mxu0  ;;  %v2727_v36 = vpop.f32.mrb[163].mxu1 }
 0x26a   : > { %v2947_v0 = vmax.f32 %v2725_v39, 0.0  ;;  %v2728_v52 = vadd.f32 %v2727_v36, %v2183_v14  ;;  %v2204_v34 = vadd.f32 %v6162_v49, %v5650_v38  ;;  %v2212_v58 = vadd.f32 %v6162_v49, %v5664_v50 }
 0x26b   : > { %v2931_v33 = vmax.f32 %v2661_v2, 0.0  ;;  %v4611_v55 = vpack.c.bf16 %v2949_v20, %v2949_v20  ;;  %v2664_v8 = vadd.f32 %v6198_v13, %v2119_v37  ;;  %v2950_v9 = vmax.f32 %v2736_v41, 0.0 }
 0x26c   : > { %v4609_v46 = vpack.c.bf16 %v2947_v0, %v2947_v0  ;;  %v2948_v21 = vmax.f32 %v2728_v52, 0.0  ;;  %v2223_v52 = vadd.f32 %v6162_v49, %v5684_v6  ;;  %v2215_v50 = vadd.f32 %v6162_v49, %v5670_v56 }
 0x26d   : > { %v4593_v28 = vpack.c.bf16 %v2931_v33, %v2931_v33  ;;  %3590 = vst.msk [vmem:[%s5856_s12 + $0x188] sm:$0xf] %vm3491_vm1, %v4611_v55  ;;  %v2932_v18 = vmax.f32 %v2664_v8, 0.0  ;;  %v4612_v51 = vpack.c.bf16 %v2950_v9, %v2950_v9 }
 0x26e   : > { %3588 = vst.msk [vmem:[%s5856_s12 + $0x180] sm:$0xf] %vm3491_vm1, %v4609_v46  ;;  %v4610_v30 = vpack.c.bf16 %v2948_v21, %v2948_v21  ;;  %v2123_v13 = vpop.f32.mrb[164].mxu0  ;;  %v4816_v40 = vpop.f32.mrb[164].mxu1 }
 0x26f   : > { %3572 = vst.msk [vmem:[%s5856_s12 + $0x140] sm:$0xf] %vm3491_vm1, %v4593_v28  ;;  %v4594_v38 = vpack.c.bf16 %v2932_v18, %v2932_v18  ;;  %3591 = vst.msk [vmem:[%s5856_s12 + $0x18c] sm:$0xf] %vm3491_vm1, %v4612_v51  ;;  %v2124_v15 = vadd.f32 %v6162_v49, %v2123_v13  ;;  %v2749_v61 = vadd.f32 %v4816_v40, %v2204_v34  ;;  %v2125_v29 = vpop.f32.mrb[165].mxu0  ;;  %v2740_v5 = vpop.f32.mrb[165].mxu1 }
 0x270   : > { %3589 = vst.msk [vmem:[%s5856_s12 + $0x184] sm:$0xf] %vm3491_vm1, %v4610_v30  ;;  %v2741_v3 = vadd.f32 %v2740_v5, %v2196_v7  ;;  %v2126_v4 = vpop.f32.mrb[166].mxu0  ;;  %v4817_v22 = vpop.f32.mrb[166].mxu1 }
 0x271   : > { %3573 = vst.msk [vmem:[%s5856_s12 + $0x144] sm:$0xf] %vm3491_vm1, %v4594_v38  ;;  %v2669_v44 = vadd.f32 %v6186_v35, %v2124_v15  ;;  %v2953_v17 = vmax.f32 %v2749_v61, 0.0  ;;  %v2127_v47 = vadd.f32 %v6162_v49, %v2126_v4  ;;  %v2752_v63 = vadd.f32 %v4817_v22, %v2207_v25  ;;  %v2128_v48 = vpop.f32.mrb[167].mxu0  ;;  %v2743_v10 = vpop.f32.mrb[167].mxu1  ;;  %v6666_v22 = vld [vmem:[#allocation3_spill] sm:$0xff] }
 0x272   : > { %v2951_v43 = vmax.f32 %v2741_v3, 0.0  ;;  %v2744_v16 = vadd.f32 %v2743_v10, %v2199_v26  ;;  %v2220_v35 = vadd.f32 %v6162_v49, %v5678_v62 }
 0x273   : > { %v2933_v32 = vmax.f32 %v2669_v44, 0.0  ;;  %v4615_v14 = vpack.c.bf16 %v2953_v17, %v2953_v17  ;;  %v2672_v39 = vadd.f32 %v6193_v45, %v2127_v47  ;;  %v2954_v27 = vmax.f32 %v2752_v63, 0.0  ;;  %v6667_v63 = vld [vmem:[#allocation6_spill] sm:$0xff] }
 0x274   : > { %v4613_v23 = vpack.c.bf16 %v2951_v43, %v2951_v43  ;;  %v2952_v2 = vmax.f32 %v2744_v16, 0.0  ;;  %v2228_v44 = vadd.f32 %v6162_v49, %v6666_v22  ;;  %v2239_v48 = vadd.f32 %v6162_v49, %v6667_v63 }
 0x275   : > { %v4595_v20 = vpack.c.bf16 %v2933_v32, %v2933_v32  ;;  %3594 = vst.msk [vmem:[%s5856_s12 + $0x198] sm:$0xf] %vm3491_vm1, %v4615_v14  ;;  %v2934_v37 = vmax.f32 %v2672_v39, 0.0  ;;  %v4616_v41 = vpack.c.bf16 %v2954_v27, %v2954_v27  ;;  %v6668_v39 = vld [vmem:[#allocation4_spill] sm:$0xff] }
 0x276   : > { %3592 = vst.msk [vmem:[%s5856_s12 + $0x190] sm:$0xf] %vm3491_vm1, %v4613_v23  ;;  %v4614_v36 = vpack.c.bf16 %v2952_v2, %v2952_v2  ;;  %v2131_v45 = vpop.f32.mrb[168].mxu0  ;;  %v4820_v0 = vpop.f32.mrb[168].mxu1  ;;  %v2231_v27 = vadd.f32 %v6162_v49, %v6668_v39 }
 0x277   : > { %3574 = vst.msk [vmem:[%s5856_s12 + $0x148] sm:$0xf] %vm3491_vm1, %v4595_v20  ;;  %v4596_v62 = vpack.c.bf16 %v2934_v37, %v2934_v37  ;;  %3595 = vst.msk [vmem:[%s5856_s12 + $0x19c] sm:$0xf] %vm3491_vm1, %v4616_v41  ;;  %v2132_v33 = vadd.f32 %v6162_v49, %v2131_v45  ;;  %v2765_v55 = vadd.f32 %v4820_v0, %v2220_v35  ;;  %v2133_v8 = vpop.f32.mrb[169].mxu0  ;;  %v2756_v9 = vpop.f32.mrb[169].mxu1 }
 0x278   : > { %3593 = vst.msk [vmem:[%s5856_s12 + $0x194] sm:$0xf] %vm3491_vm1, %v4614_v36  ;;  %v2757_v46 = vadd.f32 %v2756_v9, %v2212_v58  ;;  %v2134_v21 = vpop.f32.mrb[170].mxu0  ;;  %v4821_v34 = vpop.f32.mrb[170].mxu1 }
 0x279   : > { %3575 = vst.msk [vmem:[%s5856_s12 + $0x14c] sm:$0xf] %vm3491_vm1, %v4596_v62  ;;  %v2677_v6 = vadd.f32 %v6205_v11, %v2132_v33  ;;  %v2957_v28 = vmax.f32 %v2765_v55, 0.0  ;;  %v2135_v18 = vadd.f32 %v6162_v49, %v2134_v21  ;;  %v2768_v51 = vadd.f32 %v4821_v34, %v2223_v52  ;;  %v2136_v7 = vpop.f32.mrb[171].mxu0  ;;  %v2759_v30 = vpop.f32.mrb[171].mxu1  ;;  %v6665_v11 = vld [vmem:[#allocation5_spill] sm:$0xff] }
 0x27a   : > { %v2955_v13 = vmax.f32 %v2757_v46, 0.0  ;;  %v2760_v40 = vadd.f32 %v2759_v30, %v2215_v50  ;;  %v2236_v5 = vadd.f32 %v6162_v49, %v6665_v11  ;;  %v6671_v30 = vld [vmem:[#allocation10_spill] sm:$0xff] }
 0x27b   : > { %v2935_v56 = vmax.f32 %v2677_v6, 0.0  ;;  %v4619_v25 = vpack.c.bf16 %v2957_v28, %v2957_v28  ;;  %v2680_v38 = vadd.f32 %v6213_v54, %v2135_v18  ;;  %v2958_v15 = vmax.f32 %v2768_v51, 0.0  ;;  %v6670_v28 = vld [vmem:[#allocation7_spill] sm:$0xff] }
 0x27c   : > { %v4617_v61 = vpack.c.bf16 %v2955_v13, %v2955_v13  ;;  %v2956_v29 = vmax.f32 %v2760_v40, 0.0  ;;  %v2244_v18 = vadd.f32 %v6162_v49, %v6670_v28  ;;  %v2255_v13 = vadd.f32 %v6162_v49, %v6671_v30 }
 0x27d   : > { %v4597_v26 = vpack.c.bf16 %v2935_v56, %v2935_v56  ;;  %3598 = vst.msk [vmem:[%s5856_s12 + $0x1a8] sm:$0xf] %vm3491_vm1, %v4619_v25  ;;  %v2936_v3 = vmax.f32 %v2680_v38, 0.0  ;;  %v4620_v4 = vpack.c.bf16 %v2958_v15, %v2958_v15 }
 0x27e   : > { %3596 = vst.msk [vmem:[%s5856_s12 + $0x1a0] sm:$0xf] %vm3491_vm1, %v4617_v61  ;;  %v4618_v17 = vpack.c.bf16 %v2956_v29, %v2956_v29  ;;  %v2139_v54 = vpop.f32.mrb[172].mxu0  ;;  %v4824_v47 = vpop.f32.mrb[172].mxu1  ;;  %v6672_v61 = vld [vmem:[#allocation8_spill] sm:$0xff] }
 0x27f   : > { %3576 = vst.msk [vmem:[%s5856_s12 + $0x150] sm:$0xf] %vm3491_vm1, %v4597_v26  ;;  %v4598_v10 = vpack.c.bf16 %v2936_v3, %v2936_v3  ;;  %3599 = vst.msk [vmem:[%s5856_s12 + $0x1ac] sm:$0xf] %vm3491_vm1, %v4620_v4  ;;  %v2140_v43 = vadd.f32 %v6162_v49, %v2139_v54  ;;  %v2781_v16 = vadd.f32 %v4824_v47, %v2236_v5  ;;  %v2141_v32 = vpop.f32.mrb[173].mxu0  ;;  %v2772_v14 = vpop.f32.mrb[173].mxu1 }
 0x280   : > { %3597 = vst.msk [vmem:[%s5856_s12 + $0x1a4] sm:$0xf] %vm3491_vm1, %v4618_v17  ;;  %v2773_v23 = vadd.f32 %v2772_v14, %v2228_v44  ;;  %v2142_v2 = vpop.f32.mrb[174].mxu0  ;;  %v4825_v35 = vpop.f32.mrb[174].mxu1  ;;  %v2247_v29 = vadd.f32 %v6162_v49, %v6672_v61 }
 0x281   : > { %3577 = vst.msk [vmem:[%s5856_s12 + $0x154] sm:$0xf] %vm3491_vm1, %v4598_v10  ;;  %v2685_v20 = vadd.f32 %v6200_v12, %v2140_v43  ;;  %v2961_v37 = vmax.f32 %v2781_v16, 0.0  ;;  %v2143_v41 = vadd.f32 %v6162_v49, %v2142_v2  ;;  %v2784_v58 = vadd.f32 %v4825_v35, %v2239_v48  ;;  %v2144_v36 = vpop.f32.mrb[175].mxu0  ;;  %v2775_v45 = vpop.f32.mrb[175].mxu1  ;;  %v6669_v12 = vld [vmem:[#allocation9_spill] sm:$0xff] }
 0x282   : > { %v2959_v0 = vmax.f32 %v2773_v23, 0.0  ;;  %v2776_v52 = vadd.f32 %v2775_v45, %v2231_v27  ;;  %v2252_v46 = vadd.f32 %v6162_v49, %v6669_v12  ;;  %v6674_v35 = vld [vmem:[#allocation11_spill] sm:$0xff] }
 0x283   : > { %v2937_v62 = vmax.f32 %v2685_v20, 0.0  ;;  %v4623_v33 = vpack.c.bf16 %v2961_v37, %v2961_v37  ;;  %v2688_v55 = vadd.f32 %v6207_v59, %v2143_v41  ;;  %v2962_v8 = vmax.f32 %v2784_v58, 0.0  ;;  %v6675_v58 = vld [vmem:[#allocation14_spill] sm:$0xff] }
 0x284   : > { %v4621_v9 = vpack.c.bf16 %v2959_v0, %v2959_v0  ;;  %v2960_v50 = vmax.f32 %v2776_v52, 0.0  ;;  %v2260_v20 = vadd.f32 %v6162_v49, %v6674_v35  ;;  %v2271_v36 = vadd.f32 %v6162_v49, %v6675_v58 }
 0x285   : > { %v4599_v21 = vpack.c.bf16 %v2937_v62, %v2937_v62  ;;  %3602 = vst.msk [vmem:[%s5856_s12 + $0x1b8] sm:$0xf] %vm3491_vm1, %v4623_v33  ;;  %v2938_v34 = vmax.f32 %v2688_v55, 0.0  ;;  %v4624_v6 = vpack.c.bf16 %v2962_v8, %v2962_v8  ;;  %v6676_v55 = vld [vmem:[#allocation12_spill] sm:$0xff] }
 0x286   : > { %3600 = vst.msk [vmem:[%s5856_s12 + $0x1b0] sm:$0xf] %vm3491_vm1, %v4621_v9  ;;  %v4622_v51 = vpack.c.bf16 %v2960_v50, %v2960_v50  ;;  %v2147_v59 = vpop.f32.mrb[176].mxu0  ;;  %v4828_v7 = vpop.f32.mrb[176].mxu1  ;;  %v2263_v8 = vadd.f32 %v6162_v49, %v6676_v55  ;;  %v6682_v55 = vld [vmem:[#allocation19_spill] sm:$0xff] }
 0x287   : > { %3578 = vst.msk [vmem:[%s5856_s12 + $0x158] sm:$0xf] %vm3491_vm1, %v4599_v21  ;;  %v4600_v40 = vpack.c.bf16 %v2938_v34, %v2938_v34  ;;  %3603 = vst.msk [vmem:[%s5856_s12 + $0x1bc] sm:$0xf] %vm3491_vm1, %v4624_v6  ;;  %v2148_v56 = vadd.f32 %v6162_v49, %v2147_v59  ;;  %v2797_v25 = vadd.f32 %v4828_v7, %v2252_v46  ;;  %v2149_v38 = vpop.f32.mrb[177].mxu0  ;;  %v2788_v15 = vpop.f32.mrb[177].mxu1 }
 0x288   : > { %3601 = vst.msk [vmem:[%s5856_s12 + $0x1b4] sm:$0xf] %vm3491_vm1, %v4622_v51  ;;  %v2789_v11 = vadd.f32 %v2788_v15, %v2244_v18  ;;  %v2150_v5 = vpop.f32.mrb[178].mxu0  ;;  %v4829_v26 = vpop.f32.mrb[178].mxu1 }
 0x289   : > { %3579 = vst.msk [vmem:[%s5856_s12 + $0x15c] sm:$0xf] %vm3491_vm1, %v4600_v40  ;;  %v2693_v3 = vadd.f32 %v6220_v1, %v2148_v56  ;;  %v2965_v4 = vmax.f32 %v2797_v25, 0.0  ;;  %v2151_v22 = vadd.f32 %v6162_v49, %v2150_v5  ;;  %v2800_v44 = vadd.f32 %v4829_v26, %v2255_v13  ;;  %v2152_v17 = vpop.f32.mrb[179].mxu0  ;;  %v2791_v54 = vpop.f32.mrb[179].mxu1  ;;  %v6673_v1 = vld [vmem:[#allocation13_spill] sm:$0xff] }
 0x28a   : > { %v2963_v47 = vmax.f32 %v2789_v11, 0.0  ;;  %v2792_v63 = vadd.f32 %v2791_v54, %v2247_v29  ;;  %v2268_v39 = vadd.f32 %v6162_v49, %v6673_v1  ;;  %v6678_v11 = vld [vmem:[#allocation15_spill] sm:$0xff] }
 0x28b   : > { %v2939_v48 = vmax.f32 %v2693_v3, 0.0  ;;  %v4627_v10 = vpack.c.bf16 %v2965_v4, %v2965_v4  ;;  %v2696_v43 = vadd.f32 %v6227_v57, %v2151_v22  ;;  %v2966_v16 = vmax.f32 %v2800_v44, 0.0  ;;  %v6679_v4 = vld [vmem:[#allocation18_spill] sm:$0xff] }
 0x28c   : > { %v4625_v32 = vpack.c.bf16 %v2963_v47, %v2963_v47  ;;  %v2964_v14 = vmax.f32 %v2792_v63, 0.0  ;;  %v2276_v5 = vadd.f32 %v6162_v49, %v6678_v11  ;;  %v2287_v22 = vadd.f32 %v6162_v49, %v6679_v4 }
 0x28d   : > { %v4601_v27 = vpack.c.bf16 %v2939_v48, %v2939_v48  ;;  %3606 = vst.msk [vmem:[%s5856_s12 + $0x1c8] sm:$0xf] %vm3491_vm1, %v4627_v10  ;;  %v2940_v23 = vmax.f32 %v2696_v43, 0.0  ;;  %v4628_v2 = vpack.c.bf16 %v2966_v16, %v2966_v16  ;;  %v6680_v48 = vld [vmem:[#allocation16_spill] sm:$0xff] }
 0x28e   : > { %3604 = vst.msk [vmem:[%s5856_s12 + $0x1c0] sm:$0xf] %vm3491_vm1, %v4625_v32  ;;  %v4626_v37 = vpack.c.bf16 %v2964_v14, %v2964_v14  ;;  %v2155_v57 = vpop.f32.mrb[180].mxu0  ;;  %v4832_v41 = vpop.f32.mrb[180].mxu1  ;;  %v2279_v10 = vadd.f32 %v6162_v49, %v6680_v48 }
 0x28f   : > { %3580 = vst.msk [vmem:[%s5856_s12 + $0x160] sm:$0xf] %vm3491_vm1, %v4601_v27  ;;  %v4602_v45 = vpack.c.bf16 %v2940_v23, %v2940_v23  ;;  %3607 = vst.msk [vmem:[%s5856_s12 + $0x1cc] sm:$0xf] %vm3491_vm1, %v4628_v2  ;;  %v2156_v0 = vadd.f32 %v6162_v49, %v2155_v57  ;;  %v2813_v52 = vadd.f32 %v4832_v41, %v2268_v39  ;;  %v2157_v62 = vpop.f32.mrb[181].mxu0  ;;  %v2804_v33 = vpop.f32.mrb[181].mxu1 }
 0x290   : > { %3605 = vst.msk [vmem:[%s5856_s12 + $0x1c4] sm:$0xf] %vm3491_vm1, %v4626_v37  ;;  %v2805_v9 = vadd.f32 %v2804_v33, %v2260_v20  ;;  %v2158_v50 = vpop.f32.mrb[182].mxu0  ;;  %v4833_v12 = vpop.f32.mrb[182].mxu1 }
 0x291   : > { %3581 = vst.msk [vmem:[%s5856_s12 + $0x164] sm:$0xf] %vm3491_vm1, %v4602_v45  ;;  %v2701_v46 = vadd.f32 %v6215_v24, %v2156_v0  ;;  %v2969_v21 = vmax.f32 %v2813_v52, 0.0  ;;  %v2159_v34 = vadd.f32 %v6162_v49, %v2158_v50  ;;  %v2816_v6 = vadd.f32 %v4833_v12, %v2271_v36  ;;  %v2160_v28 = vpop.f32.mrb[183].mxu0  ;;  %v2807_v18 = vpop.f32.mrb[183].mxu1  ;;  %v6677_v24 = vld [vmem:[#allocation17_spill] sm:$0xff] }
 0x292   : > { %v2967_v51 = vmax.f32 %v2805_v9, 0.0  ;;  %v2808_v59 = vadd.f32 %v2807_v18, %v2263_v8  ;;  %v2284_v38 = vadd.f32 %v6162_v49, %v6677_v24  ;;  %v2292_v8 = vadd.f32 %v6162_v49, %v6682_v55  ;;  %v6683_v12 = vld [vmem:[#allocation22_spill] sm:$0xff] }
 0x293   : > { %v2941_v7 = vmax.f32 %v2701_v46, 0.0  ;;  %v4631_v30 = vpack.c.bf16 %v2969_v21, %v2969_v21  ;;  %v2704_v13 = vadd.f32 %v6222_v31, %v2159_v34  ;;  %v2970_v40 = vmax.f32 %v2816_v6, 0.0 }
 0x294   : > { %v4629_v56 = vpack.c.bf16 %v2967_v51, %v2967_v51  ;;  %v2968_v25 = vmax.f32 %v2808_v59, 0.0  ;;  %v2303_v46 = vadd.f32 %v6162_v49, %v6683_v12  ;;  %v6684_v51 = vld [vmem:[#allocation20_spill] sm:$0xff] }
 0x295   : > { %v4603_v15 = vpack.c.bf16 %v2941_v7, %v2941_v7  ;;  %3610 = vst.msk [vmem:[%s5856_s12 + $0x1d8] sm:$0xf] %vm3491_vm1, %v4631_v30  ;;  %v2942_v61 = vmax.f32 %v2704_v13, 0.0  ;;  %v4632_v29 = vpack.c.bf16 %v2970_v40, %v2970_v40  ;;  %v2295_v59 = vadd.f32 %v6162_v49, %v6684_v51 }
 0x296   : > { %3608 = vst.msk [vmem:[%s5856_s12 + $0x1d0] sm:$0xf] %vm3491_vm1, %v4629_v56  ;;  %v4630_v26 = vpack.c.bf16 %v2968_v25, %v2968_v25  ;;  %v2163_v31 = vpop.f32.mrb[184].mxu0  ;;  %v4836_v3 = vpop.f32.mrb[184].mxu1 }
 0x297   : > { %3582 = vst.msk [vmem:[%s5856_s12 + $0x168] sm:$0xf] %vm3491_vm1, %v4603_v15  ;;  %v4604_v44 = vpack.c.bf16 %v2942_v61, %v2942_v61  ;;  %3611 = vst.msk [vmem:[%s5856_s12 + $0x1dc] sm:$0xf] %vm3491_vm1, %v4632_v29  ;;  %v2164_v17 = vadd.f32 %v6162_v49, %v2163_v31  ;;  %v2829_v54 = vadd.f32 %v4836_v3, %v2284_v38  ;;  %v2165_v47 = vpop.f32.mrb[185].mxu0  ;;  %v2820_v63 = vpop.f32.mrb[185].mxu1 }
 0x298   : > { %3609 = vst.msk [vmem:[%s5856_s12 + $0x1d4] sm:$0xf] %vm3491_vm1, %v4630_v26  ;;  %v2821_v43 = vadd.f32 %v2820_v63, %v2276_v5  ;;  %v2166_v16 = vpop.f32.mrb[186].mxu0  ;;  %v4837_v32 = vpop.f32.mrb[186].mxu1 }
 0x299   : > { %3583 = vst.msk [vmem:[%s5856_s12 + $0x16c] sm:$0xf] %vm3491_vm1, %v4604_v44  ;;  %v2709_v14 = vadd.f32 %v6234_v53, %v2164_v17  ;;  %v2973_v1 = vmax.f32 %v2829_v54, 0.0  ;;  %v2167_v39 = vadd.f32 %v6162_v49, %v2166_v16  ;;  %v2832_v27 = vadd.f32 %v4837_v32, %v2287_v22  ;;  %v2168_v23 = vpop.f32.mrb[187].mxu0  ;;  %v2823_v2 = vpop.f32.mrb[187].mxu1  ;;  %v6681_v53 = vld [vmem:[#allocation21_spill] sm:$0xff] }
 0x29a   : > { %v2971_v35 = vmax.f32 %v2821_v43, 0.0  ;;  %v2824_v20 = vadd.f32 %v2823_v2, %v2279_v10  ;;  %v2300_v0 = vadd.f32 %v6162_v49, %v6681_v53 }
 0x29b   : > { %v2943_v37 = vmax.f32 %v2709_v14, 0.0  ;;  %v4635_v57 = vpack.c.bf16 %v2973_v1, %v2973_v1  ;;  %v2712_v41 = vadd.f32 %v6242_v19, %v2167_v39  ;;  %v2974_v58 = vmax.f32 %v2832_v27, 0.0 }
 0x29c   : > { %v4633_v36 = vpack.c.bf16 %v2971_v35, %v2971_v35  ;;  %v2972_v45 = vmax.f32 %v2824_v20, 0.0 }
 0x29d   : > { %v4605_v52 = vpack.c.bf16 %v2943_v37, %v2943_v37  ;;  %3614 = vst.msk [vmem:[%s5856_s12 + $0x1e8] sm:$0xf] %vm3491_vm1, %v4635_v57  ;;  %v2944_v62 = vmax.f32 %v2712_v41, 0.0  ;;  %v4636_v33 = vpack.c.bf16 %v2974_v58, %v2974_v58 }
 0x29e   : > { %3612 = vst.msk [vmem:[%s5856_s12 + $0x1e0] sm:$0xf] %vm3491_vm1, %v4633_v36  ;;  %v4634_v9 = vpack.c.bf16 %v2972_v45, %v2972_v45  ;;  %v2171_v19 = vpop.f32.mrb[188].mxu0  ;;  %v4840_v50 = vpop.f32.mrb[188].mxu1 }
 0x29f   : > { %3584 = vst.msk [vmem:[%s5856_s12 + $0x170] sm:$0xf] %vm3491_vm1, %v4605_v52  ;;  %v4606_v21 = vpack.c.bf16 %v2944_v62, %v2944_v62  ;;  %3615 = vst.msk [vmem:[%s5856_s12 + $0x1ec] sm:$0xf] %vm3491_vm1, %v4636_v33  ;;  %v2172_v34 = vadd.f32 %v6162_v49, %v2171_v19  ;;  %v2845_v6 = vadd.f32 %v4840_v50, %v2300_v0  ;;  %v2173_v28 = vpop.f32.mrb[189].mxu0  ;;  %v2836_v18 = vpop.f32.mrb[189].mxu1 }
 0x2a0   : > { %3613 = vst.msk [vmem:[%s5856_s12 + $0x1e4] sm:$0xf] %vm3491_vm1, %v4634_v9  ;;  %v2837_v7 = vadd.f32 %v2836_v18, %v2292_v8  ;;  %v2174_v30 = vpop.f32.mrb[190].mxu0  ;;  %v4841_v13 = vpop.f32.mrb[190].mxu1 }
 0x2a1   : > { %3585 = vst.msk [vmem:[%s5856_s12 + $0x174] sm:$0xf] %vm3491_vm1, %v4606_v21  ;;  %v2717_v40 = vadd.f32 %v6229_v42, %v2172_v34  ;;  %v2977_v56 = vmax.f32 %v2845_v6, 0.0  ;;  %v2175_v25 = vadd.f32 %v6162_v49, %v2174_v30  ;;  %v2848_v24 = vadd.f32 %v4841_v13, %v2303_v46  ;;  %v2176_v38 = vpop.f32.mrb[191].mxu0  ;;  %v2839_v15 = vpop.f32.mrb[191].mxu1 }
 0x2a2   : > { %v2975_v61 = vmax.f32 %v2837_v7, 0.0  ;;  %v2840_v29 = vadd.f32 %v2839_v15, %v2295_v59 }
 0x2a3   : > { %v2945_v11 = vmax.f32 %v2717_v40, 0.0  ;;  %v4639_v5 = vpack.c.bf16 %v2977_v56, %v2977_v56  ;;  %v2720_v26 = vadd.f32 %v6236_v60, %v2175_v25  ;;  %v2978_v31 = vmax.f32 %v2848_v24, 0.0  ;;  %3626 = sbr.rel (!%p5373_p4) target bundleno = 773 (0x305), region = 36 }
 0x2a4   : > { %v4637_v3 = vpack.c.bf16 %v2975_v61, %v2975_v61  ;;  %v2976_v42 = vmax.f32 %v2840_v29, 0.0 }
 0x2a5   : > { %v4607_v4 = vpack.c.bf16 %v2945_v11, %v2945_v11  ;;  %3618 = vst.msk [vmem:[%s5856_s12 + $0x1f8] sm:$0xf] %vm3491_vm1, %v4639_v5  ;;  %v2946_v49 = vmax.f32 %v2720_v26, 0.0  ;;  %v4640_v22 = vpack.c.bf16 %v2978_v31, %v2978_v31 }
 0x2a6   : > { %3616 = vst.msk [vmem:[%s5856_s12 + $0x1f0] sm:$0xf] %vm3491_vm1, %v4637_v3  ;;  %v4638_v44 = vpack.c.bf16 %v2976_v42, %v2976_v42 }
 0x2a7   : > { %3586 = vst.msk [vmem:[%s5856_s12 + $0x178] sm:$0xf] %vm3491_vm1, %v4607_v4  ;;  %v4608_v17 = vpack.c.bf16 %v2946_v49, %v2946_v49  ;;  %3619 = vst.msk [vmem:[%s5856_s12 + $0x1fc] sm:$0xf] %vm3491_vm1, %v4640_v22 }
 0x2a8   : > { %3617 = vst.msk [vmem:[%s5856_s12 + $0x1f4] sm:$0xf] %vm3491_vm1, %v4638_v44 }
 0x2a9   : > { %3587 = vst.msk [vmem:[%s5856_s12 + $0x17c] sm:$0xf] %vm3491_vm1, %v4608_v17 }
 0x2aa   : > { %s6692_s29 = smov (!%p3629_p8, %s3628_s29), 128 }
 0x2ab   : > { %s4498_s7 = sshll.u32 %s6692_s29, 6 }
 0x2ac   : > { %p4501_p9 = scmp.eq.s32.totalorder %s4498_s7, 0 }
 0x2ad   : > { %s6454_s8 = sshrl.u32 (!%p4501_p9), %s6692_s29, 6 }
 0x2ae   : > { %3637 = sbr.rel (%p4501_p9) target bundleno = 773 (0x305), region = 40  ;;  %p4502_p10 = scmp.le.s32.totalorder (!%p4501_p9), %s6454_s8, 0 }
 0x2b5   : > { %4042 = sbr.rel (%p4502_p10) target bundleno = 752 (0x2f0), region = 112  ;;  %s6685_s15 = smov (!%p4502_p10), %s6448_s6 }
 0x2b6   : > { %s6686_s20 = smov (!%p4502_p10), %s5856_s12  ;;  %s6463_s23 = smov (!%p4502_p10), 0  }
 0x2b7   : > { %s6465_s10 = smov (!%p4502_p10), 0  }
 0x2bc LB: >> { %v3653_v60 = vld [vmem:[%s5301_s20] sm:$0xf]  ;;  %v3655_v54 = vld [vmem:[%s5301_s20 + $0x4] sm:$0xf]  ;;  %v3657_v47 = vld [vmem:[%s5301_s20 + $0x8] sm:$0xf]  ;;  %s5309_s10 = sphi %s6465_s10, %s3647_s10   ;;  %s5305_s23 = sphi %s6463_s23, %s6687_s23   ;;  %s5301_s20 = sphi %s6686_s20, %s3786_s20   ;;  %s5297_s15 = sphi %s6685_s15, %s3787_s15  }
 0x2bd   : >> { %3654 = vst [vmem:[%s5297_s15] sm:$0xf] %v3653_v60  ;;  %3656 = vst [vmem:[%s5297_s15 + $0x4] sm:$0xf] %v3655_v54  ;;  %v3659_v63 = vld [vmem:[%s5301_s20 + $0xc] sm:$0xf]  ;;  %s3781_s11 = sadd.s32 1, %s5305_s23 }
 0x2be   : >> { %3658 = vst [vmem:[%s5297_s15 + $0x8] sm:$0xf] %v3657_v47  ;;  %v3661_v48 = vld [vmem:[%s5301_s20 + $0x10] sm:$0xf]  ;;  %v3663_v10 = vld [vmem:[%s5301_s20 + $0x14] sm:$0xf]  ;;  %p3782_p11 = scmp.ge.s32.totalorder %s3781_s11, %s6454_s8 }
 0x2bf   : >> { %3660 = vst [vmem:[%s5297_s15 + $0xc] sm:$0xf] %v3659_v63  ;;  %3662 = vst [vmem:[%s5297_s15 + $0x10] sm:$0xf] %v3661_v48  ;;  %v3665_v43 = vld [vmem:[%s5301_s20 + $0x18] sm:$0xf] }
 0x2c0   : >> { %3664 = vst [vmem:[%s5297_s15 + $0x14] sm:$0xf] %v3663_v10  ;;  %v3667_v16 = vld [vmem:[%s5301_s20 + $0x1c] sm:$0xf]  ;;  %v3669_v32 = vld [vmem:[%s5301_s20 + $0x20] sm:$0xf] }
 0x2c1   : >> { %3666 = vst [vmem:[%s5297_s15 + $0x18] sm:$0xf] %v3665_v43  ;;  %3668 = vst [vmem:[%s5297_s15 + $0x1c] sm:$0xf] %v3667_v16  ;;  %v3671_v14 = vld [vmem:[%s5301_s20 + $0x24] sm:$0xf] }
 0x2c2   : >> { %3670 = vst [vmem:[%s5297_s15 + $0x20] sm:$0xf] %v3669_v32  ;;  %v3673_v1 = vld [vmem:[%s5301_s20 + $0x28] sm:$0xf]  ;;  %v3675_v39 = vld [vmem:[%s5301_s20 + $0x2c] sm:$0xf] }
 0x2c3   : >> { %3672 = vst [vmem:[%s5297_s15 + $0x24] sm:$0xf] %v3671_v14  ;;  %3674 = vst [vmem:[%s5297_s15 + $0x28] sm:$0xf] %v3673_v1  ;;  %v3677_v27 = vld [vmem:[%s5301_s20 + $0x30] sm:$0xf] }
 0x2c4   : >> { %3676 = vst [vmem:[%s5297_s15 + $0x2c] sm:$0xf] %v3675_v39  ;;  %v3679_v23 = vld [vmem:[%s5301_s20 + $0x34] sm:$0xf]  ;;  %v3681_v2 = vld [vmem:[%s5301_s20 + $0x38] sm:$0xf] }
 0x2c5   : >> { %3678 = vst [vmem:[%s5297_s15 + $0x30] sm:$0xf] %v3677_v27  ;;  %3680 = vst [vmem:[%s5297_s15 + $0x34] sm:$0xf] %v3679_v23  ;;  %v3683_v35 = vld [vmem:[%s5301_s20 + $0x3c] sm:$0xf] }
 0x2c6   : >> { %3682 = vst [vmem:[%s5297_s15 + $0x38] sm:$0xf] %v3681_v2  ;;  %v3685_v20 = vld [vmem:[%s5301_s20 + $0x40] sm:$0xf]  ;;  %v3687_v37 = vld [vmem:[%s5301_s20 + $0x44] sm:$0xf] }
 0x2c7   : >> { %3684 = vst [vmem:[%s5297_s15 + $0x3c] sm:$0xf] %v3683_v35  ;;  %3686 = vst [vmem:[%s5297_s15 + $0x40] sm:$0xf] %v3685_v20  ;;  %v3689_v57 = vld [vmem:[%s5301_s20 + $0x48] sm:$0xf] }
 0x2c8   : >> { %3688 = vst [vmem:[%s5297_s15 + $0x44] sm:$0xf] %v3687_v37  ;;  %v3691_v41 = vld [vmem:[%s5301_s20 + $0x4c] sm:$0xf]  ;;  %v3693_v58 = vld [vmem:[%s5301_s20 + $0x50] sm:$0xf] }
 0x2c9   : >> { %3690 = vst [vmem:[%s5297_s15 + $0x48] sm:$0xf] %v3689_v57  ;;  %3692 = vst [vmem:[%s5297_s15 + $0x4c] sm:$0xf] %v3691_v41  ;;  %v3695_v36 = vld [vmem:[%s5301_s20 + $0x54] sm:$0xf] }
 0x2ca   : >> { %3694 = vst [vmem:[%s5297_s15 + $0x50] sm:$0xf] %v3693_v58  ;;  %v3697_v45 = vld [vmem:[%s5301_s20 + $0x58] sm:$0xf]  ;;  %v3699_v53 = vld [vmem:[%s5301_s20 + $0x5c] sm:$0xf] }
 0x2cb   : >> { %3696 = vst [vmem:[%s5297_s15 + $0x54] sm:$0xf] %v3695_v36  ;;  %3698 = vst [vmem:[%s5297_s15 + $0x58] sm:$0xf] %v3697_v45  ;;  %v3701_v0 = vld [vmem:[%s5301_s20 + $0x60] sm:$0xf] }
 0x2cc   : >> { %3700 = vst [vmem:[%s5297_s15 + $0x5c] sm:$0xf] %v3699_v53  ;;  %v3703_v52 = vld [vmem:[%s5301_s20 + $0x64] sm:$0xf]  ;;  %v3705_v62 = vld [vmem:[%s5301_s20 + $0x68] sm:$0xf] }
 0x2cd   : >> { %3702 = vst [vmem:[%s5297_s15 + $0x60] sm:$0xf] %v3701_v0  ;;  %3704 = vst [vmem:[%s5297_s15 + $0x64] sm:$0xf] %v3703_v52  ;;  %v3707_v33 = vld [vmem:[%s5301_s20 + $0x6c] sm:$0xf] }
 0x2ce   : >> { %3706 = vst [vmem:[%s5297_s15 + $0x68] sm:$0xf] %v3705_v62  ;;  %v3709_v55 = vld [vmem:[%s5301_s20 + $0x70] sm:$0xf]  ;;  %v3711_v8 = vld [vmem:[%s5301_s20 + $0x74] sm:$0xf] }
 0x2cf   : >> { %3708 = vst [vmem:[%s5297_s15 + $0x6c] sm:$0xf] %v3707_v33  ;;  %3710 = vst [vmem:[%s5297_s15 + $0x70] sm:$0xf] %v3709_v55  ;;  %v3713_v9 = vld [vmem:[%s5301_s20 + $0x78] sm:$0xf] }
 0x2d0   : >> { %3712 = vst [vmem:[%s5297_s15 + $0x74] sm:$0xf] %v3711_v8  ;;  %v3715_v19 = vld [vmem:[%s5301_s20 + $0x7c] sm:$0xf]  ;;  %v3717_v50 = vld [vmem:[%s5301_s20 + $0x80] sm:$0xf] }
 0x2d1   : >> { %3714 = vst [vmem:[%s5297_s15 + $0x78] sm:$0xf] %v3713_v9  ;;  %3716 = vst [vmem:[%s5297_s15 + $0x7c] sm:$0xf] %v3715_v19  ;;  %v3719_v12 = vld [vmem:[%s5301_s20 + $0x84] sm:$0xf] }
 0x2d2   : >> { %3718 = vst [vmem:[%s5297_s15 + $0x80] sm:$0xf] %v3717_v50  ;;  %v3721_v46 = vld [vmem:[%s5301_s20 + $0x88] sm:$0xf]  ;;  %v3723_v21 = vld [vmem:[%s5301_s20 + $0x8c] sm:$0xf] }
 0x2d3   : >> { %3720 = vst [vmem:[%s5297_s15 + $0x84] sm:$0xf] %v3719_v12  ;;  %3722 = vst [vmem:[%s5297_s15 + $0x88] sm:$0xf] %v3721_v46  ;;  %v3725_v34 = vld [vmem:[%s5301_s20 + $0x90] sm:$0xf] }
 0x2d4   : >> { %3724 = vst [vmem:[%s5297_s15 + $0x8c] sm:$0xf] %v3723_v21  ;;  %v3727_v6 = vld [vmem:[%s5301_s20 + $0x94] sm:$0xf]  ;;  %v3729_v28 = vld [vmem:[%s5301_s20 + $0x98] sm:$0xf] }
 0x2d5   : >> { %3726 = vst [vmem:[%s5297_s15 + $0x90] sm:$0xf] %v3725_v34  ;;  %3728 = vst [vmem:[%s5297_s15 + $0x94] sm:$0xf] %v3727_v6  ;;  %v3731_v18 = vld [vmem:[%s5301_s20 + $0x9c] sm:$0xf] }
 0x2d6   : >> { %3730 = vst [vmem:[%s5297_s15 + $0x98] sm:$0xf] %v3729_v28  ;;  %v3733_v51 = vld [vmem:[%s5301_s20 + $0xa0] sm:$0xf]  ;;  %v3735_v59 = vld [vmem:[%s5301_s20 + $0xa4] sm:$0xf] }
 0x2d7   : >> { %3732 = vst [vmem:[%s5297_s15 + $0x9c] sm:$0xf] %v3731_v18  ;;  %3734 = vst [vmem:[%s5297_s15 + $0xa0] sm:$0xf] %v3733_v51  ;;  %v3737_v7 = vld [vmem:[%s5301_s20 + $0xa8] sm:$0xf] }
 0x2d8   : >> { %3736 = vst [vmem:[%s5297_s15 + $0xa4] sm:$0xf] %v3735_v59  ;;  %v3739_v30 = vld [vmem:[%s5301_s20 + $0xac] sm:$0xf]  ;;  %v3741_v13 = vld [vmem:[%s5301_s20 + $0xb0] sm:$0xf] }
 0x2d9   : >> { %3738 = vst [vmem:[%s5297_s15 + $0xa8] sm:$0xf] %v3737_v7  ;;  %3740 = vst [vmem:[%s5297_s15 + $0xac] sm:$0xf] %v3739_v30  ;;  %v3743_v40 = vld [vmem:[%s5301_s20 + $0xb4] sm:$0xf] }
 0x2da   : >> { %3742 = vst [vmem:[%s5297_s15 + $0xb0] sm:$0xf] %v3741_v13  ;;  %v3745_v56 = vld [vmem:[%s5301_s20 + $0xb8] sm:$0xf]  ;;  %v3747_v25 = vld [vmem:[%s5301_s20 + $0xbc] sm:$0xf] }
 0x2db   : >> { %3744 = vst [vmem:[%s5297_s15 + $0xb4] sm:$0xf] %v3743_v40  ;;  %3746 = vst [vmem:[%s5297_s15 + $0xb8] sm:$0xf] %v3745_v56  ;;  %v3749_v24 = vld [vmem:[%s5301_s20 + $0xc0] sm:$0xf] }
 0x2dc   : >> { %3748 = vst [vmem:[%s5297_s15 + $0xbc] sm:$0xf] %v3747_v25  ;;  %v3751_v38 = vld [vmem:[%s5301_s20 + $0xc4] sm:$0xf]  ;;  %v3753_v15 = vld [vmem:[%s5301_s20 + $0xc8] sm:$0xf] }
 0x2dd   : >> { %3750 = vst [vmem:[%s5297_s15 + $0xc0] sm:$0xf] %v3749_v24  ;;  %3752 = vst [vmem:[%s5297_s15 + $0xc4] sm:$0xf] %v3751_v38  ;;  %v3755_v61 = vld [vmem:[%s5301_s20 + $0xcc] sm:$0xf] }
 0x2de   : >> { %3754 = vst [vmem:[%s5297_s15 + $0xc8] sm:$0xf] %v3753_v15  ;;  %v3757_v29 = vld [vmem:[%s5301_s20 + $0xd0] sm:$0xf]  ;;  %v3759_v11 = vld [vmem:[%s5301_s20 + $0xd4] sm:$0xf] }
 0x2df   : >> { %3756 = vst [vmem:[%s5297_s15 + $0xcc] sm:$0xf] %v3755_v61  ;;  %3758 = vst [vmem:[%s5297_s15 + $0xd0] sm:$0xf] %v3757_v29  ;;  %v3761_v5 = vld [vmem:[%s5301_s20 + $0xd8] sm:$0xf] }
 0x2e0   : >> { %3760 = vst [vmem:[%s5297_s15 + $0xd4] sm:$0xf] %v3759_v11  ;;  %v3763_v26 = vld [vmem:[%s5301_s20 + $0xdc] sm:$0xf]  ;;  %v3765_v31 = vld [vmem:[%s5301_s20 + $0xe0] sm:$0xf] }
 0x2e1   : >> { %3762 = vst [vmem:[%s5297_s15 + $0xd8] sm:$0xf] %v3761_v5  ;;  %3764 = vst [vmem:[%s5297_s15 + $0xdc] sm:$0xf] %v3763_v26  ;;  %v3767_v3 = vld [vmem:[%s5301_s20 + $0xe4] sm:$0xf] }
 0x2e2   : >> { %3766 = vst [vmem:[%s5297_s15 + $0xe0] sm:$0xf] %v3765_v31  ;;  %v3769_v42 = vld [vmem:[%s5301_s20 + $0xe8] sm:$0xf]  ;;  %v3771_v4 = vld [vmem:[%s5301_s20 + $0xec] sm:$0xf] }
 0x2e3   : >> { %3768 = vst [vmem:[%s5297_s15 + $0xe4] sm:$0xf] %v3767_v3  ;;  %3770 = vst [vmem:[%s5297_s15 + $0xe8] sm:$0xf] %v3769_v42  ;;  %v3773_v49 = vld [vmem:[%s5301_s20 + $0xf0] sm:$0xf] }
 0x2e4   : >> { %3772 = vst [vmem:[%s5297_s15 + $0xec] sm:$0xf] %v3771_v4  ;;  %v3775_v22 = vld [vmem:[%s5301_s20 + $0xf4] sm:$0xf]  ;;  %v3777_v44 = vld [vmem:[%s5301_s20 + $0xf8] sm:$0xf] }
 0x2e5   : >> { %3774 = vst [vmem:[%s5297_s15 + $0xf0] sm:$0xf] %v3773_v49  ;;  %3776 = vst [vmem:[%s5297_s15 + $0xf4] sm:$0xf] %v3775_v22  ;;  %v3779_v17 = vld [vmem:[%s5301_s20 + $0xfc] sm:$0xf] }
 0x2e6   : >> { %3778 = vst [vmem:[%s5297_s15 + $0xf8] sm:$0xf] %v3777_v44  ;;  %3780 = vst [vmem:[%s5297_s15 + $0xfc] sm:$0xf] %v3779_v17  ;;  %s6694_s11 = smov (%p3782_p11, %s3781_s11), 0  ;;  %s3647_s10 = sadd.s32 1, %s5309_s10  }
 0x2e7   : >> { %s4503_s14 = sshll.u32 %s6694_s11, 8  ;;  %p3646_p12 = scmp.ge.s32.totalorder %s3647_s10, %s6454_s8 }
 0x2e8   : >> { %s3786_s20 = scalar_lea.vmem %s5856_s12, %s4503_s14 [#allocation2]   ;;  %s3787_s15 = scalar_lea.vmem %s6448_s6, %s4503_s14  }
 0x2e9   : >> { %s6687_s23 = smov %s6694_s11  ;;  %3649 = sbr.rel (!%p3646_p12) target bundleno = 700 (0x2bc), region = 118 }
 0x2f0 PF: > { %s6622_s17 = sand.u32 63, %s6692_s29   ;;  %s4642_s18 = sshll.u32 %s6454_s8, 8 }
 0x2f1   : > { %s3792_s21 = scalar_lea.vmem %s5856_s12, %s4642_s18 [#allocation2]   ;;  %s3794_s22 = scalar_lea.vmem %s6448_s6, %s4642_s18  }
 0x2f2   : > { %p4508_p13 = scmp.le.s32.totalorder %s6622_s17, 0 }
 0x2f3   : > { %s5311_s24 = smov (!%p4508_p13), %s3794_s22   ;;  %s5315_s25 = smov (!%p4508_p13), %s3792_s21  }
 0x2f4   : > { %4056 = sbr.rel (%p4508_p13) target bundleno = 773 (0x305), region = 123  ;;  %s5319_s26 = smov (!%p4508_p13), 0  }
 0x2f5   : > { %s5323_s27 = smov (!%p4508_p13), 0  }
 0x2fb LB: >> { %v3804_v60 = vld [vmem:[%s5317_s25] sm:$0xf]  ;;  %s3806_s9 = sadd.s32 1, %s5321_s26  ;;  %s3798_s27 = sadd.s32 1, %s5325_s27   ;;  %s5325_s27 = sphi %s5323_s27, %s3798_s27   ;;  %s5321_s26 = sphi %s5319_s26, %s5320_s26   ;;  %s5317_s25 = sphi %s5315_s25, %s3811_s25   ;;  %s5313_s24 = sphi %s5311_s24, %s3812_s24  }
 0x2fc   : >> { %3805 = vst [vmem:[%s5313_s24] sm:$0xf] %v3804_v60  ;;  %p3807_p0 = scmp.ge.s32.totalorder %s3806_s9, %s6622_s17  ;;  %p3797_p1 = scmp.ge.s32.totalorder %s3798_s27, %s6622_s17 }
 0x2fe   : >> { %s6696_s9 = smov (%p3807_p0, %s3806_s9), 0  ;;  %3800 = sbr.rel (!%p3797_p1) target bundleno = 763 (0x2fb), region = 129 }
 0x2ff   : >> { %s4509_s12 = sshll.u32 %s6696_s9, 2  ;;  %s5320_s26 = smov %s6696_s9  }
 0x300   : >> { %s3811_s25 = scalar_lea.vmem %s3792_s21, %s4509_s12 [#allocation2]   ;;  %s3812_s24 = scalar_lea.vmem %s3794_s22, %s4509_s12  }
 0x305 PF: > { %p10_p2 = scmp.ge.s32.totalorder %s5363_s16, 4   ;;  %s6688_s12 = smov %s5289_s13 }
 0x306   : > { %s6689_s13 = smov %s5371_s19  ;;  %s6690_s14 = smov %s5363_s16 }
 0x307   :  { %12 = sbr.rel (!%p10_p2) target bundleno = 2 (0x2), region = 140 }

// kernel: net_forward.6
= control target key start
LH: loop header
LB: loop body
LE: loop exit
PB: predicated region body
PF: predicated region fallthrough
CT: control target
= control target key end

     0   :  { %vm2888_vm0 = vcmask 516096   ;;  %vm2889_vm1 = vsmask.f32 256  ;;  %s8093_s0 = inlined_call_operand.vmem [shape: bf16[24,2,12,2,64], index: 0, kind: input, shape index: {}]   ;;  %s8094_s1 = inlined_call_operand.vmem [shape: bf16[24,1,12,1,64], index: 1, kind: output, shape index: {}]  }
   0x1   :  { %v8_v0 = vld [vmem:[%s8093_s0] sm:$0x1]  ;;  %v20_v1 = vld [vmem:[%s8093_s0 + $0xc] sm:$0x1]  ;;  %v9_v3 = vld [vmem:[%s8093_s0 + $0x1] sm:$0x1] }
   0x2   :  { %v584_v2 = vmax.bf16 %v20_v1, %v8_v0  ;;  %v21_v4 = vld [vmem:[%s8093_s0 + $0xd] sm:$0x1]  ;;  %v10_v6 = vld [vmem:[%s8093_s0 + $0x2] sm:$0x1]  ;;  %v22_v7 = vld [vmem:[%s8093_s0 + $0xe] sm:$0x1] }
   0x3   :  { %v585_v5 = vmax.bf16 %v21_v4, %v9_v3  ;;  %v2891_v9 = vld [vmem:[%s8094_s1] sm:$0x1]  ;;  %v586_v10 = vmax.bf16 %v22_v7, %v10_v6  ;;  %v11_v11 = vld [vmem:[%s8093_s0 + $0x3] sm:$0x1]  ;;  %vm4081_vm2 = vmand %vm2888_vm0, %vm2889_vm1 }
   0x4   :  { %v873_v8 = vshrl.u32 %v584_v2, 16  ;;  %v2894_v14 = vld [vmem:[%s8094_s1 + $0x1] sm:$0x1]  ;;  %v23_v15 = vld [vmem:[%s8093_s0 + $0xf] sm:$0x1] }
   0x5   :  { %v878_v13 = vshrl.u32 %v585_v5, 16  ;;  %v883_v17 = vshrl.u32 %v586_v10, 16  ;;  %v587_v18 = vmax.bf16 %v23_v15, %v11_v11  ;;  %v12_v19 = vld [vmem:[%s8093_s0 + $0x4] sm:$0x1]  ;;  %v24_v20 = vld [vmem:[%s8093_s0 + $0x10] sm:$0x1] }
   0x6   :  { %v2600_v16 = vmax.bf16 %v873_v8, %v584_v2  ;;  %v2897_v22 = vld [vmem:[%s8094_s1 + $0x2] sm:$0x1]  ;;  %v588_v23 = vmax.bf16 %v24_v20, %v12_v19  ;;  %v13_v24 = vld [vmem:[%s8093_s0 + $0x5] sm:$0x1]  ;;  %v25_v25 = vld [vmem:[%s8093_s0 + $0x11] sm:$0x1] }
   0x7   :  { %v2601_v21 = vmax.bf16 %v878_v13, %v585_v5  ;;  %v2602_v27 = vmax.bf16 %v883_v17, %v586_v10  ;;  %v888_v28 = vshrl.u32 %v587_v18, 16  ;;  %v2900_v29 = vld [vmem:[%s8094_s1 + $0x3] sm:$0x1]  ;;  %v589_v30 = vmax.bf16 %v25_v25, %v13_v24  ;;  %v14_v31 = vld [vmem:[%s8093_s0 + $0x6] sm:$0x1] }
   0x8   :  { %v2892_v26 = vsel %vm4081_vm2, %v2600_v16, %v2891_v9  ;;  %v893_v33 = vshrl.u32 %v588_v23, 16  ;;  %v2903_v34 = vld [vmem:[%s8094_s1 + $0x4] sm:$0x1]  ;;  %v26_v35 = vld [vmem:[%s8093_s0 + $0x12] sm:$0x1] }
   0x9   :  { %2893 = vst [vmem:[%s8094_s1] sm:$0x1] %v2892_v26  ;;  %v2895_v32 = vsel %vm4081_vm2, %v2601_v21, %v2894_v14  ;;  %v2898_v36 = vsel %vm4081_vm2, %v2602_v27, %v2897_v22  ;;  %v2603_v37 = vmax.bf16 %v888_v28, %v587_v18  ;;  %v898_v38 = vshrl.u32 %v589_v30, 16  ;;  %v15_v40 = vld [vmem:[%s8093_s0 + $0x7] sm:$0x1]  ;;  %v27_v41 = vld [vmem:[%s8093_s0 + $0x13] sm:$0x1] }
   0xa   :  { %2896 = vst [vmem:[%s8094_s1 + $0x1] sm:$0x1] %v2895_v32  ;;  %v590_v39 = vmax.bf16 %v26_v35, %v14_v31  ;;  %2899 = vst [vmem:[%s8094_s1 + $0x2] sm:$0x1] %v2898_v36  ;;  %v2604_v42 = vmax.bf16 %v893_v33, %v588_v23  ;;  %v2906_v43 = vld [vmem:[%s8094_s1 + $0x5] sm:$0x1]  ;;  %v591_v44 = vmax.bf16 %v27_v41, %v15_v40 }
   0xb   :  { %v16_v45 = vld [vmem:[%s8093_s0 + $0x8] sm:$0x1]  ;;  %v28_v46 = vld [vmem:[%s8093_s0 + $0x14] sm:$0x1]  ;;  %v2901_v47 = vsel %vm4081_vm2, %v2603_v37, %v2900_v29  ;;  %v2605_v48 = vmax.bf16 %v898_v38, %v589_v30  ;;  %v2909_v50 = vld [vmem:[%s8094_s1 + $0x6] sm:$0x1] }
   0xc   :  { %v903_v49 = vshrl.u32 %v590_v39, 16  ;;  %v592_v51 = vmax.bf16 %v28_v46, %v16_v45  ;;  %v17_v52 = vld [vmem:[%s8093_s0 + $0x9] sm:$0x1]  ;;  %2902 = vst [vmem:[%s8094_s1 + $0x3] sm:$0x1] %v2901_v47  ;;  %v2904_v53 = vsel %vm4081_vm2, %v2604_v42, %v2903_v34  ;;  %v908_v54 = vshrl.u32 %v591_v44, 16 }
   0xd   :  { %v2912_v55 = vld [vmem:[%s8094_s1 + $0x7] sm:$0x1]  ;;  %v29_v56 = vld [vmem:[%s8093_s0 + $0x15] sm:$0x1]  ;;  %2905 = vst [vmem:[%s8094_s1 + $0x4] sm:$0x1] %v2904_v53  ;;  %v2907_v57 = vsel %vm4081_vm2, %v2605_v48, %v2906_v43 }
   0xe   :  { %v2606_v58 = vmax.bf16 %v903_v49, %v590_v39  ;;  %v913_v59 = vshrl.u32 %v592_v51, 16  ;;  %v593_v60 = vmax.bf16 %v29_v56, %v17_v52  ;;  %v18_v61 = vld [vmem:[%s8093_s0 + $0xa] sm:$0x1]  ;;  %v30_v62 = vld [vmem:[%s8093_s0 + $0x16] sm:$0x1]  ;;  %v2607_v63 = vmax.bf16 %v908_v54, %v591_v44 }
   0xf   :  { %2908 = vst [vmem:[%s8094_s1 + $0x5] sm:$0x1] %v2907_v57  ;;  %v2915_v0 = vld [vmem:[%s8094_s1 + $0x8] sm:$0x1]  ;;  %v594_v1 = vmax.bf16 %v30_v62, %v18_v61  ;;  %v19_v2 = vld [vmem:[%s8093_s0 + $0xb] sm:$0x1] }
  0x10   :  { %v31_v3 = vld [vmem:[%s8093_s0 + $0x17] sm:$0x1]  ;;  %v2910_v4 = vsel %vm4081_vm2, %v2606_v58, %v2909_v50  ;;  %v2608_v5 = vmax.bf16 %v913_v59, %v592_v51  ;;  %v918_v6 = vshrl.u32 %v593_v60, 16  ;;  %v2918_v7 = vld [vmem:[%s8094_s1 + $0x9] sm:$0x1]  ;;  %v2913_v10 = vsel %vm4081_vm2, %v2607_v63, %v2912_v55 }
  0x11   :  { %v595_v8 = vmax.bf16 %v31_v3, %v19_v2  ;;  %v32_v9 = vld [vmem:[%s8093_s0 + $0x18] sm:$0x1]  ;;  %2911 = vst [vmem:[%s8094_s1 + $0x6] sm:$0x1] %v2910_v4  ;;  %v923_v11 = vshrl.u32 %v594_v1, 16 }
  0x12   :  { %v2921_v13 = vld [vmem:[%s8094_s1 + $0xa] sm:$0x1]  ;;  %v44_v14 = vld [vmem:[%s8093_s0 + $0x24] sm:$0x1]  ;;  %2914 = vst [vmem:[%s8094_s1 + $0x7] sm:$0x1] %v2913_v10  ;;  %v2916_v15 = vsel %vm4081_vm2, %v2608_v5, %v2915_v0  ;;  %v2609_v16 = vmax.bf16 %v918_v6, %v593_v60 }
  0x13   :  { %v928_v17 = vshrl.u32 %v595_v8, 16  ;;  %v596_v18 = vmax.bf16 %v44_v14, %v32_v9  ;;  %v33_v19 = vld [vmem:[%s8093_s0 + $0x19] sm:$0x1]  ;;  %v45_v20 = vld [vmem:[%s8093_s0 + $0x25] sm:$0x1]  ;;  %v2610_v21 = vmax.bf16 %v923_v11, %v594_v1 }
  0x14   :  { %2917 = vst [vmem:[%s8094_s1 + $0x8] sm:$0x1] %v2916_v15  ;;  %v2924_v22 = vld [vmem:[%s8094_s1 + $0xb] sm:$0x1]  ;;  %v597_v23 = vmax.bf16 %v45_v20, %v33_v19  ;;  %v34_v24 = vld [vmem:[%s8093_s0 + $0x1a] sm:$0x1]  ;;  %v2919_v26 = vsel %vm4081_vm2, %v2609_v16, %v2918_v7 }
  0x15   :  { %v46_v25 = vld [vmem:[%s8093_s0 + $0x26] sm:$0x1]  ;;  %v2611_v27 = vmax.bf16 %v928_v17, %v595_v8  ;;  %v933_v28 = vshrl.u32 %v596_v18, 16  ;;  %v2927_v29 = vld [vmem:[%s8094_s1 + $0xc] sm:$0x1]  ;;  %v2922_v32 = vsel %vm4081_vm2, %v2610_v21, %v2921_v13 }
  0x16   :  { %v598_v30 = vmax.bf16 %v46_v25, %v34_v24  ;;  %v35_v31 = vld [vmem:[%s8093_s0 + $0x1b] sm:$0x1]  ;;  %2920 = vst [vmem:[%s8094_s1 + $0x9] sm:$0x1] %v2919_v26  ;;  %v938_v33 = vshrl.u32 %v597_v23, 16 }
  0x17   :  { %v2930_v34 = vld [vmem:[%s8094_s1 + $0xd] sm:$0x1]  ;;  %v47_v35 = vld [vmem:[%s8093_s0 + $0x27] sm:$0x1]  ;;  %2923 = vst [vmem:[%s8094_s1 + $0xa] sm:$0x1] %v2922_v32  ;;  %v2925_v36 = vsel %vm4081_vm2, %v2611_v27, %v2924_v22  ;;  %v2612_v37 = vmax.bf16 %v933_v28, %v596_v18 }
  0x18   :  { %v943_v38 = vshrl.u32 %v598_v30, 16  ;;  %v599_v39 = vmax.bf16 %v47_v35, %v35_v31  ;;  %v36_v40 = vld [vmem:[%s8093_s0 + $0x1c] sm:$0x1]  ;;  %v48_v41 = vld [vmem:[%s8093_s0 + $0x28] sm:$0x1]  ;;  %v2613_v42 = vmax.bf16 %v938_v33, %v597_v23 }
  0x19   :  { %2926 = vst [vmem:[%s8094_s1 + $0xb] sm:$0x1] %v2925_v36  ;;  %v2933_v43 = vld [vmem:[%s8094_s1 + $0xe] sm:$0x1]  ;;  %v600_v44 = vmax.bf16 %v48_v41, %v36_v40  ;;  %v37_v45 = vld [vmem:[%s8093_s0 + $0x1d] sm:$0x1]  ;;  %v2928_v47 = vsel %vm4081_vm2, %v2612_v37, %v2927_v29 }
  0x1a   :  { %v49_v46 = vld [vmem:[%s8093_s0 + $0x29] sm:$0x1]  ;;  %v2614_v48 = vmax.bf16 %v943_v38, %v598_v30  ;;  %v948_v49 = vshrl.u32 %v599_v39, 16  ;;  %v2936_v50 = vld [vmem:[%s8094_s1 + $0xf] sm:$0x1]  ;;  %v2931_v53 = vsel %vm4081_vm2, %v2613_v42, %v2930_v34 }
  0x1b   :  { %v601_v51 = vmax.bf16 %v49_v46, %v37_v45  ;;  %v38_v52 = vld [vmem:[%s8093_s0 + $0x1e] sm:$0x1]  ;;  %2929 = vst [vmem:[%s8094_s1 + $0xc] sm:$0x1] %v2928_v47  ;;  %v953_v54 = vshrl.u32 %v600_v44, 16 }
  0x1c   :  { %v2939_v55 = vld [vmem:[%s8094_s1 + $0x10] sm:$0x1]  ;;  %v50_v56 = vld [vmem:[%s8093_s0 + $0x2a] sm:$0x1]  ;;  %2932 = vst [vmem:[%s8094_s1 + $0xd] sm:$0x1] %v2931_v53  ;;  %v2934_v57 = vsel %vm4081_vm2, %v2614_v48, %v2933_v43  ;;  %v2615_v58 = vmax.bf16 %v948_v49, %v599_v39 }
  0x1d   :  { %v958_v59 = vshrl.u32 %v601_v51, 16  ;;  %v602_v60 = vmax.bf16 %v50_v56, %v38_v52  ;;  %v39_v61 = vld [vmem:[%s8093_s0 + $0x1f] sm:$0x1]  ;;  %v51_v62 = vld [vmem:[%s8093_s0 + $0x2b] sm:$0x1]  ;;  %v2616_v63 = vmax.bf16 %v953_v54, %v600_v44 }
  0x1e   :  { %2935 = vst [vmem:[%s8094_s1 + $0xe] sm:$0x1] %v2934_v57  ;;  %v2942_v0 = vld [vmem:[%s8094_s1 + $0x11] sm:$0x1]  ;;  %v603_v1 = vmax.bf16 %v51_v62, %v39_v61  ;;  %v40_v2 = vld [vmem:[%s8093_s0 + $0x20] sm:$0x1]  ;;  %v2937_v4 = vsel %vm4081_vm2, %v2615_v58, %v2936_v50 }
  0x1f   :  { %v52_v3 = vld [vmem:[%s8093_s0 + $0x2c] sm:$0x1]  ;;  %v2617_v5 = vmax.bf16 %v958_v59, %v601_v51  ;;  %v963_v6 = vshrl.u32 %v602_v60, 16  ;;  %v2945_v7 = vld [vmem:[%s8094_s1 + $0x12] sm:$0x1]  ;;  %v2940_v10 = vsel %vm4081_vm2, %v2616_v63, %v2939_v55 }
  0x20   :  { %v604_v8 = vmax.bf16 %v52_v3, %v40_v2  ;;  %v41_v9 = vld [vmem:[%s8093_s0 + $0x21] sm:$0x1]  ;;  %2938 = vst [vmem:[%s8094_s1 + $0xf] sm:$0x1] %v2937_v4  ;;  %v968_v11 = vshrl.u32 %v603_v1, 16 }
  0x21   :  { %v2948_v13 = vld [vmem:[%s8094_s1 + $0x13] sm:$0x1]  ;;  %v53_v14 = vld [vmem:[%s8093_s0 + $0x2d] sm:$0x1]  ;;  %2941 = vst [vmem:[%s8094_s1 + $0x10] sm:$0x1] %v2940_v10  ;;  %v2943_v15 = vsel %vm4081_vm2, %v2617_v5, %v2942_v0  ;;  %v2618_v16 = vmax.bf16 %v963_v6, %v602_v60 }
  0x22   :  { %v973_v17 = vshrl.u32 %v604_v8, 16  ;;  %v605_v18 = vmax.bf16 %v53_v14, %v41_v9  ;;  %v42_v19 = vld [vmem:[%s8093_s0 + $0x22] sm:$0x1]  ;;  %v54_v20 = vld [vmem:[%s8093_s0 + $0x2e] sm:$0x1]  ;;  %v2619_v21 = vmax.bf16 %v968_v11, %v603_v1 }
  0x23   :  { %2944 = vst [vmem:[%s8094_s1 + $0x11] sm:$0x1] %v2943_v15  ;;  %v2951_v22 = vld [vmem:[%s8094_s1 + $0x14] sm:$0x1]  ;;  %v606_v23 = vmax.bf16 %v54_v20, %v42_v19  ;;  %v43_v24 = vld [vmem:[%s8093_s0 + $0x23] sm:$0x1]  ;;  %v2946_v26 = vsel %vm4081_vm2, %v2618_v16, %v2945_v7 }
  0x24   :  { %v55_v25 = vld [vmem:[%s8093_s0 + $0x2f] sm:$0x1]  ;;  %v2620_v27 = vmax.bf16 %v973_v17, %v604_v8  ;;  %v978_v28 = vshrl.u32 %v605_v18, 16  ;;  %v2954_v29 = vld [vmem:[%s8094_s1 + $0x15] sm:$0x1]  ;;  %v2949_v32 = vsel %vm4081_vm2, %v2619_v21, %v2948_v13 }
  0x25   :  { %v607_v30 = vmax.bf16 %v55_v25, %v43_v24  ;;  %v56_v31 = vld [vmem:[%s8093_s0 + $0x30] sm:$0x1]  ;;  %2947 = vst [vmem:[%s8094_s1 + $0x12] sm:$0x1] %v2946_v26  ;;  %v983_v33 = vshrl.u32 %v606_v23, 16 }
  0x26   :  { %v2957_v34 = vld [vmem:[%s8094_s1 + $0x16] sm:$0x1]  ;;  %v68_v35 = vld [vmem:[%s8093_s0 + $0x3c] sm:$0x1]  ;;  %2950 = vst [vmem:[%s8094_s1 + $0x13] sm:$0x1] %v2949_v32  ;;  %v2952_v36 = vsel %vm4081_vm2, %v2620_v27, %v2951_v22  ;;  %v2621_v37 = vmax.bf16 %v978_v28, %v605_v18 }
  0x27   :  { %v988_v38 = vshrl.u32 %v607_v30, 16  ;;  %v608_v39 = vmax.bf16 %v68_v35, %v56_v31  ;;  %v57_v40 = vld [vmem:[%s8093_s0 + $0x31] sm:$0x1]  ;;  %v69_v41 = vld [vmem:[%s8093_s0 + $0x3d] sm:$0x1]  ;;  %v2622_v42 = vmax.bf16 %v983_v33, %v606_v23 }
  0x28   :  { %2953 = vst [vmem:[%s8094_s1 + $0x14] sm:$0x1] %v2952_v36  ;;  %v2960_v43 = vld [vmem:[%s8094_s1 + $0x17] sm:$0x1]  ;;  %v609_v44 = vmax.bf16 %v69_v41, %v57_v40  ;;  %v58_v45 = vld [vmem:[%s8093_s0 + $0x32] sm:$0x1]  ;;  %v2955_v47 = vsel %vm4081_vm2, %v2621_v37, %v2954_v29 }
  0x29   :  { %v70_v46 = vld [vmem:[%s8093_s0 + $0x3e] sm:$0x1]  ;;  %v2623_v48 = vmax.bf16 %v988_v38, %v607_v30  ;;  %v993_v49 = vshrl.u32 %v608_v39, 16  ;;  %v2963_v50 = vld [vmem:[%s8094_s1 + $0x18] sm:$0x1]  ;;  %v2958_v53 = vsel %vm4081_vm2, %v2622_v42, %v2957_v34 }
  0x2a   :  { %v610_v51 = vmax.bf16 %v70_v46, %v58_v45  ;;  %v59_v52 = vld [vmem:[%s8093_s0 + $0x33] sm:$0x1]  ;;  %2956 = vst [vmem:[%s8094_s1 + $0x15] sm:$0x1] %v2955_v47  ;;  %v998_v54 = vshrl.u32 %v609_v44, 16 }
  0x2b   :  { %v2966_v55 = vld [vmem:[%s8094_s1 + $0x19] sm:$0x1]  ;;  %v71_v56 = vld [vmem:[%s8093_s0 + $0x3f] sm:$0x1]  ;;  %2959 = vst [vmem:[%s8094_s1 + $0x16] sm:$0x1] %v2958_v53  ;;  %v2961_v57 = vsel %vm4081_vm2, %v2623_v48, %v2960_v43  ;;  %v2624_v58 = vmax.bf16 %v993_v49, %v608_v39 }
  0x2c   :  { %v1003_v59 = vshrl.u32 %v610_v51, 16  ;;  %v611_v60 = vmax.bf16 %v71_v56, %v59_v52  ;;  %v60_v61 = vld [vmem:[%s8093_s0 + $0x34] sm:$0x1]  ;;  %v72_v62 = vld [vmem:[%s8093_s0 + $0x40] sm:$0x1]  ;;  %v2625_v63 = vmax.bf16 %v998_v54, %v609_v44 }
  0x2d   :  { %2962 = vst [vmem:[%s8094_s1 + $0x17] sm:$0x1] %v2961_v57  ;;  %v2969_v0 = vld [vmem:[%s8094_s1 + $0x1a] sm:$0x1]  ;;  %v612_v1 = vmax.bf16 %v72_v62, %v60_v61  ;;  %v61_v2 = vld [vmem:[%s8093_s0 + $0x35] sm:$0x1]  ;;  %v2964_v4 = vsel %vm4081_vm2, %v2624_v58, %v2963_v50 }
  0x2e   :  { %v73_v3 = vld [vmem:[%s8093_s0 + $0x41] sm:$0x1]  ;;  %v2626_v5 = vmax.bf16 %v1003_v59, %v610_v51  ;;  %v1008_v6 = vshrl.u32 %v611_v60, 16  ;;  %v2972_v7 = vld [vmem:[%s8094_s1 + $0x1b] sm:$0x1]  ;;  %v2967_v10 = vsel %vm4081_vm2, %v2625_v63, %v2966_v55 }
  0x2f   :  { %v613_v8 = vmax.bf16 %v73_v3, %v61_v2  ;;  %v62_v9 = vld [vmem:[%s8093_s0 + $0x36] sm:$0x1]  ;;  %2965 = vst [vmem:[%s8094_s1 + $0x18] sm:$0x1] %v2964_v4  ;;  %v1013_v11 = vshrl.u32 %v612_v1, 16 }
  0x30   :  { %v2975_v13 = vld [vmem:[%s8094_s1 + $0x1c] sm:$0x1]  ;;  %v74_v14 = vld [vmem:[%s8093_s0 + $0x42] sm:$0x1]  ;;  %2968 = vst [vmem:[%s8094_s1 + $0x19] sm:$0x1] %v2967_v10  ;;  %v2970_v15 = vsel %vm4081_vm2, %v2626_v5, %v2969_v0  ;;  %v2627_v16 = vmax.bf16 %v1008_v6, %v611_v60 }
  0x31   :  { %v1018_v17 = vshrl.u32 %v613_v8, 16  ;;  %v614_v18 = vmax.bf16 %v74_v14, %v62_v9  ;;  %v63_v19 = vld [vmem:[%s8093_s0 + $0x37] sm:$0x1]  ;;  %v75_v20 = vld [vmem:[%s8093_s0 + $0x43] sm:$0x1]  ;;  %v2628_v21 = vmax.bf16 %v1013_v11, %v612_v1 }
  0x32   :  { %2971 = vst [vmem:[%s8094_s1 + $0x1a] sm:$0x1] %v2970_v15  ;;  %v2978_v22 = vld [vmem:[%s8094_s1 + $0x1d] sm:$0x1]  ;;  %v615_v23 = vmax.bf16 %v75_v20, %v63_v19  ;;  %v64_v24 = vld [vmem:[%s8093_s0 + $0x38] sm:$0x1]  ;;  %v2973_v26 = vsel %vm4081_vm2, %v2627_v16, %v2972_v7 }
  0x33   :  { %v76_v25 = vld [vmem:[%s8093_s0 + $0x44] sm:$0x1]  ;;  %v2629_v27 = vmax.bf16 %v1018_v17, %v613_v8  ;;  %v1023_v28 = vshrl.u32 %v614_v18, 16  ;;  %v2981_v29 = vld [vmem:[%s8094_s1 + $0x1e] sm:$0x1]  ;;  %v2976_v32 = vsel %vm4081_vm2, %v2628_v21, %v2975_v13 }
  0x34   :  { %v616_v30 = vmax.bf16 %v76_v25, %v64_v24  ;;  %v65_v31 = vld [vmem:[%s8093_s0 + $0x39] sm:$0x1]  ;;  %2974 = vst [vmem:[%s8094_s1 + $0x1b] sm:$0x1] %v2973_v26  ;;  %v1028_v33 = vshrl.u32 %v615_v23, 16 }
  0x35   :  { %v2984_v34 = vld [vmem:[%s8094_s1 + $0x1f] sm:$0x1]  ;;  %v77_v35 = vld [vmem:[%s8093_s0 + $0x45] sm:$0x1]  ;;  %2977 = vst [vmem:[%s8094_s1 + $0x1c] sm:$0x1] %v2976_v32  ;;  %v2979_v36 = vsel %vm4081_vm2, %v2629_v27, %v2978_v22  ;;  %v2630_v37 = vmax.bf16 %v1023_v28, %v614_v18 }
  0x36   :  { %v1033_v38 = vshrl.u32 %v616_v30, 16  ;;  %v617_v39 = vmax.bf16 %v77_v35, %v65_v31  ;;  %v66_v40 = vld [vmem:[%s8093_s0 + $0x3a] sm:$0x1]  ;;  %v78_v41 = vld [vmem:[%s8093_s0 + $0x46] sm:$0x1]  ;;  %v2631_v42 = vmax.bf16 %v1028_v33, %v615_v23 }
  0x37   :  { %2980 = vst [vmem:[%s8094_s1 + $0x1d] sm:$0x1] %v2979_v36  ;;  %v2987_v43 = vld [vmem:[%s8094_s1 + $0x20] sm:$0x1]  ;;  %v618_v44 = vmax.bf16 %v78_v41, %v66_v40  ;;  %v67_v45 = vld [vmem:[%s8093_s0 + $0x3b] sm:$0x1]  ;;  %v2982_v47 = vsel %vm4081_vm2, %v2630_v37, %v2981_v29 }
  0x38   :  { %v79_v46 = vld [vmem:[%s8093_s0 + $0x47] sm:$0x1]  ;;  %v2632_v48 = vmax.bf16 %v1033_v38, %v616_v30  ;;  %v1038_v49 = vshrl.u32 %v617_v39, 16  ;;  %v2990_v50 = vld [vmem:[%s8094_s1 + $0x21] sm:$0x1]  ;;  %v2985_v53 = vsel %vm4081_vm2, %v2631_v42, %v2984_v34 }
  0x39   :  { %v619_v51 = vmax.bf16 %v79_v46, %v67_v45  ;;  %v80_v52 = vld [vmem:[%s8093_s0 + $0x48] sm:$0x1]  ;;  %2983 = vst [vmem:[%s8094_s1 + $0x1e] sm:$0x1] %v2982_v47  ;;  %v1043_v54 = vshrl.u32 %v618_v44, 16 }
  0x3a   :  { %v2993_v55 = vld [vmem:[%s8094_s1 + $0x22] sm:$0x1]  ;;  %v92_v56 = vld [vmem:[%s8093_s0 + $0x54] sm:$0x1]  ;;  %2986 = vst [vmem:[%s8094_s1 + $0x1f] sm:$0x1] %v2985_v53  ;;  %v2988_v57 = vsel %vm4081_vm2, %v2632_v48, %v2987_v43  ;;  %v2633_v58 = vmax.bf16 %v1038_v49, %v617_v39 }
  0x3b   :  { %v1048_v59 = vshrl.u32 %v619_v51, 16  ;;  %v620_v60 = vmax.bf16 %v92_v56, %v80_v52  ;;  %v81_v61 = vld [vmem:[%s8093_s0 + $0x49] sm:$0x1]  ;;  %v93_v62 = vld [vmem:[%s8093_s0 + $0x55] sm:$0x1]  ;;  %v2634_v63 = vmax.bf16 %v1043_v54, %v618_v44 }
  0x3c   :  { %2989 = vst [vmem:[%s8094_s1 + $0x20] sm:$0x1] %v2988_v57  ;;  %v2996_v0 = vld [vmem:[%s8094_s1 + $0x23] sm:$0x1]  ;;  %v621_v1 = vmax.bf16 %v93_v62, %v81_v61  ;;  %v82_v2 = vld [vmem:[%s8093_s0 + $0x4a] sm:$0x1]  ;;  %v2991_v4 = vsel %vm4081_vm2, %v2633_v58, %v2990_v50 }
  0x3d   :  { %v94_v3 = vld [vmem:[%s8093_s0 + $0x56] sm:$0x1]  ;;  %v2635_v5 = vmax.bf16 %v1048_v59, %v619_v51  ;;  %v1053_v6 = vshrl.u32 %v620_v60, 16  ;;  %v2999_v7 = vld [vmem:[%s8094_s1 + $0x24] sm:$0x1]  ;;  %v2994_v10 = vsel %vm4081_vm2, %v2634_v63, %v2993_v55 }
  0x3e   :  { %v622_v8 = vmax.bf16 %v94_v3, %v82_v2  ;;  %v83_v9 = vld [vmem:[%s8093_s0 + $0x4b] sm:$0x1]  ;;  %2992 = vst [vmem:[%s8094_s1 + $0x21] sm:$0x1] %v2991_v4  ;;  %v1058_v11 = vshrl.u32 %v621_v1, 16 }
  0x3f   :  { %v3002_v13 = vld [vmem:[%s8094_s1 + $0x25] sm:$0x1]  ;;  %v95_v14 = vld [vmem:[%s8093_s0 + $0x57] sm:$0x1]  ;;  %2995 = vst [vmem:[%s8094_s1 + $0x22] sm:$0x1] %v2994_v10  ;;  %v2997_v15 = vsel %vm4081_vm2, %v2635_v5, %v2996_v0  ;;  %v2636_v16 = vmax.bf16 %v1053_v6, %v620_v60 }
  0x40   :  { %v1063_v17 = vshrl.u32 %v622_v8, 16  ;;  %v623_v18 = vmax.bf16 %v95_v14, %v83_v9  ;;  %v84_v19 = vld [vmem:[%s8093_s0 + $0x4c] sm:$0x1]  ;;  %v96_v20 = vld [vmem:[%s8093_s0 + $0x58] sm:$0x1]  ;;  %v2637_v21 = vmax.bf16 %v1058_v11, %v621_v1 }
  0x41   :  { %2998 = vst [vmem:[%s8094_s1 + $0x23] sm:$0x1] %v2997_v15  ;;  %v3005_v22 = vld [vmem:[%s8094_s1 + $0x26] sm:$0x1]  ;;  %v624_v23 = vmax.bf16 %v96_v20, %v84_v19  ;;  %v85_v24 = vld [vmem:[%s8093_s0 + $0x4d] sm:$0x1]  ;;  %v3000_v26 = vsel %vm4081_vm2, %v2636_v16, %v2999_v7 }
  0x42   :  { %v97_v25 = vld [vmem:[%s8093_s0 + $0x59] sm:$0x1]  ;;  %v2638_v27 = vmax.bf16 %v1063_v17, %v622_v8  ;;  %v1068_v28 = vshrl.u32 %v623_v18, 16  ;;  %v3008_v29 = vld [vmem:[%s8094_s1 + $0x27] sm:$0x1]  ;;  %v3003_v32 = vsel %vm4081_vm2, %v2637_v21, %v3002_v13 }
  0x43   :  { %v625_v30 = vmax.bf16 %v97_v25, %v85_v24  ;;  %v86_v31 = vld [vmem:[%s8093_s0 + $0x4e] sm:$0x1]  ;;  %3001 = vst [vmem:[%s8094_s1 + $0x24] sm:$0x1] %v3000_v26  ;;  %v1073_v33 = vshrl.u32 %v624_v23, 16 }
  0x44   :  { %v3011_v34 = vld [vmem:[%s8094_s1 + $0x28] sm:$0x1]  ;;  %v98_v35 = vld [vmem:[%s8093_s0 + $0x5a] sm:$0x1]  ;;  %3004 = vst [vmem:[%s8094_s1 + $0x25] sm:$0x1] %v3003_v32  ;;  %v3006_v36 = vsel %vm4081_vm2, %v2638_v27, %v3005_v22  ;;  %v2639_v37 = vmax.bf16 %v1068_v28, %v623_v18 }
  0x45   :  { %v1078_v38 = vshrl.u32 %v625_v30, 16  ;;  %v626_v39 = vmax.bf16 %v98_v35, %v86_v31  ;;  %v87_v40 = vld [vmem:[%s8093_s0 + $0x4f] sm:$0x1]  ;;  %v99_v41 = vld [vmem:[%s8093_s0 + $0x5b] sm:$0x1]  ;;  %v2640_v42 = vmax.bf16 %v1073_v33, %v624_v23 }
  0x46   :  { %3007 = vst [vmem:[%s8094_s1 + $0x26] sm:$0x1] %v3006_v36  ;;  %v3014_v43 = vld [vmem:[%s8094_s1 + $0x29] sm:$0x1]  ;;  %v627_v44 = vmax.bf16 %v99_v41, %v87_v40  ;;  %v88_v45 = vld [vmem:[%s8093_s0 + $0x50] sm:$0x1]  ;;  %v3009_v47 = vsel %vm4081_vm2, %v2639_v37, %v3008_v29 }
  0x47   :  { %v100_v46 = vld [vmem:[%s8093_s0 + $0x5c] sm:$0x1]  ;;  %v2641_v48 = vmax.bf16 %v1078_v38, %v625_v30  ;;  %v1083_v49 = vshrl.u32 %v626_v39, 16  ;;  %v3017_v50 = vld [vmem:[%s8094_s1 + $0x2a] sm:$0x1]  ;;  %v3012_v53 = vsel %vm4081_vm2, %v2640_v42, %v3011_v34 }
  0x48   :  { %v628_v51 = vmax.bf16 %v100_v46, %v88_v45  ;;  %v89_v52 = vld [vmem:[%s8093_s0 + $0x51] sm:$0x1]  ;;  %3010 = vst [vmem:[%s8094_s1 + $0x27] sm:$0x1] %v3009_v47  ;;  %v1088_v54 = vshrl.u32 %v627_v44, 16 }
  0x49   :  { %v3020_v55 = vld [vmem:[%s8094_s1 + $0x2b] sm:$0x1]  ;;  %v101_v56 = vld [vmem:[%s8093_s0 + $0x5d] sm:$0x1]  ;;  %3013 = vst [vmem:[%s8094_s1 + $0x28] sm:$0x1] %v3012_v53  ;;  %v3015_v57 = vsel %vm4081_vm2, %v2641_v48, %v3014_v43  ;;  %v2642_v58 = vmax.bf16 %v1083_v49, %v626_v39 }
  0x4a   :  { %v1093_v59 = vshrl.u32 %v628_v51, 16  ;;  %v629_v60 = vmax.bf16 %v101_v56, %v89_v52  ;;  %v90_v61 = vld [vmem:[%s8093_s0 + $0x52] sm:$0x1]  ;;  %v102_v62 = vld [vmem:[%s8093_s0 + $0x5e] sm:$0x1]  ;;  %v2643_v63 = vmax.bf16 %v1088_v54, %v627_v44 }
  0x4b   :  { %3016 = vst [vmem:[%s8094_s1 + $0x29] sm:$0x1] %v3015_v57  ;;  %v3023_v0 = vld [vmem:[%s8094_s1 + $0x2c] sm:$0x1]  ;;  %v630_v1 = vmax.bf16 %v102_v62, %v90_v61  ;;  %v91_v2 = vld [vmem:[%s8093_s0 + $0x53] sm:$0x1]  ;;  %v3018_v4 = vsel %vm4081_vm2, %v2642_v58, %v3017_v50 }
  0x4c   :  { %v103_v3 = vld [vmem:[%s8093_s0 + $0x5f] sm:$0x1]  ;;  %v2644_v5 = vmax.bf16 %v1093_v59, %v628_v51  ;;  %v1098_v6 = vshrl.u32 %v629_v60, 16  ;;  %v3026_v7 = vld [vmem:[%s8094_s1 + $0x2d] sm:$0x1]  ;;  %v3021_v10 = vsel %vm4081_vm2, %v2643_v63, %v3020_v55 }
  0x4d   :  { %v631_v8 = vmax.bf16 %v103_v3, %v91_v2  ;;  %v104_v9 = vld [vmem:[%s8093_s0 + $0x60] sm:$0x1]  ;;  %3019 = vst [vmem:[%s8094_s1 + $0x2a] sm:$0x1] %v3018_v4  ;;  %v1103_v11 = vshrl.u32 %v630_v1, 16 }
  0x4e   :  { %v3029_v13 = vld [vmem:[%s8094_s1 + $0x2e] sm:$0x1]  ;;  %v116_v14 = vld [vmem:[%s8093_s0 + $0x6c] sm:$0x1]  ;;  %3022 = vst [vmem:[%s8094_s1 + $0x2b] sm:$0x1] %v3021_v10  ;;  %v3024_v15 = vsel %vm4081_vm2, %v2644_v5, %v3023_v0  ;;  %v2645_v16 = vmax.bf16 %v1098_v6, %v629_v60 }
  0x4f   :  { %v1108_v17 = vshrl.u32 %v631_v8, 16  ;;  %v632_v18 = vmax.bf16 %v116_v14, %v104_v9  ;;  %v105_v19 = vld [vmem:[%s8093_s0 + $0x61] sm:$0x1]  ;;  %v117_v20 = vld [vmem:[%s8093_s0 + $0x6d] sm:$0x1]  ;;  %v2646_v21 = vmax.bf16 %v1103_v11, %v630_v1 }
  0x50   :  { %3025 = vst [vmem:[%s8094_s1 + $0x2c] sm:$0x1] %v3024_v15  ;;  %v3032_v22 = vld [vmem:[%s8094_s1 + $0x2f] sm:$0x1]  ;;  %v633_v23 = vmax.bf16 %v117_v20, %v105_v19  ;;  %v106_v24 = vld [vmem:[%s8093_s0 + $0x62] sm:$0x1]  ;;  %v3027_v26 = vsel %vm4081_vm2, %v2645_v16, %v3026_v7 }
  0x51   :  { %v118_v25 = vld [vmem:[%s8093_s0 + $0x6e] sm:$0x1]  ;;  %v2647_v27 = vmax.bf16 %v1108_v17, %v631_v8  ;;  %v1113_v28 = vshrl.u32 %v632_v18, 16  ;;  %v3035_v29 = vld [vmem:[%s8094_s1 + $0x30] sm:$0x1]  ;;  %v3030_v32 = vsel %vm4081_vm2, %v2646_v21, %v3029_v13 }
  0x52   :  { %v634_v30 = vmax.bf16 %v118_v25, %v106_v24  ;;  %v107_v31 = vld [vmem:[%s8093_s0 + $0x63] sm:$0x1]  ;;  %3028 = vst [vmem:[%s8094_s1 + $0x2d] sm:$0x1] %v3027_v26  ;;  %v1118_v33 = vshrl.u32 %v633_v23, 16 }
  0x53   :  { %v3038_v34 = vld [vmem:[%s8094_s1 + $0x31] sm:$0x1]  ;;  %v119_v35 = vld [vmem:[%s8093_s0 + $0x6f] sm:$0x1]  ;;  %3031 = vst [vmem:[%s8094_s1 + $0x2e] sm:$0x1] %v3030_v32  ;;  %v3033_v36 = vsel %vm4081_vm2, %v2647_v27, %v3032_v22  ;;  %v2648_v37 = vmax.bf16 %v1113_v28, %v632_v18 }
  0x54   :  { %v1123_v38 = vshrl.u32 %v634_v30, 16  ;;  %v635_v39 = vmax.bf16 %v119_v35, %v107_v31  ;;  %v108_v40 = vld [vmem:[%s8093_s0 + $0x64] sm:$0x1]  ;;  %v120_v41 = vld [vmem:[%s8093_s0 + $0x70] sm:$0x1]  ;;  %v2649_v42 = vmax.bf16 %v1118_v33, %v633_v23 }
  0x55   :  { %3034 = vst [vmem:[%s8094_s1 + $0x2f] sm:$0x1] %v3033_v36  ;;  %v3041_v43 = vld [vmem:[%s8094_s1 + $0x32] sm:$0x1]  ;;  %v636_v44 = vmax.bf16 %v120_v41, %v108_v40  ;;  %v109_v45 = vld [vmem:[%s8093_s0 + $0x65] sm:$0x1]  ;;  %v3036_v47 = vsel %vm4081_vm2, %v2648_v37, %v3035_v29 }
  0x56   :  { %v121_v46 = vld [vmem:[%s8093_s0 + $0x71] sm:$0x1]  ;;  %v2650_v48 = vmax.bf16 %v1123_v38, %v634_v30  ;;  %v1128_v49 = vshrl.u32 %v635_v39, 16  ;;  %v3044_v50 = vld [vmem:[%s8094_s1 + $0x33] sm:$0x1]  ;;  %v3039_v53 = vsel %vm4081_vm2, %v2649_v42, %v3038_v34 }
  0x57   :  { %v637_v51 = vmax.bf16 %v121_v46, %v109_v45  ;;  %v110_v52 = vld [vmem:[%s8093_s0 + $0x66] sm:$0x1]  ;;  %3037 = vst [vmem:[%s8094_s1 + $0x30] sm:$0x1] %v3036_v47  ;;  %v1133_v54 = vshrl.u32 %v636_v44, 16 }
  0x58   :  { %v3047_v55 = vld [vmem:[%s8094_s1 + $0x34] sm:$0x1]  ;;  %v122_v56 = vld [vmem:[%s8093_s0 + $0x72] sm:$0x1]  ;;  %3040 = vst [vmem:[%s8094_s1 + $0x31] sm:$0x1] %v3039_v53  ;;  %v3042_v57 = vsel %vm4081_vm2, %v2650_v48, %v3041_v43  ;;  %v2651_v58 = vmax.bf16 %v1128_v49, %v635_v39 }
  0x59   :  { %v1138_v59 = vshrl.u32 %v637_v51, 16  ;;  %v638_v60 = vmax.bf16 %v122_v56, %v110_v52  ;;  %v111_v61 = vld [vmem:[%s8093_s0 + $0x67] sm:$0x1]  ;;  %v123_v62 = vld [vmem:[%s8093_s0 + $0x73] sm:$0x1]  ;;  %v2652_v63 = vmax.bf16 %v1133_v54, %v636_v44 }
  0x5a   :  { %3043 = vst [vmem:[%s8094_s1 + $0x32] sm:$0x1] %v3042_v57  ;;  %v3050_v0 = vld [vmem:[%s8094_s1 + $0x35] sm:$0x1]  ;;  %v639_v1 = vmax.bf16 %v123_v62, %v111_v61  ;;  %v112_v2 = vld [vmem:[%s8093_s0 + $0x68] sm:$0x1]  ;;  %v3045_v4 = vsel %vm4081_vm2, %v2651_v58, %v3044_v50 }
  0x5b   :  { %v124_v3 = vld [vmem:[%s8093_s0 + $0x74] sm:$0x1]  ;;  %v2653_v5 = vmax.bf16 %v1138_v59, %v637_v51  ;;  %v1143_v6 = vshrl.u32 %v638_v60, 16  ;;  %v3053_v7 = vld [vmem:[%s8094_s1 + $0x36] sm:$0x1]  ;;  %v3048_v10 = vsel %vm4081_vm2, %v2652_v63, %v3047_v55 }
  0x5c   :  { %v640_v8 = vmax.bf16 %v124_v3, %v112_v2  ;;  %v113_v9 = vld [vmem:[%s8093_s0 + $0x69] sm:$0x1]  ;;  %3046 = vst [vmem:[%s8094_s1 + $0x33] sm:$0x1] %v3045_v4  ;;  %v1148_v11 = vshrl.u32 %v639_v1, 16 }
  0x5d   :  { %v3056_v13 = vld [vmem:[%s8094_s1 + $0x37] sm:$0x1]  ;;  %v125_v14 = vld [vmem:[%s8093_s0 + $0x75] sm:$0x1]  ;;  %3049 = vst [vmem:[%s8094_s1 + $0x34] sm:$0x1] %v3048_v10  ;;  %v3051_v15 = vsel %vm4081_vm2, %v2653_v5, %v3050_v0  ;;  %v2654_v16 = vmax.bf16 %v1143_v6, %v638_v60 }
  0x5e   :  { %v1153_v17 = vshrl.u32 %v640_v8, 16  ;;  %v641_v18 = vmax.bf16 %v125_v14, %v113_v9  ;;  %v114_v19 = vld [vmem:[%s8093_s0 + $0x6a] sm:$0x1]  ;;  %v126_v20 = vld [vmem:[%s8093_s0 + $0x76] sm:$0x1]  ;;  %v2655_v21 = vmax.bf16 %v1148_v11, %v639_v1 }
  0x5f   :  { %3052 = vst [vmem:[%s8094_s1 + $0x35] sm:$0x1] %v3051_v15  ;;  %v3059_v22 = vld [vmem:[%s8094_s1 + $0x38] sm:$0x1]  ;;  %v642_v23 = vmax.bf16 %v126_v20, %v114_v19  ;;  %v115_v24 = vld [vmem:[%s8093_s0 + $0x6b] sm:$0x1]  ;;  %v3054_v26 = vsel %vm4081_vm2, %v2654_v16, %v3053_v7 }
  0x60   :  { %v127_v25 = vld [vmem:[%s8093_s0 + $0x77] sm:$0x1]  ;;  %v2656_v27 = vmax.bf16 %v1153_v17, %v640_v8  ;;  %v1158_v28 = vshrl.u32 %v641_v18, 16  ;;  %v3062_v29 = vld [vmem:[%s8094_s1 + $0x39] sm:$0x1]  ;;  %v3057_v32 = vsel %vm4081_vm2, %v2655_v21, %v3056_v13 }
  0x61   :  { %v643_v30 = vmax.bf16 %v127_v25, %v115_v24  ;;  %v128_v31 = vld [vmem:[%s8093_s0 + $0x78] sm:$0x1]  ;;  %3055 = vst [vmem:[%s8094_s1 + $0x36] sm:$0x1] %v3054_v26  ;;  %v1163_v33 = vshrl.u32 %v642_v23, 16 }
  0x62   :  { %v3065_v34 = vld [vmem:[%s8094_s1 + $0x3a] sm:$0x1]  ;;  %v140_v35 = vld [vmem:[%s8093_s0 + $0x84] sm:$0x1]  ;;  %3058 = vst [vmem:[%s8094_s1 + $0x37] sm:$0x1] %v3057_v32  ;;  %v3060_v36 = vsel %vm4081_vm2, %v2656_v27, %v3059_v22  ;;  %v2657_v37 = vmax.bf16 %v1158_v28, %v641_v18 }
  0x63   :  { %v1168_v38 = vshrl.u32 %v643_v30, 16  ;;  %v644_v39 = vmax.bf16 %v140_v35, %v128_v31  ;;  %v129_v40 = vld [vmem:[%s8093_s0 + $0x79] sm:$0x1]  ;;  %v141_v41 = vld [vmem:[%s8093_s0 + $0x85] sm:$0x1]  ;;  %v2658_v42 = vmax.bf16 %v1163_v33, %v642_v23 }
  0x64   :  { %3061 = vst [vmem:[%s8094_s1 + $0x38] sm:$0x1] %v3060_v36  ;;  %v3068_v43 = vld [vmem:[%s8094_s1 + $0x3b] sm:$0x1]  ;;  %v645_v44 = vmax.bf16 %v141_v41, %v129_v40  ;;  %v130_v45 = vld [vmem:[%s8093_s0 + $0x7a] sm:$0x1]  ;;  %v3063_v47 = vsel %vm4081_vm2, %v2657_v37, %v3062_v29 }
  0x65   :  { %v142_v46 = vld [vmem:[%s8093_s0 + $0x86] sm:$0x1]  ;;  %v2659_v48 = vmax.bf16 %v1168_v38, %v643_v30  ;;  %v1173_v49 = vshrl.u32 %v644_v39, 16  ;;  %v3071_v50 = vld [vmem:[%s8094_s1 + $0x3c] sm:$0x1]  ;;  %v3066_v53 = vsel %vm4081_vm2, %v2658_v42, %v3065_v34 }
  0x66   :  { %v646_v51 = vmax.bf16 %v142_v46, %v130_v45  ;;  %v131_v52 = vld [vmem:[%s8093_s0 + $0x7b] sm:$0x1]  ;;  %3064 = vst [vmem:[%s8094_s1 + $0x39] sm:$0x1] %v3063_v47  ;;  %v1178_v54 = vshrl.u32 %v645_v44, 16 }
  0x67   :  { %v3074_v55 = vld [vmem:[%s8094_s1 + $0x3d] sm:$0x1]  ;;  %v143_v56 = vld [vmem:[%s8093_s0 + $0x87] sm:$0x1]  ;;  %3067 = vst [vmem:[%s8094_s1 + $0x3a] sm:$0x1] %v3066_v53  ;;  %v3069_v57 = vsel %vm4081_vm2, %v2659_v48, %v3068_v43  ;;  %v2660_v58 = vmax.bf16 %v1173_v49, %v644_v39 }
  0x68   :  { %v1183_v59 = vshrl.u32 %v646_v51, 16  ;;  %v647_v60 = vmax.bf16 %v143_v56, %v131_v52  ;;  %v132_v61 = vld [vmem:[%s8093_s0 + $0x7c] sm:$0x1]  ;;  %v144_v62 = vld [vmem:[%s8093_s0 + $0x88] sm:$0x1]  ;;  %v2661_v63 = vmax.bf16 %v1178_v54, %v645_v44 }
  0x69   :  { %3070 = vst [vmem:[%s8094_s1 + $0x3b] sm:$0x1] %v3069_v57  ;;  %v3077_v0 = vld [vmem:[%s8094_s1 + $0x3e] sm:$0x1]  ;;  %v648_v1 = vmax.bf16 %v144_v62, %v132_v61  ;;  %v133_v2 = vld [vmem:[%s8093_s0 + $0x7d] sm:$0x1]  ;;  %v3072_v4 = vsel %vm4081_vm2, %v2660_v58, %v3071_v50 }
  0x6a   :  { %v145_v3 = vld [vmem:[%s8093_s0 + $0x89] sm:$0x1]  ;;  %v2662_v5 = vmax.bf16 %v1183_v59, %v646_v51  ;;  %v1188_v6 = vshrl.u32 %v647_v60, 16  ;;  %v3080_v7 = vld [vmem:[%s8094_s1 + $0x3f] sm:$0x1]  ;;  %v3075_v10 = vsel %vm4081_vm2, %v2661_v63, %v3074_v55 }
  0x6b   :  { %v649_v8 = vmax.bf16 %v145_v3, %v133_v2  ;;  %v134_v9 = vld [vmem:[%s8093_s0 + $0x7e] sm:$0x1]  ;;  %3073 = vst [vmem:[%s8094_s1 + $0x3c] sm:$0x1] %v3072_v4  ;;  %v1193_v11 = vshrl.u32 %v648_v1, 16 }
  0x6c   :  { %v3083_v13 = vld [vmem:[%s8094_s1 + $0x40] sm:$0x1]  ;;  %v146_v14 = vld [vmem:[%s8093_s0 + $0x8a] sm:$0x1]  ;;  %3076 = vst [vmem:[%s8094_s1 + $0x3d] sm:$0x1] %v3075_v10  ;;  %v3078_v15 = vsel %vm4081_vm2, %v2662_v5, %v3077_v0  ;;  %v2663_v16 = vmax.bf16 %v1188_v6, %v647_v60 }
  0x6d   :  { %v1198_v17 = vshrl.u32 %v649_v8, 16  ;;  %v650_v18 = vmax.bf16 %v146_v14, %v134_v9  ;;  %v135_v19 = vld [vmem:[%s8093_s0 + $0x7f] sm:$0x1]  ;;  %v147_v20 = vld [vmem:[%s8093_s0 + $0x8b] sm:$0x1]  ;;  %v2664_v21 = vmax.bf16 %v1193_v11, %v648_v1 }
  0x6e   :  { %3079 = vst [vmem:[%s8094_s1 + $0x3e] sm:$0x1] %v3078_v15  ;;  %v3086_v22 = vld [vmem:[%s8094_s1 + $0x41] sm:$0x1]  ;;  %v651_v23 = vmax.bf16 %v147_v20, %v135_v19  ;;  %v136_v24 = vld [vmem:[%s8093_s0 + $0x80] sm:$0x1]  ;;  %v3081_v26 = vsel %vm4081_vm2, %v2663_v16, %v3080_v7 }
  0x6f   :  { %v148_v25 = vld [vmem:[%s8093_s0 + $0x8c] sm:$0x1]  ;;  %v2665_v27 = vmax.bf16 %v1198_v17, %v649_v8  ;;  %v1203_v28 = vshrl.u32 %v650_v18, 16  ;;  %v3089_v29 = vld [vmem:[%s8094_s1 + $0x42] sm:$0x1]  ;;  %v3084_v32 = vsel %vm4081_vm2, %v2664_v21, %v3083_v13 }
  0x70   :  { %v652_v30 = vmax.bf16 %v148_v25, %v136_v24  ;;  %v137_v31 = vld [vmem:[%s8093_s0 + $0x81] sm:$0x1]  ;;  %3082 = vst [vmem:[%s8094_s1 + $0x3f] sm:$0x1] %v3081_v26  ;;  %v1208_v33 = vshrl.u32 %v651_v23, 16 }
  0x71   :  { %v3092_v34 = vld [vmem:[%s8094_s1 + $0x43] sm:$0x1]  ;;  %v149_v35 = vld [vmem:[%s8093_s0 + $0x8d] sm:$0x1]  ;;  %3085 = vst [vmem:[%s8094_s1 + $0x40] sm:$0x1] %v3084_v32  ;;  %v3087_v36 = vsel %vm4081_vm2, %v2665_v27, %v3086_v22  ;;  %v2666_v37 = vmax.bf16 %v1203_v28, %v650_v18 }
  0x72   :  { %v1213_v38 = vshrl.u32 %v652_v30, 16  ;;  %v653_v39 = vmax.bf16 %v149_v35, %v137_v31  ;;  %v138_v40 = vld [vmem:[%s8093_s0 + $0x82] sm:$0x1]  ;;  %v150_v41 = vld [vmem:[%s8093_s0 + $0x8e] sm:$0x1]  ;;  %v2667_v42 = vmax.bf16 %v1208_v33, %v651_v23 }
  0x73   :  { %3088 = vst [vmem:[%s8094_s1 + $0x41] sm:$0x1] %v3087_v36  ;;  %v3095_v43 = vld [vmem:[%s8094_s1 + $0x44] sm:$0x1]  ;;  %v654_v44 = vmax.bf16 %v150_v41, %v138_v40  ;;  %v139_v45 = vld [vmem:[%s8093_s0 + $0x83] sm:$0x1]  ;;  %v3090_v47 = vsel %vm4081_vm2, %v2666_v37, %v3089_v29 }
  0x74   :  { %v151_v46 = vld [vmem:[%s8093_s0 + $0x8f] sm:$0x1]  ;;  %v2668_v48 = vmax.bf16 %v1213_v38, %v652_v30  ;;  %v1218_v49 = vshrl.u32 %v653_v39, 16  ;;  %v3098_v50 = vld [vmem:[%s8094_s1 + $0x45] sm:$0x1]  ;;  %v3093_v53 = vsel %vm4081_vm2, %v2667_v42, %v3092_v34 }
  0x75   :  { %v655_v51 = vmax.bf16 %v151_v46, %v139_v45  ;;  %v152_v52 = vld [vmem:[%s8093_s0 + $0x90] sm:$0x1]  ;;  %3091 = vst [vmem:[%s8094_s1 + $0x42] sm:$0x1] %v3090_v47  ;;  %v1223_v54 = vshrl.u32 %v654_v44, 16 }
  0x76   :  { %v3101_v55 = vld [vmem:[%s8094_s1 + $0x46] sm:$0x1]  ;;  %v164_v56 = vld [vmem:[%s8093_s0 + $0x9c] sm:$0x1]  ;;  %3094 = vst [vmem:[%s8094_s1 + $0x43] sm:$0x1] %v3093_v53  ;;  %v3096_v57 = vsel %vm4081_vm2, %v2668_v48, %v3095_v43  ;;  %v2669_v58 = vmax.bf16 %v1218_v49, %v653_v39 }
  0x77   :  { %v1228_v59 = vshrl.u32 %v655_v51, 16  ;;  %v656_v60 = vmax.bf16 %v164_v56, %v152_v52  ;;  %v153_v61 = vld [vmem:[%s8093_s0 + $0x91] sm:$0x1]  ;;  %v165_v62 = vld [vmem:[%s8093_s0 + $0x9d] sm:$0x1]  ;;  %v2670_v63 = vmax.bf16 %v1223_v54, %v654_v44 }
  0x78   :  { %3097 = vst [vmem:[%s8094_s1 + $0x44] sm:$0x1] %v3096_v57  ;;  %v3104_v0 = vld [vmem:[%s8094_s1 + $0x47] sm:$0x1]  ;;  %v657_v1 = vmax.bf16 %v165_v62, %v153_v61  ;;  %v154_v2 = vld [vmem:[%s8093_s0 + $0x92] sm:$0x1]  ;;  %v3099_v4 = vsel %vm4081_vm2, %v2669_v58, %v3098_v50 }
  0x79   :  { %v166_v3 = vld [vmem:[%s8093_s0 + $0x9e] sm:$0x1]  ;;  %v2671_v5 = vmax.bf16 %v1228_v59, %v655_v51  ;;  %v1233_v6 = vshrl.u32 %v656_v60, 16  ;;  %v3107_v7 = vld [vmem:[%s8094_s1 + $0x48] sm:$0x1]  ;;  %v3102_v10 = vsel %vm4081_vm2, %v2670_v63, %v3101_v55 }
  0x7a   :  { %v658_v8 = vmax.bf16 %v166_v3, %v154_v2  ;;  %v155_v9 = vld [vmem:[%s8093_s0 + $0x93] sm:$0x1]  ;;  %3100 = vst [vmem:[%s8094_s1 + $0x45] sm:$0x1] %v3099_v4  ;;  %v1238_v11 = vshrl.u32 %v657_v1, 16 }
  0x7b   :  { %v3110_v13 = vld [vmem:[%s8094_s1 + $0x49] sm:$0x1]  ;;  %v167_v14 = vld [vmem:[%s8093_s0 + $0x9f] sm:$0x1]  ;;  %3103 = vst [vmem:[%s8094_s1 + $0x46] sm:$0x1] %v3102_v10  ;;  %v3105_v15 = vsel %vm4081_vm2, %v2671_v5, %v3104_v0  ;;  %v2672_v16 = vmax.bf16 %v1233_v6, %v656_v60 }
  0x7c   :  { %v1243_v17 = vshrl.u32 %v658_v8, 16  ;;  %v659_v18 = vmax.bf16 %v167_v14, %v155_v9  ;;  %v156_v19 = vld [vmem:[%s8093_s0 + $0x94] sm:$0x1]  ;;  %v168_v20 = vld [vmem:[%s8093_s0 + $0xa0] sm:$0x1]  ;;  %v2673_v21 = vmax.bf16 %v1238_v11, %v657_v1 }
  0x7d   :  { %3106 = vst [vmem:[%s8094_s1 + $0x47] sm:$0x1] %v3105_v15  ;;  %v3113_v22 = vld [vmem:[%s8094_s1 + $0x4a] sm:$0x1]  ;;  %v660_v23 = vmax.bf16 %v168_v20, %v156_v19  ;;  %v157_v24 = vld [vmem:[%s8093_s0 + $0x95] sm:$0x1]  ;;  %v3108_v26 = vsel %vm4081_vm2, %v2672_v16, %v3107_v7 }
  0x7e   :  { %v169_v25 = vld [vmem:[%s8093_s0 + $0xa1] sm:$0x1]  ;;  %v2674_v27 = vmax.bf16 %v1243_v17, %v658_v8  ;;  %v1248_v28 = vshrl.u32 %v659_v18, 16  ;;  %v3116_v29 = vld [vmem:[%s8094_s1 + $0x4b] sm:$0x1]  ;;  %v3111_v32 = vsel %vm4081_vm2, %v2673_v21, %v3110_v13 }
  0x7f   :  { %v661_v30 = vmax.bf16 %v169_v25, %v157_v24  ;;  %v158_v31 = vld [vmem:[%s8093_s0 + $0x96] sm:$0x1]  ;;  %3109 = vst [vmem:[%s8094_s1 + $0x48] sm:$0x1] %v3108_v26  ;;  %v1253_v33 = vshrl.u32 %v660_v23, 16 }
  0x80   :  { %v3119_v34 = vld [vmem:[%s8094_s1 + $0x4c] sm:$0x1]  ;;  %v170_v35 = vld [vmem:[%s8093_s0 + $0xa2] sm:$0x1]  ;;  %3112 = vst [vmem:[%s8094_s1 + $0x49] sm:$0x1] %v3111_v32  ;;  %v3114_v36 = vsel %vm4081_vm2, %v2674_v27, %v3113_v22  ;;  %v2675_v37 = vmax.bf16 %v1248_v28, %v659_v18 }
  0x81   :  { %v1258_v38 = vshrl.u32 %v661_v30, 16  ;;  %v662_v39 = vmax.bf16 %v170_v35, %v158_v31  ;;  %v159_v40 = vld [vmem:[%s8093_s0 + $0x97] sm:$0x1]  ;;  %v171_v41 = vld [vmem:[%s8093_s0 + $0xa3] sm:$0x1]  ;;  %v2676_v42 = vmax.bf16 %v1253_v33, %v660_v23 }
  0x82   :  { %3115 = vst [vmem:[%s8094_s1 + $0x4a] sm:$0x1] %v3114_v36  ;;  %v3122_v43 = vld [vmem:[%s8094_s1 + $0x4d] sm:$0x1]  ;;  %v663_v44 = vmax.bf16 %v171_v41, %v159_v40  ;;  %v160_v45 = vld [vmem:[%s8093_s0 + $0x98] sm:$0x1]  ;;  %v3117_v47 = vsel %vm4081_vm2, %v2675_v37, %v3116_v29 }
  0x83   :  { %v172_v46 = vld [vmem:[%s8093_s0 + $0xa4] sm:$0x1]  ;;  %v2677_v48 = vmax.bf16 %v1258_v38, %v661_v30  ;;  %v1263_v49 = vshrl.u32 %v662_v39, 16  ;;  %v3125_v50 = vld [vmem:[%s8094_s1 + $0x4e] sm:$0x1]  ;;  %v3120_v53 = vsel %vm4081_vm2, %v2676_v42, %v3119_v34 }
  0x84   :  { %v664_v51 = vmax.bf16 %v172_v46, %v160_v45  ;;  %v161_v52 = vld [vmem:[%s8093_s0 + $0x99] sm:$0x1]  ;;  %3118 = vst [vmem:[%s8094_s1 + $0x4b] sm:$0x1] %v3117_v47  ;;  %v1268_v54 = vshrl.u32 %v663_v44, 16 }
  0x85   :  { %v3128_v55 = vld [vmem:[%s8094_s1 + $0x4f] sm:$0x1]  ;;  %v173_v56 = vld [vmem:[%s8093_s0 + $0xa5] sm:$0x1]  ;;  %3121 = vst [vmem:[%s8094_s1 + $0x4c] sm:$0x1] %v3120_v53  ;;  %v3123_v57 = vsel %vm4081_vm2, %v2677_v48, %v3122_v43  ;;  %v2678_v58 = vmax.bf16 %v1263_v49, %v662_v39 }
  0x86   :  { %v1273_v59 = vshrl.u32 %v664_v51, 16  ;;  %v665_v60 = vmax.bf16 %v173_v56, %v161_v52  ;;  %v162_v61 = vld [vmem:[%s8093_s0 + $0x9a] sm:$0x1]  ;;  %v174_v62 = vld [vmem:[%s8093_s0 + $0xa6] sm:$0x1]  ;;  %v2679_v63 = vmax.bf16 %v1268_v54, %v663_v44 }
  0x87   :  { %3124 = vst [vmem:[%s8094_s1 + $0x4d] sm:$0x1] %v3123_v57  ;;  %v3131_v0 = vld [vmem:[%s8094_s1 + $0x50] sm:$0x1]  ;;  %v666_v1 = vmax.bf16 %v174_v62, %v162_v61  ;;  %v163_v2 = vld [vmem:[%s8093_s0 + $0x9b] sm:$0x1]  ;;  %v3126_v4 = vsel %vm4081_vm2, %v2678_v58, %v3125_v50 }
  0x88   :  { %v175_v3 = vld [vmem:[%s8093_s0 + $0xa7] sm:$0x1]  ;;  %v2680_v5 = vmax.bf16 %v1273_v59, %v664_v51  ;;  %v1278_v6 = vshrl.u32 %v665_v60, 16  ;;  %v3134_v7 = vld [vmem:[%s8094_s1 + $0x51] sm:$0x1]  ;;  %v3129_v10 = vsel %vm4081_vm2, %v2679_v63, %v3128_v55 }
  0x89   :  { %v667_v8 = vmax.bf16 %v175_v3, %v163_v2  ;;  %v176_v9 = vld [vmem:[%s8093_s0 + $0xa8] sm:$0x1]  ;;  %3127 = vst [vmem:[%s8094_s1 + $0x4e] sm:$0x1] %v3126_v4  ;;  %v1283_v11 = vshrl.u32 %v666_v1, 16 }
  0x8a   :  { %v3137_v13 = vld [vmem:[%s8094_s1 + $0x52] sm:$0x1]  ;;  %v188_v14 = vld [vmem:[%s8093_s0 + $0xb4] sm:$0x1]  ;;  %3130 = vst [vmem:[%s8094_s1 + $0x4f] sm:$0x1] %v3129_v10  ;;  %v3132_v15 = vsel %vm4081_vm2, %v2680_v5, %v3131_v0  ;;  %v2681_v16 = vmax.bf16 %v1278_v6, %v665_v60 }
  0x8b   :  { %v1288_v17 = vshrl.u32 %v667_v8, 16  ;;  %v668_v18 = vmax.bf16 %v188_v14, %v176_v9  ;;  %v177_v19 = vld [vmem:[%s8093_s0 + $0xa9] sm:$0x1]  ;;  %v189_v20 = vld [vmem:[%s8093_s0 + $0xb5] sm:$0x1]  ;;  %v2682_v21 = vmax.bf16 %v1283_v11, %v666_v1 }
  0x8c   :  { %3133 = vst [vmem:[%s8094_s1 + $0x50] sm:$0x1] %v3132_v15  ;;  %v3140_v22 = vld [vmem:[%s8094_s1 + $0x53] sm:$0x1]  ;;  %v669_v23 = vmax.bf16 %v189_v20, %v177_v19  ;;  %v178_v24 = vld [vmem:[%s8093_s0 + $0xaa] sm:$0x1]  ;;  %v3135_v26 = vsel %vm4081_vm2, %v2681_v16, %v3134_v7 }
  0x8d   :  { %v190_v25 = vld [vmem:[%s8093_s0 + $0xb6] sm:$0x1]  ;;  %v2683_v27 = vmax.bf16 %v1288_v17, %v667_v8  ;;  %v1293_v28 = vshrl.u32 %v668_v18, 16  ;;  %v3143_v29 = vld [vmem:[%s8094_s1 + $0x54] sm:$0x1]  ;;  %v3138_v32 = vsel %vm4081_vm2, %v2682_v21, %v3137_v13 }
  0x8e   :  { %v670_v30 = vmax.bf16 %v190_v25, %v178_v24  ;;  %v179_v31 = vld [vmem:[%s8093_s0 + $0xab] sm:$0x1]  ;;  %3136 = vst [vmem:[%s8094_s1 + $0x51] sm:$0x1] %v3135_v26  ;;  %v1298_v33 = vshrl.u32 %v669_v23, 16 }
  0x8f   :  { %v3146_v34 = vld [vmem:[%s8094_s1 + $0x55] sm:$0x1]  ;;  %v191_v35 = vld [vmem:[%s8093_s0 + $0xb7] sm:$0x1]  ;;  %3139 = vst [vmem:[%s8094_s1 + $0x52] sm:$0x1] %v3138_v32  ;;  %v3141_v36 = vsel %vm4081_vm2, %v2683_v27, %v3140_v22  ;;  %v2684_v37 = vmax.bf16 %v1293_v28, %v668_v18 }
  0x90   :  { %v1303_v38 = vshrl.u32 %v670_v30, 16  ;;  %v671_v39 = vmax.bf16 %v191_v35, %v179_v31  ;;  %v180_v40 = vld [vmem:[%s8093_s0 + $0xac] sm:$0x1]  ;;  %v192_v41 = vld [vmem:[%s8093_s0 + $0xb8] sm:$0x1]  ;;  %v2685_v42 = vmax.bf16 %v1298_v33, %v669_v23 }
  0x91   :  { %3142 = vst [vmem:[%s8094_s1 + $0x53] sm:$0x1] %v3141_v36  ;;  %v3149_v43 = vld [vmem:[%s8094_s1 + $0x56] sm:$0x1]  ;;  %v672_v44 = vmax.bf16 %v192_v41, %v180_v40  ;;  %v181_v45 = vld [vmem:[%s8093_s0 + $0xad] sm:$0x1]  ;;  %v3144_v47 = vsel %vm4081_vm2, %v2684_v37, %v3143_v29 }
  0x92   :  { %v193_v46 = vld [vmem:[%s8093_s0 + $0xb9] sm:$0x1]  ;;  %v2686_v48 = vmax.bf16 %v1303_v38, %v670_v30  ;;  %v1308_v49 = vshrl.u32 %v671_v39, 16  ;;  %v3152_v50 = vld [vmem:[%s8094_s1 + $0x57] sm:$0x1]  ;;  %v3147_v53 = vsel %vm4081_vm2, %v2685_v42, %v3146_v34 }
  0x93   :  { %v673_v51 = vmax.bf16 %v193_v46, %v181_v45  ;;  %v182_v52 = vld [vmem:[%s8093_s0 + $0xae] sm:$0x1]  ;;  %3145 = vst [vmem:[%s8094_s1 + $0x54] sm:$0x1] %v3144_v47  ;;  %v1313_v54 = vshrl.u32 %v672_v44, 16 }
  0x94   :  { %v3155_v55 = vld [vmem:[%s8094_s1 + $0x58] sm:$0x1]  ;;  %v194_v56 = vld [vmem:[%s8093_s0 + $0xba] sm:$0x1]  ;;  %3148 = vst [vmem:[%s8094_s1 + $0x55] sm:$0x1] %v3147_v53  ;;  %v3150_v57 = vsel %vm4081_vm2, %v2686_v48, %v3149_v43  ;;  %v2687_v58 = vmax.bf16 %v1308_v49, %v671_v39 }
  0x95   :  { %v1318_v59 = vshrl.u32 %v673_v51, 16  ;;  %v674_v60 = vmax.bf16 %v194_v56, %v182_v52  ;;  %v183_v61 = vld [vmem:[%s8093_s0 + $0xaf] sm:$0x1]  ;;  %v195_v62 = vld [vmem:[%s8093_s0 + $0xbb] sm:$0x1]  ;;  %v2688_v63 = vmax.bf16 %v1313_v54, %v672_v44 }
  0x96   :  { %3151 = vst [vmem:[%s8094_s1 + $0x56] sm:$0x1] %v3150_v57  ;;  %v3158_v0 = vld [vmem:[%s8094_s1 + $0x59] sm:$0x1]  ;;  %v675_v1 = vmax.bf16 %v195_v62, %v183_v61  ;;  %v184_v2 = vld [vmem:[%s8093_s0 + $0xb0] sm:$0x1]  ;;  %v3153_v4 = vsel %vm4081_vm2, %v2687_v58, %v3152_v50 }
  0x97   :  { %v196_v3 = vld [vmem:[%s8093_s0 + $0xbc] sm:$0x1]  ;;  %v2689_v5 = vmax.bf16 %v1318_v59, %v673_v51  ;;  %v1323_v6 = vshrl.u32 %v674_v60, 16  ;;  %v3161_v7 = vld [vmem:[%s8094_s1 + $0x5a] sm:$0x1]  ;;  %v3156_v10 = vsel %vm4081_vm2, %v2688_v63, %v3155_v55 }
  0x98   :  { %v676_v8 = vmax.bf16 %v196_v3, %v184_v2  ;;  %v185_v9 = vld [vmem:[%s8093_s0 + $0xb1] sm:$0x1]  ;;  %3154 = vst [vmem:[%s8094_s1 + $0x57] sm:$0x1] %v3153_v4  ;;  %v1328_v11 = vshrl.u32 %v675_v1, 16 }
  0x99   :  { %v3164_v13 = vld [vmem:[%s8094_s1 + $0x5b] sm:$0x1]  ;;  %v197_v14 = vld [vmem:[%s8093_s0 + $0xbd] sm:$0x1]  ;;  %3157 = vst [vmem:[%s8094_s1 + $0x58] sm:$0x1] %v3156_v10  ;;  %v3159_v15 = vsel %vm4081_vm2, %v2689_v5, %v3158_v0  ;;  %v2690_v16 = vmax.bf16 %v1323_v6, %v674_v60 }
  0x9a   :  { %v1333_v17 = vshrl.u32 %v676_v8, 16  ;;  %v677_v18 = vmax.bf16 %v197_v14, %v185_v9  ;;  %v186_v19 = vld [vmem:[%s8093_s0 + $0xb2] sm:$0x1]  ;;  %v198_v20 = vld [vmem:[%s8093_s0 + $0xbe] sm:$0x1]  ;;  %v2691_v21 = vmax.bf16 %v1328_v11, %v675_v1 }
  0x9b   :  { %3160 = vst [vmem:[%s8094_s1 + $0x59] sm:$0x1] %v3159_v15  ;;  %v3167_v22 = vld [vmem:[%s8094_s1 + $0x5c] sm:$0x1]  ;;  %v678_v23 = vmax.bf16 %v198_v20, %v186_v19  ;;  %v187_v24 = vld [vmem:[%s8093_s0 + $0xb3] sm:$0x1]  ;;  %v3162_v26 = vsel %vm4081_vm2, %v2690_v16, %v3161_v7 }
  0x9c   :  { %v199_v25 = vld [vmem:[%s8093_s0 + $0xbf] sm:$0x1]  ;;  %v2692_v27 = vmax.bf16 %v1333_v17, %v676_v8  ;;  %v1338_v28 = vshrl.u32 %v677_v18, 16  ;;  %v3170_v29 = vld [vmem:[%s8094_s1 + $0x5d] sm:$0x1]  ;;  %v3165_v32 = vsel %vm4081_vm2, %v2691_v21, %v3164_v13 }
  0x9d   :  { %v679_v30 = vmax.bf16 %v199_v25, %v187_v24  ;;  %v200_v31 = vld [vmem:[%s8093_s0 + $0xc0] sm:$0x1]  ;;  %3163 = vst [vmem:[%s8094_s1 + $0x5a] sm:$0x1] %v3162_v26  ;;  %v1343_v33 = vshrl.u32 %v678_v23, 16 }
  0x9e   :  { %v3173_v34 = vld [vmem:[%s8094_s1 + $0x5e] sm:$0x1]  ;;  %v212_v35 = vld [vmem:[%s8093_s0 + $0xcc] sm:$0x1]  ;;  %3166 = vst [vmem:[%s8094_s1 + $0x5b] sm:$0x1] %v3165_v32  ;;  %v3168_v36 = vsel %vm4081_vm2, %v2692_v27, %v3167_v22  ;;  %v2693_v37 = vmax.bf16 %v1338_v28, %v677_v18 }
  0x9f   :  { %v1348_v38 = vshrl.u32 %v679_v30, 16  ;;  %v680_v39 = vmax.bf16 %v212_v35, %v200_v31  ;;  %v201_v40 = vld [vmem:[%s8093_s0 + $0xc1] sm:$0x1]  ;;  %v213_v41 = vld [vmem:[%s8093_s0 + $0xcd] sm:$0x1]  ;;  %v2694_v42 = vmax.bf16 %v1343_v33, %v678_v23 }
  0xa0   :  { %3169 = vst [vmem:[%s8094_s1 + $0x5c] sm:$0x1] %v3168_v36  ;;  %v3176_v43 = vld [vmem:[%s8094_s1 + $0x5f] sm:$0x1]  ;;  %v681_v44 = vmax.bf16 %v213_v41, %v201_v40  ;;  %v202_v45 = vld [vmem:[%s8093_s0 + $0xc2] sm:$0x1]  ;;  %v3171_v47 = vsel %vm4081_vm2, %v2693_v37, %v3170_v29 }
  0xa1   :  { %v214_v46 = vld [vmem:[%s8093_s0 + $0xce] sm:$0x1]  ;;  %v2695_v48 = vmax.bf16 %v1348_v38, %v679_v30  ;;  %v1353_v49 = vshrl.u32 %v680_v39, 16  ;;  %v3179_v50 = vld [vmem:[%s8094_s1 + $0x60] sm:$0x1]  ;;  %v3174_v53 = vsel %vm4081_vm2, %v2694_v42, %v3173_v34 }
  0xa2   :  { %v682_v51 = vmax.bf16 %v214_v46, %v202_v45  ;;  %v203_v52 = vld [vmem:[%s8093_s0 + $0xc3] sm:$0x1]  ;;  %3172 = vst [vmem:[%s8094_s1 + $0x5d] sm:$0x1] %v3171_v47  ;;  %v1358_v54 = vshrl.u32 %v681_v44, 16 }
  0xa3   :  { %v3182_v55 = vld [vmem:[%s8094_s1 + $0x61] sm:$0x1]  ;;  %v215_v56 = vld [vmem:[%s8093_s0 + $0xcf] sm:$0x1]  ;;  %3175 = vst [vmem:[%s8094_s1 + $0x5e] sm:$0x1] %v3174_v53  ;;  %v3177_v57 = vsel %vm4081_vm2, %v2695_v48, %v3176_v43  ;;  %v2696_v58 = vmax.bf16 %v1353_v49, %v680_v39 }
  0xa4   :  { %v1363_v59 = vshrl.u32 %v682_v51, 16  ;;  %v683_v60 = vmax.bf16 %v215_v56, %v203_v52  ;;  %v204_v61 = vld [vmem:[%s8093_s0 + $0xc4] sm:$0x1]  ;;  %v216_v62 = vld [vmem:[%s8093_s0 + $0xd0] sm:$0x1]  ;;  %v2697_v63 = vmax.bf16 %v1358_v54, %v681_v44 }
  0xa5   :  { %3178 = vst [vmem:[%s8094_s1 + $0x5f] sm:$0x1] %v3177_v57  ;;  %v3185_v0 = vld [vmem:[%s8094_s1 + $0x62] sm:$0x1]  ;;  %v684_v1 = vmax.bf16 %v216_v62, %v204_v61  ;;  %v205_v2 = vld [vmem:[%s8093_s0 + $0xc5] sm:$0x1]  ;;  %v3180_v4 = vsel %vm4081_vm2, %v2696_v58, %v3179_v50 }
  0xa6   :  { %v217_v3 = vld [vmem:[%s8093_s0 + $0xd1] sm:$0x1]  ;;  %v2698_v5 = vmax.bf16 %v1363_v59, %v682_v51  ;;  %v1368_v6 = vshrl.u32 %v683_v60, 16  ;;  %v3188_v7 = vld [vmem:[%s8094_s1 + $0x63] sm:$0x1]  ;;  %v3183_v10 = vsel %vm4081_vm2, %v2697_v63, %v3182_v55 }
  0xa7   :  { %v685_v8 = vmax.bf16 %v217_v3, %v205_v2  ;;  %v206_v9 = vld [vmem:[%s8093_s0 + $0xc6] sm:$0x1]  ;;  %3181 = vst [vmem:[%s8094_s1 + $0x60] sm:$0x1] %v3180_v4  ;;  %v1373_v11 = vshrl.u32 %v684_v1, 16 }
  0xa8   :  { %v3191_v13 = vld [vmem:[%s8094_s1 + $0x64] sm:$0x1]  ;;  %v218_v14 = vld [vmem:[%s8093_s0 + $0xd2] sm:$0x1]  ;;  %3184 = vst [vmem:[%s8094_s1 + $0x61] sm:$0x1] %v3183_v10  ;;  %v3186_v15 = vsel %vm4081_vm2, %v2698_v5, %v3185_v0  ;;  %v2699_v16 = vmax.bf16 %v1368_v6, %v683_v60 }
  0xa9   :  { %v1378_v17 = vshrl.u32 %v685_v8, 16  ;;  %v686_v18 = vmax.bf16 %v218_v14, %v206_v9  ;;  %v207_v19 = vld [vmem:[%s8093_s0 + $0xc7] sm:$0x1]  ;;  %v219_v20 = vld [vmem:[%s8093_s0 + $0xd3] sm:$0x1]  ;;  %v2700_v21 = vmax.bf16 %v1373_v11, %v684_v1 }
  0xaa   :  { %3187 = vst [vmem:[%s8094_s1 + $0x62] sm:$0x1] %v3186_v15  ;;  %v3194_v22 = vld [vmem:[%s8094_s1 + $0x65] sm:$0x1]  ;;  %v687_v23 = vmax.bf16 %v219_v20, %v207_v19  ;;  %v208_v24 = vld [vmem:[%s8093_s0 + $0xc8] sm:$0x1]  ;;  %v3189_v26 = vsel %vm4081_vm2, %v2699_v16, %v3188_v7 }
  0xab   :  { %v220_v25 = vld [vmem:[%s8093_s0 + $0xd4] sm:$0x1]  ;;  %v2701_v27 = vmax.bf16 %v1378_v17, %v685_v8  ;;  %v1383_v28 = vshrl.u32 %v686_v18, 16  ;;  %v3197_v29 = vld [vmem:[%s8094_s1 + $0x66] sm:$0x1]  ;;  %v3192_v32 = vsel %vm4081_vm2, %v2700_v21, %v3191_v13 }
  0xac   :  { %v688_v30 = vmax.bf16 %v220_v25, %v208_v24  ;;  %v209_v31 = vld [vmem:[%s8093_s0 + $0xc9] sm:$0x1]  ;;  %3190 = vst [vmem:[%s8094_s1 + $0x63] sm:$0x1] %v3189_v26  ;;  %v1388_v33 = vshrl.u32 %v687_v23, 16 }
  0xad   :  { %v3200_v34 = vld [vmem:[%s8094_s1 + $0x67] sm:$0x1]  ;;  %v221_v35 = vld [vmem:[%s8093_s0 + $0xd5] sm:$0x1]  ;;  %3193 = vst [vmem:[%s8094_s1 + $0x64] sm:$0x1] %v3192_v32  ;;  %v3195_v36 = vsel %vm4081_vm2, %v2701_v27, %v3194_v22  ;;  %v2702_v37 = vmax.bf16 %v1383_v28, %v686_v18 }
  0xae   :  { %v1393_v38 = vshrl.u32 %v688_v30, 16  ;;  %v689_v39 = vmax.bf16 %v221_v35, %v209_v31  ;;  %v210_v40 = vld [vmem:[%s8093_s0 + $0xca] sm:$0x1]  ;;  %v222_v41 = vld [vmem:[%s8093_s0 + $0xd6] sm:$0x1]  ;;  %v2703_v42 = vmax.bf16 %v1388_v33, %v687_v23 }
  0xaf   :  { %3196 = vst [vmem:[%s8094_s1 + $0x65] sm:$0x1] %v3195_v36  ;;  %v3203_v43 = vld [vmem:[%s8094_s1 + $0x68] sm:$0x1]  ;;  %v690_v44 = vmax.bf16 %v222_v41, %v210_v40  ;;  %v211_v45 = vld [vmem:[%s8093_s0 + $0xcb] sm:$0x1]  ;;  %v3198_v47 = vsel %vm4081_vm2, %v2702_v37, %v3197_v29 }
  0xb0   :  { %v223_v46 = vld [vmem:[%s8093_s0 + $0xd7] sm:$0x1]  ;;  %v2704_v48 = vmax.bf16 %v1393_v38, %v688_v30  ;;  %v1398_v49 = vshrl.u32 %v689_v39, 16  ;;  %v3206_v50 = vld [vmem:[%s8094_s1 + $0x69] sm:$0x1]  ;;  %v3201_v53 = vsel %vm4081_vm2, %v2703_v42, %v3200_v34 }
  0xb1   :  { %v691_v51 = vmax.bf16 %v223_v46, %v211_v45  ;;  %v224_v52 = vld [vmem:[%s8093_s0 + $0xd8] sm:$0x1]  ;;  %3199 = vst [vmem:[%s8094_s1 + $0x66] sm:$0x1] %v3198_v47  ;;  %v1403_v54 = vshrl.u32 %v690_v44, 16 }
  0xb2   :  { %v3209_v55 = vld [vmem:[%s8094_s1 + $0x6a] sm:$0x1]  ;;  %v236_v56 = vld [vmem:[%s8093_s0 + $0xe4] sm:$0x1]  ;;  %3202 = vst [vmem:[%s8094_s1 + $0x67] sm:$0x1] %v3201_v53  ;;  %v3204_v57 = vsel %vm4081_vm2, %v2704_v48, %v3203_v43  ;;  %v2705_v58 = vmax.bf16 %v1398_v49, %v689_v39 }
  0xb3   :  { %v1408_v59 = vshrl.u32 %v691_v51, 16  ;;  %v692_v60 = vmax.bf16 %v236_v56, %v224_v52  ;;  %v225_v61 = vld [vmem:[%s8093_s0 + $0xd9] sm:$0x1]  ;;  %v237_v62 = vld [vmem:[%s8093_s0 + $0xe5] sm:$0x1]  ;;  %v2706_v63 = vmax.bf16 %v1403_v54, %v690_v44 }
  0xb4   :  { %3205 = vst [vmem:[%s8094_s1 + $0x68] sm:$0x1] %v3204_v57  ;;  %v3212_v0 = vld [vmem:[%s8094_s1 + $0x6b] sm:$0x1]  ;;  %v693_v1 = vmax.bf16 %v237_v62, %v225_v61  ;;  %v226_v2 = vld [vmem:[%s8093_s0 + $0xda] sm:$0x1]  ;;  %v3207_v4 = vsel %vm4081_vm2, %v2705_v58, %v3206_v50 }
  0xb5   :  { %v238_v3 = vld [vmem:[%s8093_s0 + $0xe6] sm:$0x1]  ;;  %v2707_v5 = vmax.bf16 %v1408_v59, %v691_v51  ;;  %v1413_v6 = vshrl.u32 %v692_v60, 16  ;;  %v3215_v7 = vld [vmem:[%s8094_s1 + $0x6c] sm:$0x1]  ;;  %v3210_v10 = vsel %vm4081_vm2, %v2706_v63, %v3209_v55 }
  0xb6   :  { %v694_v8 = vmax.bf16 %v238_v3, %v226_v2  ;;  %v227_v9 = vld [vmem:[%s8093_s0 + $0xdb] sm:$0x1]  ;;  %3208 = vst [vmem:[%s8094_s1 + $0x69] sm:$0x1] %v3207_v4  ;;  %v1418_v11 = vshrl.u32 %v693_v1, 16 }
  0xb7   :  { %v3218_v13 = vld [vmem:[%s8094_s1 + $0x6d] sm:$0x1]  ;;  %v239_v14 = vld [vmem:[%s8093_s0 + $0xe7] sm:$0x1]  ;;  %3211 = vst [vmem:[%s8094_s1 + $0x6a] sm:$0x1] %v3210_v10  ;;  %v3213_v15 = vsel %vm4081_vm2, %v2707_v5, %v3212_v0  ;;  %v2708_v16 = vmax.bf16 %v1413_v6, %v692_v60 }
  0xb8   :  { %v1423_v17 = vshrl.u32 %v694_v8, 16  ;;  %v695_v18 = vmax.bf16 %v239_v14, %v227_v9  ;;  %v228_v19 = vld [vmem:[%s8093_s0 + $0xdc] sm:$0x1]  ;;  %v240_v20 = vld [vmem:[%s8093_s0 + $0xe8] sm:$0x1]  ;;  %v2709_v21 = vmax.bf16 %v1418_v11, %v693_v1 }
  0xb9   :  { %3214 = vst [vmem:[%s8094_s1 + $0x6b] sm:$0x1] %v3213_v15  ;;  %v3221_v22 = vld [vmem:[%s8094_s1 + $0x6e] sm:$0x1]  ;;  %v696_v23 = vmax.bf16 %v240_v20, %v228_v19  ;;  %v229_v24 = vld [vmem:[%s8093_s0 + $0xdd] sm:$0x1]  ;;  %v3216_v26 = vsel %vm4081_vm2, %v2708_v16, %v3215_v7 }
  0xba   :  { %v241_v25 = vld [vmem:[%s8093_s0 + $0xe9] sm:$0x1]  ;;  %v2710_v27 = vmax.bf16 %v1423_v17, %v694_v8  ;;  %v1428_v28 = vshrl.u32 %v695_v18, 16  ;;  %v3224_v29 = vld [vmem:[%s8094_s1 + $0x6f] sm:$0x1]  ;;  %v3219_v32 = vsel %vm4081_vm2, %v2709_v21, %v3218_v13 }
  0xbb   :  { %v697_v30 = vmax.bf16 %v241_v25, %v229_v24  ;;  %v230_v31 = vld [vmem:[%s8093_s0 + $0xde] sm:$0x1]  ;;  %3217 = vst [vmem:[%s8094_s1 + $0x6c] sm:$0x1] %v3216_v26  ;;  %v1433_v33 = vshrl.u32 %v696_v23, 16 }
  0xbc   :  { %v3227_v34 = vld [vmem:[%s8094_s1 + $0x70] sm:$0x1]  ;;  %v242_v35 = vld [vmem:[%s8093_s0 + $0xea] sm:$0x1]  ;;  %3220 = vst [vmem:[%s8094_s1 + $0x6d] sm:$0x1] %v3219_v32  ;;  %v3222_v36 = vsel %vm4081_vm2, %v2710_v27, %v3221_v22  ;;  %v2711_v37 = vmax.bf16 %v1428_v28, %v695_v18 }
  0xbd   :  { %v1438_v38 = vshrl.u32 %v697_v30, 16  ;;  %v698_v39 = vmax.bf16 %v242_v35, %v230_v31  ;;  %v231_v40 = vld [vmem:[%s8093_s0 + $0xdf] sm:$0x1]  ;;  %v243_v41 = vld [vmem:[%s8093_s0 + $0xeb] sm:$0x1]  ;;  %v2712_v42 = vmax.bf16 %v1433_v33, %v696_v23 }
  0xbe   :  { %3223 = vst [vmem:[%s8094_s1 + $0x6e] sm:$0x1] %v3222_v36  ;;  %v3230_v43 = vld [vmem:[%s8094_s1 + $0x71] sm:$0x1]  ;;  %v699_v44 = vmax.bf16 %v243_v41, %v231_v40  ;;  %v232_v45 = vld [vmem:[%s8093_s0 + $0xe0] sm:$0x1]  ;;  %v3225_v47 = vsel %vm4081_vm2, %v2711_v37, %v3224_v29 }
  0xbf   :  { %v244_v46 = vld [vmem:[%s8093_s0 + $0xec] sm:$0x1]  ;;  %v2713_v48 = vmax.bf16 %v1438_v38, %v697_v30  ;;  %v1443_v49 = vshrl.u32 %v698_v39, 16  ;;  %v3233_v50 = vld [vmem:[%s8094_s1 + $0x72] sm:$0x1]  ;;  %v3228_v53 = vsel %vm4081_vm2, %v2712_v42, %v3227_v34 }
  0xc0   :  { %v700_v51 = vmax.bf16 %v244_v46, %v232_v45  ;;  %v233_v52 = vld [vmem:[%s8093_s0 + $0xe1] sm:$0x1]  ;;  %3226 = vst [vmem:[%s8094_s1 + $0x6f] sm:$0x1] %v3225_v47  ;;  %v1448_v54 = vshrl.u32 %v699_v44, 16 }
  0xc1   :  { %v3236_v55 = vld [vmem:[%s8094_s1 + $0x73] sm:$0x1]  ;;  %v245_v56 = vld [vmem:[%s8093_s0 + $0xed] sm:$0x1]  ;;  %3229 = vst [vmem:[%s8094_s1 + $0x70] sm:$0x1] %v3228_v53  ;;  %v3231_v57 = vsel %vm4081_vm2, %v2713_v48, %v3230_v43  ;;  %v2714_v58 = vmax.bf16 %v1443_v49, %v698_v39 }
  0xc2   :  { %v1453_v59 = vshrl.u32 %v700_v51, 16  ;;  %v701_v60 = vmax.bf16 %v245_v56, %v233_v52  ;;  %v234_v61 = vld [vmem:[%s8093_s0 + $0xe2] sm:$0x1]  ;;  %v246_v62 = vld [vmem:[%s8093_s0 + $0xee] sm:$0x1]  ;;  %v2715_v63 = vmax.bf16 %v1448_v54, %v699_v44 }
  0xc3   :  { %3232 = vst [vmem:[%s8094_s1 + $0x71] sm:$0x1] %v3231_v57  ;;  %v3239_v0 = vld [vmem:[%s8094_s1 + $0x74] sm:$0x1]  ;;  %v702_v1 = vmax.bf16 %v246_v62, %v234_v61  ;;  %v235_v2 = vld [vmem:[%s8093_s0 + $0xe3] sm:$0x1]  ;;  %v3234_v4 = vsel %vm4081_vm2, %v2714_v58, %v3233_v50 }
  0xc4   :  { %v247_v3 = vld [vmem:[%s8093_s0 + $0xef] sm:$0x1]  ;;  %v2716_v5 = vmax.bf16 %v1453_v59, %v700_v51  ;;  %v1458_v6 = vshrl.u32 %v701_v60, 16  ;;  %v3242_v7 = vld [vmem:[%s8094_s1 + $0x75] sm:$0x1]  ;;  %v3237_v10 = vsel %vm4081_vm2, %v2715_v63, %v3236_v55 }
  0xc5   :  { %v703_v8 = vmax.bf16 %v247_v3, %v235_v2  ;;  %v248_v9 = vld [vmem:[%s8093_s0 + $0xf0] sm:$0x1]  ;;  %3235 = vst [vmem:[%s8094_s1 + $0x72] sm:$0x1] %v3234_v4  ;;  %v1463_v11 = vshrl.u32 %v702_v1, 16 }
  0xc6   :  { %v3245_v13 = vld [vmem:[%s8094_s1 + $0x76] sm:$0x1]  ;;  %v260_v14 = vld [vmem:[%s8093_s0 + $0xfc] sm:$0x1]  ;;  %3238 = vst [vmem:[%s8094_s1 + $0x73] sm:$0x1] %v3237_v10  ;;  %v3240_v15 = vsel %vm4081_vm2, %v2716_v5, %v3239_v0  ;;  %v2717_v16 = vmax.bf16 %v1458_v6, %v701_v60 }
  0xc7   :  { %v1468_v17 = vshrl.u32 %v703_v8, 16  ;;  %v704_v18 = vmax.bf16 %v260_v14, %v248_v9  ;;  %v249_v19 = vld [vmem:[%s8093_s0 + $0xf1] sm:$0x1]  ;;  %v261_v20 = vld [vmem:[%s8093_s0 + $0xfd] sm:$0x1]  ;;  %v2718_v21 = vmax.bf16 %v1463_v11, %v702_v1 }
  0xc8   :  { %3241 = vst [vmem:[%s8094_s1 + $0x74] sm:$0x1] %v3240_v15  ;;  %v3248_v22 = vld [vmem:[%s8094_s1 + $0x77] sm:$0x1]  ;;  %v705_v23 = vmax.bf16 %v261_v20, %v249_v19  ;;  %v250_v24 = vld [vmem:[%s8093_s0 + $0xf2] sm:$0x1]  ;;  %v3243_v26 = vsel %vm4081_vm2, %v2717_v16, %v3242_v7 }
  0xc9   :  { %v262_v25 = vld [vmem:[%s8093_s0 + $0xfe] sm:$0x1]  ;;  %v2719_v27 = vmax.bf16 %v1468_v17, %v703_v8  ;;  %v1473_v28 = vshrl.u32 %v704_v18, 16  ;;  %v3251_v29 = vld [vmem:[%s8094_s1 + $0x78] sm:$0x1]  ;;  %v3246_v32 = vsel %vm4081_vm2, %v2718_v21, %v3245_v13 }
  0xca   :  { %v706_v30 = vmax.bf16 %v262_v25, %v250_v24  ;;  %v251_v31 = vld [vmem:[%s8093_s0 + $0xf3] sm:$0x1]  ;;  %3244 = vst [vmem:[%s8094_s1 + $0x75] sm:$0x1] %v3243_v26  ;;  %v1478_v33 = vshrl.u32 %v705_v23, 16 }
  0xcb   :  { %v3254_v34 = vld [vmem:[%s8094_s1 + $0x79] sm:$0x1]  ;;  %v263_v35 = vld [vmem:[%s8093_s0 + $0xff] sm:$0x1]  ;;  %3247 = vst [vmem:[%s8094_s1 + $0x76] sm:$0x1] %v3246_v32  ;;  %v3249_v36 = vsel %vm4081_vm2, %v2719_v27, %v3248_v22  ;;  %v2720_v37 = vmax.bf16 %v1473_v28, %v704_v18 }
  0xcc   :  { %v1483_v38 = vshrl.u32 %v706_v30, 16  ;;  %v707_v39 = vmax.bf16 %v263_v35, %v251_v31  ;;  %v252_v40 = vld [vmem:[%s8093_s0 + $0xf4] sm:$0x1]  ;;  %v264_v41 = vld [vmem:[%s8093_s0 + $0x100] sm:$0x1]  ;;  %v2721_v42 = vmax.bf16 %v1478_v33, %v705_v23 }
  0xcd   :  { %3250 = vst [vmem:[%s8094_s1 + $0x77] sm:$0x1] %v3249_v36  ;;  %v3257_v43 = vld [vmem:[%s8094_s1 + $0x7a] sm:$0x1]  ;;  %v708_v44 = vmax.bf16 %v264_v41, %v252_v40  ;;  %v253_v45 = vld [vmem:[%s8093_s0 + $0xf5] sm:$0x1]  ;;  %v3252_v47 = vsel %vm4081_vm2, %v2720_v37, %v3251_v29 }
  0xce   :  { %v265_v46 = vld [vmem:[%s8093_s0 + $0x101] sm:$0x1]  ;;  %v2722_v48 = vmax.bf16 %v1483_v38, %v706_v30  ;;  %v1488_v49 = vshrl.u32 %v707_v39, 16  ;;  %v3260_v50 = vld [vmem:[%s8094_s1 + $0x7b] sm:$0x1]  ;;  %v3255_v53 = vsel %vm4081_vm2, %v2721_v42, %v3254_v34 }
  0xcf   :  { %v709_v51 = vmax.bf16 %v265_v46, %v253_v45  ;;  %v254_v52 = vld [vmem:[%s8093_s0 + $0xf6] sm:$0x1]  ;;  %3253 = vst [vmem:[%s8094_s1 + $0x78] sm:$0x1] %v3252_v47  ;;  %v1493_v54 = vshrl.u32 %v708_v44, 16 }
  0xd0   :  { %v3263_v55 = vld [vmem:[%s8094_s1 + $0x7c] sm:$0x1]  ;;  %v266_v56 = vld [vmem:[%s8093_s0 + $0x102] sm:$0x1]  ;;  %3256 = vst [vmem:[%s8094_s1 + $0x79] sm:$0x1] %v3255_v53  ;;  %v3258_v57 = vsel %vm4081_vm2, %v2722_v48, %v3257_v43  ;;  %v2723_v58 = vmax.bf16 %v1488_v49, %v707_v39 }
  0xd1   :  { %v1498_v59 = vshrl.u32 %v709_v51, 16  ;;  %v710_v60 = vmax.bf16 %v266_v56, %v254_v52  ;;  %v255_v61 = vld [vmem:[%s8093_s0 + $0xf7] sm:$0x1]  ;;  %v267_v62 = vld [vmem:[%s8093_s0 + $0x103] sm:$0x1]  ;;  %v2724_v63 = vmax.bf16 %v1493_v54, %v708_v44 }
  0xd2   :  { %3259 = vst [vmem:[%s8094_s1 + $0x7a] sm:$0x1] %v3258_v57  ;;  %v3266_v0 = vld [vmem:[%s8094_s1 + $0x7d] sm:$0x1]  ;;  %v711_v1 = vmax.bf16 %v267_v62, %v255_v61  ;;  %v256_v2 = vld [vmem:[%s8093_s0 + $0xf8] sm:$0x1]  ;;  %v3261_v4 = vsel %vm4081_vm2, %v2723_v58, %v3260_v50 }
  0xd3   :  { %v268_v3 = vld [vmem:[%s8093_s0 + $0x104] sm:$0x1]  ;;  %v2725_v5 = vmax.bf16 %v1498_v59, %v709_v51  ;;  %v1503_v6 = vshrl.u32 %v710_v60, 16  ;;  %v3269_v7 = vld [vmem:[%s8094_s1 + $0x7e] sm:$0x1]  ;;  %v3264_v10 = vsel %vm4081_vm2, %v2724_v63, %v3263_v55 }
  0xd4   :  { %v712_v8 = vmax.bf16 %v268_v3, %v256_v2  ;;  %v257_v9 = vld [vmem:[%s8093_s0 + $0xf9] sm:$0x1]  ;;  %3262 = vst [vmem:[%s8094_s1 + $0x7b] sm:$0x1] %v3261_v4  ;;  %v1508_v11 = vshrl.u32 %v711_v1, 16 }
  0xd5   :  { %v3272_v13 = vld [vmem:[%s8094_s1 + $0x7f] sm:$0x1]  ;;  %v269_v14 = vld [vmem:[%s8093_s0 + $0x105] sm:$0x1]  ;;  %3265 = vst [vmem:[%s8094_s1 + $0x7c] sm:$0x1] %v3264_v10  ;;  %v3267_v15 = vsel %vm4081_vm2, %v2725_v5, %v3266_v0  ;;  %v2726_v16 = vmax.bf16 %v1503_v6, %v710_v60 }
  0xd6   :  { %v1513_v17 = vshrl.u32 %v712_v8, 16  ;;  %v713_v18 = vmax.bf16 %v269_v14, %v257_v9  ;;  %v258_v19 = vld [vmem:[%s8093_s0 + $0xfa] sm:$0x1]  ;;  %v270_v20 = vld [vmem:[%s8093_s0 + $0x106] sm:$0x1]  ;;  %v2727_v21 = vmax.bf16 %v1508_v11, %v711_v1 }
  0xd7   :  { %3268 = vst [vmem:[%s8094_s1 + $0x7d] sm:$0x1] %v3267_v15  ;;  %v3275_v22 = vld [vmem:[%s8094_s1 + $0x80] sm:$0x1]  ;;  %v714_v23 = vmax.bf16 %v270_v20, %v258_v19  ;;  %v259_v24 = vld [vmem:[%s8093_s0 + $0xfb] sm:$0x1]  ;;  %v3270_v26 = vsel %vm4081_vm2, %v2726_v16, %v3269_v7 }
  0xd8   :  { %v271_v25 = vld [vmem:[%s8093_s0 + $0x107] sm:$0x1]  ;;  %v2728_v27 = vmax.bf16 %v1513_v17, %v712_v8  ;;  %v1518_v28 = vshrl.u32 %v713_v18, 16  ;;  %v3278_v29 = vld [vmem:[%s8094_s1 + $0x81] sm:$0x1]  ;;  %v3273_v32 = vsel %vm4081_vm2, %v2727_v21, %v3272_v13 }
  0xd9   :  { %v715_v30 = vmax.bf16 %v271_v25, %v259_v24  ;;  %v272_v31 = vld [vmem:[%s8093_s0 + $0x108] sm:$0x1]  ;;  %3271 = vst [vmem:[%s8094_s1 + $0x7e] sm:$0x1] %v3270_v26  ;;  %v1523_v33 = vshrl.u32 %v714_v23, 16 }
  0xda   :  { %v3281_v34 = vld [vmem:[%s8094_s1 + $0x82] sm:$0x1]  ;;  %v284_v35 = vld [vmem:[%s8093_s0 + $0x114] sm:$0x1]  ;;  %3274 = vst [vmem:[%s8094_s1 + $0x7f] sm:$0x1] %v3273_v32  ;;  %v3276_v36 = vsel %vm4081_vm2, %v2728_v27, %v3275_v22  ;;  %v2729_v37 = vmax.bf16 %v1518_v28, %v713_v18 }
  0xdb   :  { %v1528_v38 = vshrl.u32 %v715_v30, 16  ;;  %v716_v39 = vmax.bf16 %v284_v35, %v272_v31  ;;  %v273_v40 = vld [vmem:[%s8093_s0 + $0x109] sm:$0x1]  ;;  %v285_v41 = vld [vmem:[%s8093_s0 + $0x115] sm:$0x1]  ;;  %v2730_v42 = vmax.bf16 %v1523_v33, %v714_v23 }
  0xdc   :  { %3277 = vst [vmem:[%s8094_s1 + $0x80] sm:$0x1] %v3276_v36  ;;  %v3284_v43 = vld [vmem:[%s8094_s1 + $0x83] sm:$0x1]  ;;  %v717_v44 = vmax.bf16 %v285_v41, %v273_v40  ;;  %v274_v45 = vld [vmem:[%s8093_s0 + $0x10a] sm:$0x1]  ;;  %v3279_v47 = vsel %vm4081_vm2, %v2729_v37, %v3278_v29 }
  0xdd   :  { %v286_v46 = vld [vmem:[%s8093_s0 + $0x116] sm:$0x1]  ;;  %v2731_v48 = vmax.bf16 %v1528_v38, %v715_v30  ;;  %v1533_v49 = vshrl.u32 %v716_v39, 16  ;;  %v3287_v50 = vld [vmem:[%s8094_s1 + $0x84] sm:$0x1]  ;;  %v3282_v53 = vsel %vm4081_vm2, %v2730_v42, %v3281_v34 }
  0xde   :  { %v718_v51 = vmax.bf16 %v286_v46, %v274_v45  ;;  %v275_v52 = vld [vmem:[%s8093_s0 + $0x10b] sm:$0x1]  ;;  %3280 = vst [vmem:[%s8094_s1 + $0x81] sm:$0x1] %v3279_v47  ;;  %v1538_v54 = vshrl.u32 %v717_v44, 16 }
  0xdf   :  { %v3290_v55 = vld [vmem:[%s8094_s1 + $0x85] sm:$0x1]  ;;  %v287_v56 = vld [vmem:[%s8093_s0 + $0x117] sm:$0x1]  ;;  %3283 = vst [vmem:[%s8094_s1 + $0x82] sm:$0x1] %v3282_v53  ;;  %v3285_v57 = vsel %vm4081_vm2, %v2731_v48, %v3284_v43  ;;  %v2732_v58 = vmax.bf16 %v1533_v49, %v716_v39 }
  0xe0   :  { %v1543_v59 = vshrl.u32 %v718_v51, 16  ;;  %v719_v60 = vmax.bf16 %v287_v56, %v275_v52  ;;  %v276_v61 = vld [vmem:[%s8093_s0 + $0x10c] sm:$0x1]  ;;  %v288_v62 = vld [vmem:[%s8093_s0 + $0x118] sm:$0x1]  ;;  %v2733_v63 = vmax.bf16 %v1538_v54, %v717_v44 }
  0xe1   :  { %3286 = vst [vmem:[%s8094_s1 + $0x83] sm:$0x1] %v3285_v57  ;;  %v3293_v0 = vld [vmem:[%s8094_s1 + $0x86] sm:$0x1]  ;;  %v720_v1 = vmax.bf16 %v288_v62, %v276_v61  ;;  %v277_v2 = vld [vmem:[%s8093_s0 + $0x10d] sm:$0x1]  ;;  %v3288_v4 = vsel %vm4081_vm2, %v2732_v58, %v3287_v50 }
  0xe2   :  { %v289_v3 = vld [vmem:[%s8093_s0 + $0x119] sm:$0x1]  ;;  %v2734_v5 = vmax.bf16 %v1543_v59, %v718_v51  ;;  %v1548_v6 = vshrl.u32 %v719_v60, 16  ;;  %v3296_v7 = vld [vmem:[%s8094_s1 + $0x87] sm:$0x1]  ;;  %v3291_v10 = vsel %vm4081_vm2, %v2733_v63, %v3290_v55 }
  0xe3   :  { %v721_v8 = vmax.bf16 %v289_v3, %v277_v2  ;;  %v278_v9 = vld [vmem:[%s8093_s0 + $0x10e] sm:$0x1]  ;;  %3289 = vst [vmem:[%s8094_s1 + $0x84] sm:$0x1] %v3288_v4  ;;  %v1553_v11 = vshrl.u32 %v720_v1, 16 }
  0xe4   :  { %v3299_v13 = vld [vmem:[%s8094_s1 + $0x88] sm:$0x1]  ;;  %v290_v14 = vld [vmem:[%s8093_s0 + $0x11a] sm:$0x1]  ;;  %3292 = vst [vmem:[%s8094_s1 + $0x85] sm:$0x1] %v3291_v10  ;;  %v3294_v15 = vsel %vm4081_vm2, %v2734_v5, %v3293_v0  ;;  %v2735_v16 = vmax.bf16 %v1548_v6, %v719_v60 }
  0xe5   :  { %v1558_v17 = vshrl.u32 %v721_v8, 16  ;;  %v722_v18 = vmax.bf16 %v290_v14, %v278_v9  ;;  %v279_v19 = vld [vmem:[%s8093_s0 + $0x10f] sm:$0x1]  ;;  %v291_v20 = vld [vmem:[%s8093_s0 + $0x11b] sm:$0x1]  ;;  %v2736_v21 = vmax.bf16 %v1553_v11, %v720_v1 }
  0xe6   :  { %3295 = vst [vmem:[%s8094_s1 + $0x86] sm:$0x1] %v3294_v15  ;;  %v3302_v22 = vld [vmem:[%s8094_s1 + $0x89] sm:$0x1]  ;;  %v723_v23 = vmax.bf16 %v291_v20, %v279_v19  ;;  %v280_v24 = vld [vmem:[%s8093_s0 + $0x110] sm:$0x1]  ;;  %v3297_v26 = vsel %vm4081_vm2, %v2735_v16, %v3296_v7 }
  0xe7   :  { %v292_v25 = vld [vmem:[%s8093_s0 + $0x11c] sm:$0x1]  ;;  %v2737_v27 = vmax.bf16 %v1558_v17, %v721_v8  ;;  %v1563_v28 = vshrl.u32 %v722_v18, 16  ;;  %v3305_v29 = vld [vmem:[%s8094_s1 + $0x8a] sm:$0x1]  ;;  %v3300_v32 = vsel %vm4081_vm2, %v2736_v21, %v3299_v13 }
  0xe8   :  { %v724_v30 = vmax.bf16 %v292_v25, %v280_v24  ;;  %v281_v31 = vld [vmem:[%s8093_s0 + $0x111] sm:$0x1]  ;;  %3298 = vst [vmem:[%s8094_s1 + $0x87] sm:$0x1] %v3297_v26  ;;  %v1568_v33 = vshrl.u32 %v723_v23, 16 }
  0xe9   :  { %v3308_v34 = vld [vmem:[%s8094_s1 + $0x8b] sm:$0x1]  ;;  %v293_v35 = vld [vmem:[%s8093_s0 + $0x11d] sm:$0x1]  ;;  %3301 = vst [vmem:[%s8094_s1 + $0x88] sm:$0x1] %v3300_v32  ;;  %v3303_v36 = vsel %vm4081_vm2, %v2737_v27, %v3302_v22  ;;  %v2738_v37 = vmax.bf16 %v1563_v28, %v722_v18 }
  0xea   :  { %v1573_v38 = vshrl.u32 %v724_v30, 16  ;;  %v725_v39 = vmax.bf16 %v293_v35, %v281_v31  ;;  %v282_v40 = vld [vmem:[%s8093_s0 + $0x112] sm:$0x1]  ;;  %v294_v41 = vld [vmem:[%s8093_s0 + $0x11e] sm:$0x1]  ;;  %v2739_v42 = vmax.bf16 %v1568_v33, %v723_v23 }
  0xeb   :  { %3304 = vst [vmem:[%s8094_s1 + $0x89] sm:$0x1] %v3303_v36  ;;  %v3311_v43 = vld [vmem:[%s8094_s1 + $0x8c] sm:$0x1]  ;;  %v726_v44 = vmax.bf16 %v294_v41, %v282_v40  ;;  %v283_v45 = vld [vmem:[%s8093_s0 + $0x113] sm:$0x1]  ;;  %v3306_v47 = vsel %vm4081_vm2, %v2738_v37, %v3305_v29 }
  0xec   :  { %v295_v46 = vld [vmem:[%s8093_s0 + $0x11f] sm:$0x1]  ;;  %v2740_v48 = vmax.bf16 %v1573_v38, %v724_v30  ;;  %v1578_v49 = vshrl.u32 %v725_v39, 16  ;;  %v3314_v50 = vld [vmem:[%s8094_s1 + $0x8d] sm:$0x1]  ;;  %v3309_v53 = vsel %vm4081_vm2, %v2739_v42, %v3308_v34 }
  0xed   :  { %v727_v51 = vmax.bf16 %v295_v46, %v283_v45  ;;  %v296_v52 = vld [vmem:[%s8093_s0 + $0x120] sm:$0x1]  ;;  %3307 = vst [vmem:[%s8094_s1 + $0x8a] sm:$0x1] %v3306_v47  ;;  %v1583_v54 = vshrl.u32 %v726_v44, 16 }
  0xee   :  { %v3317_v55 = vld [vmem:[%s8094_s1 + $0x8e] sm:$0x1]  ;;  %v308_v56 = vld [vmem:[%s8093_s0 + $0x12c] sm:$0x1]  ;;  %3310 = vst [vmem:[%s8094_s1 + $0x8b] sm:$0x1] %v3309_v53  ;;  %v3312_v57 = vsel %vm4081_vm2, %v2740_v48, %v3311_v43  ;;  %v2741_v58 = vmax.bf16 %v1578_v49, %v725_v39 }
  0xef   :  { %v1588_v59 = vshrl.u32 %v727_v51, 16  ;;  %v728_v60 = vmax.bf16 %v308_v56, %v296_v52  ;;  %v297_v61 = vld [vmem:[%s8093_s0 + $0x121] sm:$0x1]  ;;  %v309_v62 = vld [vmem:[%s8093_s0 + $0x12d] sm:$0x1]  ;;  %v2742_v63 = vmax.bf16 %v1583_v54, %v726_v44 }
  0xf0   :  { %3313 = vst [vmem:[%s8094_s1 + $0x8c] sm:$0x1] %v3312_v57  ;;  %v3320_v0 = vld [vmem:[%s8094_s1 + $0x8f] sm:$0x1]  ;;  %v729_v1 = vmax.bf16 %v309_v62, %v297_v61  ;;  %v298_v2 = vld [vmem:[%s8093_s0 + $0x122] sm:$0x1]  ;;  %v3315_v4 = vsel %vm4081_vm2, %v2741_v58, %v3314_v50 }
  0xf1   :  { %v310_v3 = vld [vmem:[%s8093_s0 + $0x12e] sm:$0x1]  ;;  %v2743_v5 = vmax.bf16 %v1588_v59, %v727_v51  ;;  %v1593_v6 = vshrl.u32 %v728_v60, 16  ;;  %v3323_v7 = vld [vmem:[%s8094_s1 + $0x90] sm:$0x1]  ;;  %v3318_v10 = vsel %vm4081_vm2, %v2742_v63, %v3317_v55 }
  0xf2   :  { %v730_v8 = vmax.bf16 %v310_v3, %v298_v2  ;;  %v299_v9 = vld [vmem:[%s8093_s0 + $0x123] sm:$0x1]  ;;  %3316 = vst [vmem:[%s8094_s1 + $0x8d] sm:$0x1] %v3315_v4  ;;  %v1598_v11 = vshrl.u32 %v729_v1, 16 }
  0xf3   :  { %v3326_v13 = vld [vmem:[%s8094_s1 + $0x91] sm:$0x1]  ;;  %v311_v14 = vld [vmem:[%s8093_s0 + $0x12f] sm:$0x1]  ;;  %3319 = vst [vmem:[%s8094_s1 + $0x8e] sm:$0x1] %v3318_v10  ;;  %v3321_v15 = vsel %vm4081_vm2, %v2743_v5, %v3320_v0  ;;  %v2744_v16 = vmax.bf16 %v1593_v6, %v728_v60 }
  0xf4   :  { %v1603_v17 = vshrl.u32 %v730_v8, 16  ;;  %v731_v18 = vmax.bf16 %v311_v14, %v299_v9  ;;  %v300_v19 = vld [vmem:[%s8093_s0 + $0x124] sm:$0x1]  ;;  %v312_v20 = vld [vmem:[%s8093_s0 + $0x130] sm:$0x1]  ;;  %v2745_v21 = vmax.bf16 %v1598_v11, %v729_v1 }
  0xf5   :  { %3322 = vst [vmem:[%s8094_s1 + $0x8f] sm:$0x1] %v3321_v15  ;;  %v3329_v22 = vld [vmem:[%s8094_s1 + $0x92] sm:$0x1]  ;;  %v732_v23 = vmax.bf16 %v312_v20, %v300_v19  ;;  %v301_v24 = vld [vmem:[%s8093_s0 + $0x125] sm:$0x1]  ;;  %v3324_v26 = vsel %vm4081_vm2, %v2744_v16, %v3323_v7 }
  0xf6   :  { %v313_v25 = vld [vmem:[%s8093_s0 + $0x131] sm:$0x1]  ;;  %v2746_v27 = vmax.bf16 %v1603_v17, %v730_v8  ;;  %v1608_v28 = vshrl.u32 %v731_v18, 16  ;;  %v3332_v29 = vld [vmem:[%s8094_s1 + $0x93] sm:$0x1]  ;;  %v3327_v32 = vsel %vm4081_vm2, %v2745_v21, %v3326_v13 }
  0xf7   :  { %v733_v30 = vmax.bf16 %v313_v25, %v301_v24  ;;  %v302_v31 = vld [vmem:[%s8093_s0 + $0x126] sm:$0x1]  ;;  %3325 = vst [vmem:[%s8094_s1 + $0x90] sm:$0x1] %v3324_v26  ;;  %v1613_v33 = vshrl.u32 %v732_v23, 16 }
  0xf8   :  { %v3335_v34 = vld [vmem:[%s8094_s1 + $0x94] sm:$0x1]  ;;  %v314_v35 = vld [vmem:[%s8093_s0 + $0x132] sm:$0x1]  ;;  %3328 = vst [vmem:[%s8094_s1 + $0x91] sm:$0x1] %v3327_v32  ;;  %v3330_v36 = vsel %vm4081_vm2, %v2746_v27, %v3329_v22  ;;  %v2747_v37 = vmax.bf16 %v1608_v28, %v731_v18 }
  0xf9   :  { %v1618_v38 = vshrl.u32 %v733_v30, 16  ;;  %v734_v39 = vmax.bf16 %v314_v35, %v302_v31  ;;  %v303_v40 = vld [vmem:[%s8093_s0 + $0x127] sm:$0x1]  ;;  %v315_v41 = vld [vmem:[%s8093_s0 + $0x133] sm:$0x1]  ;;  %v2748_v42 = vmax.bf16 %v1613_v33, %v732_v23 }
  0xfa   :  { %3331 = vst [vmem:[%s8094_s1 + $0x92] sm:$0x1] %v3330_v36  ;;  %v3338_v43 = vld [vmem:[%s8094_s1 + $0x95] sm:$0x1]  ;;  %v735_v44 = vmax.bf16 %v315_v41, %v303_v40  ;;  %v304_v45 = vld [vmem:[%s8093_s0 + $0x128] sm:$0x1]  ;;  %v3333_v47 = vsel %vm4081_vm2, %v2747_v37, %v3332_v29 }
  0xfb   :  { %v316_v46 = vld [vmem:[%s8093_s0 + $0x134] sm:$0x1]  ;;  %v2749_v48 = vmax.bf16 %v1618_v38, %v733_v30  ;;  %v1623_v49 = vshrl.u32 %v734_v39, 16  ;;  %v3341_v50 = vld [vmem:[%s8094_s1 + $0x96] sm:$0x1]  ;;  %v3336_v53 = vsel %vm4081_vm2, %v2748_v42, %v3335_v34 }
  0xfc   :  { %v736_v51 = vmax.bf16 %v316_v46, %v304_v45  ;;  %v305_v52 = vld [vmem:[%s8093_s0 + $0x129] sm:$0x1]  ;;  %3334 = vst [vmem:[%s8094_s1 + $0x93] sm:$0x1] %v3333_v47  ;;  %v1628_v54 = vshrl.u32 %v735_v44, 16 }
  0xfd   :  { %v3344_v55 = vld [vmem:[%s8094_s1 + $0x97] sm:$0x1]  ;;  %v317_v56 = vld [vmem:[%s8093_s0 + $0x135] sm:$0x1]  ;;  %3337 = vst [vmem:[%s8094_s1 + $0x94] sm:$0x1] %v3336_v53  ;;  %v3339_v57 = vsel %vm4081_vm2, %v2749_v48, %v3338_v43  ;;  %v2750_v58 = vmax.bf16 %v1623_v49, %v734_v39 }
  0xfe   :  { %v1633_v59 = vshrl.u32 %v736_v51, 16  ;;  %v737_v60 = vmax.bf16 %v317_v56, %v305_v52  ;;  %v306_v61 = vld [vmem:[%s8093_s0 + $0x12a] sm:$0x1]  ;;  %v318_v62 = vld [vmem:[%s8093_s0 + $0x136] sm:$0x1]  ;;  %v2751_v63 = vmax.bf16 %v1628_v54, %v735_v44 }
  0xff   :  { %3340 = vst [vmem:[%s8094_s1 + $0x95] sm:$0x1] %v3339_v57  ;;  %v3347_v0 = vld [vmem:[%s8094_s1 + $0x98] sm:$0x1]  ;;  %v738_v1 = vmax.bf16 %v318_v62, %v306_v61  ;;  %v307_v2 = vld [vmem:[%s8093_s0 + $0x12b] sm:$0x1]  ;;  %v3342_v4 = vsel %vm4081_vm2, %v2750_v58, %v3341_v50 }
 0x100   :  { %v319_v3 = vld [vmem:[%s8093_s0 + $0x137] sm:$0x1]  ;;  %v2752_v5 = vmax.bf16 %v1633_v59, %v736_v51  ;;  %v1638_v6 = vshrl.u32 %v737_v60, 16  ;;  %v3350_v7 = vld [vmem:[%s8094_s1 + $0x99] sm:$0x1]  ;;  %v3345_v10 = vsel %vm4081_vm2, %v2751_v63, %v3344_v55 }
 0x101   :  { %v739_v8 = vmax.bf16 %v319_v3, %v307_v2  ;;  %v320_v9 = vld [vmem:[%s8093_s0 + $0x138] sm:$0x1]  ;;  %3343 = vst [vmem:[%s8094_s1 + $0x96] sm:$0x1] %v3342_v4  ;;  %v1643_v11 = vshrl.u32 %v738_v1, 16 }
 0x102   :  { %v3353_v13 = vld [vmem:[%s8094_s1 + $0x9a] sm:$0x1]  ;;  %v332_v14 = vld [vmem:[%s8093_s0 + $0x144] sm:$0x1]  ;;  %3346 = vst [vmem:[%s8094_s1 + $0x97] sm:$0x1] %v3345_v10  ;;  %v3348_v15 = vsel %vm4081_vm2, %v2752_v5, %v3347_v0  ;;  %v2753_v16 = vmax.bf16 %v1638_v6, %v737_v60 }
 0x103   :  { %v1648_v17 = vshrl.u32 %v739_v8, 16  ;;  %v740_v18 = vmax.bf16 %v332_v14, %v320_v9  ;;  %v321_v19 = vld [vmem:[%s8093_s0 + $0x139] sm:$0x1]  ;;  %v333_v20 = vld [vmem:[%s8093_s0 + $0x145] sm:$0x1]  ;;  %v2754_v21 = vmax.bf16 %v1643_v11, %v738_v1 }
 0x104   :  { %3349 = vst [vmem:[%s8094_s1 + $0x98] sm:$0x1] %v3348_v15  ;;  %v3356_v22 = vld [vmem:[%s8094_s1 + $0x9b] sm:$0x1]  ;;  %v741_v23 = vmax.bf16 %v333_v20, %v321_v19  ;;  %v322_v24 = vld [vmem:[%s8093_s0 + $0x13a] sm:$0x1]  ;;  %v3351_v26 = vsel %vm4081_vm2, %v2753_v16, %v3350_v7 }
 0x105   :  { %v334_v25 = vld [vmem:[%s8093_s0 + $0x146] sm:$0x1]  ;;  %v2755_v27 = vmax.bf16 %v1648_v17, %v739_v8  ;;  %v1653_v28 = vshrl.u32 %v740_v18, 16  ;;  %v3359_v29 = vld [vmem:[%s8094_s1 + $0x9c] sm:$0x1]  ;;  %v3354_v32 = vsel %vm4081_vm2, %v2754_v21, %v3353_v13 }
 0x106   :  { %v742_v30 = vmax.bf16 %v334_v25, %v322_v24  ;;  %v323_v31 = vld [vmem:[%s8093_s0 + $0x13b] sm:$0x1]  ;;  %3352 = vst [vmem:[%s8094_s1 + $0x99] sm:$0x1] %v3351_v26  ;;  %v1658_v33 = vshrl.u32 %v741_v23, 16 }
 0x107   :  { %v3362_v34 = vld [vmem:[%s8094_s1 + $0x9d] sm:$0x1]  ;;  %v335_v35 = vld [vmem:[%s8093_s0 + $0x147] sm:$0x1]  ;;  %3355 = vst [vmem:[%s8094_s1 + $0x9a] sm:$0x1] %v3354_v32  ;;  %v3357_v36 = vsel %vm4081_vm2, %v2755_v27, %v3356_v22  ;;  %v2756_v37 = vmax.bf16 %v1653_v28, %v740_v18 }
 0x108   :  { %v1663_v38 = vshrl.u32 %v742_v30, 16  ;;  %v743_v39 = vmax.bf16 %v335_v35, %v323_v31  ;;  %v324_v40 = vld [vmem:[%s8093_s0 + $0x13c] sm:$0x1]  ;;  %v336_v41 = vld [vmem:[%s8093_s0 + $0x148] sm:$0x1]  ;;  %v2757_v42 = vmax.bf16 %v1658_v33, %v741_v23 }
 0x109   :  { %3358 = vst [vmem:[%s8094_s1 + $0x9b] sm:$0x1] %v3357_v36  ;;  %v3365_v43 = vld [vmem:[%s8094_s1 + $0x9e] sm:$0x1]  ;;  %v744_v44 = vmax.bf16 %v336_v41, %v324_v40  ;;  %v325_v45 = vld [vmem:[%s8093_s0 + $0x13d] sm:$0x1]  ;;  %v3360_v47 = vsel %vm4081_vm2, %v2756_v37, %v3359_v29 }
 0x10a   :  { %v337_v46 = vld [vmem:[%s8093_s0 + $0x149] sm:$0x1]  ;;  %v2758_v48 = vmax.bf16 %v1663_v38, %v742_v30  ;;  %v1668_v49 = vshrl.u32 %v743_v39, 16  ;;  %v3368_v50 = vld [vmem:[%s8094_s1 + $0x9f] sm:$0x1]  ;;  %v3363_v53 = vsel %vm4081_vm2, %v2757_v42, %v3362_v34 }
 0x10b   :  { %v745_v51 = vmax.bf16 %v337_v46, %v325_v45  ;;  %v326_v52 = vld [vmem:[%s8093_s0 + $0x13e] sm:$0x1]  ;;  %3361 = vst [vmem:[%s8094_s1 + $0x9c] sm:$0x1] %v3360_v47  ;;  %v1673_v54 = vshrl.u32 %v744_v44, 16 }
 0x10c   :  { %v3371_v55 = vld [vmem:[%s8094_s1 + $0xa0] sm:$0x1]  ;;  %v338_v56 = vld [vmem:[%s8093_s0 + $0x14a] sm:$0x1]  ;;  %3364 = vst [vmem:[%s8094_s1 + $0x9d] sm:$0x1] %v3363_v53  ;;  %v3366_v57 = vsel %vm4081_vm2, %v2758_v48, %v3365_v43  ;;  %v2759_v58 = vmax.bf16 %v1668_v49, %v743_v39 }
 0x10d   :  { %v1678_v59 = vshrl.u32 %v745_v51, 16  ;;  %v746_v60 = vmax.bf16 %v338_v56, %v326_v52  ;;  %v327_v61 = vld [vmem:[%s8093_s0 + $0x13f] sm:$0x1]  ;;  %v339_v62 = vld [vmem:[%s8093_s0 + $0x14b] sm:$0x1]  ;;  %v2760_v63 = vmax.bf16 %v1673_v54, %v744_v44 }
 0x10e   :  { %3367 = vst [vmem:[%s8094_s1 + $0x9e] sm:$0x1] %v3366_v57  ;;  %v3374_v0 = vld [vmem:[%s8094_s1 + $0xa1] sm:$0x1]  ;;  %v747_v1 = vmax.bf16 %v339_v62, %v327_v61  ;;  %v328_v2 = vld [vmem:[%s8093_s0 + $0x140] sm:$0x1]  ;;  %v3369_v4 = vsel %vm4081_vm2, %v2759_v58, %v3368_v50 }
 0x10f   :  { %v340_v3 = vld [vmem:[%s8093_s0 + $0x14c] sm:$0x1]  ;;  %v2761_v5 = vmax.bf16 %v1678_v59, %v745_v51  ;;  %v1683_v6 = vshrl.u32 %v746_v60, 16  ;;  %v3377_v7 = vld [vmem:[%s8094_s1 + $0xa2] sm:$0x1]  ;;  %v3372_v10 = vsel %vm4081_vm2, %v2760_v63, %v3371_v55 }
 0x110   :  { %v748_v8 = vmax.bf16 %v340_v3, %v328_v2  ;;  %v329_v9 = vld [vmem:[%s8093_s0 + $0x141] sm:$0x1]  ;;  %3370 = vst [vmem:[%s8094_s1 + $0x9f] sm:$0x1] %v3369_v4  ;;  %v1688_v11 = vshrl.u32 %v747_v1, 16 }
 0x111   :  { %v3380_v13 = vld [vmem:[%s8094_s1 + $0xa3] sm:$0x1]  ;;  %v341_v14 = vld [vmem:[%s8093_s0 + $0x14d] sm:$0x1]  ;;  %3373 = vst [vmem:[%s8094_s1 + $0xa0] sm:$0x1] %v3372_v10  ;;  %v3375_v15 = vsel %vm4081_vm2, %v2761_v5, %v3374_v0  ;;  %v2762_v16 = vmax.bf16 %v1683_v6, %v746_v60 }
 0x112   :  { %v1693_v17 = vshrl.u32 %v748_v8, 16  ;;  %v749_v18 = vmax.bf16 %v341_v14, %v329_v9  ;;  %v330_v19 = vld [vmem:[%s8093_s0 + $0x142] sm:$0x1]  ;;  %v342_v20 = vld [vmem:[%s8093_s0 + $0x14e] sm:$0x1]  ;;  %v2763_v21 = vmax.bf16 %v1688_v11, %v747_v1 }
 0x113   :  { %3376 = vst [vmem:[%s8094_s1 + $0xa1] sm:$0x1] %v3375_v15  ;;  %v3383_v22 = vld [vmem:[%s8094_s1 + $0xa4] sm:$0x1]  ;;  %v750_v23 = vmax.bf16 %v342_v20, %v330_v19  ;;  %v331_v24 = vld [vmem:[%s8093_s0 + $0x143] sm:$0x1]  ;;  %v3378_v26 = vsel %vm4081_vm2, %v2762_v16, %v3377_v7 }
 0x114   :  { %v343_v25 = vld [vmem:[%s8093_s0 + $0x14f] sm:$0x1]  ;;  %v2764_v27 = vmax.bf16 %v1693_v17, %v748_v8  ;;  %v1698_v28 = vshrl.u32 %v749_v18, 16  ;;  %v3386_v29 = vld [vmem:[%s8094_s1 + $0xa5] sm:$0x1]  ;;  %v3381_v32 = vsel %vm4081_vm2, %v2763_v21, %v3380_v13 }
 0x115   :  { %v751_v30 = vmax.bf16 %v343_v25, %v331_v24  ;;  %v344_v31 = vld [vmem:[%s8093_s0 + $0x150] sm:$0x1]  ;;  %3379 = vst [vmem:[%s8094_s1 + $0xa2] sm:$0x1] %v3378_v26  ;;  %v1703_v33 = vshrl.u32 %v750_v23, 16 }
 0x116   :  { %v3389_v34 = vld [vmem:[%s8094_s1 + $0xa6] sm:$0x1]  ;;  %v356_v35 = vld [vmem:[%s8093_s0 + $0x15c] sm:$0x1]  ;;  %3382 = vst [vmem:[%s8094_s1 + $0xa3] sm:$0x1] %v3381_v32  ;;  %v3384_v36 = vsel %vm4081_vm2, %v2764_v27, %v3383_v22  ;;  %v2765_v37 = vmax.bf16 %v1698_v28, %v749_v18 }
 0x117   :  { %v1708_v38 = vshrl.u32 %v751_v30, 16  ;;  %v752_v39 = vmax.bf16 %v356_v35, %v344_v31  ;;  %v345_v40 = vld [vmem:[%s8093_s0 + $0x151] sm:$0x1]  ;;  %v357_v41 = vld [vmem:[%s8093_s0 + $0x15d] sm:$0x1]  ;;  %v2766_v42 = vmax.bf16 %v1703_v33, %v750_v23 }
 0x118   :  { %3385 = vst [vmem:[%s8094_s1 + $0xa4] sm:$0x1] %v3384_v36  ;;  %v3392_v43 = vld [vmem:[%s8094_s1 + $0xa7] sm:$0x1]  ;;  %v753_v44 = vmax.bf16 %v357_v41, %v345_v40  ;;  %v346_v45 = vld [vmem:[%s8093_s0 + $0x152] sm:$0x1]  ;;  %v3387_v47 = vsel %vm4081_vm2, %v2765_v37, %v3386_v29 }
 0x119   :  { %v358_v46 = vld [vmem:[%s8093_s0 + $0x15e] sm:$0x1]  ;;  %v2767_v48 = vmax.bf16 %v1708_v38, %v751_v30  ;;  %v1713_v49 = vshrl.u32 %v752_v39, 16  ;;  %v3395_v50 = vld [vmem:[%s8094_s1 + $0xa8] sm:$0x1]  ;;  %v3390_v53 = vsel %vm4081_vm2, %v2766_v42, %v3389_v34 }
 0x11a   :  { %v754_v51 = vmax.bf16 %v358_v46, %v346_v45  ;;  %v347_v52 = vld [vmem:[%s8093_s0 + $0x153] sm:$0x1]  ;;  %3388 = vst [vmem:[%s8094_s1 + $0xa5] sm:$0x1] %v3387_v47  ;;  %v1718_v54 = vshrl.u32 %v753_v44, 16 }
 0x11b   :  { %v3398_v55 = vld [vmem:[%s8094_s1 + $0xa9] sm:$0x1]  ;;  %v359_v56 = vld [vmem:[%s8093_s0 + $0x15f] sm:$0x1]  ;;  %3391 = vst [vmem:[%s8094_s1 + $0xa6] sm:$0x1] %v3390_v53  ;;  %v3393_v57 = vsel %vm4081_vm2, %v2767_v48, %v3392_v43  ;;  %v2768_v58 = vmax.bf16 %v1713_v49, %v752_v39 }
 0x11c   :  { %v1723_v59 = vshrl.u32 %v754_v51, 16  ;;  %v755_v60 = vmax.bf16 %v359_v56, %v347_v52  ;;  %v348_v61 = vld [vmem:[%s8093_s0 + $0x154] sm:$0x1]  ;;  %v360_v62 = vld [vmem:[%s8093_s0 + $0x160] sm:$0x1]  ;;  %v2769_v63 = vmax.bf16 %v1718_v54, %v753_v44 }
 0x11d   :  { %3394 = vst [vmem:[%s8094_s1 + $0xa7] sm:$0x1] %v3393_v57  ;;  %v3401_v0 = vld [vmem:[%s8094_s1 + $0xaa] sm:$0x1]  ;;  %v756_v1 = vmax.bf16 %v360_v62, %v348_v61  ;;  %v349_v2 = vld [vmem:[%s8093_s0 + $0x155] sm:$0x1]  ;;  %v3396_v4 = vsel %vm4081_vm2, %v2768_v58, %v3395_v50 }
 0x11e   :  { %v361_v3 = vld [vmem:[%s8093_s0 + $0x161] sm:$0x1]  ;;  %v2770_v5 = vmax.bf16 %v1723_v59, %v754_v51  ;;  %v1728_v6 = vshrl.u32 %v755_v60, 16  ;;  %v3404_v7 = vld [vmem:[%s8094_s1 + $0xab] sm:$0x1]  ;;  %v3399_v10 = vsel %vm4081_vm2, %v2769_v63, %v3398_v55 }
 0x11f   :  { %v757_v8 = vmax.bf16 %v361_v3, %v349_v2  ;;  %v350_v9 = vld [vmem:[%s8093_s0 + $0x156] sm:$0x1]  ;;  %3397 = vst [vmem:[%s8094_s1 + $0xa8] sm:$0x1] %v3396_v4  ;;  %v1733_v11 = vshrl.u32 %v756_v1, 16 }
 0x120   :  { %v3407_v13 = vld [vmem:[%s8094_s1 + $0xac] sm:$0x1]  ;;  %v362_v14 = vld [vmem:[%s8093_s0 + $0x162] sm:$0x1]  ;;  %3400 = vst [vmem:[%s8094_s1 + $0xa9] sm:$0x1] %v3399_v10  ;;  %v3402_v15 = vsel %vm4081_vm2, %v2770_v5, %v3401_v0  ;;  %v2771_v16 = vmax.bf16 %v1728_v6, %v755_v60 }
 0x121   :  { %v1738_v17 = vshrl.u32 %v757_v8, 16  ;;  %v758_v18 = vmax.bf16 %v362_v14, %v350_v9  ;;  %v351_v19 = vld [vmem:[%s8093_s0 + $0x157] sm:$0x1]  ;;  %v363_v20 = vld [vmem:[%s8093_s0 + $0x163] sm:$0x1]  ;;  %v2772_v21 = vmax.bf16 %v1733_v11, %v756_v1 }
 0x122   :  { %3403 = vst [vmem:[%s8094_s1 + $0xaa] sm:$0x1] %v3402_v15  ;;  %v3410_v22 = vld [vmem:[%s8094_s1 + $0xad] sm:$0x1]  ;;  %v759_v23 = vmax.bf16 %v363_v20, %v351_v19  ;;  %v352_v24 = vld [vmem:[%s8093_s0 + $0x158] sm:$0x1]  ;;  %v3405_v26 = vsel %vm4081_vm2, %v2771_v16, %v3404_v7 }
 0x123   :  { %v364_v25 = vld [vmem:[%s8093_s0 + $0x164] sm:$0x1]  ;;  %v2773_v27 = vmax.bf16 %v1738_v17, %v757_v8  ;;  %v1743_v28 = vshrl.u32 %v758_v18, 16  ;;  %v3413_v29 = vld [vmem:[%s8094_s1 + $0xae] sm:$0x1]  ;;  %v3408_v32 = vsel %vm4081_vm2, %v2772_v21, %v3407_v13 }
 0x124   :  { %v760_v30 = vmax.bf16 %v364_v25, %v352_v24  ;;  %v353_v31 = vld [vmem:[%s8093_s0 + $0x159] sm:$0x1]  ;;  %3406 = vst [vmem:[%s8094_s1 + $0xab] sm:$0x1] %v3405_v26  ;;  %v1748_v33 = vshrl.u32 %v759_v23, 16 }
 0x125   :  { %v3416_v34 = vld [vmem:[%s8094_s1 + $0xaf] sm:$0x1]  ;;  %v365_v35 = vld [vmem:[%s8093_s0 + $0x165] sm:$0x1]  ;;  %3409 = vst [vmem:[%s8094_s1 + $0xac] sm:$0x1] %v3408_v32  ;;  %v3411_v36 = vsel %vm4081_vm2, %v2773_v27, %v3410_v22  ;;  %v2774_v37 = vmax.bf16 %v1743_v28, %v758_v18 }
 0x126   :  { %v1753_v38 = vshrl.u32 %v760_v30, 16  ;;  %v761_v39 = vmax.bf16 %v365_v35, %v353_v31  ;;  %v354_v40 = vld [vmem:[%s8093_s0 + $0x15a] sm:$0x1]  ;;  %v366_v41 = vld [vmem:[%s8093_s0 + $0x166] sm:$0x1]  ;;  %v2775_v42 = vmax.bf16 %v1748_v33, %v759_v23 }
 0x127   :  { %3412 = vst [vmem:[%s8094_s1 + $0xad] sm:$0x1] %v3411_v36  ;;  %v3419_v43 = vld [vmem:[%s8094_s1 + $0xb0] sm:$0x1]  ;;  %v762_v44 = vmax.bf16 %v366_v41, %v354_v40  ;;  %v355_v45 = vld [vmem:[%s8093_s0 + $0x15b] sm:$0x1]  ;;  %v3414_v47 = vsel %vm4081_vm2, %v2774_v37, %v3413_v29 }
 0x128   :  { %v367_v46 = vld [vmem:[%s8093_s0 + $0x167] sm:$0x1]  ;;  %v2776_v48 = vmax.bf16 %v1753_v38, %v760_v30  ;;  %v1758_v49 = vshrl.u32 %v761_v39, 16  ;;  %v3422_v50 = vld [vmem:[%s8094_s1 + $0xb1] sm:$0x1]  ;;  %v3417_v53 = vsel %vm4081_vm2, %v2775_v42, %v3416_v34 }
 0x129   :  { %v763_v51 = vmax.bf16 %v367_v46, %v355_v45  ;;  %v368_v52 = vld [vmem:[%s8093_s0 + $0x168] sm:$0x1]  ;;  %3415 = vst [vmem:[%s8094_s1 + $0xae] sm:$0x1] %v3414_v47  ;;  %v1763_v54 = vshrl.u32 %v762_v44, 16 }
 0x12a   :  { %v3425_v55 = vld [vmem:[%s8094_s1 + $0xb2] sm:$0x1]  ;;  %v380_v56 = vld [vmem:[%s8093_s0 + $0x174] sm:$0x1]  ;;  %3418 = vst [vmem:[%s8094_s1 + $0xaf] sm:$0x1] %v3417_v53  ;;  %v3420_v57 = vsel %vm4081_vm2, %v2776_v48, %v3419_v43  ;;  %v2777_v58 = vmax.bf16 %v1758_v49, %v761_v39 }
 0x12b   :  { %v1768_v59 = vshrl.u32 %v763_v51, 16  ;;  %v764_v60 = vmax.bf16 %v380_v56, %v368_v52  ;;  %v369_v61 = vld [vmem:[%s8093_s0 + $0x169] sm:$0x1]  ;;  %v381_v62 = vld [vmem:[%s8093_s0 + $0x175] sm:$0x1]  ;;  %v2778_v63 = vmax.bf16 %v1763_v54, %v762_v44 }
 0x12c   :  { %3421 = vst [vmem:[%s8094_s1 + $0xb0] sm:$0x1] %v3420_v57  ;;  %v3428_v0 = vld [vmem:[%s8094_s1 + $0xb3] sm:$0x1]  ;;  %v765_v1 = vmax.bf16 %v381_v62, %v369_v61  ;;  %v370_v2 = vld [vmem:[%s8093_s0 + $0x16a] sm:$0x1]  ;;  %v3423_v4 = vsel %vm4081_vm2, %v2777_v58, %v3422_v50 }
 0x12d   :  { %v382_v3 = vld [vmem:[%s8093_s0 + $0x176] sm:$0x1]  ;;  %v2779_v5 = vmax.bf16 %v1768_v59, %v763_v51  ;;  %v1773_v6 = vshrl.u32 %v764_v60, 16  ;;  %v3431_v7 = vld [vmem:[%s8094_s1 + $0xb4] sm:$0x1]  ;;  %v3426_v10 = vsel %vm4081_vm2, %v2778_v63, %v3425_v55 }
 0x12e   :  { %v766_v8 = vmax.bf16 %v382_v3, %v370_v2  ;;  %v371_v9 = vld [vmem:[%s8093_s0 + $0x16b] sm:$0x1]  ;;  %3424 = vst [vmem:[%s8094_s1 + $0xb1] sm:$0x1] %v3423_v4  ;;  %v1778_v11 = vshrl.u32 %v765_v1, 16 }
 0x12f   :  { %v3434_v13 = vld [vmem:[%s8094_s1 + $0xb5] sm:$0x1]  ;;  %v383_v14 = vld [vmem:[%s8093_s0 + $0x177] sm:$0x1]  ;;  %3427 = vst [vmem:[%s8094_s1 + $0xb2] sm:$0x1] %v3426_v10  ;;  %v3429_v15 = vsel %vm4081_vm2, %v2779_v5, %v3428_v0  ;;  %v2780_v16 = vmax.bf16 %v1773_v6, %v764_v60 }
 0x130   :  { %v1783_v17 = vshrl.u32 %v766_v8, 16  ;;  %v767_v18 = vmax.bf16 %v383_v14, %v371_v9  ;;  %v372_v19 = vld [vmem:[%s8093_s0 + $0x16c] sm:$0x1]  ;;  %v384_v20 = vld [vmem:[%s8093_s0 + $0x178] sm:$0x1]  ;;  %v2781_v21 = vmax.bf16 %v1778_v11, %v765_v1 }
 0x131   :  { %3430 = vst [vmem:[%s8094_s1 + $0xb3] sm:$0x1] %v3429_v15  ;;  %v3437_v22 = vld [vmem:[%s8094_s1 + $0xb6] sm:$0x1]  ;;  %v768_v23 = vmax.bf16 %v384_v20, %v372_v19  ;;  %v373_v24 = vld [vmem:[%s8093_s0 + $0x16d] sm:$0x1]  ;;  %v3432_v26 = vsel %vm4081_vm2, %v2780_v16, %v3431_v7 }
 0x132   :  { %v385_v25 = vld [vmem:[%s8093_s0 + $0x179] sm:$0x1]  ;;  %v2782_v27 = vmax.bf16 %v1783_v17, %v766_v8  ;;  %v1788_v28 = vshrl.u32 %v767_v18, 16  ;;  %v3440_v29 = vld [vmem:[%s8094_s1 + $0xb7] sm:$0x1]  ;;  %v3435_v32 = vsel %vm4081_vm2, %v2781_v21, %v3434_v13 }
 0x133   :  { %v769_v30 = vmax.bf16 %v385_v25, %v373_v24  ;;  %v374_v31 = vld [vmem:[%s8093_s0 + $0x16e] sm:$0x1]  ;;  %3433 = vst [vmem:[%s8094_s1 + $0xb4] sm:$0x1] %v3432_v26  ;;  %v1793_v33 = vshrl.u32 %v768_v23, 16 }
 0x134   :  { %v3443_v34 = vld [vmem:[%s8094_s1 + $0xb8] sm:$0x1]  ;;  %v386_v35 = vld [vmem:[%s8093_s0 + $0x17a] sm:$0x1]  ;;  %3436 = vst [vmem:[%s8094_s1 + $0xb5] sm:$0x1] %v3435_v32  ;;  %v3438_v36 = vsel %vm4081_vm2, %v2782_v27, %v3437_v22  ;;  %v2783_v37 = vmax.bf16 %v1788_v28, %v767_v18 }
 0x135   :  { %v1798_v38 = vshrl.u32 %v769_v30, 16  ;;  %v770_v39 = vmax.bf16 %v386_v35, %v374_v31  ;;  %v375_v40 = vld [vmem:[%s8093_s0 + $0x16f] sm:$0x1]  ;;  %v387_v41 = vld [vmem:[%s8093_s0 + $0x17b] sm:$0x1]  ;;  %v2784_v42 = vmax.bf16 %v1793_v33, %v768_v23 }
 0x136   :  { %3439 = vst [vmem:[%s8094_s1 + $0xb6] sm:$0x1] %v3438_v36  ;;  %v3446_v43 = vld [vmem:[%s8094_s1 + $0xb9] sm:$0x1]  ;;  %v771_v44 = vmax.bf16 %v387_v41, %v375_v40  ;;  %v376_v45 = vld [vmem:[%s8093_s0 + $0x170] sm:$0x1]  ;;  %v3441_v47 = vsel %vm4081_vm2, %v2783_v37, %v3440_v29 }
 0x137   :  { %v388_v46 = vld [vmem:[%s8093_s0 + $0x17c] sm:$0x1]  ;;  %v2785_v48 = vmax.bf16 %v1798_v38, %v769_v30  ;;  %v1803_v49 = vshrl.u32 %v770_v39, 16  ;;  %v3449_v50 = vld [vmem:[%s8094_s1 + $0xba] sm:$0x1]  ;;  %v3444_v53 = vsel %vm4081_vm2, %v2784_v42, %v3443_v34 }
 0x138   :  { %v772_v51 = vmax.bf16 %v388_v46, %v376_v45  ;;  %v377_v52 = vld [vmem:[%s8093_s0 + $0x171] sm:$0x1]  ;;  %3442 = vst [vmem:[%s8094_s1 + $0xb7] sm:$0x1] %v3441_v47  ;;  %v1808_v54 = vshrl.u32 %v771_v44, 16 }
 0x139   :  { %v3452_v55 = vld [vmem:[%s8094_s1 + $0xbb] sm:$0x1]  ;;  %v389_v56 = vld [vmem:[%s8093_s0 + $0x17d] sm:$0x1]  ;;  %3445 = vst [vmem:[%s8094_s1 + $0xb8] sm:$0x1] %v3444_v53  ;;  %v3447_v57 = vsel %vm4081_vm2, %v2785_v48, %v3446_v43  ;;  %v2786_v58 = vmax.bf16 %v1803_v49, %v770_v39 }
 0x13a   :  { %v1813_v59 = vshrl.u32 %v772_v51, 16  ;;  %v773_v60 = vmax.bf16 %v389_v56, %v377_v52  ;;  %v378_v61 = vld [vmem:[%s8093_s0 + $0x172] sm:$0x1]  ;;  %v390_v62 = vld [vmem:[%s8093_s0 + $0x17e] sm:$0x1]  ;;  %v2787_v63 = vmax.bf16 %v1808_v54, %v771_v44 }
 0x13b   :  { %3448 = vst [vmem:[%s8094_s1 + $0xb9] sm:$0x1] %v3447_v57  ;;  %v3455_v0 = vld [vmem:[%s8094_s1 + $0xbc] sm:$0x1]  ;;  %v774_v1 = vmax.bf16 %v390_v62, %v378_v61  ;;  %v379_v2 = vld [vmem:[%s8093_s0 + $0x173] sm:$0x1]  ;;  %v3450_v4 = vsel %vm4081_vm2, %v2786_v58, %v3449_v50 }
 0x13c   :  { %v391_v3 = vld [vmem:[%s8093_s0 + $0x17f] sm:$0x1]  ;;  %v2788_v5 = vmax.bf16 %v1813_v59, %v772_v51  ;;  %v1818_v6 = vshrl.u32 %v773_v60, 16  ;;  %v3458_v7 = vld [vmem:[%s8094_s1 + $0xbd] sm:$0x1]  ;;  %v3453_v10 = vsel %vm4081_vm2, %v2787_v63, %v3452_v55 }
 0x13d   :  { %v775_v8 = vmax.bf16 %v391_v3, %v379_v2  ;;  %v392_v9 = vld [vmem:[%s8093_s0 + $0x180] sm:$0x1]  ;;  %3451 = vst [vmem:[%s8094_s1 + $0xba] sm:$0x1] %v3450_v4  ;;  %v1823_v11 = vshrl.u32 %v774_v1, 16 }
 0x13e   :  { %v3461_v13 = vld [vmem:[%s8094_s1 + $0xbe] sm:$0x1]  ;;  %v404_v14 = vld [vmem:[%s8093_s0 + $0x18c] sm:$0x1]  ;;  %3454 = vst [vmem:[%s8094_s1 + $0xbb] sm:$0x1] %v3453_v10  ;;  %v3456_v15 = vsel %vm4081_vm2, %v2788_v5, %v3455_v0  ;;  %v2789_v16 = vmax.bf16 %v1818_v6, %v773_v60 }
 0x13f   :  { %v1828_v17 = vshrl.u32 %v775_v8, 16  ;;  %v776_v18 = vmax.bf16 %v404_v14, %v392_v9  ;;  %v393_v19 = vld [vmem:[%s8093_s0 + $0x181] sm:$0x1]  ;;  %v405_v20 = vld [vmem:[%s8093_s0 + $0x18d] sm:$0x1]  ;;  %v2790_v21 = vmax.bf16 %v1823_v11, %v774_v1 }
 0x140   :  { %3457 = vst [vmem:[%s8094_s1 + $0xbc] sm:$0x1] %v3456_v15  ;;  %v3464_v22 = vld [vmem:[%s8094_s1 + $0xbf] sm:$0x1]  ;;  %v777_v23 = vmax.bf16 %v405_v20, %v393_v19  ;;  %v394_v24 = vld [vmem:[%s8093_s0 + $0x182] sm:$0x1]  ;;  %v3459_v26 = vsel %vm4081_vm2, %v2789_v16, %v3458_v7 }
 0x141   :  { %v406_v25 = vld [vmem:[%s8093_s0 + $0x18e] sm:$0x1]  ;;  %v2791_v27 = vmax.bf16 %v1828_v17, %v775_v8  ;;  %v1833_v28 = vshrl.u32 %v776_v18, 16  ;;  %v3467_v29 = vld [vmem:[%s8094_s1 + $0xc0] sm:$0x1]  ;;  %v3462_v32 = vsel %vm4081_vm2, %v2790_v21, %v3461_v13 }
 0x142   :  { %v778_v30 = vmax.bf16 %v406_v25, %v394_v24  ;;  %v395_v31 = vld [vmem:[%s8093_s0 + $0x183] sm:$0x1]  ;;  %3460 = vst [vmem:[%s8094_s1 + $0xbd] sm:$0x1] %v3459_v26  ;;  %v1838_v33 = vshrl.u32 %v777_v23, 16 }
 0x143   :  { %v3470_v34 = vld [vmem:[%s8094_s1 + $0xc1] sm:$0x1]  ;;  %v407_v35 = vld [vmem:[%s8093_s0 + $0x18f] sm:$0x1]  ;;  %3463 = vst [vmem:[%s8094_s1 + $0xbe] sm:$0x1] %v3462_v32  ;;  %v3465_v36 = vsel %vm4081_vm2, %v2791_v27, %v3464_v22  ;;  %v2792_v37 = vmax.bf16 %v1833_v28, %v776_v18 }
 0x144   :  { %v1843_v38 = vshrl.u32 %v778_v30, 16  ;;  %v779_v39 = vmax.bf16 %v407_v35, %v395_v31  ;;  %v396_v40 = vld [vmem:[%s8093_s0 + $0x184] sm:$0x1]  ;;  %v408_v41 = vld [vmem:[%s8093_s0 + $0x190] sm:$0x1]  ;;  %v2793_v42 = vmax.bf16 %v1838_v33, %v777_v23 }
 0x145   :  { %3466 = vst [vmem:[%s8094_s1 + $0xbf] sm:$0x1] %v3465_v36  ;;  %v3473_v43 = vld [vmem:[%s8094_s1 + $0xc2] sm:$0x1]  ;;  %v780_v44 = vmax.bf16 %v408_v41, %v396_v40  ;;  %v397_v45 = vld [vmem:[%s8093_s0 + $0x185] sm:$0x1]  ;;  %v3468_v47 = vsel %vm4081_vm2, %v2792_v37, %v3467_v29 }
 0x146   :  { %v409_v46 = vld [vmem:[%s8093_s0 + $0x191] sm:$0x1]  ;;  %v2794_v48 = vmax.bf16 %v1843_v38, %v778_v30  ;;  %v1848_v49 = vshrl.u32 %v779_v39, 16  ;;  %v3476_v50 = vld [vmem:[%s8094_s1 + $0xc3] sm:$0x1]  ;;  %v3471_v53 = vsel %vm4081_vm2, %v2793_v42, %v3470_v34 }
 0x147   :  { %v781_v51 = vmax.bf16 %v409_v46, %v397_v45  ;;  %v398_v52 = vld [vmem:[%s8093_s0 + $0x186] sm:$0x1]  ;;  %3469 = vst [vmem:[%s8094_s1 + $0xc0] sm:$0x1] %v3468_v47  ;;  %v1853_v54 = vshrl.u32 %v780_v44, 16 }
 0x148   :  { %v3479_v55 = vld [vmem:[%s8094_s1 + $0xc4] sm:$0x1]  ;;  %v410_v56 = vld [vmem:[%s8093_s0 + $0x192] sm:$0x1]  ;;  %3472 = vst [vmem:[%s8094_s1 + $0xc1] sm:$0x1] %v3471_v53  ;;  %v3474_v57 = vsel %vm4081_vm2, %v2794_v48, %v3473_v43  ;;  %v2795_v58 = vmax.bf16 %v1848_v49, %v779_v39 }
 0x149   :  { %v1858_v59 = vshrl.u32 %v781_v51, 16  ;;  %v782_v60 = vmax.bf16 %v410_v56, %v398_v52  ;;  %v399_v61 = vld [vmem:[%s8093_s0 + $0x187] sm:$0x1]  ;;  %v411_v62 = vld [vmem:[%s8093_s0 + $0x193] sm:$0x1]  ;;  %v2796_v63 = vmax.bf16 %v1853_v54, %v780_v44 }
 0x14a   :  { %3475 = vst [vmem:[%s8094_s1 + $0xc2] sm:$0x1] %v3474_v57  ;;  %v3482_v0 = vld [vmem:[%s8094_s1 + $0xc5] sm:$0x1]  ;;  %v783_v1 = vmax.bf16 %v411_v62, %v399_v61  ;;  %v400_v2 = vld [vmem:[%s8093_s0 + $0x188] sm:$0x1]  ;;  %v3477_v4 = vsel %vm4081_vm2, %v2795_v58, %v3476_v50 }
 0x14b   :  { %v412_v3 = vld [vmem:[%s8093_s0 + $0x194] sm:$0x1]  ;;  %v2797_v5 = vmax.bf16 %v1858_v59, %v781_v51  ;;  %v1863_v6 = vshrl.u32 %v782_v60, 16  ;;  %v3485_v7 = vld [vmem:[%s8094_s1 + $0xc6] sm:$0x1]  ;;  %v3480_v10 = vsel %vm4081_vm2, %v2796_v63, %v3479_v55 }
 0x14c   :  { %v784_v8 = vmax.bf16 %v412_v3, %v400_v2  ;;  %v401_v9 = vld [vmem:[%s8093_s0 + $0x189] sm:$0x1]  ;;  %3478 = vst [vmem:[%s8094_s1 + $0xc3] sm:$0x1] %v3477_v4  ;;  %v1868_v11 = vshrl.u32 %v783_v1, 16 }
 0x14d   :  { %v3488_v13 = vld [vmem:[%s8094_s1 + $0xc7] sm:$0x1]  ;;  %v413_v14 = vld [vmem:[%s8093_s0 + $0x195] sm:$0x1]  ;;  %3481 = vst [vmem:[%s8094_s1 + $0xc4] sm:$0x1] %v3480_v10  ;;  %v3483_v15 = vsel %vm4081_vm2, %v2797_v5, %v3482_v0  ;;  %v2798_v16 = vmax.bf16 %v1863_v6, %v782_v60 }
 0x14e   :  { %v1873_v17 = vshrl.u32 %v784_v8, 16  ;;  %v785_v18 = vmax.bf16 %v413_v14, %v401_v9  ;;  %v402_v19 = vld [vmem:[%s8093_s0 + $0x18a] sm:$0x1]  ;;  %v414_v20 = vld [vmem:[%s8093_s0 + $0x196] sm:$0x1]  ;;  %v2799_v21 = vmax.bf16 %v1868_v11, %v783_v1 }
 0x14f   :  { %3484 = vst [vmem:[%s8094_s1 + $0xc5] sm:$0x1] %v3483_v15  ;;  %v3491_v22 = vld [vmem:[%s8094_s1 + $0xc8] sm:$0x1]  ;;  %v786_v23 = vmax.bf16 %v414_v20, %v402_v19  ;;  %v403_v24 = vld [vmem:[%s8093_s0 + $0x18b] sm:$0x1]  ;;  %v3486_v26 = vsel %vm4081_vm2, %v2798_v16, %v3485_v7 }
 0x150   :  { %v415_v25 = vld [vmem:[%s8093_s0 + $0x197] sm:$0x1]  ;;  %v2800_v27 = vmax.bf16 %v1873_v17, %v784_v8  ;;  %v1878_v28 = vshrl.u32 %v785_v18, 16  ;;  %v3494_v29 = vld [vmem:[%s8094_s1 + $0xc9] sm:$0x1]  ;;  %v3489_v32 = vsel %vm4081_vm2, %v2799_v21, %v3488_v13 }
 0x151   :  { %v787_v30 = vmax.bf16 %v415_v25, %v403_v24  ;;  %v416_v31 = vld [vmem:[%s8093_s0 + $0x198] sm:$0x1]  ;;  %3487 = vst [vmem:[%s8094_s1 + $0xc6] sm:$0x1] %v3486_v26  ;;  %v1883_v33 = vshrl.u32 %v786_v23, 16 }
 0x152   :  { %v3497_v34 = vld [vmem:[%s8094_s1 + $0xca] sm:$0x1]  ;;  %v428_v35 = vld [vmem:[%s8093_s0 + $0x1a4] sm:$0x1]  ;;  %3490 = vst [vmem:[%s8094_s1 + $0xc7] sm:$0x1] %v3489_v32  ;;  %v3492_v36 = vsel %vm4081_vm2, %v2800_v27, %v3491_v22  ;;  %v2801_v37 = vmax.bf16 %v1878_v28, %v785_v18 }
 0x153   :  { %v1888_v38 = vshrl.u32 %v787_v30, 16  ;;  %v788_v39 = vmax.bf16 %v428_v35, %v416_v31  ;;  %v417_v40 = vld [vmem:[%s8093_s0 + $0x199] sm:$0x1]  ;;  %v429_v41 = vld [vmem:[%s8093_s0 + $0x1a5] sm:$0x1]  ;;  %v2802_v42 = vmax.bf16 %v1883_v33, %v786_v23 }
 0x154   :  { %3493 = vst [vmem:[%s8094_s1 + $0xc8] sm:$0x1] %v3492_v36  ;;  %v3500_v43 = vld [vmem:[%s8094_s1 + $0xcb] sm:$0x1]  ;;  %v789_v44 = vmax.bf16 %v429_v41, %v417_v40  ;;  %v418_v45 = vld [vmem:[%s8093_s0 + $0x19a] sm:$0x1]  ;;  %v3495_v47 = vsel %vm4081_vm2, %v2801_v37, %v3494_v29 }
 0x155   :  { %v430_v46 = vld [vmem:[%s8093_s0 + $0x1a6] sm:$0x1]  ;;  %v2803_v48 = vmax.bf16 %v1888_v38, %v787_v30  ;;  %v1893_v49 = vshrl.u32 %v788_v39, 16  ;;  %v3503_v50 = vld [vmem:[%s8094_s1 + $0xcc] sm:$0x1]  ;;  %v3498_v53 = vsel %vm4081_vm2, %v2802_v42, %v3497_v34 }
 0x156   :  { %v790_v51 = vmax.bf16 %v430_v46, %v418_v45  ;;  %v419_v52 = vld [vmem:[%s8093_s0 + $0x19b] sm:$0x1]  ;;  %3496 = vst [vmem:[%s8094_s1 + $0xc9] sm:$0x1] %v3495_v47  ;;  %v1898_v54 = vshrl.u32 %v789_v44, 16 }
 0x157   :  { %v3506_v55 = vld [vmem:[%s8094_s1 + $0xcd] sm:$0x1]  ;;  %v431_v56 = vld [vmem:[%s8093_s0 + $0x1a7] sm:$0x1]  ;;  %3499 = vst [vmem:[%s8094_s1 + $0xca] sm:$0x1] %v3498_v53  ;;  %v3501_v57 = vsel %vm4081_vm2, %v2803_v48, %v3500_v43  ;;  %v2804_v58 = vmax.bf16 %v1893_v49, %v788_v39 }
 0x158   :  { %v1903_v59 = vshrl.u32 %v790_v51, 16  ;;  %v791_v60 = vmax.bf16 %v431_v56, %v419_v52  ;;  %v420_v61 = vld [vmem:[%s8093_s0 + $0x19c] sm:$0x1]  ;;  %v432_v62 = vld [vmem:[%s8093_s0 + $0x1a8] sm:$0x1]  ;;  %v2805_v63 = vmax.bf16 %v1898_v54, %v789_v44 }
 0x159   :  { %3502 = vst [vmem:[%s8094_s1 + $0xcb] sm:$0x1] %v3501_v57  ;;  %v3509_v0 = vld [vmem:[%s8094_s1 + $0xce] sm:$0x1]  ;;  %v792_v1 = vmax.bf16 %v432_v62, %v420_v61  ;;  %v421_v2 = vld [vmem:[%s8093_s0 + $0x19d] sm:$0x1]  ;;  %v3504_v4 = vsel %vm4081_vm2, %v2804_v58, %v3503_v50 }
 0x15a   :  { %v433_v3 = vld [vmem:[%s8093_s0 + $0x1a9] sm:$0x1]  ;;  %v2806_v5 = vmax.bf16 %v1903_v59, %v790_v51  ;;  %v1908_v6 = vshrl.u32 %v791_v60, 16  ;;  %v3512_v7 = vld [vmem:[%s8094_s1 + $0xcf] sm:$0x1]  ;;  %v3507_v10 = vsel %vm4081_vm2, %v2805_v63, %v3506_v55 }
 0x15b   :  { %v793_v8 = vmax.bf16 %v433_v3, %v421_v2  ;;  %v422_v9 = vld [vmem:[%s8093_s0 + $0x19e] sm:$0x1]  ;;  %3505 = vst [vmem:[%s8094_s1 + $0xcc] sm:$0x1] %v3504_v4  ;;  %v1913_v11 = vshrl.u32 %v792_v1, 16 }
 0x15c   :  { %v3515_v13 = vld [vmem:[%s8094_s1 + $0xd0] sm:$0x1]  ;;  %v434_v14 = vld [vmem:[%s8093_s0 + $0x1aa] sm:$0x1]  ;;  %3508 = vst [vmem:[%s8094_s1 + $0xcd] sm:$0x1] %v3507_v10  ;;  %v3510_v15 = vsel %vm4081_vm2, %v2806_v5, %v3509_v0  ;;  %v2807_v16 = vmax.bf16 %v1908_v6, %v791_v60 }
 0x15d   :  { %v1918_v17 = vshrl.u32 %v793_v8, 16  ;;  %v794_v18 = vmax.bf16 %v434_v14, %v422_v9  ;;  %v423_v19 = vld [vmem:[%s8093_s0 + $0x19f] sm:$0x1]  ;;  %v435_v20 = vld [vmem:[%s8093_s0 + $0x1ab] sm:$0x1]  ;;  %v2808_v21 = vmax.bf16 %v1913_v11, %v792_v1 }
 0x15e   :  { %3511 = vst [vmem:[%s8094_s1 + $0xce] sm:$0x1] %v3510_v15  ;;  %v3518_v22 = vld [vmem:[%s8094_s1 + $0xd1] sm:$0x1]  ;;  %v795_v23 = vmax.bf16 %v435_v20, %v423_v19  ;;  %v424_v24 = vld [vmem:[%s8093_s0 + $0x1a0] sm:$0x1]  ;;  %v3513_v26 = vsel %vm4081_vm2, %v2807_v16, %v3512_v7 }
 0x15f   :  { %v436_v25 = vld [vmem:[%s8093_s0 + $0x1ac] sm:$0x1]  ;;  %v2809_v27 = vmax.bf16 %v1918_v17, %v793_v8  ;;  %v1923_v28 = vshrl.u32 %v794_v18, 16  ;;  %v3521_v29 = vld [vmem:[%s8094_s1 + $0xd2] sm:$0x1]  ;;  %v3516_v32 = vsel %vm4081_vm2, %v2808_v21, %v3515_v13 }
 0x160   :  { %v796_v30 = vmax.bf16 %v436_v25, %v424_v24  ;;  %v425_v31 = vld [vmem:[%s8093_s0 + $0x1a1] sm:$0x1]  ;;  %3514 = vst [vmem:[%s8094_s1 + $0xcf] sm:$0x1] %v3513_v26  ;;  %v1928_v33 = vshrl.u32 %v795_v23, 16 }
 0x161   :  { %v3524_v34 = vld [vmem:[%s8094_s1 + $0xd3] sm:$0x1]  ;;  %v437_v35 = vld [vmem:[%s8093_s0 + $0x1ad] sm:$0x1]  ;;  %3517 = vst [vmem:[%s8094_s1 + $0xd0] sm:$0x1] %v3516_v32  ;;  %v3519_v36 = vsel %vm4081_vm2, %v2809_v27, %v3518_v22  ;;  %v2810_v37 = vmax.bf16 %v1923_v28, %v794_v18 }
 0x162   :  { %v1933_v38 = vshrl.u32 %v796_v30, 16  ;;  %v797_v39 = vmax.bf16 %v437_v35, %v425_v31  ;;  %v426_v40 = vld [vmem:[%s8093_s0 + $0x1a2] sm:$0x1]  ;;  %v438_v41 = vld [vmem:[%s8093_s0 + $0x1ae] sm:$0x1]  ;;  %v2811_v42 = vmax.bf16 %v1928_v33, %v795_v23 }
 0x163   :  { %3520 = vst [vmem:[%s8094_s1 + $0xd1] sm:$0x1] %v3519_v36  ;;  %v3527_v43 = vld [vmem:[%s8094_s1 + $0xd4] sm:$0x1]  ;;  %v798_v44 = vmax.bf16 %v438_v41, %v426_v40  ;;  %v427_v45 = vld [vmem:[%s8093_s0 + $0x1a3] sm:$0x1]  ;;  %v3522_v47 = vsel %vm4081_vm2, %v2810_v37, %v3521_v29 }
 0x164   :  { %v439_v46 = vld [vmem:[%s8093_s0 + $0x1af] sm:$0x1]  ;;  %v2812_v48 = vmax.bf16 %v1933_v38, %v796_v30  ;;  %v1938_v49 = vshrl.u32 %v797_v39, 16  ;;  %v3530_v50 = vld [vmem:[%s8094_s1 + $0xd5] sm:$0x1]  ;;  %v3525_v53 = vsel %vm4081_vm2, %v2811_v42, %v3524_v34 }
 0x165   :  { %v799_v51 = vmax.bf16 %v439_v46, %v427_v45  ;;  %v440_v52 = vld [vmem:[%s8093_s0 + $0x1b0] sm:$0x1]  ;;  %3523 = vst [vmem:[%s8094_s1 + $0xd2] sm:$0x1] %v3522_v47  ;;  %v1943_v54 = vshrl.u32 %v798_v44, 16 }
 0x166   :  { %v3533_v55 = vld [vmem:[%s8094_s1 + $0xd6] sm:$0x1]  ;;  %v452_v56 = vld [vmem:[%s8093_s0 + $0x1bc] sm:$0x1]  ;;  %3526 = vst [vmem:[%s8094_s1 + $0xd3] sm:$0x1] %v3525_v53  ;;  %v3528_v57 = vsel %vm4081_vm2, %v2812_v48, %v3527_v43  ;;  %v2813_v58 = vmax.bf16 %v1938_v49, %v797_v39 }
 0x167   :  { %v1948_v59 = vshrl.u32 %v799_v51, 16  ;;  %v800_v60 = vmax.bf16 %v452_v56, %v440_v52  ;;  %v441_v61 = vld [vmem:[%s8093_s0 + $0x1b1] sm:$0x1]  ;;  %v453_v62 = vld [vmem:[%s8093_s0 + $0x1bd] sm:$0x1]  ;;  %v2814_v63 = vmax.bf16 %v1943_v54, %v798_v44 }
 0x168   :  { %3529 = vst [vmem:[%s8094_s1 + $0xd4] sm:$0x1] %v3528_v57  ;;  %v3536_v0 = vld [vmem:[%s8094_s1 + $0xd7] sm:$0x1]  ;;  %v801_v1 = vmax.bf16 %v453_v62, %v441_v61  ;;  %v442_v2 = vld [vmem:[%s8093_s0 + $0x1b2] sm:$0x1]  ;;  %v3531_v4 = vsel %vm4081_vm2, %v2813_v58, %v3530_v50 }
 0x169   :  { %v454_v3 = vld [vmem:[%s8093_s0 + $0x1be] sm:$0x1]  ;;  %v2815_v5 = vmax.bf16 %v1948_v59, %v799_v51  ;;  %v1953_v6 = vshrl.u32 %v800_v60, 16  ;;  %v3539_v7 = vld [vmem:[%s8094_s1 + $0xd8] sm:$0x1]  ;;  %v3534_v10 = vsel %vm4081_vm2, %v2814_v63, %v3533_v55 }
 0x16a   :  { %v802_v8 = vmax.bf16 %v454_v3, %v442_v2  ;;  %v443_v9 = vld [vmem:[%s8093_s0 + $0x1b3] sm:$0x1]  ;;  %3532 = vst [vmem:[%s8094_s1 + $0xd5] sm:$0x1] %v3531_v4  ;;  %v1958_v11 = vshrl.u32 %v801_v1, 16 }
 0x16b   :  { %v3542_v13 = vld [vmem:[%s8094_s1 + $0xd9] sm:$0x1]  ;;  %v455_v14 = vld [vmem:[%s8093_s0 + $0x1bf] sm:$0x1]  ;;  %3535 = vst [vmem:[%s8094_s1 + $0xd6] sm:$0x1] %v3534_v10  ;;  %v3537_v15 = vsel %vm4081_vm2, %v2815_v5, %v3536_v0  ;;  %v2816_v16 = vmax.bf16 %v1953_v6, %v800_v60 }
 0x16c   :  { %v1963_v17 = vshrl.u32 %v802_v8, 16  ;;  %v803_v18 = vmax.bf16 %v455_v14, %v443_v9  ;;  %v444_v19 = vld [vmem:[%s8093_s0 + $0x1b4] sm:$0x1]  ;;  %v456_v20 = vld [vmem:[%s8093_s0 + $0x1c0] sm:$0x1]  ;;  %v2817_v21 = vmax.bf16 %v1958_v11, %v801_v1 }
 0x16d   :  { %3538 = vst [vmem:[%s8094_s1 + $0xd7] sm:$0x1] %v3537_v15  ;;  %v3545_v22 = vld [vmem:[%s8094_s1 + $0xda] sm:$0x1]  ;;  %v804_v23 = vmax.bf16 %v456_v20, %v444_v19  ;;  %v445_v24 = vld [vmem:[%s8093_s0 + $0x1b5] sm:$0x1]  ;;  %v3540_v26 = vsel %vm4081_vm2, %v2816_v16, %v3539_v7 }
 0x16e   :  { %v457_v25 = vld [vmem:[%s8093_s0 + $0x1c1] sm:$0x1]  ;;  %v2818_v27 = vmax.bf16 %v1963_v17, %v802_v8  ;;  %v1968_v28 = vshrl.u32 %v803_v18, 16  ;;  %v3548_v29 = vld [vmem:[%s8094_s1 + $0xdb] sm:$0x1]  ;;  %v3543_v32 = vsel %vm4081_vm2, %v2817_v21, %v3542_v13 }
 0x16f   :  { %v805_v30 = vmax.bf16 %v457_v25, %v445_v24  ;;  %v446_v31 = vld [vmem:[%s8093_s0 + $0x1b6] sm:$0x1]  ;;  %3541 = vst [vmem:[%s8094_s1 + $0xd8] sm:$0x1] %v3540_v26  ;;  %v1973_v33 = vshrl.u32 %v804_v23, 16 }
 0x170   :  { %v3551_v34 = vld [vmem:[%s8094_s1 + $0xdc] sm:$0x1]  ;;  %v458_v35 = vld [vmem:[%s8093_s0 + $0x1c2] sm:$0x1]  ;;  %3544 = vst [vmem:[%s8094_s1 + $0xd9] sm:$0x1] %v3543_v32  ;;  %v3546_v36 = vsel %vm4081_vm2, %v2818_v27, %v3545_v22  ;;  %v2819_v37 = vmax.bf16 %v1968_v28, %v803_v18 }
 0x171   :  { %v1978_v38 = vshrl.u32 %v805_v30, 16  ;;  %v806_v39 = vmax.bf16 %v458_v35, %v446_v31  ;;  %v447_v40 = vld [vmem:[%s8093_s0 + $0x1b7] sm:$0x1]  ;;  %v459_v41 = vld [vmem:[%s8093_s0 + $0x1c3] sm:$0x1]  ;;  %v2820_v42 = vmax.bf16 %v1973_v33, %v804_v23 }
 0x172   :  { %3547 = vst [vmem:[%s8094_s1 + $0xda] sm:$0x1] %v3546_v36  ;;  %v3554_v43 = vld [vmem:[%s8094_s1 + $0xdd] sm:$0x1]  ;;  %v807_v44 = vmax.bf16 %v459_v41, %v447_v40  ;;  %v448_v45 = vld [vmem:[%s8093_s0 + $0x1b8] sm:$0x1]  ;;  %v3549_v47 = vsel %vm4081_vm2, %v2819_v37, %v3548_v29 }
 0x173   :  { %v460_v46 = vld [vmem:[%s8093_s0 + $0x1c4] sm:$0x1]  ;;  %v2821_v48 = vmax.bf16 %v1978_v38, %v805_v30  ;;  %v1983_v49 = vshrl.u32 %v806_v39, 16  ;;  %v3557_v50 = vld [vmem:[%s8094_s1 + $0xde] sm:$0x1]  ;;  %v3552_v53 = vsel %vm4081_vm2, %v2820_v42, %v3551_v34 }
 0x174   :  { %v808_v51 = vmax.bf16 %v460_v46, %v448_v45  ;;  %v449_v52 = vld [vmem:[%s8093_s0 + $0x1b9] sm:$0x1]  ;;  %3550 = vst [vmem:[%s8094_s1 + $0xdb] sm:$0x1] %v3549_v47  ;;  %v1988_v54 = vshrl.u32 %v807_v44, 16 }
 0x175   :  { %v3560_v55 = vld [vmem:[%s8094_s1 + $0xdf] sm:$0x1]  ;;  %v461_v56 = vld [vmem:[%s8093_s0 + $0x1c5] sm:$0x1]  ;;  %3553 = vst [vmem:[%s8094_s1 + $0xdc] sm:$0x1] %v3552_v53  ;;  %v3555_v57 = vsel %vm4081_vm2, %v2821_v48, %v3554_v43  ;;  %v2822_v58 = vmax.bf16 %v1983_v49, %v806_v39 }
 0x176   :  { %v1993_v59 = vshrl.u32 %v808_v51, 16  ;;  %v809_v60 = vmax.bf16 %v461_v56, %v449_v52  ;;  %v450_v61 = vld [vmem:[%s8093_s0 + $0x1ba] sm:$0x1]  ;;  %v462_v62 = vld [vmem:[%s8093_s0 + $0x1c6] sm:$0x1]  ;;  %v2823_v63 = vmax.bf16 %v1988_v54, %v807_v44 }
 0x177   :  { %3556 = vst [vmem:[%s8094_s1 + $0xdd] sm:$0x1] %v3555_v57  ;;  %v3563_v0 = vld [vmem:[%s8094_s1 + $0xe0] sm:$0x1]  ;;  %v810_v1 = vmax.bf16 %v462_v62, %v450_v61  ;;  %v451_v2 = vld [vmem:[%s8093_s0 + $0x1bb] sm:$0x1]  ;;  %v3558_v4 = vsel %vm4081_vm2, %v2822_v58, %v3557_v50 }
 0x178   :  { %v463_v3 = vld [vmem:[%s8093_s0 + $0x1c7] sm:$0x1]  ;;  %v2824_v5 = vmax.bf16 %v1993_v59, %v808_v51  ;;  %v1998_v6 = vshrl.u32 %v809_v60, 16  ;;  %v3566_v7 = vld [vmem:[%s8094_s1 + $0xe1] sm:$0x1]  ;;  %v3561_v10 = vsel %vm4081_vm2, %v2823_v63, %v3560_v55 }
 0x179   :  { %v811_v8 = vmax.bf16 %v463_v3, %v451_v2  ;;  %v464_v9 = vld [vmem:[%s8093_s0 + $0x1c8] sm:$0x1]  ;;  %3559 = vst [vmem:[%s8094_s1 + $0xde] sm:$0x1] %v3558_v4  ;;  %v2003_v11 = vshrl.u32 %v810_v1, 16 }
 0x17a   :  { %v3569_v13 = vld [vmem:[%s8094_s1 + $0xe2] sm:$0x1]  ;;  %v476_v14 = vld [vmem:[%s8093_s0 + $0x1d4] sm:$0x1]  ;;  %3562 = vst [vmem:[%s8094_s1 + $0xdf] sm:$0x1] %v3561_v10  ;;  %v3564_v15 = vsel %vm4081_vm2, %v2824_v5, %v3563_v0  ;;  %v2825_v16 = vmax.bf16 %v1998_v6, %v809_v60 }
 0x17b   :  { %v2008_v17 = vshrl.u32 %v811_v8, 16  ;;  %v812_v18 = vmax.bf16 %v476_v14, %v464_v9  ;;  %v465_v19 = vld [vmem:[%s8093_s0 + $0x1c9] sm:$0x1]  ;;  %v477_v20 = vld [vmem:[%s8093_s0 + $0x1d5] sm:$0x1]  ;;  %v2826_v21 = vmax.bf16 %v2003_v11, %v810_v1 }
 0x17c   :  { %3565 = vst [vmem:[%s8094_s1 + $0xe0] sm:$0x1] %v3564_v15  ;;  %v3572_v22 = vld [vmem:[%s8094_s1 + $0xe3] sm:$0x1]  ;;  %v813_v23 = vmax.bf16 %v477_v20, %v465_v19  ;;  %v466_v24 = vld [vmem:[%s8093_s0 + $0x1ca] sm:$0x1]  ;;  %v3567_v26 = vsel %vm4081_vm2, %v2825_v16, %v3566_v7 }
 0x17d   :  { %v478_v25 = vld [vmem:[%s8093_s0 + $0x1d6] sm:$0x1]  ;;  %v2827_v27 = vmax.bf16 %v2008_v17, %v811_v8  ;;  %v2013_v28 = vshrl.u32 %v812_v18, 16  ;;  %v3575_v29 = vld [vmem:[%s8094_s1 + $0xe4] sm:$0x1]  ;;  %v3570_v32 = vsel %vm4081_vm2, %v2826_v21, %v3569_v13 }
 0x17e   :  { %v814_v30 = vmax.bf16 %v478_v25, %v466_v24  ;;  %v467_v31 = vld [vmem:[%s8093_s0 + $0x1cb] sm:$0x1]  ;;  %3568 = vst [vmem:[%s8094_s1 + $0xe1] sm:$0x1] %v3567_v26  ;;  %v2018_v33 = vshrl.u32 %v813_v23, 16 }
 0x17f   :  { %v3578_v34 = vld [vmem:[%s8094_s1 + $0xe5] sm:$0x1]  ;;  %v479_v35 = vld [vmem:[%s8093_s0 + $0x1d7] sm:$0x1]  ;;  %3571 = vst [vmem:[%s8094_s1 + $0xe2] sm:$0x1] %v3570_v32  ;;  %v3573_v36 = vsel %vm4081_vm2, %v2827_v27, %v3572_v22  ;;  %v2828_v37 = vmax.bf16 %v2013_v28, %v812_v18 }
 0x180   :  { %v2023_v38 = vshrl.u32 %v814_v30, 16  ;;  %v815_v39 = vmax.bf16 %v479_v35, %v467_v31  ;;  %v468_v40 = vld [vmem:[%s8093_s0 + $0x1cc] sm:$0x1]  ;;  %v480_v41 = vld [vmem:[%s8093_s0 + $0x1d8] sm:$0x1]  ;;  %v2829_v42 = vmax.bf16 %v2018_v33, %v813_v23 }
 0x181   :  { %3574 = vst [vmem:[%s8094_s1 + $0xe3] sm:$0x1] %v3573_v36  ;;  %v3581_v43 = vld [vmem:[%s8094_s1 + $0xe6] sm:$0x1]  ;;  %v816_v44 = vmax.bf16 %v480_v41, %v468_v40  ;;  %v469_v45 = vld [vmem:[%s8093_s0 + $0x1cd] sm:$0x1]  ;;  %v3576_v47 = vsel %vm4081_vm2, %v2828_v37, %v3575_v29 }
 0x182   :  { %v481_v46 = vld [vmem:[%s8093_s0 + $0x1d9] sm:$0x1]  ;;  %v2830_v48 = vmax.bf16 %v2023_v38, %v814_v30  ;;  %v2028_v49 = vshrl.u32 %v815_v39, 16  ;;  %v3584_v50 = vld [vmem:[%s8094_s1 + $0xe7] sm:$0x1]  ;;  %v3579_v53 = vsel %vm4081_vm2, %v2829_v42, %v3578_v34 }
 0x183   :  { %v817_v51 = vmax.bf16 %v481_v46, %v469_v45  ;;  %v470_v52 = vld [vmem:[%s8093_s0 + $0x1ce] sm:$0x1]  ;;  %3577 = vst [vmem:[%s8094_s1 + $0xe4] sm:$0x1] %v3576_v47  ;;  %v2033_v54 = vshrl.u32 %v816_v44, 16 }
 0x184   :  { %v3587_v55 = vld [vmem:[%s8094_s1 + $0xe8] sm:$0x1]  ;;  %v482_v56 = vld [vmem:[%s8093_s0 + $0x1da] sm:$0x1]  ;;  %3580 = vst [vmem:[%s8094_s1 + $0xe5] sm:$0x1] %v3579_v53  ;;  %v3582_v57 = vsel %vm4081_vm2, %v2830_v48, %v3581_v43  ;;  %v2831_v58 = vmax.bf16 %v2028_v49, %v815_v39 }
 0x185   :  { %v2038_v59 = vshrl.u32 %v817_v51, 16  ;;  %v818_v60 = vmax.bf16 %v482_v56, %v470_v52  ;;  %v471_v61 = vld [vmem:[%s8093_s0 + $0x1cf] sm:$0x1]  ;;  %v483_v62 = vld [vmem:[%s8093_s0 + $0x1db] sm:$0x1]  ;;  %v2832_v63 = vmax.bf16 %v2033_v54, %v816_v44 }
 0x186   :  { %3583 = vst [vmem:[%s8094_s1 + $0xe6] sm:$0x1] %v3582_v57  ;;  %v3590_v0 = vld [vmem:[%s8094_s1 + $0xe9] sm:$0x1]  ;;  %v819_v1 = vmax.bf16 %v483_v62, %v471_v61  ;;  %v472_v2 = vld [vmem:[%s8093_s0 + $0x1d0] sm:$0x1]  ;;  %v3585_v4 = vsel %vm4081_vm2, %v2831_v58, %v3584_v50 }
 0x187   :  { %v484_v3 = vld [vmem:[%s8093_s0 + $0x1dc] sm:$0x1]  ;;  %v2833_v5 = vmax.bf16 %v2038_v59, %v817_v51  ;;  %v2043_v6 = vshrl.u32 %v818_v60, 16  ;;  %v3593_v7 = vld [vmem:[%s8094_s1 + $0xea] sm:$0x1]  ;;  %v3588_v10 = vsel %vm4081_vm2, %v2832_v63, %v3587_v55 }
 0x188   :  { %v820_v8 = vmax.bf16 %v484_v3, %v472_v2  ;;  %v473_v9 = vld [vmem:[%s8093_s0 + $0x1d1] sm:$0x1]  ;;  %3586 = vst [vmem:[%s8094_s1 + $0xe7] sm:$0x1] %v3585_v4  ;;  %v2048_v11 = vshrl.u32 %v819_v1, 16 }
 0x189   :  { %v3596_v13 = vld [vmem:[%s8094_s1 + $0xeb] sm:$0x1]  ;;  %v485_v14 = vld [vmem:[%s8093_s0 + $0x1dd] sm:$0x1]  ;;  %3589 = vst [vmem:[%s8094_s1 + $0xe8] sm:$0x1] %v3588_v10  ;;  %v3591_v15 = vsel %vm4081_vm2, %v2833_v5, %v3590_v0  ;;  %v2834_v16 = vmax.bf16 %v2043_v6, %v818_v60 }
 0x18a   :  { %v2053_v17 = vshrl.u32 %v820_v8, 16  ;;  %v821_v18 = vmax.bf16 %v485_v14, %v473_v9  ;;  %v474_v19 = vld [vmem:[%s8093_s0 + $0x1d2] sm:$0x1]  ;;  %v486_v20 = vld [vmem:[%s8093_s0 + $0x1de] sm:$0x1]  ;;  %v2835_v21 = vmax.bf16 %v2048_v11, %v819_v1 }
 0x18b   :  { %3592 = vst [vmem:[%s8094_s1 + $0xe9] sm:$0x1] %v3591_v15  ;;  %v3599_v22 = vld [vmem:[%s8094_s1 + $0xec] sm:$0x1]  ;;  %v822_v23 = vmax.bf16 %v486_v20, %v474_v19  ;;  %v475_v24 = vld [vmem:[%s8093_s0 + $0x1d3] sm:$0x1]  ;;  %v3594_v26 = vsel %vm4081_vm2, %v2834_v16, %v3593_v7 }
 0x18c   :  { %v487_v25 = vld [vmem:[%s8093_s0 + $0x1df] sm:$0x1]  ;;  %v2836_v27 = vmax.bf16 %v2053_v17, %v820_v8  ;;  %v2058_v28 = vshrl.u32 %v821_v18, 16  ;;  %v3602_v29 = vld [vmem:[%s8094_s1 + $0xed] sm:$0x1]  ;;  %v3597_v32 = vsel %vm4081_vm2, %v2835_v21, %v3596_v13 }
 0x18d   :  { %v823_v30 = vmax.bf16 %v487_v25, %v475_v24  ;;  %v488_v31 = vld [vmem:[%s8093_s0 + $0x1e0] sm:$0x1]  ;;  %3595 = vst [vmem:[%s8094_s1 + $0xea] sm:$0x1] %v3594_v26  ;;  %v2063_v33 = vshrl.u32 %v822_v23, 16 }
 0x18e   :  { %v3605_v34 = vld [vmem:[%s8094_s1 + $0xee] sm:$0x1]  ;;  %v500_v35 = vld [vmem:[%s8093_s0 + $0x1ec] sm:$0x1]  ;;  %3598 = vst [vmem:[%s8094_s1 + $0xeb] sm:$0x1] %v3597_v32  ;;  %v3600_v36 = vsel %vm4081_vm2, %v2836_v27, %v3599_v22  ;;  %v2837_v37 = vmax.bf16 %v2058_v28, %v821_v18 }
 0x18f   :  { %v2068_v38 = vshrl.u32 %v823_v30, 16  ;;  %v824_v39 = vmax.bf16 %v500_v35, %v488_v31  ;;  %v489_v40 = vld [vmem:[%s8093_s0 + $0x1e1] sm:$0x1]  ;;  %v501_v41 = vld [vmem:[%s8093_s0 + $0x1ed] sm:$0x1]  ;;  %v2838_v42 = vmax.bf16 %v2063_v33, %v822_v23 }
 0x190   :  { %3601 = vst [vmem:[%s8094_s1 + $0xec] sm:$0x1] %v3600_v36  ;;  %v3608_v43 = vld [vmem:[%s8094_s1 + $0xef] sm:$0x1]  ;;  %v825_v44 = vmax.bf16 %v501_v41, %v489_v40  ;;  %v490_v45 = vld [vmem:[%s8093_s0 + $0x1e2] sm:$0x1]  ;;  %v3603_v47 = vsel %vm4081_vm2, %v2837_v37, %v3602_v29 }
 0x191   :  { %v502_v46 = vld [vmem:[%s8093_s0 + $0x1ee] sm:$0x1]  ;;  %v2839_v48 = vmax.bf16 %v2068_v38, %v823_v30  ;;  %v2073_v49 = vshrl.u32 %v824_v39, 16  ;;  %v3611_v50 = vld [vmem:[%s8094_s1 + $0xf0] sm:$0x1]  ;;  %v3606_v53 = vsel %vm4081_vm2, %v2838_v42, %v3605_v34 }
 0x192   :  { %v826_v51 = vmax.bf16 %v502_v46, %v490_v45  ;;  %v491_v52 = vld [vmem:[%s8093_s0 + $0x1e3] sm:$0x1]  ;;  %3604 = vst [vmem:[%s8094_s1 + $0xed] sm:$0x1] %v3603_v47  ;;  %v2078_v54 = vshrl.u32 %v825_v44, 16 }
 0x193   :  { %v3614_v55 = vld [vmem:[%s8094_s1 + $0xf1] sm:$0x1]  ;;  %v503_v56 = vld [vmem:[%s8093_s0 + $0x1ef] sm:$0x1]  ;;  %3607 = vst [vmem:[%s8094_s1 + $0xee] sm:$0x1] %v3606_v53  ;;  %v3609_v57 = vsel %vm4081_vm2, %v2839_v48, %v3608_v43  ;;  %v2840_v58 = vmax.bf16 %v2073_v49, %v824_v39 }
 0x194   :  { %v2083_v59 = vshrl.u32 %v826_v51, 16  ;;  %v827_v60 = vmax.bf16 %v503_v56, %v491_v52  ;;  %v492_v61 = vld [vmem:[%s8093_s0 + $0x1e4] sm:$0x1]  ;;  %v504_v62 = vld [vmem:[%s8093_s0 + $0x1f0] sm:$0x1]  ;;  %v2841_v63 = vmax.bf16 %v2078_v54, %v825_v44 }
 0x195   :  { %3610 = vst [vmem:[%s8094_s1 + $0xef] sm:$0x1] %v3609_v57  ;;  %v3617_v0 = vld [vmem:[%s8094_s1 + $0xf2] sm:$0x1]  ;;  %v828_v1 = vmax.bf16 %v504_v62, %v492_v61  ;;  %v493_v2 = vld [vmem:[%s8093_s0 + $0x1e5] sm:$0x1]  ;;  %v3612_v4 = vsel %vm4081_vm2, %v2840_v58, %v3611_v50 }
 0x196   :  { %v505_v3 = vld [vmem:[%s8093_s0 + $0x1f1] sm:$0x1]  ;;  %v2842_v5 = vmax.bf16 %v2083_v59, %v826_v51  ;;  %v2088_v6 = vshrl.u32 %v827_v60, 16  ;;  %v3620_v7 = vld [vmem:[%s8094_s1 + $0xf3] sm:$0x1]  ;;  %v3615_v10 = vsel %vm4081_vm2, %v2841_v63, %v3614_v55 }
 0x197   :  { %v829_v8 = vmax.bf16 %v505_v3, %v493_v2  ;;  %v494_v9 = vld [vmem:[%s8093_s0 + $0x1e6] sm:$0x1]  ;;  %3613 = vst [vmem:[%s8094_s1 + $0xf0] sm:$0x1] %v3612_v4  ;;  %v2093_v11 = vshrl.u32 %v828_v1, 16 }
 0x198   :  { %v3623_v13 = vld [vmem:[%s8094_s1 + $0xf4] sm:$0x1]  ;;  %v506_v14 = vld [vmem:[%s8093_s0 + $0x1f2] sm:$0x1]  ;;  %3616 = vst [vmem:[%s8094_s1 + $0xf1] sm:$0x1] %v3615_v10  ;;  %v3618_v15 = vsel %vm4081_vm2, %v2842_v5, %v3617_v0  ;;  %v2843_v16 = vmax.bf16 %v2088_v6, %v827_v60 }
 0x199   :  { %v2098_v17 = vshrl.u32 %v829_v8, 16  ;;  %v830_v18 = vmax.bf16 %v506_v14, %v494_v9  ;;  %v495_v19 = vld [vmem:[%s8093_s0 + $0x1e7] sm:$0x1]  ;;  %v507_v20 = vld [vmem:[%s8093_s0 + $0x1f3] sm:$0x1]  ;;  %v2844_v21 = vmax.bf16 %v2093_v11, %v828_v1 }
 0x19a   :  { %3619 = vst [vmem:[%s8094_s1 + $0xf2] sm:$0x1] %v3618_v15  ;;  %v3626_v22 = vld [vmem:[%s8094_s1 + $0xf5] sm:$0x1]  ;;  %v831_v23 = vmax.bf16 %v507_v20, %v495_v19  ;;  %v496_v24 = vld [vmem:[%s8093_s0 + $0x1e8] sm:$0x1]  ;;  %v3621_v26 = vsel %vm4081_vm2, %v2843_v16, %v3620_v7 }
 0x19b   :  { %v508_v25 = vld [vmem:[%s8093_s0 + $0x1f4] sm:$0x1]  ;;  %v2845_v27 = vmax.bf16 %v2098_v17, %v829_v8  ;;  %v2103_v28 = vshrl.u32 %v830_v18, 16  ;;  %v3629_v29 = vld [vmem:[%s8094_s1 + $0xf6] sm:$0x1]  ;;  %v3624_v32 = vsel %vm4081_vm2, %v2844_v21, %v3623_v13 }
 0x19c   :  { %v832_v30 = vmax.bf16 %v508_v25, %v496_v24  ;;  %v497_v31 = vld [vmem:[%s8093_s0 + $0x1e9] sm:$0x1]  ;;  %3622 = vst [vmem:[%s8094_s1 + $0xf3] sm:$0x1] %v3621_v26  ;;  %v2108_v33 = vshrl.u32 %v831_v23, 16 }
 0x19d   :  { %v3632_v34 = vld [vmem:[%s8094_s1 + $0xf7] sm:$0x1]  ;;  %v509_v35 = vld [vmem:[%s8093_s0 + $0x1f5] sm:$0x1]  ;;  %3625 = vst [vmem:[%s8094_s1 + $0xf4] sm:$0x1] %v3624_v32  ;;  %v3627_v36 = vsel %vm4081_vm2, %v2845_v27, %v3626_v22  ;;  %v2846_v37 = vmax.bf16 %v2103_v28, %v830_v18 }
 0x19e   :  { %v2113_v38 = vshrl.u32 %v832_v30, 16  ;;  %v833_v39 = vmax.bf16 %v509_v35, %v497_v31  ;;  %v498_v40 = vld [vmem:[%s8093_s0 + $0x1ea] sm:$0x1]  ;;  %v510_v41 = vld [vmem:[%s8093_s0 + $0x1f6] sm:$0x1]  ;;  %v2847_v42 = vmax.bf16 %v2108_v33, %v831_v23 }
 0x19f   :  { %3628 = vst [vmem:[%s8094_s1 + $0xf5] sm:$0x1] %v3627_v36  ;;  %v3635_v43 = vld [vmem:[%s8094_s1 + $0xf8] sm:$0x1]  ;;  %v834_v44 = vmax.bf16 %v510_v41, %v498_v40  ;;  %v499_v45 = vld [vmem:[%s8093_s0 + $0x1eb] sm:$0x1]  ;;  %v3630_v47 = vsel %vm4081_vm2, %v2846_v37, %v3629_v29 }
 0x1a0   :  { %v511_v46 = vld [vmem:[%s8093_s0 + $0x1f7] sm:$0x1]  ;;  %v2848_v48 = vmax.bf16 %v2113_v38, %v832_v30  ;;  %v2118_v49 = vshrl.u32 %v833_v39, 16  ;;  %v3638_v50 = vld [vmem:[%s8094_s1 + $0xf9] sm:$0x1]  ;;  %v3633_v53 = vsel %vm4081_vm2, %v2847_v42, %v3632_v34 }
 0x1a1   :  { %v835_v51 = vmax.bf16 %v511_v46, %v499_v45  ;;  %v512_v52 = vld [vmem:[%s8093_s0 + $0x1f8] sm:$0x1]  ;;  %3631 = vst [vmem:[%s8094_s1 + $0xf6] sm:$0x1] %v3630_v47  ;;  %v2123_v54 = vshrl.u32 %v834_v44, 16 }
 0x1a2   :  { %v3641_v55 = vld [vmem:[%s8094_s1 + $0xfa] sm:$0x1]  ;;  %v524_v56 = vld [vmem:[%s8093_s0 + $0x204] sm:$0x1]  ;;  %3634 = vst [vmem:[%s8094_s1 + $0xf7] sm:$0x1] %v3633_v53  ;;  %v3636_v57 = vsel %vm4081_vm2, %v2848_v48, %v3635_v43  ;;  %v2849_v58 = vmax.bf16 %v2118_v49, %v833_v39 }
 0x1a3   :  { %v2128_v59 = vshrl.u32 %v835_v51, 16  ;;  %v836_v60 = vmax.bf16 %v524_v56, %v512_v52  ;;  %v513_v61 = vld [vmem:[%s8093_s0 + $0x1f9] sm:$0x1]  ;;  %v525_v62 = vld [vmem:[%s8093_s0 + $0x205] sm:$0x1]  ;;  %v2850_v63 = vmax.bf16 %v2123_v54, %v834_v44 }
 0x1a4   :  { %3637 = vst [vmem:[%s8094_s1 + $0xf8] sm:$0x1] %v3636_v57  ;;  %v3644_v0 = vld [vmem:[%s8094_s1 + $0xfb] sm:$0x1]  ;;  %v837_v1 = vmax.bf16 %v525_v62, %v513_v61  ;;  %v514_v2 = vld [vmem:[%s8093_s0 + $0x1fa] sm:$0x1]  ;;  %v3639_v4 = vsel %vm4081_vm2, %v2849_v58, %v3638_v50 }
 0x1a5   :  { %v526_v3 = vld [vmem:[%s8093_s0 + $0x206] sm:$0x1]  ;;  %v2851_v5 = vmax.bf16 %v2128_v59, %v835_v51  ;;  %v2133_v6 = vshrl.u32 %v836_v60, 16  ;;  %v3647_v7 = vld [vmem:[%s8094_s1 + $0xfc] sm:$0x1]  ;;  %v3642_v10 = vsel %vm4081_vm2, %v2850_v63, %v3641_v55 }
 0x1a6   :  { %v838_v8 = vmax.bf16 %v526_v3, %v514_v2  ;;  %v515_v9 = vld [vmem:[%s8093_s0 + $0x1fb] sm:$0x1]  ;;  %3640 = vst [vmem:[%s8094_s1 + $0xf9] sm:$0x1] %v3639_v4  ;;  %v2138_v11 = vshrl.u32 %v837_v1, 16 }
 0x1a7   :  { %v3650_v13 = vld [vmem:[%s8094_s1 + $0xfd] sm:$0x1]  ;;  %v527_v14 = vld [vmem:[%s8093_s0 + $0x207] sm:$0x1]  ;;  %3643 = vst [vmem:[%s8094_s1 + $0xfa] sm:$0x1] %v3642_v10  ;;  %v3645_v15 = vsel %vm4081_vm2, %v2851_v5, %v3644_v0  ;;  %v2852_v16 = vmax.bf16 %v2133_v6, %v836_v60 }
 0x1a8   :  { %v2143_v17 = vshrl.u32 %v838_v8, 16  ;;  %v839_v18 = vmax.bf16 %v527_v14, %v515_v9  ;;  %v516_v19 = vld [vmem:[%s8093_s0 + $0x1fc] sm:$0x1]  ;;  %v528_v20 = vld [vmem:[%s8093_s0 + $0x208] sm:$0x1]  ;;  %v2853_v21 = vmax.bf16 %v2138_v11, %v837_v1 }
 0x1a9   :  { %3646 = vst [vmem:[%s8094_s1 + $0xfb] sm:$0x1] %v3645_v15  ;;  %v3653_v22 = vld [vmem:[%s8094_s1 + $0xfe] sm:$0x1]  ;;  %v840_v23 = vmax.bf16 %v528_v20, %v516_v19  ;;  %v517_v24 = vld [vmem:[%s8093_s0 + $0x1fd] sm:$0x1]  ;;  %v3648_v26 = vsel %vm4081_vm2, %v2852_v16, %v3647_v7 }
 0x1aa   :  { %v529_v25 = vld [vmem:[%s8093_s0 + $0x209] sm:$0x1]  ;;  %v2854_v27 = vmax.bf16 %v2143_v17, %v838_v8  ;;  %v2148_v28 = vshrl.u32 %v839_v18, 16  ;;  %v3656_v29 = vld [vmem:[%s8094_s1 + $0xff] sm:$0x1]  ;;  %v3651_v32 = vsel %vm4081_vm2, %v2853_v21, %v3650_v13 }
 0x1ab   :  { %v841_v30 = vmax.bf16 %v529_v25, %v517_v24  ;;  %v518_v31 = vld [vmem:[%s8093_s0 + $0x1fe] sm:$0x1]  ;;  %3649 = vst [vmem:[%s8094_s1 + $0xfc] sm:$0x1] %v3648_v26  ;;  %v2153_v33 = vshrl.u32 %v840_v23, 16 }
 0x1ac   :  { %v3659_v34 = vld [vmem:[%s8094_s1 + $0x100] sm:$0x1]  ;;  %v530_v35 = vld [vmem:[%s8093_s0 + $0x20a] sm:$0x1]  ;;  %3652 = vst [vmem:[%s8094_s1 + $0xfd] sm:$0x1] %v3651_v32  ;;  %v3654_v36 = vsel %vm4081_vm2, %v2854_v27, %v3653_v22  ;;  %v2855_v37 = vmax.bf16 %v2148_v28, %v839_v18 }
 0x1ad   :  { %v2158_v38 = vshrl.u32 %v841_v30, 16  ;;  %v842_v39 = vmax.bf16 %v530_v35, %v518_v31  ;;  %v519_v40 = vld [vmem:[%s8093_s0 + $0x1ff] sm:$0x1]  ;;  %v531_v41 = vld [vmem:[%s8093_s0 + $0x20b] sm:$0x1]  ;;  %v2856_v42 = vmax.bf16 %v2153_v33, %v840_v23 }
 0x1ae   :  { %3655 = vst [vmem:[%s8094_s1 + $0xfe] sm:$0x1] %v3654_v36  ;;  %v3662_v43 = vld [vmem:[%s8094_s1 + $0x101] sm:$0x1]  ;;  %v843_v44 = vmax.bf16 %v531_v41, %v519_v40  ;;  %v520_v45 = vld [vmem:[%s8093_s0 + $0x200] sm:$0x1]  ;;  %v3657_v47 = vsel %vm4081_vm2, %v2855_v37, %v3656_v29 }
 0x1af   :  { %v532_v46 = vld [vmem:[%s8093_s0 + $0x20c] sm:$0x1]  ;;  %v2857_v48 = vmax.bf16 %v2158_v38, %v841_v30  ;;  %v2163_v49 = vshrl.u32 %v842_v39, 16  ;;  %v3665_v50 = vld [vmem:[%s8094_s1 + $0x102] sm:$0x1]  ;;  %v3660_v53 = vsel %vm4081_vm2, %v2856_v42, %v3659_v34 }
 0x1b0   :  { %v844_v51 = vmax.bf16 %v532_v46, %v520_v45  ;;  %v521_v52 = vld [vmem:[%s8093_s0 + $0x201] sm:$0x1]  ;;  %3658 = vst [vmem:[%s8094_s1 + $0xff] sm:$0x1] %v3657_v47  ;;  %v2168_v54 = vshrl.u32 %v843_v44, 16 }
 0x1b1   :  { %v3668_v55 = vld [vmem:[%s8094_s1 + $0x103] sm:$0x1]  ;;  %v533_v56 = vld [vmem:[%s8093_s0 + $0x20d] sm:$0x1]  ;;  %3661 = vst [vmem:[%s8094_s1 + $0x100] sm:$0x1] %v3660_v53  ;;  %v3663_v57 = vsel %vm4081_vm2, %v2857_v48, %v3662_v43  ;;  %v2858_v58 = vmax.bf16 %v2163_v49, %v842_v39 }
 0x1b2   :  { %v2173_v59 = vshrl.u32 %v844_v51, 16  ;;  %v845_v60 = vmax.bf16 %v533_v56, %v521_v52  ;;  %v522_v61 = vld [vmem:[%s8093_s0 + $0x202] sm:$0x1]  ;;  %v534_v62 = vld [vmem:[%s8093_s0 + $0x20e] sm:$0x1]  ;;  %v2859_v63 = vmax.bf16 %v2168_v54, %v843_v44 }
 0x1b3   :  { %3664 = vst [vmem:[%s8094_s1 + $0x101] sm:$0x1] %v3663_v57  ;;  %v3671_v0 = vld [vmem:[%s8094_s1 + $0x104] sm:$0x1]  ;;  %v846_v1 = vmax.bf16 %v534_v62, %v522_v61  ;;  %v523_v2 = vld [vmem:[%s8093_s0 + $0x203] sm:$0x1]  ;;  %v3666_v4 = vsel %vm4081_vm2, %v2858_v58, %v3665_v50 }
 0x1b4   :  { %v535_v3 = vld [vmem:[%s8093_s0 + $0x20f] sm:$0x1]  ;;  %v2860_v5 = vmax.bf16 %v2173_v59, %v844_v51  ;;  %v2178_v6 = vshrl.u32 %v845_v60, 16  ;;  %v3674_v7 = vld [vmem:[%s8094_s1 + $0x105] sm:$0x1]  ;;  %v3669_v10 = vsel %vm4081_vm2, %v2859_v63, %v3668_v55 }
 0x1b5   :  { %v847_v8 = vmax.bf16 %v535_v3, %v523_v2  ;;  %v536_v9 = vld [vmem:[%s8093_s0 + $0x210] sm:$0x1]  ;;  %3667 = vst [vmem:[%s8094_s1 + $0x102] sm:$0x1] %v3666_v4  ;;  %v2183_v11 = vshrl.u32 %v846_v1, 16 }
 0x1b6   :  { %v3677_v13 = vld [vmem:[%s8094_s1 + $0x106] sm:$0x1]  ;;  %v548_v14 = vld [vmem:[%s8093_s0 + $0x21c] sm:$0x1]  ;;  %3670 = vst [vmem:[%s8094_s1 + $0x103] sm:$0x1] %v3669_v10  ;;  %v3672_v15 = vsel %vm4081_vm2, %v2860_v5, %v3671_v0  ;;  %v2861_v16 = vmax.bf16 %v2178_v6, %v845_v60 }
 0x1b7   :  { %v2188_v17 = vshrl.u32 %v847_v8, 16  ;;  %v848_v18 = vmax.bf16 %v548_v14, %v536_v9  ;;  %v537_v19 = vld [vmem:[%s8093_s0 + $0x211] sm:$0x1]  ;;  %v549_v20 = vld [vmem:[%s8093_s0 + $0x21d] sm:$0x1]  ;;  %v2862_v21 = vmax.bf16 %v2183_v11, %v846_v1 }
 0x1b8   :  { %3673 = vst [vmem:[%s8094_s1 + $0x104] sm:$0x1] %v3672_v15  ;;  %v3680_v22 = vld [vmem:[%s8094_s1 + $0x107] sm:$0x1]  ;;  %v849_v23 = vmax.bf16 %v549_v20, %v537_v19  ;;  %v538_v24 = vld [vmem:[%s8093_s0 + $0x212] sm:$0x1]  ;;  %v3675_v26 = vsel %vm4081_vm2, %v2861_v16, %v3674_v7 }
 0x1b9   :  { %v550_v25 = vld [vmem:[%s8093_s0 + $0x21e] sm:$0x1]  ;;  %v2863_v27 = vmax.bf16 %v2188_v17, %v847_v8  ;;  %v2193_v28 = vshrl.u32 %v848_v18, 16  ;;  %v3683_v29 = vld [vmem:[%s8094_s1 + $0x108] sm:$0x1]  ;;  %v3678_v32 = vsel %vm4081_vm2, %v2862_v21, %v3677_v13 }
 0x1ba   :  { %v850_v30 = vmax.bf16 %v550_v25, %v538_v24  ;;  %v539_v31 = vld [vmem:[%s8093_s0 + $0x213] sm:$0x1]  ;;  %3676 = vst [vmem:[%s8094_s1 + $0x105] sm:$0x1] %v3675_v26  ;;  %v2198_v33 = vshrl.u32 %v849_v23, 16 }
 0x1bb   :  { %v3686_v34 = vld [vmem:[%s8094_s1 + $0x109] sm:$0x1]  ;;  %v551_v35 = vld [vmem:[%s8093_s0 + $0x21f] sm:$0x1]  ;;  %3679 = vst [vmem:[%s8094_s1 + $0x106] sm:$0x1] %v3678_v32  ;;  %v3681_v36 = vsel %vm4081_vm2, %v2863_v27, %v3680_v22  ;;  %v2864_v37 = vmax.bf16 %v2193_v28, %v848_v18 }
 0x1bc   :  { %v2203_v38 = vshrl.u32 %v850_v30, 16  ;;  %v851_v39 = vmax.bf16 %v551_v35, %v539_v31  ;;  %v540_v40 = vld [vmem:[%s8093_s0 + $0x214] sm:$0x1]  ;;  %v552_v41 = vld [vmem:[%s8093_s0 + $0x220] sm:$0x1]  ;;  %v2865_v42 = vmax.bf16 %v2198_v33, %v849_v23 }
 0x1bd   :  { %3682 = vst [vmem:[%s8094_s1 + $0x107] sm:$0x1] %v3681_v36  ;;  %v3689_v43 = vld [vmem:[%s8094_s1 + $0x10a] sm:$0x1]  ;;  %v852_v44 = vmax.bf16 %v552_v41, %v540_v40  ;;  %v541_v45 = vld [vmem:[%s8093_s0 + $0x215] sm:$0x1]  ;;  %v3684_v47 = vsel %vm4081_vm2, %v2864_v37, %v3683_v29 }
 0x1be   :  { %v553_v46 = vld [vmem:[%s8093_s0 + $0x221] sm:$0x1]  ;;  %v2866_v48 = vmax.bf16 %v2203_v38, %v850_v30  ;;  %v2208_v49 = vshrl.u32 %v851_v39, 16  ;;  %v3692_v50 = vld [vmem:[%s8094_s1 + $0x10b] sm:$0x1]  ;;  %v3687_v53 = vsel %vm4081_vm2, %v2865_v42, %v3686_v34 }
 0x1bf   :  { %v853_v51 = vmax.bf16 %v553_v46, %v541_v45  ;;  %v542_v52 = vld [vmem:[%s8093_s0 + $0x216] sm:$0x1]  ;;  %3685 = vst [vmem:[%s8094_s1 + $0x108] sm:$0x1] %v3684_v47  ;;  %v2213_v54 = vshrl.u32 %v852_v44, 16 }
 0x1c0   :  { %v3695_v55 = vld [vmem:[%s8094_s1 + $0x10c] sm:$0x1]  ;;  %v554_v56 = vld [vmem:[%s8093_s0 + $0x222] sm:$0x1]  ;;  %3688 = vst [vmem:[%s8094_s1 + $0x109] sm:$0x1] %v3687_v53  ;;  %v3690_v57 = vsel %vm4081_vm2, %v2866_v48, %v3689_v43  ;;  %v2867_v58 = vmax.bf16 %v2208_v49, %v851_v39 }
 0x1c1   :  { %v2218_v59 = vshrl.u32 %v853_v51, 16  ;;  %v854_v60 = vmax.bf16 %v554_v56, %v542_v52  ;;  %v543_v61 = vld [vmem:[%s8093_s0 + $0x217] sm:$0x1]  ;;  %v555_v62 = vld [vmem:[%s8093_s0 + $0x223] sm:$0x1]  ;;  %v2868_v63 = vmax.bf16 %v2213_v54, %v852_v44 }
 0x1c2   :  { %3691 = vst [vmem:[%s8094_s1 + $0x10a] sm:$0x1] %v3690_v57  ;;  %v3698_v0 = vld [vmem:[%s8094_s1 + $0x10d] sm:$0x1]  ;;  %v855_v1 = vmax.bf16 %v555_v62, %v543_v61  ;;  %v544_v2 = vld [vmem:[%s8093_s0 + $0x218] sm:$0x1]  ;;  %v3693_v4 = vsel %vm4081_vm2, %v2867_v58, %v3692_v50 }
 0x1c3   :  { %v556_v3 = vld [vmem:[%s8093_s0 + $0x224] sm:$0x1]  ;;  %v2869_v5 = vmax.bf16 %v2218_v59, %v853_v51  ;;  %v2223_v6 = vshrl.u32 %v854_v60, 16  ;;  %v3701_v7 = vld [vmem:[%s8094_s1 + $0x10e] sm:$0x1]  ;;  %v3696_v10 = vsel %vm4081_vm2, %v2868_v63, %v3695_v55 }
 0x1c4   :  { %v856_v8 = vmax.bf16 %v556_v3, %v544_v2  ;;  %v545_v9 = vld [vmem:[%s8093_s0 + $0x219] sm:$0x1]  ;;  %3694 = vst [vmem:[%s8094_s1 + $0x10b] sm:$0x1] %v3693_v4  ;;  %v2228_v11 = vshrl.u32 %v855_v1, 16 }
 0x1c5   :  { %v3704_v13 = vld [vmem:[%s8094_s1 + $0x10f] sm:$0x1]  ;;  %v557_v14 = vld [vmem:[%s8093_s0 + $0x225] sm:$0x1]  ;;  %3697 = vst [vmem:[%s8094_s1 + $0x10c] sm:$0x1] %v3696_v10  ;;  %v3699_v15 = vsel %vm4081_vm2, %v2869_v5, %v3698_v0  ;;  %v2870_v16 = vmax.bf16 %v2223_v6, %v854_v60 }
 0x1c6   :  { %v2233_v17 = vshrl.u32 %v856_v8, 16  ;;  %v857_v18 = vmax.bf16 %v557_v14, %v545_v9  ;;  %v546_v19 = vld [vmem:[%s8093_s0 + $0x21a] sm:$0x1]  ;;  %v558_v20 = vld [vmem:[%s8093_s0 + $0x226] sm:$0x1]  ;;  %v2871_v21 = vmax.bf16 %v2228_v11, %v855_v1 }
 0x1c7   :  { %3700 = vst [vmem:[%s8094_s1 + $0x10d] sm:$0x1] %v3699_v15  ;;  %v3707_v22 = vld [vmem:[%s8094_s1 + $0x110] sm:$0x1]  ;;  %v858_v23 = vmax.bf16 %v558_v20, %v546_v19  ;;  %v547_v24 = vld [vmem:[%s8093_s0 + $0x21b] sm:$0x1]  ;;  %v3702_v26 = vsel %vm4081_vm2, %v2870_v16, %v3701_v7 }
 0x1c8   :  { %v559_v25 = vld [vmem:[%s8093_s0 + $0x227] sm:$0x1]  ;;  %v2872_v27 = vmax.bf16 %v2233_v17, %v856_v8  ;;  %v2238_v28 = vshrl.u32 %v857_v18, 16  ;;  %v3710_v29 = vld [vmem:[%s8094_s1 + $0x111] sm:$0x1]  ;;  %v3705_v32 = vsel %vm4081_vm2, %v2871_v21, %v3704_v13 }
 0x1c9   :  { %v859_v30 = vmax.bf16 %v559_v25, %v547_v24  ;;  %v560_v31 = vld [vmem:[%s8093_s0 + $0x228] sm:$0x1]  ;;  %3703 = vst [vmem:[%s8094_s1 + $0x10e] sm:$0x1] %v3702_v26  ;;  %v2243_v33 = vshrl.u32 %v858_v23, 16 }
 0x1ca   :  { %v3713_v34 = vld [vmem:[%s8094_s1 + $0x112] sm:$0x1]  ;;  %v572_v35 = vld [vmem:[%s8093_s0 + $0x234] sm:$0x1]  ;;  %3706 = vst [vmem:[%s8094_s1 + $0x10f] sm:$0x1] %v3705_v32  ;;  %v3708_v36 = vsel %vm4081_vm2, %v2872_v27, %v3707_v22  ;;  %v2873_v37 = vmax.bf16 %v2238_v28, %v857_v18 }
 0x1cb   :  { %v2248_v38 = vshrl.u32 %v859_v30, 16  ;;  %v860_v39 = vmax.bf16 %v572_v35, %v560_v31  ;;  %v561_v40 = vld [vmem:[%s8093_s0 + $0x229] sm:$0x1]  ;;  %v573_v41 = vld [vmem:[%s8093_s0 + $0x235] sm:$0x1]  ;;  %v2874_v42 = vmax.bf16 %v2243_v33, %v858_v23 }
 0x1cc   :  { %3709 = vst [vmem:[%s8094_s1 + $0x110] sm:$0x1] %v3708_v36  ;;  %v3716_v43 = vld [vmem:[%s8094_s1 + $0x113] sm:$0x1]  ;;  %v861_v44 = vmax.bf16 %v573_v41, %v561_v40  ;;  %v562_v45 = vld [vmem:[%s8093_s0 + $0x22a] sm:$0x1]  ;;  %v3711_v47 = vsel %vm4081_vm2, %v2873_v37, %v3710_v29 }
 0x1cd   :  { %v574_v46 = vld [vmem:[%s8093_s0 + $0x236] sm:$0x1]  ;;  %v2875_v48 = vmax.bf16 %v2248_v38, %v859_v30  ;;  %v2253_v49 = vshrl.u32 %v860_v39, 16  ;;  %v3719_v50 = vld [vmem:[%s8094_s1 + $0x114] sm:$0x1]  ;;  %v3714_v53 = vsel %vm4081_vm2, %v2874_v42, %v3713_v34 }
 0x1ce   :  { %v862_v51 = vmax.bf16 %v574_v46, %v562_v45  ;;  %v563_v52 = vld [vmem:[%s8093_s0 + $0x22b] sm:$0x1]  ;;  %3712 = vst [vmem:[%s8094_s1 + $0x111] sm:$0x1] %v3711_v47  ;;  %v2258_v54 = vshrl.u32 %v861_v44, 16 }
 0x1cf   :  { %v3722_v55 = vld [vmem:[%s8094_s1 + $0x115] sm:$0x1]  ;;  %v575_v56 = vld [vmem:[%s8093_s0 + $0x237] sm:$0x1]  ;;  %3715 = vst [vmem:[%s8094_s1 + $0x112] sm:$0x1] %v3714_v53  ;;  %v3717_v57 = vsel %vm4081_vm2, %v2875_v48, %v3716_v43  ;;  %v2876_v58 = vmax.bf16 %v2253_v49, %v860_v39 }
 0x1d0   :  { %v2263_v59 = vshrl.u32 %v862_v51, 16  ;;  %v863_v60 = vmax.bf16 %v575_v56, %v563_v52  ;;  %v564_v61 = vld [vmem:[%s8093_s0 + $0x22c] sm:$0x1]  ;;  %v576_v62 = vld [vmem:[%s8093_s0 + $0x238] sm:$0x1]  ;;  %v2877_v63 = vmax.bf16 %v2258_v54, %v861_v44 }
 0x1d1   :  { %3718 = vst [vmem:[%s8094_s1 + $0x113] sm:$0x1] %v3717_v57  ;;  %v3725_v0 = vld [vmem:[%s8094_s1 + $0x116] sm:$0x1]  ;;  %v864_v1 = vmax.bf16 %v576_v62, %v564_v61  ;;  %v565_v2 = vld [vmem:[%s8093_s0 + $0x22d] sm:$0x1]  ;;  %v3720_v4 = vsel %vm4081_vm2, %v2876_v58, %v3719_v50 }
 0x1d2   :  { %v577_v3 = vld [vmem:[%s8093_s0 + $0x239] sm:$0x1]  ;;  %v2878_v5 = vmax.bf16 %v2263_v59, %v862_v51  ;;  %v2268_v6 = vshrl.u32 %v863_v60, 16  ;;  %v3728_v7 = vld [vmem:[%s8094_s1 + $0x117] sm:$0x1]  ;;  %v3723_v10 = vsel %vm4081_vm2, %v2877_v63, %v3722_v55 }
 0x1d3   :  { %v865_v8 = vmax.bf16 %v577_v3, %v565_v2  ;;  %v566_v9 = vld [vmem:[%s8093_s0 + $0x22e] sm:$0x1]  ;;  %3721 = vst [vmem:[%s8094_s1 + $0x114] sm:$0x1] %v3720_v4  ;;  %v2273_v11 = vshrl.u32 %v864_v1, 16 }
 0x1d4   :  { %v3731_v13 = vld [vmem:[%s8094_s1 + $0x118] sm:$0x1]  ;;  %v578_v14 = vld [vmem:[%s8093_s0 + $0x23a] sm:$0x1]  ;;  %3724 = vst [vmem:[%s8094_s1 + $0x115] sm:$0x1] %v3723_v10  ;;  %v3726_v15 = vsel %vm4081_vm2, %v2878_v5, %v3725_v0  ;;  %v2879_v16 = vmax.bf16 %v2268_v6, %v863_v60 }
 0x1d5   :  { %v2278_v17 = vshrl.u32 %v865_v8, 16  ;;  %v866_v18 = vmax.bf16 %v578_v14, %v566_v9  ;;  %v567_v19 = vld [vmem:[%s8093_s0 + $0x22f] sm:$0x1]  ;;  %v579_v20 = vld [vmem:[%s8093_s0 + $0x23b] sm:$0x1]  ;;  %v2880_v21 = vmax.bf16 %v2273_v11, %v864_v1 }
 0x1d6   :  { %3727 = vst [vmem:[%s8094_s1 + $0x116] sm:$0x1] %v3726_v15  ;;  %v3734_v22 = vld [vmem:[%s8094_s1 + $0x119] sm:$0x1]  ;;  %v867_v23 = vmax.bf16 %v579_v20, %v567_v19  ;;  %v568_v24 = vld [vmem:[%s8093_s0 + $0x230] sm:$0x1]  ;;  %v3729_v26 = vsel %vm4081_vm2, %v2879_v16, %v3728_v7 }
 0x1d7   :  { %v580_v25 = vld [vmem:[%s8093_s0 + $0x23c] sm:$0x1]  ;;  %v2881_v27 = vmax.bf16 %v2278_v17, %v865_v8  ;;  %v2283_v28 = vshrl.u32 %v866_v18, 16  ;;  %v3737_v29 = vld [vmem:[%s8094_s1 + $0x11a] sm:$0x1]  ;;  %v3732_v32 = vsel %vm4081_vm2, %v2880_v21, %v3731_v13 }
 0x1d8   :  { %v868_v30 = vmax.bf16 %v580_v25, %v568_v24  ;;  %v569_v31 = vld [vmem:[%s8093_s0 + $0x231] sm:$0x1]  ;;  %3730 = vst [vmem:[%s8094_s1 + $0x117] sm:$0x1] %v3729_v26  ;;  %v2288_v33 = vshrl.u32 %v867_v23, 16 }
 0x1d9   :  { %v3740_v34 = vld [vmem:[%s8094_s1 + $0x11b] sm:$0x1]  ;;  %v581_v35 = vld [vmem:[%s8093_s0 + $0x23d] sm:$0x1]  ;;  %3733 = vst [vmem:[%s8094_s1 + $0x118] sm:$0x1] %v3732_v32  ;;  %v3735_v36 = vsel %vm4081_vm2, %v2881_v27, %v3734_v22  ;;  %v2882_v37 = vmax.bf16 %v2283_v28, %v866_v18 }
 0x1da   :  { %v2293_v38 = vshrl.u32 %v868_v30, 16  ;;  %v869_v39 = vmax.bf16 %v581_v35, %v569_v31  ;;  %v570_v40 = vld [vmem:[%s8093_s0 + $0x232] sm:$0x1]  ;;  %v582_v41 = vld [vmem:[%s8093_s0 + $0x23e] sm:$0x1]  ;;  %v2883_v42 = vmax.bf16 %v2288_v33, %v867_v23 }
 0x1db   :  { %3736 = vst [vmem:[%s8094_s1 + $0x119] sm:$0x1] %v3735_v36  ;;  %v3743_v43 = vld [vmem:[%s8094_s1 + $0x11c] sm:$0x1]  ;;  %v870_v44 = vmax.bf16 %v582_v41, %v570_v40  ;;  %v571_v45 = vld [vmem:[%s8093_s0 + $0x233] sm:$0x1]  ;;  %v3738_v47 = vsel %vm4081_vm2, %v2882_v37, %v3737_v29 }
 0x1dc   :  { %v583_v46 = vld [vmem:[%s8093_s0 + $0x23f] sm:$0x1]  ;;  %v2884_v48 = vmax.bf16 %v2293_v38, %v868_v30  ;;  %v2298_v49 = vshrl.u32 %v869_v39, 16  ;;  %3739 = vst [vmem:[%s8094_s1 + $0x11a] sm:$0x1] %v3738_v47  ;;  %v3741_v51 = vsel %vm4081_vm2, %v2883_v42, %v3740_v34 }
 0x1dd   :  { %v871_v50 = vmax.bf16 %v583_v46, %v571_v45  ;;  %v3746_v52 = vld [vmem:[%s8094_s1 + $0x11d] sm:$0x1]  ;;  %v2303_v53 = vshrl.u32 %v870_v44, 16  ;;  %3742 = vst [vmem:[%s8094_s1 + $0x11b] sm:$0x1] %v3741_v51 }
 0x1de   :  { %v3744_v54 = vsel %vm4081_vm2, %v2884_v48, %v3743_v43  ;;  %v2885_v55 = vmax.bf16 %v2298_v49, %v869_v39  ;;  %v3749_v56 = vld [vmem:[%s8094_s1 + $0x11e] sm:$0x1]  ;;  %v3752_v59 = vld [vmem:[%s8094_s1 + $0x11f] sm:$0x1] }
 0x1df   :  { %v2308_v57 = vshrl.u32 %v871_v50, 16  ;;  %3745 = vst [vmem:[%s8094_s1 + $0x11c] sm:$0x1] %v3744_v54  ;;  %v2886_v58 = vmax.bf16 %v2303_v53, %v870_v44 }
 0x1e0   :  { %v3747_v60 = vsel %vm4081_vm2, %v2885_v55, %v3746_v52 }
 0x1e1   :  { %v2887_v61 = vmax.bf16 %v2308_v57, %v871_v50  ;;  %3748 = vst [vmem:[%s8094_s1 + $0x11d] sm:$0x1] %v3747_v60  ;;  %v3750_v62 = vsel %vm4081_vm2, %v2886_v58, %v3749_v56 }
 0x1e2   :  { %3751 = vst [vmem:[%s8094_s1 + $0x11e] sm:$0x1] %v3750_v62 }
 0x1e3   :  { %v3753_v63 = vsel %vm4081_vm2, %v2887_v61, %v3752_v59 }
 0x1e4   :  { %3754 = vst [vmem:[%s8094_s1 + $0x11f] sm:$0x1] %v3753_v63 }

// kernel: net_forward.7
= control target key start
LH: loop header
LB: loop body
LE: loop exit
PB: predicated region body
PF: predicated region fallthrough
CT: control target
= control target key end

     0   :  { %v1203_v28 = vlaneseq  ;;  %v8794_v36 = vmov 1966171168   ;;  %s10784_s0 = inlined_call_operand.vmem [shape: bf16[2,9216], index: 0, kind: input, shape index: {}]   ;;  %s10785_s1 = inlined_call_operand.vmem [shape: bf16[9216,128], index: 1, kind: input, shape index: {}]   ;;  %s10786_s2 = inlined_call_operand.vmem [shape: f32[1,128], index: 2, kind: input, shape index: {}]   ;;  %s10787_s3 = inlined_call_operand.vmem [shape: f32[128,10], index: 3, kind: input, shape index: {}]   ;;  %s10788_s4 = inlined_call_operand.vmem [shape: f32[1,10], index: 4, kind: input, shape index: {}]   ;;  %s10789_s5 = inlined_call_operand.hbm [shape: f32[2,10], index: 5, kind: output, shape index: {}]  }
   0x1   :  { %v8181_v0 = vld [vmem:[%s10785_s1 + $0x40] sm:$0xff]   ;;  %v8185_v4 = vld [vmem:[%s10785_s1 + $0x48] sm:$0xff]   ;;  %v8189_v8 = vld [vmem:[%s10785_s1 + $0x50] sm:$0xff]   ;;  %v1201_v37 = vunpack.c.l.s4 %v8794_v36 }
   0x2   :  { %v8182_v1 = vld [vmem:[%s10785_s1 + $0xc0] sm:$0xff]   ;;  %7308 = vmatprep.subr.bf16.mxu0 %v8181_v0  ;;  %v8186_v5 = vld [vmem:[%s10785_s1 + $0xc8] sm:$0xff]   ;;  %v8190_v9 = vld [vmem:[%s10785_s1 + $0xd0] sm:$0xff]   ;;  %v1204_v33 = vshrl.u32 %v1203_v28, 7 }
   0x3   :  { %v8183_v2 = vld [vmem:[%s10785_s1] sm:$0xff]   ;;  %7330 = vmatprep.subr.bf16.mxu1 %v8182_v1  ;;  %v8187_v6 = vld [vmem:[%s10785_s1 + $0x8] sm:$0xff]   ;;  %v8191_v10 = vld [vmem:[%s10785_s1 + $0x10] sm:$0xff]   ;;  %v1202_v40 = vunpack.c.0.s8 %v1201_v37 }
   0x4   :  { %v8184_v3 = vld [vmem:[%s10785_s1 + $0x80] sm:$0xff]   ;;  %7309 = vmatpush3.bf16.msra.mxu0 %v8183_v2  ;;  %v8188_v7 = vld [vmem:[%s10785_s1 + $0x88] sm:$0xff]   ;;  %v8192_v11 = vld [vmem:[%s10785_s1 + $0x90] sm:$0xff]  }
   0x5   :  { %7331 = vmatpush3.bf16.msra.mxu1 %v8184_v3  ;;  %7310 = vmatprep.subr.bf16.mxu0 %v8185_v4  ;;  %v8193_v12 = vld [vmem:[%s10785_s1 + $0x58] sm:$0xff]   ;;  %v8197_v16 = vld [vmem:[%s10785_s1 + $0x60] sm:$0xff]   ;;  %v8201_v20 = vld [vmem:[%s10785_s1 + $0x68] sm:$0xff]   ;;  %v8934_v41 = vsub.s32 %v1202_v40, %v1204_v33 }
   0x6   :  { %7332 = vmatprep.subr.bf16.mxu1 %v8186_v5  ;;  %v8194_v13 = vld [vmem:[%s10785_s1 + $0xd8] sm:$0xff]   ;;  %v8198_v17 = vld [vmem:[%s10785_s1 + $0xe0] sm:$0xff]   ;;  %v8202_v21 = vld [vmem:[%s10785_s1 + $0xe8] sm:$0xff]  }
   0x7   :  { %v8195_v14 = vld [vmem:[%s10785_s1 + $0x18] sm:$0xff]   ;;  %v8199_v18 = vld [vmem:[%s10785_s1 + $0x20] sm:$0xff]   ;;  %v8203_v22 = vld [vmem:[%s10785_s1 + $0x28] sm:$0xff]  }
   0x8   :  { %7311 = vmatpush3.bf16.msra.mxu0 %v8187_v6  ;;  %v8196_v15 = vld [vmem:[%s10785_s1 + $0x98] sm:$0xff]   ;;  %v8200_v19 = vld [vmem:[%s10785_s1 + $0xa0] sm:$0xff]   ;;  %v8204_v23 = vld [vmem:[%s10785_s1 + $0xa8] sm:$0xff]  }
   0x9   :  { %7333 = vmatpush3.bf16.msra.mxu1 %v8188_v7  ;;  %7312 = vmatprep.subr.bf16.mxu0 %v8189_v8  ;;  %v8205_v24 = vld [vmem:[%s10785_s1 + $0x70] sm:$0xff]   ;;  %v8209_v29 = vld [vmem:[%s10785_s1 + $0x78] sm:$0xff]   ;;  %v22_v34 = vld [vmem:[%s10784_s0] sm:$0xff] }
   0xa   :  { %7334 = vmatprep.subr.bf16.mxu1 %v8190_v9  ;;  %v8206_v25 = vld [vmem:[%s10785_s1 + $0xf0] sm:$0xff]   ;;  %v8210_v30 = vld [vmem:[%s10785_s1 + $0xf8] sm:$0xff]   ;;  %v8214_v35 = vld [vmem:[%s10785_s1 + $0x140] sm:$0xff]   ;;  %v1199_v39 = vcombine.high %v22_v34, %v22_v34  ;;  %v1206_v42 = vrot.slane %v22_v34, %v8934_v41 }
   0xb   :  { %v8207_v26 = vld [vmem:[%s10785_s1 + $0x30] sm:$0xff]   ;;  %v8211_v31 = vld [vmem:[%s10785_s1 + $0x38] sm:$0xff]   ;;  %v8215_v38 = vld [vmem:[%s10785_s1 + $0x1c0] sm:$0xff]  }
   0xc   :  { %7313 = vmatpush3.bf16.msra.mxu0 %v8191_v10  ;;  %v8208_v27 = vld [vmem:[%s10785_s1 + $0xb0] sm:$0xff]   ;;  %v8212_v32 = vld [vmem:[%s10785_s1 + $0xb8] sm:$0xff]   ;;  %v8938_v43 = vrot.slane %v1199_v39, %v8934_v41  ;;  %v1214_v44 = vcombine.high %v1206_v42, %v1206_v42  ;;  %v1222_v45 = vrot.slane %v1206_v42, %v8934_v41  ;;  %v8216_v47 = vld [vmem:[%s10785_s1 + $0x100] sm:$0xff]  }
   0xd   :  { %7335 = vmatpush3.bf16.msra.mxu1 %v8192_v11  ;;  %7314 = vmatprep.subr.bf16.mxu0 %v8193_v12  ;;  %v8217_v49 = vld [vmem:[%s10785_s1 + $0x180] sm:$0xff]   ;;  %v8218_v52 = vld [vmem:[%s10785_s1 + $0x148] sm:$0xff]   ;;  %v8222_v58 = vld [vmem:[%s10785_s1 + $0x150] sm:$0xff]  }
   0xe   :  { %7336 = vmatprep.subr.bf16.mxu1 %v8194_v13  ;;  %v1215_v46 = vcombine.high %v8938_v43, %v8938_v43  ;;  %v1236_v48 = vrot.slane %v1214_v44, %v8934_v41  ;;  %v1244_v51 = vcombine.high %v1222_v45, %v1222_v45  ;;  %v8219_v54 = vld [vmem:[%s10785_s1 + $0x1c8] sm:$0xff]   ;;  %v8223_v59 = vld [vmem:[%s10785_s1 + $0x1d0] sm:$0xff]   ;;  %v8226_v62 = vld [vmem:[%s10785_s1 + $0x158] sm:$0xff]  }
   0xf   :  { %v8220_v55 = vld [vmem:[%s10785_s1 + $0x108] sm:$0xff]   ;;  %v8224_v60 = vld [vmem:[%s10785_s1 + $0x110] sm:$0xff]   ;;  %v8227_v63 = vld [vmem:[%s10785_s1 + $0x1d8] sm:$0xff]  }
  0x10   :  { %7315 = vmatpush3.bf16.msra.mxu0 %v8195_v14  ;;  %v1243_v50 = vrot.slane %v1215_v46, %v8934_v41  ;;  %5200 = vmatprep.mubr.bf16.mxu0 %v1236_v48  ;;  %v1246_v53 = vcombine.high %v1236_v48, %v1236_v48  ;;  %v8221_v57 = vld [vmem:[%s10785_s1 + $0x188] sm:$0xff]   ;;  %v8225_v61 = vld [vmem:[%s10785_s1 + $0x190] sm:$0xff]   ;;  %v8228_v0 = vld [vmem:[%s10785_s1 + $0x118] sm:$0xff]  }
  0x11   :  { %7337 = vmatpush3.bf16.msra.mxu1 %v8196_v15  ;;  %7316 = vmatprep.subr.bf16.mxu0 %v8197_v16  ;;  %v8229_v1 = vld [vmem:[%s10785_s1 + $0x198] sm:$0xff]   ;;  %v8230_v2 = vld [vmem:[%s10785_s1 + $0x160] sm:$0xff]   ;;  %v8234_v6 = vld [vmem:[%s10785_s1 + $0x168] sm:$0xff]  }
  0x12   :  { %7338 = vmatprep.subr.bf16.mxu1 %v8198_v17  ;;  %v1247_v56 = vcombine.high %v1243_v50, %v1243_v50  ;;  %5240 = vmatprep.mubr.bf16.mxu1 %v1246_v53  ;;  %v8231_v3 = vld [vmem:[%s10785_s1 + $0x1e0] sm:$0xff]   ;;  %v8235_v7 = vld [vmem:[%s10785_s1 + $0x1e8] sm:$0xff]   ;;  %v8238_v10 = vld [vmem:[%s10785_s1 + $0x170] sm:$0xff]  }
  0x13   :  { %v8232_v4 = vld [vmem:[%s10785_s1 + $0x120] sm:$0xff]   ;;  %v8236_v8 = vld [vmem:[%s10785_s1 + $0x128] sm:$0xff]   ;;  %v8239_v11 = vld [vmem:[%s10785_s1 + $0x1f0] sm:$0xff]  }
  0x14   :  { %7317 = vmatpush3.bf16.msra.mxu0 %v8199_v18  ;;  %v8233_v5 = vld [vmem:[%s10785_s1 + $0x1a0] sm:$0xff]   ;;  %v8237_v9 = vld [vmem:[%s10785_s1 + $0x1a8] sm:$0xff]   ;;  %v8240_v12 = vld [vmem:[%s10785_s1 + $0x130] sm:$0xff]   ;;  %v1229_v18 = vrot.slane %v8938_v43, %v8934_v41 }
  0x15   :  { %7339 = vmatpush3.bf16.msra.mxu1 %v8200_v19  ;;  %7318 = vmatprep.subr.bf16.mxu0 %v8201_v20  ;;  %v8241_v13 = vld [vmem:[%s10785_s1 + $0x1b0] sm:$0xff]   ;;  %v8242_v14 = vld [vmem:[%s10785_s1 + $0x178] sm:$0xff]   ;;  %v8246_v19 = vld [vmem:[%s10785_s1 + $0x240] sm:$0xff]  }
  0x16   :  { %7340 = vmatprep.subr.bf16.mxu1 %v8202_v21  ;;  %v8243_v15 = vld [vmem:[%s10785_s1 + $0x1f8] sm:$0xff]   ;;  %v8247_v20 = vld [vmem:[%s10785_s1 + $0x2c0] sm:$0xff]   ;;  %v8254_v28 = vld [vmem:[%s10785_s1 + $0x250] sm:$0xff]  }
  0x17   :  { %v8244_v16 = vld [vmem:[%s10785_s1 + $0x138] sm:$0xff]   ;;  %v8248_v21 = vld [vmem:[%s10785_s1 + $0x200] sm:$0xff]   ;;  %v8266_v40 = vld [vmem:[%s10785_s1 + $0x268] sm:$0xff]  }
  0x18   :  { %7319 = vmatpush3.bf16.msra.mxu0 %v8203_v22  ;;  %v8245_v17 = vld [vmem:[%s10785_s1 + $0x1b8] sm:$0xff]   ;;  %v8249_v22 = vld [vmem:[%s10785_s1 + $0x280] sm:$0xff]   ;;  %v8267_v42 = vld [vmem:[%s10785_s1 + $0x2e8] sm:$0xff]  }
  0x19   :  { %7341 = vmatpush3.bf16.msra.mxu1 %v8204_v23  ;;  %7320 = vmatprep.subr.bf16.mxu0 %v8205_v24  ;;  %v1245_v23 = vcombine.high %v1229_v18, %v1229_v18  ;;  %v8250_v24 = vld [vmem:[%s10785_s1 + $0x248] sm:$0xff]   ;;  %v8259_v33 = vld [vmem:[%s10785_s1 + $0x2d8] sm:$0xff]   ;;  %v8262_v36 = vld [vmem:[%s10785_s1 + $0x260] sm:$0xff]  }
  0x1a   :  { %7342 = vmatprep.subr.bf16.mxu1 %v8206_v25  ;;  %v8251_v25 = vld [vmem:[%s10785_s1 + $0x2c8] sm:$0xff]   ;;  %v8260_v34 = vld [vmem:[%s10785_s1 + $0x218] sm:$0xff]   ;;  %v8263_v37 = vld [vmem:[%s10785_s1 + $0x2e0] sm:$0xff]  }
  0x1b   :  { %v8265_v39 = vld [vmem:[%s10785_s1 + $0x2a0] sm:$0xff]   ;;  %v8268_v43 = vld [vmem:[%s10785_s1 + $0x228] sm:$0xff]  }
  0x1c   :  { %7321 = vmatpush3.bf16.msra.mxu0 %v8207_v26  ;;  %v8252_v26 = vld [vmem:[%s10785_s1 + $0x208] sm:$0xff]  }
  0x1d   :  { %7343 = vmatpush3.bf16.msra.mxu1 %v8208_v27  ;;  %7322 = vmatprep.subr.bf16.mxu0 %v8209_v29  ;;  %v8253_v27 = vld [vmem:[%s10785_s1 + $0x288] sm:$0xff]   ;;  %v8255_v29 = vld [vmem:[%s10785_s1 + $0x2d0] sm:$0xff]  }
  0x1e   :  { %7344 = vmatprep.subr.bf16.mxu1 %v8210_v30  ;;  %v8256_v30 = vld [vmem:[%s10785_s1 + $0x210] sm:$0xff]   ;;  %v8269_v44 = vld [vmem:[%s10785_s1 + $0x2a8] sm:$0xff]  }
  0x1f   :  { %v23_v46 = vld [vmem:[%s10784_s0 + $0x8] sm:$0xff] }
  0x20   :  { %7323 = vmatpush3.bf16.msra.mxu0 %v8211_v31  ;;  %v8257_v31 = vld [vmem:[%s10785_s1 + $0x290] sm:$0xff]   ;;  %v1255_v48 = vrot.slane %v23_v46, %v8934_v41 }
  0x21   :  { %7345 = vmatpush3.bf16.msra.mxu1 %v8212_v32  ;;  %7352 = vmatprep.subr.bf16.mxu0 %v8214_v35  ;;  %v8258_v32 = vld [vmem:[%s10785_s1 + $0x258] sm:$0xff]  }
  0x22   :  { %7374 = vmatprep.subr.bf16.mxu1 %v8215_v38  ;;  %v8261_v35 = vld [vmem:[%s10785_s1 + $0x298] sm:$0xff]   ;;  %v8264_v38 = vld [vmem:[%s10785_s1 + $0x220] sm:$0xff]  }
  0x23   :  { %5201 = vmatmul.mubr.bf16.vlgmr.msra.gmra.mrb[0].mxu0 %v1222_v45  ;;  %v8270_v45 = vld [vmem:[%s10785_s1 + $0x270] sm:$0xff]  }
  0x24   :  { %7353 = vmatpush3.bf16.msra.mxu0 %v8216_v47  ;;  %5241 = vmatmul.mubr.bf16.vlgmr.msra.gmra.mrb[0].mxu1 %v1244_v51  ;;  %v8271_v47 = vld [vmem:[%s10785_s1 + $0x2f0] sm:$0xff]  }
  0x25   :  { %7354 = vmatprep.subr.bf16.mxu0 %v8218_v52  ;;  %7375 = vmatpush3.bf16.msra.mxu1 %v8217_v49  ;;  %v1248_v49 = vcombine.high %v23_v46, %v23_v46  ;;  %v8273_v51 = vld [vmem:[%s10785_s1 + $0x2b0] sm:$0xff]   ;;  %v1263_v52 = vcombine.high %v1255_v48, %v1255_v48 }
  0x26   :  { %5280 = vmatprep.mubr.bf16.mxu0 %v1243_v50  ;;  %7376 = vmatprep.subr.bf16.mxu1 %v8219_v54  ;;  %v8272_v50 = vld [vmem:[%s10785_s1 + $0x230] sm:$0xff]   ;;  %v8274_v54 = vld [vmem:[%s10785_s1 + $0x278] sm:$0xff]  }
  0x27   :  { %5320 = vmatprep.mubr.bf16.mxu1 %v1247_v56  ;;  %v9126_v53 = vrot.slane %v1248_v49, %v8934_v41  ;;  %v1285_v56 = vrot.slane %v1263_v52, %v8934_v41  ;;  %v8321_v46 = vld [vmem:[%s10785_s1 + $0x410] sm:$0xff]   ;;  %v8324_v49 = vld [vmem:[%s10785_s1 + $0x4d8] sm:$0xff]   ;;  %v8327_v52 = vld [vmem:[%s10785_s1 + $0x460] sm:$0xff]  }
  0x28   :  { %7355 = vmatpush3.bf16.msra.mxu0 %v8220_v55  ;;  %v8275_v55 = vld [vmem:[%s10785_s1 + $0x2f8] sm:$0xff]  }
  0x29   :  { %7356 = vmatprep.subr.bf16.mxu0 %v8222_v58  ;;  %7377 = vmatpush3.bf16.msra.mxu1 %v8221_v57  ;;  %v1264_v57 = vcombine.high %v9126_v53, %v9126_v53  ;;  %v8276_v58 = vld [vmem:[%s10785_s1 + $0x238] sm:$0xff]  }
  0x2a   :  { %7378 = vmatprep.subr.bf16.mxu1 %v8223_v59  ;;  %v8277_v59 = vld [vmem:[%s10785_s1 + $0x2b8] sm:$0xff]  }
  0x2c   :  { %7357 = vmatpush3.bf16.msra.mxu0 %v8224_v60  ;;  %v1295_v60 = vcombine.high %v1285_v56, %v1285_v56 }
  0x2d   :  { %7358 = vmatprep.subr.bf16.mxu0 %v8226_v62  ;;  %7379 = vmatpush3.bf16.msra.mxu1 %v8225_v61  ;;  %v1271_v61 = vrot.slane %v1255_v48, %v8934_v41  ;;  %v8278_v62 = vld [vmem:[%s10785_s1 + $0x340] sm:$0xff]   ;;  %v8323_v48 = vld [vmem:[%s10785_s1 + $0x458] sm:$0xff]  }
  0x2e   :  { %7380 = vmatprep.subr.bf16.mxu1 %v8227_v63  ;;  %v8279_v63 = vld [vmem:[%s10785_s1 + $0x3c0] sm:$0xff]  }
  0x30   :  { %7359 = vmatpush3.bf16.msra.mxu0 %v8228_v0  ;;  %v1292_v0 = vrot.slane %v1264_v57, %v8934_v41  ;;  %v8332_v57 = vld [vmem:[%s10785_s1 + $0x4e8] sm:$0xff]  }
  0x31   :  { %7360 = vmatprep.subr.bf16.mxu0 %v8230_v2  ;;  %7381 = vmatpush3.bf16.msra.mxu1 %v8229_v1  ;;  %v8280_v1 = vld [vmem:[%s10785_s1 + $0x300] sm:$0xff]  }
  0x32   :  { %7382 = vmatprep.subr.bf16.mxu1 %v8231_v3  ;;  %v8281_v2 = vld [vmem:[%s10785_s1 + $0x380] sm:$0xff]   ;;  %v1293_v3 = vcombine.high %v1271_v61, %v1271_v61 }
  0x34   :  { %7361 = vmatpush3.bf16.msra.mxu0 %v8232_v4  ;;  %v8282_v4 = vld [vmem:[%s10785_s1 + $0x348] sm:$0xff]  }
  0x35   :  { %7362 = vmatprep.subr.bf16.mxu0 %v8234_v6  ;;  %7383 = vmatpush3.bf16.msra.mxu1 %v8233_v5  ;;  %v8283_v5 = vld [vmem:[%s10785_s1 + $0x3c8] sm:$0xff]   ;;  %v1296_v6 = vcombine.high %v1292_v0, %v1292_v0 }
  0x36   :  { %7384 = vmatprep.subr.bf16.mxu1 %v8235_v7  ;;  %v8284_v7 = vld [vmem:[%s10785_s1 + $0x308] sm:$0xff]  }
  0x38   :  { %7363 = vmatpush3.bf16.msra.mxu0 %v8236_v8  ;;  %v8285_v8 = vld [vmem:[%s10785_s1 + $0x388] sm:$0xff]  }
  0x39   :  { %7364 = vmatprep.subr.bf16.mxu0 %v8238_v10  ;;  %7385 = vmatpush3.bf16.msra.mxu1 %v8237_v9  ;;  %v8286_v9 = vld [vmem:[%s10785_s1 + $0x350] sm:$0xff]  }
  0x3a   :  { %7386 = vmatprep.subr.bf16.mxu1 %v8239_v11  ;;  %v8287_v10 = vld [vmem:[%s10785_s1 + $0x3d0] sm:$0xff]  }
  0x3b   :  { %v8288_v11 = vld [vmem:[%s10785_s1 + $0x310] sm:$0xff]  }
  0x3c   :  { %7365 = vmatpush3.bf16.msra.mxu0 %v8240_v12  ;;  %v8289_v12 = vld [vmem:[%s10785_s1 + $0x390] sm:$0xff]  }
  0x3d   :  { %7366 = vmatprep.subr.bf16.mxu0 %v8242_v14  ;;  %7387 = vmatpush3.bf16.msra.mxu1 %v8241_v13  ;;  %v8290_v13 = vld [vmem:[%s10785_s1 + $0x358] sm:$0xff]  }
  0x3e   :  { %7388 = vmatprep.subr.bf16.mxu1 %v8243_v15  ;;  %v8291_v14 = vld [vmem:[%s10785_s1 + $0x3d8] sm:$0xff]  }
  0x3f   :  { %v8292_v15 = vld [vmem:[%s10785_s1 + $0x318] sm:$0xff]  }
  0x40   :  { %7367 = vmatpush3.bf16.msra.mxu0 %v8244_v16  ;;  %v8293_v16 = vld [vmem:[%s10785_s1 + $0x398] sm:$0xff]  }
  0x41   :  { %7396 = vmatprep.subr.bf16.mxu0 %v8246_v19  ;;  %7389 = vmatpush3.bf16.msra.mxu1 %v8245_v17  ;;  %v8294_v17 = vld [vmem:[%s10785_s1 + $0x360] sm:$0xff]  }
  0x42   :  { %7418 = vmatprep.subr.bf16.mxu1 %v8247_v20  ;;  %v8296_v19 = vld [vmem:[%s10785_s1 + $0x320] sm:$0xff]  }
  0x43   :  { %5281 = vmatmul.mubr.bf16.vlgmr.msra.gmra.mrb[4].mxu0 %v1229_v18  ;;  %v8295_v18 = vld [vmem:[%s10785_s1 + $0x3e0] sm:$0xff]  }
  0x44   :  { %7397 = vmatpush3.bf16.msra.mxu0 %v8248_v21  ;;  %5321 = vmatmul.mubr.bf16.vlgmr.msra.gmra.mrb[4].mxu1 %v1245_v23  ;;  %v8297_v20 = vld [vmem:[%s10785_s1 + $0x3a0] sm:$0xff]   ;;  %v8298_v21 = vld [vmem:[%s10785_s1 + $0x368] sm:$0xff]  }
  0x45   :  { %7398 = vmatprep.subr.bf16.mxu0 %v8250_v24  ;;  %7419 = vmatpush3.bf16.msra.mxu1 %v8249_v22  ;;  %v8299_v22 = vld [vmem:[%s10785_s1 + $0x3e8] sm:$0xff]  }
  0x46   :  { %7420 = vmatprep.subr.bf16.mxu1 %v8251_v25  ;;  %5360 = vmatprep.mubr.bf16.mxu0 %v1285_v56  ;;  %v8300_v23 = vld [vmem:[%s10785_s1 + $0x328] sm:$0xff]   ;;  %v8302_v25 = vld [vmem:[%s10785_s1 + $0x370] sm:$0xff]  }
  0x47   :  { %5400 = vmatprep.mubr.bf16.mxu1 %v1295_v60  ;;  %v8301_v24 = vld [vmem:[%s10785_s1 + $0x3a8] sm:$0xff]   ;;  %v8335_v60 = vld [vmem:[%s10785_s1 + $0x470] sm:$0xff]  }
  0x48   :  { %7399 = vmatpush3.bf16.msra.mxu0 %v8252_v26  ;;  %v8303_v26 = vld [vmem:[%s10785_s1 + $0x3f0] sm:$0xff]   ;;  %v8331_v56 = vld [vmem:[%s10785_s1 + $0x468] sm:$0xff]  }
  0x49   :  { %7400 = vmatprep.subr.bf16.mxu0 %v8254_v28  ;;  %7421 = vmatpush3.bf16.msra.mxu1 %v8253_v27  ;;  %v8304_v27 = vld [vmem:[%s10785_s1 + $0x330] sm:$0xff]  }
  0x4a   :  { %7422 = vmatprep.subr.bf16.mxu1 %v8255_v29  ;;  %v8305_v28 = vld [vmem:[%s10785_s1 + $0x3b0] sm:$0xff]   ;;  %v8306_v29 = vld [vmem:[%s10785_s1 + $0x378] sm:$0xff]  }
  0x4c   :  { %7401 = vmatpush3.bf16.msra.mxu0 %v8256_v30  ;;  %v8307_v30 = vld [vmem:[%s10785_s1 + $0x3f8] sm:$0xff]  }
  0x4d   :  { %7402 = vmatprep.subr.bf16.mxu0 %v8258_v32  ;;  %7423 = vmatpush3.bf16.msra.mxu1 %v8257_v31  ;;  %v8308_v31 = vld [vmem:[%s10785_s1 + $0x338] sm:$0xff]  }
  0x4e   :  { %7424 = vmatprep.subr.bf16.mxu1 %v8259_v33  ;;  %v8309_v32 = vld [vmem:[%s10785_s1 + $0x3b8] sm:$0xff]   ;;  %v1278_v33 = vrot.slane %v9126_v53, %v8934_v41  ;;  %v8328_v53 = vld [vmem:[%s10785_s1 + $0x4e0] sm:$0xff]  }
  0x50   :  { %7403 = vmatpush3.bf16.msra.mxu0 %v8260_v34  ;;  %v8311_v34 = vld [vmem:[%s10785_s1 + $0x440] sm:$0xff]  }
  0x51   :  { %7404 = vmatprep.subr.bf16.mxu0 %v8262_v36  ;;  %7425 = vmatpush3.bf16.msra.mxu1 %v8261_v35  ;;  %v8312_v35 = vld [vmem:[%s10785_s1 + $0x4c0] sm:$0xff]  }
  0x52   :  { %7426 = vmatprep.subr.bf16.mxu1 %v8263_v37  ;;  %v8313_v36 = vld [vmem:[%s10785_s1 + $0x400] sm:$0xff]  }
  0x53   :  { %v8314_v37 = vld [vmem:[%s10785_s1 + $0x480] sm:$0xff]  }
  0x54   :  { %7405 = vmatpush3.bf16.msra.mxu0 %v8264_v38  ;;  %v1294_v38 = vcombine.high %v1278_v33, %v1278_v33 }
  0x55   :  { %7406 = vmatprep.subr.bf16.mxu0 %v8266_v40  ;;  %7427 = vmatpush3.bf16.msra.mxu1 %v8265_v39  ;;  %v8315_v39 = vld [vmem:[%s10785_s1 + $0x448] sm:$0xff]  }
  0x56   :  { %7428 = vmatprep.subr.bf16.mxu1 %v8267_v42  ;;  %v8316_v40 = vld [vmem:[%s10785_s1 + $0x4c8] sm:$0xff]  }
  0x57   :  { %v8317_v42 = vld [vmem:[%s10785_s1 + $0x408] sm:$0xff]  }
  0x58   :  { %7407 = vmatpush3.bf16.msra.mxu0 %v8268_v43  ;;  %v8318_v43 = vld [vmem:[%s10785_s1 + $0x488] sm:$0xff]  }
  0x59   :  { %7408 = vmatprep.subr.bf16.mxu0 %v8270_v45  ;;  %7429 = vmatpush3.bf16.msra.mxu1 %v8269_v44  ;;  %v8319_v44 = vld [vmem:[%s10785_s1 + $0x450] sm:$0xff]  }
  0x5a   :  { %7430 = vmatprep.subr.bf16.mxu1 %v8271_v47  ;;  %v8320_v45 = vld [vmem:[%s10785_s1 + $0x4d0] sm:$0xff]  }
  0x5b   :  { %v8322_v47 = vld [vmem:[%s10785_s1 + $0x490] sm:$0xff]  }
  0x5c   :  { %7409 = vmatpush3.bf16.msra.mxu0 %v8272_v50  ;;  %v8325_v50 = vld [vmem:[%s10785_s1 + $0x418] sm:$0xff]  }
  0x5d   :  { %7410 = vmatprep.subr.bf16.mxu0 %v8274_v54  ;;  %7431 = vmatpush3.bf16.msra.mxu1 %v8273_v51  ;;  %v8326_v51 = vld [vmem:[%s10785_s1 + $0x498] sm:$0xff]   ;;  %v8329_v54 = vld [vmem:[%s10785_s1 + $0x420] sm:$0xff]  }
  0x5e   :  { %7432 = vmatprep.subr.bf16.mxu1 %v8275_v55  ;;  %v8330_v55 = vld [vmem:[%s10785_s1 + $0x4a0] sm:$0xff]  }
  0x60   :  { %7411 = vmatpush3.bf16.msra.mxu0 %v8276_v58  ;;  %v8333_v58 = vld [vmem:[%s10785_s1 + $0x428] sm:$0xff]  }
  0x61   :  { %7440 = vmatprep.subr.bf16.mxu0 %v8278_v62  ;;  %7433 = vmatpush3.bf16.msra.mxu1 %v8277_v59  ;;  %v8334_v59 = vld [vmem:[%s10785_s1 + $0x4a8] sm:$0xff]   ;;  %v8336_v62 = vld [vmem:[%s10785_s1 + $0x4f0] sm:$0xff]  }
  0x62   :  { %7462 = vmatprep.subr.bf16.mxu1 %v8279_v63 }
  0x63   :  { %5361 = vmatmul.mubr.bf16.vlgmr.msra.gmra.mrb[8].mxu0 %v1271_v61  ;;  %v24_v61 = vld [vmem:[%s10784_s0 + $0x10] sm:$0xff] }
  0x64   :  { %7441 = vmatpush3.bf16.msra.mxu0 %v8280_v1  ;;  %5440 = vmatprep.mubr.bf16.mxu0 %v1292_v0  ;;  %v1304_v63 = vrot.slane %v24_v61, %v8934_v41  ;;  %v1297_v0 = vcombine.high %v24_v61, %v24_v61  ;;  %v8337_v1 = vld [vmem:[%s10785_s1 + $0x430] sm:$0xff]  }
  0x65   :  { %5401 = vmatmul.mubr.bf16.vlgmr.msra.gmra.mrb[8].mxu1 %v1293_v3  ;;  %7442 = vmatprep.subr.bf16.mxu0 %v8282_v4  ;;  %v8386_v61 = vld [vmem:[%s10785_s1 + $0x610] sm:$0xff]  }
  0x66   :  { %7463 = vmatpush3.bf16.msra.mxu1 %v8281_v2  ;;  %5480 = vmatprep.mubr.bf16.mxu1 %v1296_v6  ;;  %v8338_v2 = vld [vmem:[%s10785_s1 + $0x4b0] sm:$0xff]   ;;  %v1312_v3 = vcombine.high %v1304_v63, %v1304_v63  ;;  %v9332_v4 = vrot.slane %v1297_v0, %v8934_v41  ;;  %v8340_v6 = vld [vmem:[%s10785_s1 + $0x4f8] sm:$0xff]  }
  0x67   :  { %7464 = vmatprep.subr.bf16.mxu1 %v8283_v5  ;;  %v8339_v5 = vld [vmem:[%s10785_s1 + $0x478] sm:$0xff]  }
  0x68   :  { %7443 = vmatpush3.bf16.msra.mxu0 %v8284_v7  ;;  %v1334_v7 = vrot.slane %v1312_v3, %v8934_v41  ;;  %v8389_v0 = vld [vmem:[%s10785_s1 + $0x6d8] sm:$0xff]   ;;  %v8392_v3 = vld [vmem:[%s10785_s1 + $0x660] sm:$0xff]  }
  0x69   :  { %7444 = vmatprep.subr.bf16.mxu0 %v8286_v9  ;;  %v8341_v9 = vld [vmem:[%s10785_s1 + $0x438] sm:$0xff]  }
  0x6a   :  { %7465 = vmatpush3.bf16.msra.mxu1 %v8285_v8  ;;  %v1313_v8 = vcombine.high %v9332_v4, %v9332_v4 }
  0x6b   :  { %7466 = vmatprep.subr.bf16.mxu1 %v8287_v10  ;;  %v8342_v10 = vld [vmem:[%s10785_s1 + $0x4b8] sm:$0xff]  }
  0x6c   :  { %7445 = vmatpush3.bf16.msra.mxu0 %v8288_v11  ;;  %v1344_v11 = vcombine.high %v1334_v7, %v1334_v7 }
  0x6d   :  { %7446 = vmatprep.subr.bf16.mxu0 %v8290_v13  ;;  %v8343_v13 = vld [vmem:[%s10785_s1 + $0x540] sm:$0xff]  }
  0x6e   :  { %7467 = vmatpush3.bf16.msra.mxu1 %v8289_v12  ;;  %v1320_v12 = vrot.slane %v1304_v63, %v8934_v41  ;;  %v8388_v63 = vld [vmem:[%s10785_s1 + $0x658] sm:$0xff]  }
  0x6f   :  { %7468 = vmatprep.subr.bf16.mxu1 %v8291_v14  ;;  %v8344_v14 = vld [vmem:[%s10785_s1 + $0x5c0] sm:$0xff]  }
  0x70   :  { %7447 = vmatpush3.bf16.msra.mxu0 %v8292_v15  ;;  %v1341_v15 = vrot.slane %v1313_v8, %v8934_v41  ;;  %v8397_v8 = vld [vmem:[%s10785_s1 + $0x6e8] sm:$0xff]  }
  0x71   :  { %7448 = vmatprep.subr.bf16.mxu0 %v8294_v17  ;;  %v8346_v17 = vld [vmem:[%s10785_s1 + $0x580] sm:$0xff]  }
  0x72   :  { %7469 = vmatpush3.bf16.msra.mxu1 %v8293_v16  ;;  %v8345_v16 = vld [vmem:[%s10785_s1 + $0x500] sm:$0xff]  }
  0x73   :  { %7470 = vmatprep.subr.bf16.mxu1 %v8295_v18  ;;  %v1342_v18 = vcombine.high %v1320_v12, %v1320_v12 }
  0x74   :  { %7449 = vmatpush3.bf16.msra.mxu0 %v8296_v19  ;;  %v8347_v19 = vld [vmem:[%s10785_s1 + $0x548] sm:$0xff]  }
  0x75   :  { %7450 = vmatprep.subr.bf16.mxu0 %v8298_v21  ;;  %v1345_v21 = vcombine.high %v1341_v15, %v1341_v15 }
  0x76   :  { %7471 = vmatpush3.bf16.msra.mxu1 %v8297_v20  ;;  %v8348_v20 = vld [vmem:[%s10785_s1 + $0x5c8] sm:$0xff]  }
  0x77   :  { %7472 = vmatprep.subr.bf16.mxu1 %v8299_v22  ;;  %v8349_v22 = vld [vmem:[%s10785_s1 + $0x508] sm:$0xff]  }
  0x78   :  { %7451 = vmatpush3.bf16.msra.mxu0 %v8300_v23  ;;  %v8350_v23 = vld [vmem:[%s10785_s1 + $0x588] sm:$0xff]  }
  0x79   :  { %7452 = vmatprep.subr.bf16.mxu0 %v8302_v25  ;;  %v8352_v25 = vld [vmem:[%s10785_s1 + $0x5d0] sm:$0xff]  }
  0x7a   :  { %7473 = vmatpush3.bf16.msra.mxu1 %v8301_v24  ;;  %v8351_v24 = vld [vmem:[%s10785_s1 + $0x550] sm:$0xff]  }
  0x7b   :  { %7474 = vmatprep.subr.bf16.mxu1 %v8303_v26  ;;  %v8353_v26 = vld [vmem:[%s10785_s1 + $0x510] sm:$0xff]  }
  0x7c   :  { %7453 = vmatpush3.bf16.msra.mxu0 %v8304_v27  ;;  %v8354_v27 = vld [vmem:[%s10785_s1 + $0x590] sm:$0xff]  }
  0x7d   :  { %7454 = vmatprep.subr.bf16.mxu0 %v8306_v29  ;;  %v8356_v29 = vld [vmem:[%s10785_s1 + $0x5d8] sm:$0xff]  }
  0x7e   :  { %7475 = vmatpush3.bf16.msra.mxu1 %v8305_v28  ;;  %v8355_v28 = vld [vmem:[%s10785_s1 + $0x558] sm:$0xff]  }
  0x7f   :  { %7476 = vmatprep.subr.bf16.mxu1 %v8307_v30  ;;  %v8357_v30 = vld [vmem:[%s10785_s1 + $0x518] sm:$0xff]  }
  0x80   :  { %7455 = vmatpush3.bf16.msra.mxu0 %v8308_v31  ;;  %v8358_v31 = vld [vmem:[%s10785_s1 + $0x598] sm:$0xff]  }
  0x81   :  { %7484 = vmatprep.subr.bf16.mxu0 %v8311_v34  ;;  %v8361_v34 = vld [vmem:[%s10785_s1 + $0x520] sm:$0xff]  }
  0x82   :  { %7477 = vmatpush3.bf16.msra.mxu1 %v8309_v32  ;;  %v8359_v32 = vld [vmem:[%s10785_s1 + $0x560] sm:$0xff]  }
  0x83   :  { %5441 = vmatmul.mubr.bf16.vlgmr.msra.gmra.mrb[12].mxu0 %v1278_v33  ;;  %7506 = vmatprep.subr.bf16.mxu1 %v8312_v35  ;;  %v8360_v33 = vld [vmem:[%s10785_s1 + $0x5e0] sm:$0xff]  }
  0x84   :  { %7485 = vmatpush3.bf16.msra.mxu0 %v8313_v36  ;;  %5520 = vmatprep.mubr.bf16.mxu0 %v1334_v7  ;;  %v8362_v35 = vld [vmem:[%s10785_s1 + $0x5a0] sm:$0xff]   ;;  %v8363_v36 = vld [vmem:[%s10785_s1 + $0x568] sm:$0xff]  }
  0x85   :  { %5481 = vmatmul.mubr.bf16.vlgmr.msra.gmra.mrb[12].mxu1 %v1294_v38  ;;  %7486 = vmatprep.subr.bf16.mxu0 %v8315_v39  ;;  %v8365_v38 = vld [vmem:[%s10785_s1 + $0x528] sm:$0xff]  }
  0x86   :  { %7507 = vmatpush3.bf16.msra.mxu1 %v8314_v37  ;;  %5560 = vmatprep.mubr.bf16.mxu1 %v1344_v11  ;;  %v8364_v37 = vld [vmem:[%s10785_s1 + $0x5e8] sm:$0xff]   ;;  %v8400_v11 = vld [vmem:[%s10785_s1 + $0x670] sm:$0xff]  }
  0x87   :  { %7508 = vmatprep.subr.bf16.mxu1 %v8316_v40  ;;  %v8366_v39 = vld [vmem:[%s10785_s1 + $0x5a8] sm:$0xff]   ;;  %v8367_v40 = vld [vmem:[%s10785_s1 + $0x570] sm:$0xff]  }
  0x88   :  { %7487 = vmatpush3.bf16.msra.mxu0 %v8317_v42  ;;  %v8368_v42 = vld [vmem:[%s10785_s1 + $0x5f0] sm:$0xff]   ;;  %v8396_v7 = vld [vmem:[%s10785_s1 + $0x668] sm:$0xff]  }
  0x89   :  { %7488 = vmatprep.subr.bf16.mxu0 %v8319_v44  ;;  %v8370_v44 = vld [vmem:[%s10785_s1 + $0x5b0] sm:$0xff]  }
  0x8a   :  { %7509 = vmatpush3.bf16.msra.mxu1 %v8318_v43  ;;  %v8369_v43 = vld [vmem:[%s10785_s1 + $0x530] sm:$0xff]  }
  0x8b   :  { %7510 = vmatprep.subr.bf16.mxu1 %v8320_v45  ;;  %v8371_v45 = vld [vmem:[%s10785_s1 + $0x578] sm:$0xff]  }
  0x8c   :  { %7489 = vmatpush3.bf16.msra.mxu0 %v8321_v46  ;;  %v8372_v46 = vld [vmem:[%s10785_s1 + $0x5f8] sm:$0xff]  }
  0x8d   :  { %7490 = vmatprep.subr.bf16.mxu0 %v8323_v48  ;;  %v8374_v48 = vld [vmem:[%s10785_s1 + $0x5b8] sm:$0xff]  }
  0x8e   :  { %7511 = vmatpush3.bf16.msra.mxu1 %v8322_v47  ;;  %v8373_v47 = vld [vmem:[%s10785_s1 + $0x538] sm:$0xff]  }
  0x8f   :  { %7512 = vmatprep.subr.bf16.mxu1 %v8324_v49  ;;  %v1327_v49 = vrot.slane %v9332_v4, %v8934_v41  ;;  %v8393_v4 = vld [vmem:[%s10785_s1 + $0x6e0] sm:$0xff]  }
  0x90   :  { %7491 = vmatpush3.bf16.msra.mxu0 %v8325_v50  ;;  %v8376_v50 = vld [vmem:[%s10785_s1 + $0x640] sm:$0xff]  }
  0x91   :  { %7492 = vmatprep.subr.bf16.mxu0 %v8327_v52  ;;  %v8378_v52 = vld [vmem:[%s10785_s1 + $0x600] sm:$0xff]  }
  0x92   :  { %7513 = vmatpush3.bf16.msra.mxu1 %v8326_v51  ;;  %v8377_v51 = vld [vmem:[%s10785_s1 + $0x6c0] sm:$0xff]  }
  0x93   :  { %7514 = vmatprep.subr.bf16.mxu1 %v8328_v53  ;;  %v8379_v53 = vld [vmem:[%s10785_s1 + $0x680] sm:$0xff]  }
  0x94   :  { %7493 = vmatpush3.bf16.msra.mxu0 %v8329_v54  ;;  %v1343_v54 = vcombine.high %v1327_v49, %v1327_v49 }
  0x95   :  { %7494 = vmatprep.subr.bf16.mxu0 %v8331_v56  ;;  %v8381_v56 = vld [vmem:[%s10785_s1 + $0x6c8] sm:$0xff]  }
  0x96   :  { %7515 = vmatpush3.bf16.msra.mxu1 %v8330_v55  ;;  %v8380_v55 = vld [vmem:[%s10785_s1 + $0x648] sm:$0xff]  }
  0x97   :  { %7516 = vmatprep.subr.bf16.mxu1 %v8332_v57  ;;  %v8382_v57 = vld [vmem:[%s10785_s1 + $0x608] sm:$0xff]  }
  0x98   :  { %7495 = vmatpush3.bf16.msra.mxu0 %v8333_v58  ;;  %v8383_v58 = vld [vmem:[%s10785_s1 + $0x688] sm:$0xff]  }
  0x99   :  { %7496 = vmatprep.subr.bf16.mxu0 %v8335_v60  ;;  %v8385_v60 = vld [vmem:[%s10785_s1 + $0x6d0] sm:$0xff]  }
  0x9a   :  { %7517 = vmatpush3.bf16.msra.mxu1 %v8334_v59  ;;  %v8384_v59 = vld [vmem:[%s10785_s1 + $0x650] sm:$0xff]  }
  0x9b   :  { %7518 = vmatprep.subr.bf16.mxu1 %v8336_v62  ;;  %v8387_v62 = vld [vmem:[%s10785_s1 + $0x690] sm:$0xff]  }
  0x9c   :  { %7497 = vmatpush3.bf16.msra.mxu0 %v8337_v1  ;;  %v8390_v1 = vld [vmem:[%s10785_s1 + $0x618] sm:$0xff]  }
  0x9d   :  { %7498 = vmatprep.subr.bf16.mxu0 %v8339_v5  ;;  %v8394_v5 = vld [vmem:[%s10785_s1 + $0x620] sm:$0xff]  }
  0x9e   :  { %7519 = vmatpush3.bf16.msra.mxu1 %v8338_v2  ;;  %v8391_v2 = vld [vmem:[%s10785_s1 + $0x698] sm:$0xff]  }
  0x9f   :  { %7520 = vmatprep.subr.bf16.mxu1 %v8340_v6  ;;  %v8395_v6 = vld [vmem:[%s10785_s1 + $0x6a0] sm:$0xff]  }
  0xa0   :  { %7499 = vmatpush3.bf16.msra.mxu0 %v8341_v9  ;;  %v8398_v9 = vld [vmem:[%s10785_s1 + $0x628] sm:$0xff]  }
  0xa1   :  { %7528 = vmatprep.subr.bf16.mxu0 %v8343_v13  ;;  %v8401_v13 = vld [vmem:[%s10785_s1 + $0x6f0] sm:$0xff]  }
  0xa2   :  { %7521 = vmatpush3.bf16.msra.mxu1 %v8342_v10  ;;  %v8399_v10 = vld [vmem:[%s10785_s1 + $0x6a8] sm:$0xff]  }
  0xa3   :  { %5521 = vmatmul.mubr.bf16.vlgmr.msra.gmra.mrb[16].mxu0 %v1320_v12  ;;  %7550 = vmatprep.subr.bf16.mxu1 %v8344_v14  ;;  %v25_v12 = vld [vmem:[%s10784_s0 + $0x18] sm:$0xff] }
  0xa4   :  { %7529 = vmatpush3.bf16.msra.mxu0 %v8345_v16  ;;  %5600 = vmatprep.mubr.bf16.mxu0 %v1341_v15  ;;  %v1353_v14 = vrot.slane %v25_v12, %v8934_v41  ;;  %v1346_v15 = vcombine.high %v25_v12, %v25_v12  ;;  %v8402_v16 = vld [vmem:[%s10785_s1 + $0x630] sm:$0xff]   ;;  %v8439_v12 = vld [vmem:[%s10785_s1 + $0x7b8] sm:$0xff]  }
  0xa5   :  { %5561 = vmatmul.mubr.bf16.vlgmr.msra.gmra.mrb[16].mxu1 %v1342_v18  ;;  %7530 = vmatprep.subr.bf16.mxu0 %v8347_v19 }
  0xa6   :  { %7551 = vmatpush3.bf16.msra.mxu1 %v8346_v17  ;;  %5640 = vmatprep.mubr.bf16.mxu1 %v1345_v21  ;;  %v8404_v17 = vld [vmem:[%s10785_s1 + $0x678] sm:$0xff]   ;;  %v1361_v18 = vcombine.high %v1353_v14, %v1353_v14  ;;  %v9538_v19 = vrot.slane %v1346_v15, %v8934_v41  ;;  %v8442_v15 = vld [vmem:[%s10785_s1 + $0x8c0] sm:$0xff]  }
  0xa7   :  { %7552 = vmatprep.subr.bf16.mxu1 %v8348_v20  ;;  %v8403_v20 = vld [vmem:[%s10785_s1 + $0x6b0] sm:$0xff]   ;;  %v8405_v21 = vld [vmem:[%s10785_s1 + $0x6f8] sm:$0xff]  }
  0xa8   :  { %7531 = vmatpush3.bf16.msra.mxu0 %v8349_v22  ;;  %v1383_v22 = vrot.slane %v1361_v18, %v8934_v41 }
  0xa9   :  { %7532 = vmatprep.subr.bf16.mxu0 %v8351_v24  ;;  %v8406_v24 = vld [vmem:[%s10785_s1 + $0x638] sm:$0xff]  }
  0xaa   :  { %7553 = vmatpush3.bf16.msra.mxu1 %v8350_v23  ;;  %v1362_v23 = vcombine.high %v9538_v19, %v9538_v19 }
  0xab   :  { %7554 = vmatprep.subr.bf16.mxu1 %v8352_v25  ;;  %v1393_v25 = vcombine.high %v1383_v22, %v1383_v22 }
  0xac   :  { %7533 = vmatpush3.bf16.msra.mxu0 %v8353_v26  ;;  %v1369_v26 = vrot.slane %v1353_v14, %v8934_v41  ;;  %v8441_v14 = vld [vmem:[%s10785_s1 + $0x840] sm:$0xff]  }
  0xad   :  { %7534 = vmatprep.subr.bf16.mxu0 %v8355_v28  ;;  %v8407_v28 = vld [vmem:[%s10785_s1 + $0x6b8] sm:$0xff]  }
  0xae   :  { %7555 = vmatpush3.bf16.msra.mxu1 %v8354_v27  ;;  %v8408_v27 = vld [vmem:[%s10785_s1 + $0x740] sm:$0xff]  }
  0xaf   :  { %7556 = vmatprep.subr.bf16.mxu1 %v8356_v29  ;;  %v1390_v29 = vrot.slane %v1362_v23, %v8934_v41  ;;  %v8449_v23 = vld [vmem:[%s10785_s1 + $0x850] sm:$0xff]  }
  0xb0   :  { %7535 = vmatpush3.bf16.msra.mxu0 %v8357_v30  ;;  %v8409_v30 = vld [vmem:[%s10785_s1 + $0x7c0] sm:$0xff]  }
  0xb1   :  { %7536 = vmatprep.subr.bf16.mxu0 %v8359_v32  ;;  %v1391_v32 = vcombine.high %v1369_v26, %v1369_v26 }
  0xb2   :  { %7557 = vmatpush3.bf16.msra.mxu1 %v8358_v31  ;;  %v8410_v31 = vld [vmem:[%s10785_s1 + $0x700] sm:$0xff]  }
  0xb3   :  { %7558 = vmatprep.subr.bf16.mxu1 %v8360_v33  ;;  %v8412_v33 = vld [vmem:[%s10785_s1 + $0x748] sm:$0xff]  }
  0xb4   :  { %7537 = vmatpush3.bf16.msra.mxu0 %v8361_v34  ;;  %v8411_v34 = vld [vmem:[%s10785_s1 + $0x780] sm:$0xff]  }
  0xb5   :  { %7538 = vmatprep.subr.bf16.mxu0 %v8363_v36  ;;  %v8413_v36 = vld [vmem:[%s10785_s1 + $0x7c8] sm:$0xff]  }
  0xb6   :  { %7559 = vmatpush3.bf16.msra.mxu1 %v8362_v35  ;;  %v1394_v35 = vcombine.high %v1390_v29, %v1390_v29 }
  0xb7   :  { %7560 = vmatprep.subr.bf16.mxu1 %v8364_v37  ;;  %v8414_v37 = vld [vmem:[%s10785_s1 + $0x708] sm:$0xff]  }
  0xb8   :  { %7539 = vmatpush3.bf16.msra.mxu0 %v8365_v38  ;;  %v8416_v38 = vld [vmem:[%s10785_s1 + $0x750] sm:$0xff]  }
  0xb9   :  { %7540 = vmatprep.subr.bf16.mxu0 %v8367_v40  ;;  %v8417_v40 = vld [vmem:[%s10785_s1 + $0x7d0] sm:$0xff]  }
  0xba   :  { %7561 = vmatpush3.bf16.msra.mxu1 %v8366_v39  ;;  %v8415_v39 = vld [vmem:[%s10785_s1 + $0x788] sm:$0xff]  }
  0xbb   :  { %7562 = vmatprep.subr.bf16.mxu1 %v8368_v42  ;;  %v8418_v42 = vld [vmem:[%s10785_s1 + $0x710] sm:$0xff]  }
  0xbc   :  { %7541 = vmatpush3.bf16.msra.mxu0 %v8369_v43  ;;  %v8420_v43 = vld [vmem:[%s10785_s1 + $0x758] sm:$0xff]  }
  0xbd   :  { %7542 = vmatprep.subr.bf16.mxu0 %v8371_v45  ;;  %v8421_v45 = vld [vmem:[%s10785_s1 + $0x7d8] sm:$0xff]  }
  0xbe   :  { %7563 = vmatpush3.bf16.msra.mxu1 %v8370_v44  ;;  %v8419_v44 = vld [vmem:[%s10785_s1 + $0x790] sm:$0xff]  }
  0xbf   :  { %7564 = vmatprep.subr.bf16.mxu1 %v8372_v46  ;;  %v8422_v46 = vld [vmem:[%s10785_s1 + $0x718] sm:$0xff]  }
  0xc0   :  { %7543 = vmatpush3.bf16.msra.mxu0 %v8373_v47  ;;  %v8423_v47 = vld [vmem:[%s10785_s1 + $0x798] sm:$0xff]  }
  0xc1   :  { %7572 = vmatprep.subr.bf16.mxu0 %v8376_v50  ;;  %v8426_v50 = vld [vmem:[%s10785_s1 + $0x720] sm:$0xff]  }
  0xc2   :  { %7565 = vmatpush3.bf16.msra.mxu1 %v8374_v48  ;;  %v8424_v48 = vld [vmem:[%s10785_s1 + $0x760] sm:$0xff]  }
  0xc3   :  { %5601 = vmatmul.mubr.bf16.vlgmr.msra.gmra.mrb[20].mxu0 %v1327_v49  ;;  %7594 = vmatprep.subr.bf16.mxu1 %v8377_v51  ;;  %v8425_v49 = vld [vmem:[%s10785_s1 + $0x7e0] sm:$0xff]  }
  0xc4   :  { %7573 = vmatpush3.bf16.msra.mxu0 %v8378_v52  ;;  %5680 = vmatprep.mubr.bf16.mxu0 %v1383_v22  ;;  %v8427_v51 = vld [vmem:[%s10785_s1 + $0x7a0] sm:$0xff]   ;;  %v8428_v52 = vld [vmem:[%s10785_s1 + $0x768] sm:$0xff]  }
  0xc5   :  { %5641 = vmatmul.mubr.bf16.vlgmr.msra.gmra.mrb[20].mxu1 %v1343_v54  ;;  %7574 = vmatprep.subr.bf16.mxu0 %v8380_v55  ;;  %v8430_v54 = vld [vmem:[%s10785_s1 + $0x728] sm:$0xff]  }
  0xc6   :  { %7595 = vmatpush3.bf16.msra.mxu1 %v8379_v53  ;;  %5720 = vmatprep.mubr.bf16.mxu1 %v1393_v25  ;;  %v8429_v53 = vld [vmem:[%s10785_s1 + $0x7e8] sm:$0xff]   ;;  %v8451_v25 = vld [vmem:[%s10785_s1 + $0x810] sm:$0xff]  }
  0xc7   :  { %7596 = vmatprep.subr.bf16.mxu1 %v8381_v56  ;;  %v8431_v55 = vld [vmem:[%s10785_s1 + $0x7a8] sm:$0xff]   ;;  %v6730_v56 = vld [vmem:[%s10786_s2] ss:$0 sm:$0xff] }
  0xc8   :  { %7575 = vmatpush3.bf16.msra.mxu0 %v8382_v57  ;;  %v8432_v57 = vld [vmem:[%s10785_s1 + $0x770] sm:$0xff]   ;;  %v8448_v22 = vld [vmem:[%s10785_s1 + $0x888] sm:$0xff]  }
  0xc9   :  { %7576 = vmatprep.subr.bf16.mxu0 %v8384_v59  ;;  %v8433_v59 = vld [vmem:[%s10785_s1 + $0x7f0] sm:$0xff]  }
  0xca   :  { %7597 = vmatpush3.bf16.msra.mxu1 %v8383_v58 }
  0xcb   :  { %7598 = vmatprep.subr.bf16.mxu1 %v8385_v60 }
  0xcc   :  { %7577 = vmatpush3.bf16.msra.mxu0 %v8386_v61  ;;  %v8434_v61 = vld [vmem:[%s10785_s1 + $0x730] sm:$0xff]  }
  0xcd   :  { %7578 = vmatprep.subr.bf16.mxu0 %v8388_v63 }
  0xce   :  { %7599 = vmatpush3.bf16.msra.mxu1 %v8387_v62 }
  0xcf   :  { %7600 = vmatprep.subr.bf16.mxu1 %v8389_v0 }
  0xd0   :  { %7579 = vmatpush3.bf16.msra.mxu0 %v8390_v1  ;;  %v8435_v1 = vld [vmem:[%s10785_s1 + $0x7b0] sm:$0xff]  }
  0xd1   :  { %7580 = vmatprep.subr.bf16.mxu0 %v8392_v3 }
  0xd2   :  { %7601 = vmatpush3.bf16.msra.mxu1 %v8391_v2  ;;  %v8436_v2 = vld [vmem:[%s10785_s1 + $0x778] sm:$0xff]  }
  0xd3   :  { %7602 = vmatprep.subr.bf16.mxu1 %v8393_v4 }
  0xd4   :  { %7581 = vmatpush3.bf16.msra.mxu0 %v8394_v5 }
  0xd5   :  { %7582 = vmatprep.subr.bf16.mxu0 %v8396_v7 }
  0xd6   :  { %7603 = vmatpush3.bf16.msra.mxu1 %v8395_v6 }
  0xd7   :  { %7604 = vmatprep.subr.bf16.mxu1 %v8397_v8  ;;  %v8437_v8 = vld [vmem:[%s10785_s1 + $0x7f8] sm:$0xff]  }
  0xd8   :  { %7583 = vmatpush3.bf16.msra.mxu0 %v8398_v9 }
  0xd9   :  { %7584 = vmatprep.subr.bf16.mxu0 %v8400_v11 }
  0xda   :  { %7605 = vmatpush3.bf16.msra.mxu1 %v8399_v10  ;;  %v8438_v10 = vld [vmem:[%s10785_s1 + $0x738] sm:$0xff]  }
  0xdb   :  { %7606 = vmatprep.subr.bf16.mxu1 %v8401_v13  ;;  %v1376_v13 = vrot.slane %v9538_v19, %v8934_v41  ;;  %v8445_v19 = vld [vmem:[%s10785_s1 + $0x848] sm:$0xff]  }
  0xdc   :  { %7585 = vmatpush3.bf16.msra.mxu0 %v8402_v16  ;;  %v8443_v16 = vld [vmem:[%s10785_s1 + $0x800] sm:$0xff]  }
  0xdd   :  { %7586 = vmatprep.subr.bf16.mxu0 %v8404_v17  ;;  %v8444_v17 = vld [vmem:[%s10785_s1 + $0x880] sm:$0xff]   ;;  %v1392_v18 = vcombine.high %v1376_v13, %v1376_v13 }
  0xde   :  { %7607 = vmatpush3.bf16.msra.mxu1 %v8403_v20  ;;  %v8446_v20 = vld [vmem:[%s10785_s1 + $0x8c8] sm:$0xff]  }
  0xdf   :  { %7608 = vmatprep.subr.bf16.mxu1 %v8405_v21  ;;  %v8447_v21 = vld [vmem:[%s10785_s1 + $0x808] sm:$0xff]  }
  0xe0   :  { %7587 = vmatpush3.bf16.msra.mxu0 %v8406_v24  ;;  %v8450_v24 = vld [vmem:[%s10785_s1 + $0x8d0] sm:$0xff]  }
  0xe1   :  { %7616 = vmatprep.subr.bf16.mxu0 %v8408_v27  ;;  %v8453_v27 = vld [vmem:[%s10785_s1 + $0x858] sm:$0xff]  }
  0xe2   :  { %7609 = vmatpush3.bf16.msra.mxu1 %v8407_v28  ;;  %v8454_v28 = vld [vmem:[%s10785_s1 + $0x8d8] sm:$0xff]  }
  0xe3   :  { %5681 = vmatmul.mubr.bf16.vlgmr.msra.gmra.mrb[24].mxu0 %v1369_v26  ;;  %7638 = vmatprep.subr.bf16.mxu1 %v8409_v30  ;;  %v8452_v26 = vld [vmem:[%s10785_s1 + $0x890] sm:$0xff]   ;;  %v8456_v30 = vld [vmem:[%s10785_s1 + $0x898] sm:$0xff]  }
  0xe4   :  { %7617 = vmatpush3.bf16.msra.mxu0 %v8410_v31  ;;  %5760 = vmatprep.mubr.bf16.mxu0 %v1390_v29  ;;  %v8455_v29 = vld [vmem:[%s10785_s1 + $0x818] sm:$0xff]   ;;  %v8457_v31 = vld [vmem:[%s10785_s1 + $0x860] sm:$0xff]  }
  0xe5   :  { %5721 = vmatmul.mubr.bf16.vlgmr.msra.gmra.mrb[24].mxu1 %v1391_v32  ;;  %7618 = vmatprep.subr.bf16.mxu0 %v8412_v33  ;;  %v8458_v32 = vld [vmem:[%s10785_s1 + $0x8e0] sm:$0xff]  }
  0xe6   :  { %7639 = vmatpush3.bf16.msra.mxu1 %v8411_v34  ;;  %5800 = vmatprep.mubr.bf16.mxu1 %v1394_v35  ;;  %v8459_v33 = vld [vmem:[%s10785_s1 + $0x820] sm:$0xff]   ;;  %v8461_v35 = vld [vmem:[%s10785_s1 + $0x868] sm:$0xff]  }
  0xe7   :  { %7640 = vmatprep.subr.bf16.mxu1 %v8413_v36  ;;  %v8460_v34 = vld [vmem:[%s10785_s1 + $0x8a0] sm:$0xff]   ;;  %v8462_v36 = vld [vmem:[%s10785_s1 + $0x8e8] sm:$0xff]  }
  0xe8   :  { %7619 = vmatpush3.bf16.msra.mxu0 %v8414_v37  ;;  %v8463_v37 = vld [vmem:[%s10785_s1 + $0x828] sm:$0xff]  }
  0xe9   :  { %7620 = vmatprep.subr.bf16.mxu0 %v8416_v38  ;;  %v8464_v38 = vld [vmem:[%s10785_s1 + $0x8a8] sm:$0xff]  }
  0xea   :  { %7641 = vmatpush3.bf16.msra.mxu1 %v8415_v39  ;;  %v8465_v39 = vld [vmem:[%s10785_s1 + $0x870] sm:$0xff]  }
  0xeb   :  { %7642 = vmatprep.subr.bf16.mxu1 %v8417_v40  ;;  %v8466_v40 = vld [vmem:[%s10785_s1 + $0x8f0] sm:$0xff]  }
  0xec   :  { %7621 = vmatpush3.bf16.msra.mxu0 %v8418_v42 }
  0xed   :  { %7622 = vmatprep.subr.bf16.mxu0 %v8420_v43  ;;  %v8467_v43 = vld [vmem:[%s10785_s1 + $0x830] sm:$0xff]  }
  0xee   :  { %7643 = vmatpush3.bf16.msra.mxu1 %v8419_v44 }
  0xef   :  { %7644 = vmatprep.subr.bf16.mxu1 %v8421_v45  ;;  %v26_v45 = vld [vmem:[%s10784_s0 + $0x20] sm:$0xff] }
  0xf0   :  { %7623 = vmatpush3.bf16.msra.mxu0 %v8422_v46 }
  0xf1   :  { %7624 = vmatprep.subr.bf16.mxu0 %v8424_v48 }
  0xf2   :  { %7645 = vmatpush3.bf16.msra.mxu1 %v8423_v47 }
  0xf3   :  { %7646 = vmatprep.subr.bf16.mxu1 %v8425_v49  ;;  %v8468_v49 = vld [vmem:[%s10785_s1 + $0x8b0] sm:$0xff]  }
  0xf4   :  { %7625 = vmatpush3.bf16.msra.mxu0 %v8426_v50  ;;  %v8469_v50 = vld [vmem:[%s10785_s1 + $0x878] sm:$0xff]  }
  0xf5   :  { %7626 = vmatprep.subr.bf16.mxu0 %v8428_v52  ;;  %v1395_v52 = vcombine.high %v26_v45, %v26_v45 }
  0xf6   :  { %7647 = vmatpush3.bf16.msra.mxu1 %v8427_v51  ;;  %v7324_v58 = vpop.f32.mrb[0].mxu0  ;;  %v1402_v51 = vrot.slane %v26_v45, %v8934_v41 }
  0xf7   :  { %v7325_v60 = vpop.f32.mrb[1].mxu0  ;;  %7648 = vmatprep.subr.bf16.mxu1 %v8429_v53  ;;  %v7346_v62 = vpop.f32.mrb[0].mxu1 }
  0xf8   :  { %v7326_v63 = vadd.f32 %v7325_v60, %v7324_v58  ;;  %v7327_v0 = vpop.f32.mrb[2].mxu0  ;;  %7627 = vmatpush3.bf16.msra.mxu0 %v8430_v54  ;;  %v7347_v3 = vpop.f32.mrb[1].mxu1  ;;  %v8470_v58 = vld [vmem:[%s10785_s1 + $0x8f8] sm:$0xff]  }
  0xf9   :  { %v7328_v4 = vpop.f32.mrb[3].mxu0  ;;  %7628 = vmatprep.subr.bf16.mxu0 %v8432_v57  ;;  %v7348_v6 = vadd.f32 %v7347_v3, %v7346_v62  ;;  %v7349_v7 = vpop.f32.mrb[2].mxu1  ;;  %v9759_v62 = vrot.slane %v1395_v52, %v8934_v41  ;;  %v8472_v0 = vld [vmem:[%s10785_s1 + $0x8b8] sm:$0xff]   ;;  %v8473_v3 = vld [vmem:[%s10785_s1 + $0x940] sm:$0xff]  }
  0xfa   :  { %v5203_v5 = vadd.f32 %v7326_v63, %v6730_v56  ;;  %7649 = vmatpush3.bf16.msra.mxu1 %v8431_v55  ;;  %v7350_v9 = vpop.f32.mrb[3].mxu1  ;;  %v8475_v7 = vld [vmem:[%s10785_s1 + $0x900] sm:$0xff]   ;;  %v8504_v52 = vld [vmem:[%s10785_s1 + $0x9b8] sm:$0xff]  }
  0xfb   :  { %7650 = vmatprep.subr.bf16.mxu1 %v8433_v59  ;;  %v1410_v59 = vcombine.high %v1402_v51, %v1402_v51  ;;  %v1411_v4 = vcombine.high %v9759_v62, %v9759_v62  ;;  %v8476_v9 = vld [vmem:[%s10785_s1 + $0x980] sm:$0xff]  }
  0xfc   :  { %v9653_v11 = vadd.f32 %v7348_v6, %v5203_v5  ;;  %7629 = vmatpush3.bf16.msra.mxu0 %v8434_v61  ;;  %v8471_v61 = vld [vmem:[%s10785_s1 + $0x838] sm:$0xff]   ;;  %v8474_v6 = vld [vmem:[%s10785_s1 + $0x9c0] sm:$0xff]  }
  0xfd   :  { %7630 = vmatprep.subr.bf16.mxu0 %v8436_v2  ;;  %v1418_v2 = vrot.slane %v1402_v51, %v8934_v41 }
  0xfe   :  { %7651 = vmatpush3.bf16.msra.mxu1 %v8435_v1  ;;  %v1432_v1 = vrot.slane %v1410_v59, %v8934_v41  ;;  %v8510_v59 = vld [vmem:[%s10785_s1 + $0xa48] sm:$0xff]  }
  0xff   :  { %7652 = vmatprep.subr.bf16.mxu1 %v8437_v8  ;;  %v1439_v8 = vrot.slane %v1411_v4, %v8934_v41  ;;  %v8519_v4 = vld [vmem:[%s10785_s1 + $0xad8] sm:$0xff]  }
 0x100   :  { %7631 = vmatpush3.bf16.msra.mxu0 %v8438_v10  ;;  %v1442_v5 = vcombine.high %v1432_v1, %v1432_v1  ;;  %v1440_v10 = vcombine.high %v1418_v2, %v1418_v2 }
 0x101   :  { %7660 = vmatprep.subr.bf16.mxu0 %v8441_v14  ;;  %v8479_v14 = vld [vmem:[%s10785_s1 + $0x908] sm:$0xff]  }
 0x102   :  { %7653 = vmatpush3.bf16.msra.mxu1 %v8439_v12  ;;  %v8478_v12 = vld [vmem:[%s10785_s1 + $0x9c8] sm:$0xff]  }
 0x103   :  { %5761 = vmatmul.mubr.bf16.vlgmr.msra.gmra.mrb[28].mxu0 %v1376_v13  ;;  %7682 = vmatprep.subr.bf16.mxu1 %v8442_v15  ;;  %v1443_v13 = vcombine.high %v1439_v8, %v1439_v8  ;;  %v8480_v15 = vld [vmem:[%s10785_s1 + $0x988] sm:$0xff]  }
 0x104   :  { %7661 = vmatpush3.bf16.msra.mxu0 %v8443_v16  ;;  %5840 = vmatprep.mubr.bf16.mxu0 %v1432_v1  ;;  %v8481_v16 = vld [vmem:[%s10785_s1 + $0x950] sm:$0xff]  }
 0x105   :  { %5801 = vmatmul.mubr.bf16.vlgmr.msra.gmra.mrb[28].mxu1 %v1392_v18  ;;  %7662 = vmatprep.subr.bf16.mxu0 %v8445_v19  ;;  %v8483_v18 = vld [vmem:[%s10785_s1 + $0x910] sm:$0xff]  }
 0x106   :  { %7683 = vmatpush3.bf16.msra.mxu1 %v8444_v17  ;;  %5880 = vmatprep.mubr.bf16.mxu1 %v1442_v5  ;;  %v8482_v17 = vld [vmem:[%s10785_s1 + $0x9d0] sm:$0xff]   ;;  %v8520_v5 = vld [vmem:[%s10785_s1 + $0xa18] sm:$0xff]  }
 0x107   :  { %7684 = vmatprep.subr.bf16.mxu1 %v8446_v20  ;;  %v8484_v19 = vld [vmem:[%s10785_s1 + $0x990] sm:$0xff]   ;;  %v8485_v20 = vld [vmem:[%s10785_s1 + $0x958] sm:$0xff]  }
 0x108   :  { %7663 = vmatpush3.bf16.msra.mxu0 %v8447_v21  ;;  %v8486_v21 = vld [vmem:[%s10785_s1 + $0x9d8] sm:$0xff]   ;;  %v8516_v1 = vld [vmem:[%s10785_s1 + $0xa10] sm:$0xff]  }
 0x109   :  { %7664 = vmatprep.subr.bf16.mxu0 %v8449_v23  ;;  %v8488_v23 = vld [vmem:[%s10785_s1 + $0x998] sm:$0xff]  }
 0x10a   :  { %7685 = vmatpush3.bf16.msra.mxu1 %v8448_v22  ;;  %v8487_v22 = vld [vmem:[%s10785_s1 + $0x918] sm:$0xff]  }
 0x10b   :  { %7686 = vmatprep.subr.bf16.mxu1 %v8450_v24  ;;  %v8489_v24 = vld [vmem:[%s10785_s1 + $0x960] sm:$0xff]  }
 0x10c   :  { %7665 = vmatpush3.bf16.msra.mxu0 %v8451_v25  ;;  %v8490_v25 = vld [vmem:[%s10785_s1 + $0x9e0] sm:$0xff]  }
 0x10d   :  { %7666 = vmatprep.subr.bf16.mxu0 %v8453_v27  ;;  %v8492_v27 = vld [vmem:[%s10785_s1 + $0x9a0] sm:$0xff]  }
 0x10e   :  { %7687 = vmatpush3.bf16.msra.mxu1 %v8452_v26  ;;  %v8491_v26 = vld [vmem:[%s10785_s1 + $0x920] sm:$0xff]  }
 0x10f   :  { %7688 = vmatprep.subr.bf16.mxu1 %v8454_v28  ;;  %v8493_v28 = vld [vmem:[%s10785_s1 + $0x968] sm:$0xff]  }
 0x110   :  { %7667 = vmatpush3.bf16.msra.mxu0 %v8455_v29  ;;  %v8494_v29 = vld [vmem:[%s10785_s1 + $0x9e8] sm:$0xff]  }
 0x111   :  { %7668 = vmatprep.subr.bf16.mxu0 %v8457_v31  ;;  %v8496_v31 = vld [vmem:[%s10785_s1 + $0x9a8] sm:$0xff]  }
 0x112   :  { %7689 = vmatpush3.bf16.msra.mxu1 %v8456_v30  ;;  %v8495_v30 = vld [vmem:[%s10785_s1 + $0x928] sm:$0xff]  }
 0x113   :  { %7690 = vmatprep.subr.bf16.mxu1 %v8458_v32  ;;  %v8497_v32 = vld [vmem:[%s10785_s1 + $0x970] sm:$0xff]  }
 0x114   :  { %7669 = vmatpush3.bf16.msra.mxu0 %v8459_v33 }
 0x115   :  { %7670 = vmatprep.subr.bf16.mxu0 %v8461_v35 }
 0x116   :  { %7691 = vmatpush3.bf16.msra.mxu1 %v8460_v34  ;;  %v7368_v42 = vpop.f32.mrb[4].mxu0  ;;  %v8498_v34 = vld [vmem:[%s10785_s1 + $0x9f0] sm:$0xff]  }
 0x117   :  { %v7369_v44 = vpop.f32.mrb[5].mxu0  ;;  %7692 = vmatprep.subr.bf16.mxu1 %v8462_v36  ;;  %v7390_v46 = vpop.f32.mrb[4].mxu1  ;;  %v8499_v36 = vld [vmem:[%s10785_s1 + $0x930] sm:$0xff]  }
 0x118   :  { %v7370_v47 = vadd.f32 %v7369_v44, %v7368_v42  ;;  %v7371_v48 = vpop.f32.mrb[6].mxu0  ;;  %7671 = vmatpush3.bf16.msra.mxu0 %v8463_v37  ;;  %v7391_v53 = vpop.f32.mrb[5].mxu1  ;;  %v8501_v42 = vld [vmem:[%s10785_s1 + $0x978] sm:$0xff]  }
 0x119   :  { %v7372_v54 = vpop.f32.mrb[7].mxu0  ;;  %7672 = vmatprep.subr.bf16.mxu0 %v8465_v39  ;;  %v7392_v56 = vadd.f32 %v7391_v53, %v7390_v46  ;;  %v7393_v57 = vpop.f32.mrb[6].mxu1  ;;  %v8502_v48 = vld [vmem:[%s10785_s1 + $0x9f8] sm:$0xff]   ;;  %v1425_v53 = vrot.slane %v9759_v62, %v8934_v41  ;;  %v8513_v62 = vld [vmem:[%s10785_s1 + $0xa88] sm:$0xff]  }
 0x11a   :  { %v5283_v55 = vadd.f32 %v7370_v47, %v9653_v11  ;;  %7693 = vmatpush3.bf16.msra.mxu1 %v8464_v38  ;;  %v7394_v60 = vpop.f32.mrb[7].mxu1  ;;  %v8477_v11 = vld [vmem:[%s10785_s1 + $0x948] sm:$0xff]   ;;  %v8506_v54 = vld [vmem:[%s10785_s1 + $0xa40] sm:$0xff]  }
 0x11b   :  { %7694 = vmatprep.subr.bf16.mxu1 %v8466_v40  ;;  %v8500_v40 = vld [vmem:[%s10785_s1 + $0x9b0] sm:$0xff]   ;;  %v8509_v57 = vld [vmem:[%s10785_s1 + $0xa80] sm:$0xff]   ;;  %v8511_v60 = vld [vmem:[%s10785_s1 + $0xac8] sm:$0xff]  }
 0x11c   :  { %v9761_v63 = vadd.f32 %v7392_v56, %v5283_v55  ;;  %7673 = vmatpush3.bf16.msra.mxu0 %v8467_v43  ;;  %v8507_v55 = vld [vmem:[%s10785_s1 + $0xac0] sm:$0xff]  }
 0x11d   :  { %7674 = vmatprep.subr.bf16.mxu0 %v8469_v50  ;;  %v8503_v50 = vld [vmem:[%s10785_s1 + $0x938] sm:$0xff]   ;;  %v8508_v56 = vld [vmem:[%s10785_s1 + $0xa00] sm:$0xff]  }
 0x11e   :  { %7695 = vmatpush3.bf16.msra.mxu1 %v8468_v49 }
 0x11f   :  { %7696 = vmatprep.subr.bf16.mxu1 %v8470_v58  ;;  %v1441_v58 = vcombine.high %v1425_v53, %v1425_v53 }
 0x120   :  { %7675 = vmatpush3.bf16.msra.mxu0 %v8471_v61  ;;  %v8512_v61 = vld [vmem:[%s10785_s1 + $0xa08] sm:$0xff]  }
 0x121   :  { %7704 = vmatprep.subr.bf16.mxu0 %v8473_v3  ;;  %v8518_v3 = vld [vmem:[%s10785_s1 + $0xa58] sm:$0xff]  }
 0x122   :  { %7697 = vmatpush3.bf16.msra.mxu1 %v8472_v0  ;;  %v8515_v0 = vld [vmem:[%s10785_s1 + $0xad0] sm:$0xff]  }
 0x123   :  { %5841 = vmatmul.mubr.bf16.vlgmr.msra.gmra.mrb[32].mxu0 %v1418_v2  ;;  %7726 = vmatprep.subr.bf16.mxu1 %v8474_v6  ;;  %v8517_v2 = vld [vmem:[%s10785_s1 + $0xa90] sm:$0xff]   ;;  %v8521_v6 = vld [vmem:[%s10785_s1 + $0xa98] sm:$0xff]  }
 0x124   :  { %7705 = vmatpush3.bf16.msra.mxu0 %v8475_v7  ;;  %5920 = vmatprep.mubr.bf16.mxu0 %v1439_v8  ;;  %v8522_v7 = vld [vmem:[%s10785_s1 + $0xa60] sm:$0xff]  }
 0x125   :  { %5881 = vmatmul.mubr.bf16.vlgmr.msra.gmra.mrb[32].mxu1 %v1440_v10  ;;  %7706 = vmatprep.subr.bf16.mxu0 %v8477_v11  ;;  %v8523_v8 = vld [vmem:[%s10785_s1 + $0xae0] sm:$0xff]   ;;  %v8526_v11 = vld [vmem:[%s10785_s1 + $0xa68] sm:$0xff]  }
 0x126   :  { %7727 = vmatpush3.bf16.msra.mxu1 %v8476_v9  ;;  %5960 = vmatprep.mubr.bf16.mxu1 %v1443_v13  ;;  %v8524_v9 = vld [vmem:[%s10785_s1 + $0xa20] sm:$0xff]   ;;  %v8528_v13 = vld [vmem:[%s10785_s1 + $0xa28] sm:$0xff]  }
 0x127   :  { %7728 = vmatprep.subr.bf16.mxu1 %v8478_v12  ;;  %v8525_v10 = vld [vmem:[%s10785_s1 + $0xaa0] sm:$0xff]   ;;  %v8527_v12 = vld [vmem:[%s10785_s1 + $0xae8] sm:$0xff]  }
 0x128   :  { %7707 = vmatpush3.bf16.msra.mxu0 %v8479_v14  ;;  %v8529_v14 = vld [vmem:[%s10785_s1 + $0xaa8] sm:$0xff]  }
 0x129   :  { %7708 = vmatprep.subr.bf16.mxu0 %v8481_v16 }
 0x12a   :  { %7729 = vmatpush3.bf16.msra.mxu1 %v8480_v15  ;;  %v8530_v15 = vld [vmem:[%s10785_s1 + $0xa70] sm:$0xff]  }
 0x12b   :  { %7730 = vmatprep.subr.bf16.mxu1 %v8482_v17  ;;  %v8531_v17 = vld [vmem:[%s10785_s1 + $0xaf0] sm:$0xff]  }
 0x12c   :  { %7709 = vmatpush3.bf16.msra.mxu0 %v8483_v18 }
 0x12d   :  { %7710 = vmatprep.subr.bf16.mxu0 %v8485_v20 }
 0x12e   :  { %7731 = vmatpush3.bf16.msra.mxu1 %v8484_v19  ;;  %v8532_v19 = vld [vmem:[%s10785_s1 + $0xa30] sm:$0xff]  }
 0x12f   :  { %7732 = vmatprep.subr.bf16.mxu1 %v8486_v21 }
 0x130   :  { %7711 = vmatpush3.bf16.msra.mxu0 %v8487_v22 }
 0x131   :  { %7712 = vmatprep.subr.bf16.mxu0 %v8489_v24  ;;  %v8534_v24 = vld [vmem:[%s10785_s1 + $0xa78] sm:$0xff]  }
 0x132   :  { %7733 = vmatpush3.bf16.msra.mxu1 %v8488_v23  ;;  %v8533_v23 = vld [vmem:[%s10785_s1 + $0xab0] sm:$0xff]  }
 0x133   :  { %7734 = vmatprep.subr.bf16.mxu1 %v8490_v25  ;;  %v27_v25 = vld [vmem:[%s10784_s0 + $0x28] sm:$0xff] }
 0x134   :  { %7713 = vmatpush3.bf16.msra.mxu0 %v8491_v26 }
 0x135   :  { %7714 = vmatprep.subr.bf16.mxu0 %v8493_v28  ;;  %v1451_v28 = vrot.slane %v27_v25, %v8934_v41 }
 0x136   :  { %7735 = vmatpush3.bf16.msra.mxu1 %v8492_v27  ;;  %v7412_v33 = vpop.f32.mrb[8].mxu0 }
 0x137   :  { %v7413_v35 = vpop.f32.mrb[9].mxu0  ;;  %7736 = vmatprep.subr.bf16.mxu1 %v8494_v29  ;;  %v1444_v29 = vcombine.high %v27_v25, %v27_v25  ;;  %v8568_v25 = vld [vmem:[%s10785_s1 + $0xb38] sm:$0xff]  }
 0x138   :  { %v7434_v37 = vpop.f32.mrb[8].mxu1  ;;  %v7414_v38 = vadd.f32 %v7413_v35, %v7412_v33  ;;  %v7415_v39 = vpop.f32.mrb[10].mxu0  ;;  %7715 = vmatpush3.bf16.msra.mxu0 %v8495_v30  ;;  %v8535_v33 = vld [vmem:[%s10785_s1 + $0xaf8] sm:$0xff]  }
 0x139   :  { %v7435_v43 = vpop.f32.mrb[9].mxu1  ;;  %v7416_v44 = vpop.f32.mrb[11].mxu0  ;;  %7716 = vmatprep.subr.bf16.mxu0 %v8497_v32  ;;  %v8536_v35 = vld [vmem:[%s10785_s1 + $0xa38] sm:$0xff]  }
 0x13a   :  { %v5363_v45 = vadd.f32 %v7414_v38, %v9761_v63  ;;  %v7436_v46 = vadd.f32 %v7435_v43, %v7434_v37  ;;  %v7437_v47 = vpop.f32.mrb[10].mxu1  ;;  %7737 = vmatpush3.bf16.msra.mxu1 %v8496_v31  ;;  %v8514_v63 = vld [vmem:[%s10785_s1 + $0xa50] sm:$0xff]   ;;  %v9971_v37 = vrot.slane %v1444_v29, %v8934_v41  ;;  %v8537_v39 = vld [vmem:[%s10785_s1 + $0xab8] sm:$0xff]   ;;  %v8538_v43 = vld [vmem:[%s10785_s1 + $0xb40] sm:$0xff]  }
 0x13b   :  { %v7438_v49 = vpop.f32.mrb[11].mxu1  ;;  %7738 = vmatprep.subr.bf16.mxu1 %v8498_v34  ;;  %v8540_v47 = vld [vmem:[%s10785_s1 + $0xb00] sm:$0xff]  }
 0x13c   :  { %v9865_v51 = vadd.f32 %v7436_v46, %v5363_v45  ;;  %7717 = vmatpush3.bf16.msra.mxu0 %v8499_v36  ;;  %v1459_v36 = vcombine.high %v1451_v28, %v1451_v28  ;;  %v1460_v44 = vcombine.high %v9971_v37, %v9971_v37  ;;  %v8539_v45 = vld [vmem:[%s10785_s1 + $0xbc0] sm:$0xff]  }
 0x13d   :  { %7718 = vmatprep.subr.bf16.mxu0 %v8501_v42  ;;  %v1467_v42 = vrot.slane %v1451_v28, %v8934_v41  ;;  %v8541_v49 = vld [vmem:[%s10785_s1 + $0xb80] sm:$0xff]   ;;  %v1474_v28 = vrot.slane %v9971_v37, %v8934_v41  ;;  %v8578_v37 = vld [vmem:[%s10785_s1 + $0xc88] sm:$0xff]  }
 0x13e   :  { %7739 = vmatpush3.bf16.msra.mxu1 %v8500_v40  ;;  %v1481_v40 = vrot.slane %v1459_v36, %v8934_v41  ;;  %v8571_v29 = vld [vmem:[%s10785_s1 + $0xc40] sm:$0xff]   ;;  %v8577_v36 = vld [vmem:[%s10785_s1 + $0xc08] sm:$0xff]  }
 0x13f   :  { %7740 = vmatprep.subr.bf16.mxu1 %v8502_v48  ;;  %v1488_v48 = vrot.slane %v1460_v44, %v8934_v41  ;;  %v8584_v44 = vld [vmem:[%s10785_s1 + $0xcd8] sm:$0xff]  }
 0x140   :  { %7719 = vmatpush3.bf16.msra.mxu0 %v8503_v50  ;;  %v1491_v46 = vcombine.high %v1481_v40, %v1481_v40  ;;  %v1489_v50 = vcombine.high %v1467_v42, %v1467_v42 }
 0x141   :  { %7748 = vmatprep.subr.bf16.mxu0 %v8506_v54  ;;  %v8544_v54 = vld [vmem:[%s10785_s1 + $0xb08] sm:$0xff]  }
 0x142   :  { %7741 = vmatpush3.bf16.msra.mxu1 %v8504_v52  ;;  %v8543_v52 = vld [vmem:[%s10785_s1 + $0xbc8] sm:$0xff]  }
 0x143   :  { %5921 = vmatmul.mubr.bf16.vlgmr.msra.gmra.mrb[36].mxu0 %v1425_v53  ;;  %7770 = vmatprep.subr.bf16.mxu1 %v8507_v55  ;;  %v1492_v53 = vcombine.high %v1488_v48, %v1488_v48  ;;  %v8545_v55 = vld [vmem:[%s10785_s1 + $0xb88] sm:$0xff]  }
 0x144   :  { %7749 = vmatpush3.bf16.msra.mxu0 %v8508_v56  ;;  %6000 = vmatprep.mubr.bf16.mxu0 %v1481_v40  ;;  %v8546_v56 = vld [vmem:[%s10785_s1 + $0xb50] sm:$0xff]  }
 0x145   :  { %5961 = vmatmul.mubr.bf16.vlgmr.msra.gmra.mrb[36].mxu1 %v1441_v58  ;;  %7750 = vmatprep.subr.bf16.mxu0 %v8510_v59  ;;  %v8548_v58 = vld [vmem:[%s10785_s1 + $0xb10] sm:$0xff]  }
 0x146   :  { %7771 = vmatpush3.bf16.msra.mxu1 %v8509_v57  ;;  %6040 = vmatprep.mubr.bf16.mxu1 %v1491_v46  ;;  %v8547_v57 = vld [vmem:[%s10785_s1 + $0xbd0] sm:$0xff]   ;;  %v8586_v46 = vld [vmem:[%s10785_s1 + $0xc98] sm:$0xff]  }
 0x147   :  { %7772 = vmatprep.subr.bf16.mxu1 %v8511_v60  ;;  %v8549_v59 = vld [vmem:[%s10785_s1 + $0xb90] sm:$0xff]   ;;  %v8550_v60 = vld [vmem:[%s10785_s1 + $0xb58] sm:$0xff]  }
 0x148   :  { %7751 = vmatpush3.bf16.msra.mxu0 %v8512_v61  ;;  %v8551_v61 = vld [vmem:[%s10785_s1 + $0xbd8] sm:$0xff]   ;;  %v8581_v40 = vld [vmem:[%s10785_s1 + $0xc10] sm:$0xff]  }
 0x149   :  { %7752 = vmatprep.subr.bf16.mxu0 %v8514_v63  ;;  %v8553_v63 = vld [vmem:[%s10785_s1 + $0xb98] sm:$0xff]  }
 0x14a   :  { %7773 = vmatpush3.bf16.msra.mxu1 %v8513_v62  ;;  %v8552_v62 = vld [vmem:[%s10785_s1 + $0xb18] sm:$0xff]  }
 0x14b   :  { %7774 = vmatprep.subr.bf16.mxu1 %v8515_v0  ;;  %v8554_v0 = vld [vmem:[%s10785_s1 + $0xb60] sm:$0xff]  }
 0x14c   :  { %7753 = vmatpush3.bf16.msra.mxu0 %v8516_v1  ;;  %v8555_v1 = vld [vmem:[%s10785_s1 + $0xbe0] sm:$0xff]  }
 0x14d   :  { %7754 = vmatprep.subr.bf16.mxu0 %v8518_v3  ;;  %v8557_v3 = vld [vmem:[%s10785_s1 + $0xba0] sm:$0xff]  }
 0x14e   :  { %7775 = vmatpush3.bf16.msra.mxu1 %v8517_v2  ;;  %v8556_v2 = vld [vmem:[%s10785_s1 + $0xb20] sm:$0xff]  }
 0x14f   :  { %7776 = vmatprep.subr.bf16.mxu1 %v8519_v4  ;;  %v8558_v4 = vld [vmem:[%s10785_s1 + $0xb68] sm:$0xff]  }
 0x150   :  { %7755 = vmatpush3.bf16.msra.mxu0 %v8520_v5  ;;  %v8559_v5 = vld [vmem:[%s10785_s1 + $0xbe8] sm:$0xff]  }
 0x151   :  { %7756 = vmatprep.subr.bf16.mxu0 %v8522_v7  ;;  %v8561_v7 = vld [vmem:[%s10785_s1 + $0xba8] sm:$0xff]  }
 0x152   :  { %7777 = vmatpush3.bf16.msra.mxu1 %v8521_v6  ;;  %v8560_v6 = vld [vmem:[%s10785_s1 + $0xb28] sm:$0xff]  }
 0x153   :  { %7778 = vmatprep.subr.bf16.mxu1 %v8523_v8  ;;  %v8562_v8 = vld [vmem:[%s10785_s1 + $0xb70] sm:$0xff]  }
 0x154   :  { %7757 = vmatpush3.bf16.msra.mxu0 %v8524_v9 }
 0x155   :  { %7758 = vmatprep.subr.bf16.mxu0 %v8526_v11 }
 0x156   :  { %7779 = vmatpush3.bf16.msra.mxu1 %v8525_v10  ;;  %v7456_v16 = vpop.f32.mrb[12].mxu0  ;;  %v8563_v10 = vld [vmem:[%s10785_s1 + $0xbf0] sm:$0xff]  }
 0x157   :  { %v7457_v18 = vpop.f32.mrb[13].mxu0  ;;  %7780 = vmatprep.subr.bf16.mxu1 %v8527_v12  ;;  %v8564_v12 = vld [vmem:[%s10785_s1 + $0xb30] sm:$0xff]  }
 0x158   :  { %v7478_v20 = vpop.f32.mrb[12].mxu1  ;;  %v7458_v21 = vadd.f32 %v7457_v18, %v7456_v16  ;;  %v7459_v22 = vpop.f32.mrb[14].mxu0  ;;  %7759 = vmatpush3.bf16.msra.mxu0 %v8528_v13  ;;  %v8565_v16 = vld [vmem:[%s10785_s1 + $0xbb0] sm:$0xff]  }
 0x159   :  { %v7479_v26 = vpop.f32.mrb[13].mxu1  ;;  %v7460_v27 = vpop.f32.mrb[15].mxu0  ;;  %7760 = vmatprep.subr.bf16.mxu0 %v8530_v15 }
 0x15a   :  { %v5443_v30 = vadd.f32 %v7458_v21, %v9865_v51  ;;  %v7480_v31 = vadd.f32 %v7479_v26, %v7478_v20  ;;  %v7481_v32 = vpop.f32.mrb[14].mxu1  ;;  %7781 = vmatpush3.bf16.msra.mxu1 %v8529_v14  ;;  %v8542_v51 = vld [vmem:[%s10785_s1 + $0xb48] sm:$0xff]   ;;  %v8569_v27 = vld [vmem:[%s10785_s1 + $0xbb8] sm:$0xff]  }
 0x15b   :  { %v7482_v34 = vpop.f32.mrb[15].mxu1  ;;  %7782 = vmatprep.subr.bf16.mxu1 %v8531_v17  ;;  %v8566_v17 = vld [vmem:[%s10785_s1 + $0xb78] sm:$0xff]   ;;  %v8574_v32 = vld [vmem:[%s10785_s1 + $0xc80] sm:$0xff]  }
 0x15c   :  { %v9973_v38 = vadd.f32 %v7480_v31, %v5443_v30  ;;  %7761 = vmatpush3.bf16.msra.mxu0 %v8532_v19  ;;  %v8572_v30 = vld [vmem:[%s10785_s1 + $0xcc0] sm:$0xff]   ;;  %v8575_v34 = vld [vmem:[%s10785_s1 + $0xc48] sm:$0xff]  }
 0x15d   :  { %7762 = vmatprep.subr.bf16.mxu0 %v8534_v24  ;;  %v8573_v31 = vld [vmem:[%s10785_s1 + $0xc00] sm:$0xff]  }
 0x15e   :  { %7783 = vmatpush3.bf16.msra.mxu1 %v8533_v23  ;;  %v8567_v23 = vld [vmem:[%s10785_s1 + $0xbf8] sm:$0xff]  }
 0x15f   :  { %7784 = vmatprep.subr.bf16.mxu1 %v8535_v33  ;;  %v1490_v33 = vcombine.high %v1474_v28, %v1474_v28 }
 0x160   :  { %7763 = vmatpush3.bf16.msra.mxu0 %v8536_v35  ;;  %v8576_v35 = vld [vmem:[%s10785_s1 + $0xcc8] sm:$0xff]  }
 0x161   :  { %7792 = vmatprep.subr.bf16.mxu0 %v8538_v43  ;;  %v8583_v43 = vld [vmem:[%s10785_s1 + $0xc58] sm:$0xff]  }
 0x162   :  { %7785 = vmatpush3.bf16.msra.mxu1 %v8537_v39  ;;  %v8580_v39 = vld [vmem:[%s10785_s1 + $0xcd0] sm:$0xff]  }
 0x163   :  { %6001 = vmatmul.mubr.bf16.vlgmr.msra.gmra.mrb[40].mxu0 %v1467_v42  ;;  %7814 = vmatprep.subr.bf16.mxu1 %v8539_v45  ;;  %v8582_v42 = vld [vmem:[%s10785_s1 + $0xc90] sm:$0xff]   ;;  %v8585_v45 = vld [vmem:[%s10785_s1 + $0xc18] sm:$0xff]  }
 0x164   :  { %7793 = vmatpush3.bf16.msra.mxu0 %v8540_v47  ;;  %6080 = vmatprep.mubr.bf16.mxu0 %v1488_v48  ;;  %v8587_v47 = vld [vmem:[%s10785_s1 + $0xc60] sm:$0xff]  }
 0x165   :  { %6041 = vmatmul.mubr.bf16.vlgmr.msra.gmra.mrb[40].mxu1 %v1489_v50  ;;  %7794 = vmatprep.subr.bf16.mxu0 %v8542_v51  ;;  %v8588_v48 = vld [vmem:[%s10785_s1 + $0xce0] sm:$0xff]   ;;  %v8591_v51 = vld [vmem:[%s10785_s1 + $0xc68] sm:$0xff]  }
 0x166   :  { %7815 = vmatpush3.bf16.msra.mxu1 %v8541_v49  ;;  %6120 = vmatprep.mubr.bf16.mxu1 %v1492_v53  ;;  %v8589_v49 = vld [vmem:[%s10785_s1 + $0xc20] sm:$0xff]   ;;  %v8593_v53 = vld [vmem:[%s10785_s1 + $0xc28] sm:$0xff]  }
 0x167   :  { %7816 = vmatprep.subr.bf16.mxu1 %v8543_v52  ;;  %v8590_v50 = vld [vmem:[%s10785_s1 + $0xca0] sm:$0xff]   ;;  %v8592_v52 = vld [vmem:[%s10785_s1 + $0xce8] sm:$0xff]  }
 0x168   :  { %7795 = vmatpush3.bf16.msra.mxu0 %v8544_v54  ;;  %v8594_v54 = vld [vmem:[%s10785_s1 + $0xca8] sm:$0xff]  }
 0x169   :  { %7796 = vmatprep.subr.bf16.mxu0 %v8546_v56 }
 0x16a   :  { %7817 = vmatpush3.bf16.msra.mxu1 %v8545_v55  ;;  %v8595_v55 = vld [vmem:[%s10785_s1 + $0xc70] sm:$0xff]  }
 0x16b   :  { %7818 = vmatprep.subr.bf16.mxu1 %v8547_v57  ;;  %v8596_v57 = vld [vmem:[%s10785_s1 + $0xcf0] sm:$0xff]  }
 0x16c   :  { %7797 = vmatpush3.bf16.msra.mxu0 %v8548_v58 }
 0x16d   :  { %7798 = vmatprep.subr.bf16.mxu0 %v8550_v60 }
 0x16e   :  { %7819 = vmatpush3.bf16.msra.mxu1 %v8549_v59  ;;  %v8597_v59 = vld [vmem:[%s10785_s1 + $0xc30] sm:$0xff]  }
 0x16f   :  { %7820 = vmatprep.subr.bf16.mxu1 %v8551_v61 }
 0x170   :  { %7799 = vmatpush3.bf16.msra.mxu0 %v8552_v62 }
 0x171   :  { %7800 = vmatprep.subr.bf16.mxu0 %v8554_v0 }
 0x172   :  { %7821 = vmatpush3.bf16.msra.mxu1 %v8553_v63  ;;  %v8598_v63 = vld [vmem:[%s10785_s1 + $0xcb0] sm:$0xff]  }
 0x173   :  { %7822 = vmatprep.subr.bf16.mxu1 %v8555_v1 }
 0x174   :  { %7801 = vmatpush3.bf16.msra.mxu0 %v8556_v2  ;;  %v8599_v2 = vld [vmem:[%s10785_s1 + $0xc78] sm:$0xff]  }
 0x175   :  { %7802 = vmatprep.subr.bf16.mxu0 %v8558_v4 }
 0x176   :  { %7823 = vmatpush3.bf16.msra.mxu1 %v8557_v3  ;;  %v7500_v9 = vpop.f32.mrb[16].mxu0  ;;  %v28_v3 = vld [vmem:[%s10784_s0 + $0x30] sm:$0xff] }
 0x177   :  { %v7501_v11 = vpop.f32.mrb[17].mxu0  ;;  %7824 = vmatprep.subr.bf16.mxu1 %v8559_v5 }
 0x178   :  { %v7522_v13 = vpop.f32.mrb[16].mxu1  ;;  %v7502_v14 = vadd.f32 %v7501_v11, %v7500_v9  ;;  %v7503_v15 = vpop.f32.mrb[18].mxu0  ;;  %7803 = vmatpush3.bf16.msra.mxu0 %v8560_v6  ;;  %v1493_v9 = vcombine.high %v28_v3, %v28_v3  ;;  %v8601_v11 = vld [vmem:[%s10785_s1 + $0xc38] sm:$0xff]  }
 0x179   :  { %v7523_v18 = vpop.f32.mrb[17].mxu1  ;;  %v7504_v19 = vpop.f32.mrb[19].mxu0  ;;  %7804 = vmatprep.subr.bf16.mxu0 %v8562_v8  ;;  %v1500_v8 = vrot.slane %v28_v3, %v8934_v41  ;;  %v8634_v3 = vld [vmem:[%s10785_s1 + $0xdb8] sm:$0xff]  }
 0x17a   :  { %v5523_v20 = vadd.f32 %v7502_v14, %v9973_v38  ;;  %v7524_v21 = vadd.f32 %v7523_v18, %v7522_v13  ;;  %v7525_v22 = vpop.f32.mrb[18].mxu1  ;;  %7825 = vmatpush3.bf16.msra.mxu1 %v8561_v7  ;;  %v8579_v38 = vld [vmem:[%s10785_s1 + $0xc50] sm:$0xff]   ;;  %v8600_v7 = vld [vmem:[%s10785_s1 + $0xcf8] sm:$0xff]   ;;  %v10188_v15 = vrot.slane %v1493_v9, %v8934_v41  ;;  %v8604_v19 = vld [vmem:[%s10785_s1 + $0xdc0] sm:$0xff]  }
 0x17b   :  { %v7526_v24 = vpop.f32.mrb[19].mxu1  ;;  %7826 = vmatprep.subr.bf16.mxu1 %v8563_v10  ;;  %v8602_v13 = vld [vmem:[%s10785_s1 + $0xcb8] sm:$0xff]   ;;  %v1508_v14 = vcombine.high %v1500_v8, %v1500_v8 }
 0x17c   :  { %v10077_v26 = vadd.f32 %v7524_v21, %v5523_v20  ;;  %7805 = vmatpush3.bf16.msra.mxu0 %v8564_v12  ;;  %v1509_v20 = vcombine.high %v10188_v15, %v10188_v15  ;;  %v8605_v21 = vld [vmem:[%s10785_s1 + $0xd00] sm:$0xff]  }
 0x17d   :  { %7806 = vmatprep.subr.bf16.mxu0 %v8566_v17  ;;  %v8603_v17 = vld [vmem:[%s10785_s1 + $0xd40] sm:$0xff]   ;;  %v1530_v18 = vrot.slane %v1508_v14, %v8934_v41  ;;  %v8644_v14 = vld [vmem:[%s10785_s1 + $0xe50] sm:$0xff]  }
 0x17e   :  { %7827 = vmatpush3.bf16.msra.mxu1 %v8565_v16  ;;  %v1516_v16 = vrot.slane %v1500_v8, %v8934_v41  ;;  %v1537_v24 = vrot.slane %v1509_v20, %v8934_v41  ;;  %v8639_v8 = vld [vmem:[%s10785_s1 + $0xe80] sm:$0xff]   ;;  %v8650_v20 = vld [vmem:[%s10785_s1 + $0xe18] sm:$0xff]  }
 0x17f   :  { %7828 = vmatprep.subr.bf16.mxu1 %v8567_v23  ;;  %v1540_v22 = vcombine.high %v1530_v18, %v1530_v18  ;;  %v8606_v23 = vld [vmem:[%s10785_s1 + $0xd80] sm:$0xff]  }
 0x180   :  { %7807 = vmatpush3.bf16.msra.mxu0 %v8568_v25  ;;  %v1538_v25 = vcombine.high %v1516_v16, %v1516_v16 }
 0x181   :  { %7836 = vmatprep.subr.bf16.mxu0 %v8571_v29  ;;  %v8609_v29 = vld [vmem:[%s10785_s1 + $0xd08] sm:$0xff]  }
 0x182   :  { %7829 = vmatpush3.bf16.msra.mxu1 %v8569_v27  ;;  %v8608_v27 = vld [vmem:[%s10785_s1 + $0xdc8] sm:$0xff]  }
 0x183   :  { %6081 = vmatmul.mubr.bf16.vlgmr.msra.gmra.mrb[44].mxu0 %v1474_v28  ;;  %7858 = vmatprep.subr.bf16.mxu1 %v8572_v30  ;;  %v1541_v28 = vcombine.high %v1537_v24, %v1537_v24  ;;  %v8610_v30 = vld [vmem:[%s10785_s1 + $0xd88] sm:$0xff]  }
 0x184   :  { %7837 = vmatpush3.bf16.msra.mxu0 %v8573_v31  ;;  %6160 = vmatprep.mubr.bf16.mxu0 %v1530_v18  ;;  %v8611_v31 = vld [vmem:[%s10785_s1 + $0xd50] sm:$0xff]   ;;  %v8648_v18 = vld [vmem:[%s10785_s1 + $0xe58] sm:$0xff]  }
 0x185   :  { %6121 = vmatmul.mubr.bf16.vlgmr.msra.gmra.mrb[44].mxu1 %v1490_v33  ;;  %7838 = vmatprep.subr.bf16.mxu0 %v8575_v34  ;;  %v8613_v33 = vld [vmem:[%s10785_s1 + $0xd10] sm:$0xff]  }
 0x186   :  { %7859 = vmatpush3.bf16.msra.mxu1 %v8574_v32  ;;  %6200 = vmatprep.mubr.bf16.mxu1 %v1540_v22  ;;  %v8612_v32 = vld [vmem:[%s10785_s1 + $0xdd0] sm:$0xff]   ;;  %v8652_v22 = vld [vmem:[%s10785_s1 + $0xe60] sm:$0xff]  }
 0x187   :  { %7860 = vmatprep.subr.bf16.mxu1 %v8576_v35  ;;  %v8614_v34 = vld [vmem:[%s10785_s1 + $0xd90] sm:$0xff]   ;;  %v8615_v35 = vld [vmem:[%s10785_s1 + $0xd58] sm:$0xff]  }
 0x188   :  { %7839 = vmatpush3.bf16.msra.mxu0 %v8577_v36  ;;  %v8616_v36 = vld [vmem:[%s10785_s1 + $0xdd8] sm:$0xff]  }
 0x189   :  { %7840 = vmatprep.subr.bf16.mxu0 %v8579_v38  ;;  %v8618_v38 = vld [vmem:[%s10785_s1 + $0xd98] sm:$0xff]  }
 0x18a   :  { %7861 = vmatpush3.bf16.msra.mxu1 %v8578_v37  ;;  %v8617_v37 = vld [vmem:[%s10785_s1 + $0xd18] sm:$0xff]  }
 0x18b   :  { %7862 = vmatprep.subr.bf16.mxu1 %v8580_v39  ;;  %v8619_v39 = vld [vmem:[%s10785_s1 + $0xd60] sm:$0xff]  }
 0x18c   :  { %7841 = vmatpush3.bf16.msra.mxu0 %v8581_v40  ;;  %v8620_v40 = vld [vmem:[%s10785_s1 + $0xde0] sm:$0xff]  }
 0x18d   :  { %7842 = vmatprep.subr.bf16.mxu0 %v8583_v43  ;;  %v8622_v43 = vld [vmem:[%s10785_s1 + $0xda0] sm:$0xff]  }
 0x18e   :  { %7863 = vmatpush3.bf16.msra.mxu1 %v8582_v42  ;;  %v8621_v42 = vld [vmem:[%s10785_s1 + $0xd20] sm:$0xff]  }
 0x18f   :  { %7864 = vmatprep.subr.bf16.mxu1 %v8584_v44  ;;  %v8623_v44 = vld [vmem:[%s10785_s1 + $0xd68] sm:$0xff]  }
 0x190   :  { %7843 = vmatpush3.bf16.msra.mxu0 %v8585_v45  ;;  %v8624_v45 = vld [vmem:[%s10785_s1 + $0xde8] sm:$0xff]  }
 0x191   :  { %7844 = vmatprep.subr.bf16.mxu0 %v8587_v47  ;;  %v8626_v47 = vld [vmem:[%s10785_s1 + $0xda8] sm:$0xff]  }
 0x192   :  { %7865 = vmatpush3.bf16.msra.mxu1 %v8586_v46  ;;  %v8625_v46 = vld [vmem:[%s10785_s1 + $0xd28] sm:$0xff]  }
 0x193   :  { %7866 = vmatprep.subr.bf16.mxu1 %v8588_v48  ;;  %v8627_v48 = vld [vmem:[%s10785_s1 + $0xd70] sm:$0xff]  }
 0x194   :  { %7845 = vmatpush3.bf16.msra.mxu0 %v8589_v49 }
 0x195   :  { %7846 = vmatprep.subr.bf16.mxu0 %v8591_v51 }
 0x196   :  { %7867 = vmatpush3.bf16.msra.mxu1 %v8590_v50  ;;  %v7544_v56 = vpop.f32.mrb[20].mxu0  ;;  %v8628_v50 = vld [vmem:[%s10785_s1 + $0xdf0] sm:$0xff]  }
 0x197   :  { %v7545_v58 = vpop.f32.mrb[21].mxu0  ;;  %7868 = vmatprep.subr.bf16.mxu1 %v8592_v52  ;;  %v8629_v52 = vld [vmem:[%s10785_s1 + $0xd30] sm:$0xff]  }
 0x198   :  { %v7566_v60 = vpop.f32.mrb[20].mxu1  ;;  %v7546_v61 = vadd.f32 %v7545_v58, %v7544_v56  ;;  %v7547_v62 = vpop.f32.mrb[22].mxu0  ;;  %7847 = vmatpush3.bf16.msra.mxu0 %v8593_v53  ;;  %v8630_v56 = vld [vmem:[%s10785_s1 + $0xdb0] sm:$0xff]  }
 0x199   :  { %v7567_v0 = vpop.f32.mrb[21].mxu1  ;;  %v7548_v1 = vpop.f32.mrb[23].mxu0  ;;  %7848 = vmatprep.subr.bf16.mxu0 %v8595_v55 }
 0x19a   :  { %v5603_v4 = vadd.f32 %v7546_v61, %v10077_v26  ;;  %v7568_v5 = vadd.f32 %v7567_v0, %v7566_v60  ;;  %v7569_v6 = vpop.f32.mrb[22].mxu1  ;;  %7869 = vmatpush3.bf16.msra.mxu1 %v8594_v54  ;;  %v8607_v26 = vld [vmem:[%s10785_s1 + $0xd48] sm:$0xff]   ;;  %v8633_v1 = vld [vmem:[%s10785_s1 + $0xd38] sm:$0xff]  }
 0x19b   :  { %v7570_v10 = vpop.f32.mrb[23].mxu1  ;;  %7870 = vmatprep.subr.bf16.mxu1 %v8596_v57  ;;  %v8631_v57 = vld [vmem:[%s10785_s1 + $0xd78] sm:$0xff]   ;;  %v8637_v6 = vld [vmem:[%s10785_s1 + $0xec0] sm:$0xff]  }
 0x19c   :  { %v10182_v12 = vadd.f32 %v7568_v5, %v5603_v4  ;;  %7849 = vmatpush3.bf16.msra.mxu0 %v8597_v59  ;;  %v1523_v4 = vrot.slane %v10188_v15, %v8934_v41  ;;  %v8636_v5 = vld [vmem:[%s10785_s1 + $0xe40] sm:$0xff]   ;;  %v8640_v10 = vld [vmem:[%s10785_s1 + $0xe48] sm:$0xff]   ;;  %v8645_v15 = vld [vmem:[%s10785_s1 + $0xed0] sm:$0xff]  }
 0x19d   :  { %7850 = vmatprep.subr.bf16.mxu0 %v8599_v2 }
 0x19e   :  { %7871 = vmatpush3.bf16.msra.mxu1 %v8598_v63  ;;  %v8632_v63 = vld [vmem:[%s10785_s1 + $0xdf8] sm:$0xff]   ;;  %v1539_v9 = vcombine.high %v1523_v4, %v1523_v4 }
 0x19f   :  { %7872 = vmatprep.subr.bf16.mxu1 %v8600_v7  ;;  %v8638_v7 = vld [vmem:[%s10785_s1 + $0xe00] sm:$0xff]  }
 0x1a0   :  { %7851 = vmatpush3.bf16.msra.mxu0 %v8601_v11  ;;  %v8641_v11 = vld [vmem:[%s10785_s1 + $0xec8] sm:$0xff]  }
 0x1a1   :  { %7880 = vmatprep.subr.bf16.mxu0 %v8603_v17  ;;  %v8647_v17 = vld [vmem:[%s10785_s1 + $0xe90] sm:$0xff]  }
 0x1a2   :  { %7873 = vmatpush3.bf16.msra.mxu1 %v8602_v13  ;;  %v8643_v13 = vld [vmem:[%s10785_s1 + $0xe88] sm:$0xff]  }
 0x1a3   :  { %6161 = vmatmul.mubr.bf16.vlgmr.msra.gmra.mrb[48].mxu0 %v1516_v16  ;;  %7902 = vmatprep.subr.bf16.mxu1 %v8604_v19  ;;  %v8646_v16 = vld [vmem:[%s10785_s1 + $0xe10] sm:$0xff]   ;;  %v8649_v19 = vld [vmem:[%s10785_s1 + $0xed8] sm:$0xff]  }
 0x1a4   :  { %7881 = vmatpush3.bf16.msra.mxu0 %v8605_v21  ;;  %6240 = vmatprep.mubr.bf16.mxu0 %v1537_v24  ;;  %v8651_v21 = vld [vmem:[%s10785_s1 + $0xe98] sm:$0xff]   ;;  %v8654_v24 = vld [vmem:[%s10785_s1 + $0xe20] sm:$0xff]  }
 0x1a5   :  { %6201 = vmatmul.mubr.bf16.vlgmr.msra.gmra.mrb[48].mxu1 %v1538_v25  ;;  %7882 = vmatprep.subr.bf16.mxu0 %v8607_v26  ;;  %v8655_v25 = vld [vmem:[%s10785_s1 + $0xea0] sm:$0xff]   ;;  %v8656_v26 = vld [vmem:[%s10785_s1 + $0xe68] sm:$0xff]  }
 0x1a6   :  { %7903 = vmatpush3.bf16.msra.mxu1 %v8606_v23  ;;  %6280 = vmatprep.mubr.bf16.mxu1 %v1541_v28  ;;  %v8653_v23 = vld [vmem:[%s10785_s1 + $0xee0] sm:$0xff]   ;;  %v8658_v28 = vld [vmem:[%s10785_s1 + $0xe28] sm:$0xff]  }
 0x1a7   :  { %7904 = vmatprep.subr.bf16.mxu1 %v8608_v27  ;;  %v8657_v27 = vld [vmem:[%s10785_s1 + $0xee8] sm:$0xff]  }
 0x1a8   :  { %7883 = vmatpush3.bf16.msra.mxu0 %v8609_v29  ;;  %v8659_v29 = vld [vmem:[%s10785_s1 + $0xea8] sm:$0xff]  }
 0x1a9   :  { %7884 = vmatprep.subr.bf16.mxu0 %v8611_v31 }
 0x1aa   :  { %7905 = vmatpush3.bf16.msra.mxu1 %v8610_v30  ;;  %v8660_v30 = vld [vmem:[%s10785_s1 + $0xe70] sm:$0xff]  }
 0x1ab   :  { %7906 = vmatprep.subr.bf16.mxu1 %v8612_v32  ;;  %v8661_v32 = vld [vmem:[%s10785_s1 + $0xef0] sm:$0xff]  }
 0x1ac   :  { %7885 = vmatpush3.bf16.msra.mxu0 %v8613_v33 }
 0x1ad   :  { %7886 = vmatprep.subr.bf16.mxu0 %v8615_v35 }
 0x1ae   :  { %7907 = vmatpush3.bf16.msra.mxu1 %v8614_v34  ;;  %v8662_v34 = vld [vmem:[%s10785_s1 + $0xe30] sm:$0xff]  }
 0x1af   :  { %7908 = vmatprep.subr.bf16.mxu1 %v8616_v36 }
 0x1b0   :  { %7887 = vmatpush3.bf16.msra.mxu0 %v8617_v37 }
 0x1b1   :  { %7888 = vmatprep.subr.bf16.mxu0 %v8619_v39 }
 0x1b2   :  { %7909 = vmatpush3.bf16.msra.mxu1 %v8618_v38  ;;  %v8663_v38 = vld [vmem:[%s10785_s1 + $0xeb0] sm:$0xff]  }
 0x1b3   :  { %7910 = vmatprep.subr.bf16.mxu1 %v8620_v40 }
 0x1b4   :  { %7889 = vmatpush3.bf16.msra.mxu0 %v8621_v42  ;;  %v8664_v42 = vld [vmem:[%s10785_s1 + $0xe78] sm:$0xff]  }
 0x1b5   :  { %7890 = vmatprep.subr.bf16.mxu0 %v8623_v44 }
 0x1b6   :  { %7911 = vmatpush3.bf16.msra.mxu1 %v8622_v43  ;;  %v7588_v49 = vpop.f32.mrb[24].mxu0  ;;  %v8665_v43 = vld [vmem:[%s10785_s1 + $0xef8] sm:$0xff]  }
 0x1b7   :  { %v7589_v51 = vpop.f32.mrb[25].mxu0  ;;  %7912 = vmatprep.subr.bf16.mxu1 %v8624_v45 }
 0x1b8   :  { %v7610_v53 = vpop.f32.mrb[24].mxu1  ;;  %v7590_v54 = vadd.f32 %v7589_v51, %v7588_v49  ;;  %v7591_v55 = vpop.f32.mrb[26].mxu0  ;;  %7891 = vmatpush3.bf16.msra.mxu0 %v8625_v46  ;;  %v8666_v49 = vld [vmem:[%s10785_s1 + $0xe38] sm:$0xff]  }
 0x1b9   :  { %v7611_v58 = vpop.f32.mrb[25].mxu1  ;;  %v7592_v59 = vpop.f32.mrb[27].mxu0  ;;  %7892 = vmatprep.subr.bf16.mxu0 %v8627_v48 }
 0x1ba   :  { %v5683_v60 = vadd.f32 %v7590_v54, %v10182_v12  ;;  %v7612_v61 = vadd.f32 %v7611_v58, %v7610_v53  ;;  %v7613_v62 = vpop.f32.mrb[26].mxu1  ;;  %7913 = vmatpush3.bf16.msra.mxu1 %v8626_v47  ;;  %v8642_v12 = vld [vmem:[%s10785_s1 + $0xe08] sm:$0xff]   ;;  %v29_v47 = vld [vmem:[%s10784_s0 + $0x38] sm:$0xff]  ;;  %v8669_v58 = vld [vmem:[%s10785_s1 + $0xfc0] sm:$0xff]  }
 0x1bb   :  { %v7614_v0 = vpop.f32.mrb[27].mxu1  ;;  %7914 = vmatprep.subr.bf16.mxu1 %v8628_v50  ;;  %v1549_v50 = vrot.slane %v29_v47, %v8934_v41  ;;  %v1542_v51 = vcombine.high %v29_v47, %v29_v47  ;;  %v8667_v53 = vld [vmem:[%s10785_s1 + $0xeb8] sm:$0xff]   ;;  %v8671_v62 = vld [vmem:[%s10785_s1 + $0xf80] sm:$0xff]  }
 0x1bc   :  { %v10289_v2 = vadd.f32 %v7612_v61, %v5683_v60  ;;  %7893 = vmatpush3.bf16.msra.mxu0 %v8629_v52  ;;  %v8670_v60 = vld [vmem:[%s10785_s1 + $0xf00] sm:$0xff]  }
 0x1bd   :  { %7894 = vmatprep.subr.bf16.mxu0 %v8631_v57  ;;  %v1557_v54 = vcombine.high %v1549_v50, %v1549_v50  ;;  %v1565_v55 = vrot.slane %v1549_v50, %v8934_v41  ;;  %v10404_v57 = vrot.slane %v1542_v51, %v8934_v41  ;;  %v8703_v47 = vld [vmem:[%s10785_s1 + $0x1000] sm:$0xff]   ;;  %v8705_v50 = vld [vmem:[%s10785_s1 + $0x1048] sm:$0xff]  }
 0x1be   :  { %7915 = vmatpush3.bf16.msra.mxu1 %v8630_v56  ;;  %v8668_v56 = vld [vmem:[%s10785_s1 + $0xf40] sm:$0xff]   ;;  %v8706_v51 = vld [vmem:[%s10785_s1 + $0x10c8] sm:$0xff]  }
 0x1bf   :  { %7916 = vmatprep.subr.bf16.mxu1 %v8632_v63  ;;  %v1579_v59 = vrot.slane %v1557_v54, %v8934_v41  ;;  %v1558_v61 = vcombine.high %v10404_v57, %v10404_v57  ;;  %v1587_v0 = vcombine.high %v1565_v55, %v1565_v55  ;;  %v8709_v54 = vld [vmem:[%s10785_s1 + $0x1050] sm:$0xff]  }
 0x1c0   :  { %7895 = vmatpush3.bf16.msra.mxu0 %v8633_v1  ;;  %v8672_v1 = vld [vmem:[%s10785_s1 + $0xf48] sm:$0xff]  }
 0x1c1   :  { %7924 = vmatprep.subr.bf16.mxu0 %v8636_v5  ;;  %v1589_v63 = vcombine.high %v1579_v59, %v1579_v59 }
 0x1c2   :  { %7917 = vmatpush3.bf16.msra.mxu1 %v8634_v3  ;;  %v8673_v3 = vld [vmem:[%s10785_s1 + $0xfc8] sm:$0xff]  }
 0x1c3   :  { %6241 = vmatmul.mubr.bf16.vlgmr.msra.gmra.mrb[52].mxu0 %v1523_v4  ;;  %7946 = vmatprep.subr.bf16.mxu1 %v8637_v6  ;;  %v8674_v4 = vld [vmem:[%s10785_s1 + $0xf08] sm:$0xff]  }
 0x1c4   :  { %7925 = vmatpush3.bf16.msra.mxu0 %v8638_v7  ;;  %6320 = vmatprep.mubr.bf16.mxu0 %v1579_v59  ;;  %v8675_v6 = vld [vmem:[%s10785_s1 + $0xf88] sm:$0xff]   ;;  %v8676_v7 = vld [vmem:[%s10785_s1 + $0xf50] sm:$0xff]   ;;  %v8714_v59 = vld [vmem:[%s10785_s1 + $0x10d8] sm:$0xff]  }
 0x1c5   :  { %6281 = vmatmul.mubr.bf16.vlgmr.msra.gmra.mrb[52].mxu1 %v1539_v9  ;;  %7926 = vmatprep.subr.bf16.mxu0 %v8640_v10  ;;  %v8678_v9 = vld [vmem:[%s10785_s1 + $0xf10] sm:$0xff]  }
 0x1c6   :  { %7947 = vmatpush3.bf16.msra.mxu1 %v8639_v8  ;;  %6360 = vmatprep.mubr.bf16.mxu1 %v1589_v63  ;;  %v8677_v8 = vld [vmem:[%s10785_s1 + $0xfd0] sm:$0xff]   ;;  %v8718_v63 = vld [vmem:[%s10785_s1 + $0x10e0] sm:$0xff]  }
 0x1c7   :  { %7948 = vmatprep.subr.bf16.mxu1 %v8641_v11  ;;  %v8679_v10 = vld [vmem:[%s10785_s1 + $0xf90] sm:$0xff]   ;;  %v8680_v11 = vld [vmem:[%s10785_s1 + $0xf58] sm:$0xff]  }
 0x1c8   :  { %7927 = vmatpush3.bf16.msra.mxu0 %v8642_v12  ;;  %v8681_v12 = vld [vmem:[%s10785_s1 + $0xfd8] sm:$0xff]  }
 0x1c9   :  { %7928 = vmatprep.subr.bf16.mxu0 %v8644_v14  ;;  %v8683_v14 = vld [vmem:[%s10785_s1 + $0xf98] sm:$0xff]  }
 0x1ca   :  { %7949 = vmatpush3.bf16.msra.mxu1 %v8643_v13  ;;  %v8682_v13 = vld [vmem:[%s10785_s1 + $0xf18] sm:$0xff]  }
 0x1cb   :  { %7950 = vmatprep.subr.bf16.mxu1 %v8645_v15  ;;  %v8684_v15 = vld [vmem:[%s10785_s1 + $0xf60] sm:$0xff]  }
 0x1cc   :  { %7929 = vmatpush3.bf16.msra.mxu0 %v8646_v16  ;;  %v8685_v16 = vld [vmem:[%s10785_s1 + $0xfe0] sm:$0xff]  }
 0x1cd   :  { %7930 = vmatprep.subr.bf16.mxu0 %v8648_v18  ;;  %v8687_v18 = vld [vmem:[%s10785_s1 + $0xfa0] sm:$0xff]  }
 0x1ce   :  { %7951 = vmatpush3.bf16.msra.mxu1 %v8647_v17  ;;  %v8686_v17 = vld [vmem:[%s10785_s1 + $0xf20] sm:$0xff]  }
 0x1cf   :  { %7952 = vmatprep.subr.bf16.mxu1 %v8649_v19  ;;  %v8688_v19 = vld [vmem:[%s10785_s1 + $0xf68] sm:$0xff]  }
 0x1d0   :  { %7931 = vmatpush3.bf16.msra.mxu0 %v8650_v20  ;;  %v8689_v20 = vld [vmem:[%s10785_s1 + $0xfe8] sm:$0xff]  }
 0x1d1   :  { %7932 = vmatprep.subr.bf16.mxu0 %v8652_v22  ;;  %v8691_v22 = vld [vmem:[%s10785_s1 + $0xfa8] sm:$0xff]  }
 0x1d2   :  { %7953 = vmatpush3.bf16.msra.mxu1 %v8651_v21  ;;  %v8690_v21 = vld [vmem:[%s10785_s1 + $0xf28] sm:$0xff]  }
 0x1d3   :  { %7954 = vmatprep.subr.bf16.mxu1 %v8653_v23  ;;  %v8692_v23 = vld [vmem:[%s10785_s1 + $0xf70] sm:$0xff]  }
 0x1d4   :  { %7933 = vmatpush3.bf16.msra.mxu0 %v8654_v24 }
 0x1d5   :  { %7934 = vmatprep.subr.bf16.mxu0 %v8656_v26 }
 0x1d6   :  { %7955 = vmatpush3.bf16.msra.mxu1 %v8655_v25  ;;  %v7632_v31 = vpop.f32.mrb[28].mxu0  ;;  %v8693_v25 = vld [vmem:[%s10785_s1 + $0xff0] sm:$0xff]  }
 0x1d7   :  { %v7633_v33 = vpop.f32.mrb[29].mxu0  ;;  %7956 = vmatprep.subr.bf16.mxu1 %v8657_v27  ;;  %v8694_v27 = vld [vmem:[%s10785_s1 + $0xf30] sm:$0xff]  }
 0x1d8   :  { %v7654_v35 = vpop.f32.mrb[28].mxu1  ;;  %v7634_v36 = vadd.f32 %v7633_v33, %v7632_v31  ;;  %v7635_v37 = vpop.f32.mrb[30].mxu0  ;;  %7935 = vmatpush3.bf16.msra.mxu0 %v8658_v28  ;;  %v8695_v31 = vld [vmem:[%s10785_s1 + $0xfb0] sm:$0xff]  }
 0x1d9   :  { %v7655_v39 = vpop.f32.mrb[29].mxu1  ;;  %v7636_v40 = vpop.f32.mrb[31].mxu0  ;;  %7936 = vmatprep.subr.bf16.mxu0 %v8660_v30 }
 0x1da   :  { %v5763_v44 = vadd.f32 %v7634_v36, %v10289_v2  ;;  %v7656_v45 = vadd.f32 %v7655_v39, %v7654_v35  ;;  %v7657_v46 = vpop.f32.mrb[30].mxu1  ;;  %7957 = vmatpush3.bf16.msra.mxu1 %v8659_v29  ;;  %v1586_v2 = vrot.slane %v1558_v61, %v8934_v41  ;;  %v8698_v40 = vld [vmem:[%s10785_s1 + $0xf38] sm:$0xff]  }
 0x1db   :  { %v7658_v48 = vpop.f32.mrb[31].mxu1  ;;  %7958 = vmatprep.subr.bf16.mxu1 %v8661_v32  ;;  %v8696_v32 = vld [vmem:[%s10785_s1 + $0xf78] sm:$0xff]   ;;  %v8702_v46 = vld [vmem:[%s10785_s1 + $0x10c0] sm:$0xff]  }
 0x1dc   :  { %v10394_v52 = vadd.f32 %v7656_v45, %v5763_v44  ;;  %7937 = vmatpush3.bf16.msra.mxu0 %v8662_v34  ;;  %v1590_v5 = vcombine.high %v1586_v2, %v1586_v2  ;;  %v1572_v44 = vrot.slane %v10404_v57, %v8934_v41  ;;  %v8701_v45 = vld [vmem:[%s10785_s1 + $0x1040] sm:$0xff]   ;;  %v8712_v57 = vld [vmem:[%s10785_s1 + $0x1090] sm:$0xff]   ;;  %v8716_v61 = vld [vmem:[%s10785_s1 + $0x1098] sm:$0xff]  }
 0x1dd   :  { %7938 = vmatprep.subr.bf16.mxu0 %v8664_v42  ;;  %v8704_v48 = vld [vmem:[%s10785_s1 + $0x1080] sm:$0xff]  }
 0x1de   :  { %7959 = vmatpush3.bf16.msra.mxu1 %v8663_v38  ;;  %v8697_v38 = vld [vmem:[%s10785_s1 + $0xff8] sm:$0xff]  }
 0x1df   :  { %7960 = vmatprep.subr.bf16.mxu1 %v8665_v43  ;;  %v8699_v43 = vld [vmem:[%s10785_s1 + $0xfb8] sm:$0xff]  }
 0x1e0   :  { %7939 = vmatpush3.bf16.msra.mxu0 %v8666_v49  ;;  %v1588_v49 = vcombine.high %v1572_v44, %v1572_v44 }
 0x1e1   :  { %7968 = vmatprep.subr.bf16.mxu0 %v8668_v56  ;;  %v8711_v56 = vld [vmem:[%s10785_s1 + $0x1010] sm:$0xff]  }
 0x1e2   :  { %7961 = vmatpush3.bf16.msra.mxu1 %v8667_v53  ;;  %v8708_v53 = vld [vmem:[%s10785_s1 + $0x1088] sm:$0xff]  }
 0x1e3   :  { %6321 = vmatmul.mubr.bf16.vlgmr.msra.gmra.mrb[56].mxu0 %v1565_v55  ;;  %7990 = vmatprep.subr.bf16.mxu1 %v8669_v58  ;;  %v8710_v55 = vld [vmem:[%s10785_s1 + $0x10d0] sm:$0xff]   ;;  %v8713_v58 = vld [vmem:[%s10785_s1 + $0x1058] sm:$0xff]  }
 0x1e4   :  { %7969 = vmatpush3.bf16.msra.mxu0 %v8670_v60  ;;  %6400 = vmatprep.mubr.bf16.mxu0 %v1586_v2  ;;  %v8715_v60 = vld [vmem:[%s10785_s1 + $0x1018] sm:$0xff]   ;;  %v8721_v2 = vld [vmem:[%s10785_s1 + $0x1068] sm:$0xff]  }
 0x1e5   :  { %6361 = vmatmul.mubr.bf16.vlgmr.msra.gmra.mrb[56].mxu1 %v1587_v0  ;;  %7970 = vmatprep.subr.bf16.mxu0 %v8672_v1  ;;  %v8719_v0 = vld [vmem:[%s10785_s1 + $0x1020] sm:$0xff]  }
 0x1e6   :  { %7991 = vmatpush3.bf16.msra.mxu1 %v8671_v62  ;;  %6440 = vmatprep.mubr.bf16.mxu1 %v1590_v5  ;;  %v8717_v62 = vld [vmem:[%s10785_s1 + $0x1060] sm:$0xff]   ;;  %v8724_v5 = vld [vmem:[%s10785_s1 + $0x10a8] sm:$0xff]  }
 0x1e7   :  { %7992 = vmatprep.subr.bf16.mxu1 %v8673_v3  ;;  %v8720_v1 = vld [vmem:[%s10785_s1 + $0x10a0] sm:$0xff]   ;;  %v8722_v3 = vld [vmem:[%s10785_s1 + $0x10e8] sm:$0xff]  }
 0x1e8   :  { %7971 = vmatpush3.bf16.msra.mxu0 %v8674_v4  ;;  %v8723_v4 = vld [vmem:[%s10785_s1 + $0x1028] sm:$0xff]  }
 0x1e9   :  { %7972 = vmatprep.subr.bf16.mxu0 %v8676_v7 }
 0x1ea   :  { %7993 = vmatpush3.bf16.msra.mxu1 %v8675_v6  ;;  %v8725_v6 = vld [vmem:[%s10785_s1 + $0x1070] sm:$0xff]  }
 0x1eb   :  { %7994 = vmatprep.subr.bf16.mxu1 %v8677_v8  ;;  %v8726_v8 = vld [vmem:[%s10785_s1 + $0x10f0] sm:$0xff]  }
 0x1ec   :  { %7973 = vmatpush3.bf16.msra.mxu0 %v8678_v9 }
 0x1ed   :  { %7974 = vmatprep.subr.bf16.mxu0 %v8680_v11 }
 0x1ee   :  { %7995 = vmatpush3.bf16.msra.mxu1 %v8679_v10  ;;  %v8727_v10 = vld [vmem:[%s10785_s1 + $0x1030] sm:$0xff]  }
 0x1ef   :  { %7996 = vmatprep.subr.bf16.mxu1 %v8681_v12 }
 0x1f0   :  { %7975 = vmatpush3.bf16.msra.mxu0 %v8682_v13 }
 0x1f1   :  { %7976 = vmatprep.subr.bf16.mxu0 %v8684_v15 }
 0x1f2   :  { %7997 = vmatpush3.bf16.msra.mxu1 %v8683_v14 }
 0x1f3   :  { %7998 = vmatprep.subr.bf16.mxu1 %v8685_v16  ;;  %v8728_v16 = vld [vmem:[%s10785_s1 + $0x10b0] sm:$0xff]  }
 0x1f4   :  { %7977 = vmatpush3.bf16.msra.mxu0 %v8686_v17  ;;  %v8729_v17 = vld [vmem:[%s10785_s1 + $0x1078] sm:$0xff]  }
 0x1f5   :  { %7978 = vmatprep.subr.bf16.mxu0 %v8688_v19 }
 0x1f6   :  { %7999 = vmatpush3.bf16.msra.mxu1 %v8687_v18  ;;  %v7676_v24 = vpop.f32.mrb[32].mxu0 }
 0x1f7   :  { %v7677_v26 = vpop.f32.mrb[33].mxu0  ;;  %8000 = vmatprep.subr.bf16.mxu1 %v8689_v20 }
 0x1f8   :  { %v7698_v28 = vpop.f32.mrb[32].mxu1  ;;  %v7678_v29 = vadd.f32 %v7677_v26, %v7676_v24  ;;  %v7679_v30 = vpop.f32.mrb[34].mxu0  ;;  %7979 = vmatpush3.bf16.msra.mxu0 %v8690_v21  ;;  %v8730_v21 = vld [vmem:[%s10785_s1 + $0x10f8] sm:$0xff]  }
 0x1f9   :  { %v7699_v33 = vpop.f32.mrb[33].mxu1  ;;  %v7680_v34 = vpop.f32.mrb[35].mxu0  ;;  %7980 = vmatprep.subr.bf16.mxu0 %v8692_v23  ;;  %v30_v23 = vld [vmem:[%s10784_s0 + $0x40] sm:$0xff] }
 0x1fa   :  { %v5843_v35 = vadd.f32 %v7678_v29, %v10394_v52  ;;  %v7700_v36 = vadd.f32 %v7699_v33, %v7698_v28  ;;  %v7701_v37 = vpop.f32.mrb[34].mxu1  ;;  %8001 = vmatpush3.bf16.msra.mxu1 %v8691_v22  ;;  %v8707_v52 = vld [vmem:[%s10785_s1 + $0x1008] sm:$0xff]   ;;  %v1598_v26 = vrot.slane %v30_v23, %v8934_v41  ;;  %v8733_v28 = vld [vmem:[%s10785_s1 + $0x1140] sm:$0xff]   ;;  %v8732_v29 = vld [vmem:[%s10785_s1 + $0x10b8] sm:$0xff]  }
 0x1fb   :  { %v7702_v39 = vpop.f32.mrb[35].mxu1  ;;  %8002 = vmatprep.subr.bf16.mxu1 %v8693_v25  ;;  %v8731_v25 = vld [vmem:[%s10785_s1 + $0x1038] sm:$0xff]   ;;  %v8734_v33 = vld [vmem:[%s10785_s1 + $0x11c0] sm:$0xff]  }
 0x1fc   :  { %v10501_v42 = vadd.f32 %v7700_v36, %v5843_v35  ;;  %7981 = vmatpush3.bf16.msra.mxu0 %v8694_v27  ;;  %v1591_v27 = vcombine.high %v30_v23, %v30_v23  ;;  %v1606_v30 = vcombine.high %v1598_v26, %v1598_v26  ;;  %v8735_v35 = vld [vmem:[%s10785_s1 + $0x1100] sm:$0xff]  }
 0x1fd   :  { %7982 = vmatprep.subr.bf16.mxu0 %v8696_v32 }
 0x1fe   :  { %8003 = vmatpush3.bf16.msra.mxu1 %v8695_v31  ;;  %v1614_v31 = vrot.slane %v1598_v26, %v8934_v41  ;;  %v10616_v32 = vrot.slane %v1591_v27, %v8934_v41  ;;  %v1628_v34 = vrot.slane %v1606_v30, %v8934_v41 }
 0x1ff   :  { %8004 = vmatprep.subr.bf16.mxu1 %v8697_v38  ;;  %v8737_v38 = vld [vmem:[%s10785_s1 + $0x1148] sm:$0xff]  }
 0x200   :  { %7983 = vmatpush3.bf16.msra.mxu0 %v8698_v40  ;;  %v1607_v36 = vcombine.high %v10616_v32, %v10616_v32  ;;  %v1636_v37 = vcombine.high %v1614_v31, %v1614_v31  ;;  %v1638_v39 = vcombine.high %v1628_v34, %v1628_v34  ;;  %v8736_v40 = vld [vmem:[%s10785_s1 + $0x1180] sm:$0xff]  }
 0x201   :  { %8012 = vmatprep.subr.bf16.mxu0 %v8701_v45 }
 0x202   :  { %8005 = vmatpush3.bf16.msra.mxu1 %v8699_v43  ;;  %v8738_v43 = vld [vmem:[%s10785_s1 + $0x11c8] sm:$0xff]  }
 0x203   :  { %6401 = vmatmul.mubr.bf16.vlgmr.msra.gmra.mrb[60].mxu0 %v1572_v44  ;;  %8034 = vmatprep.subr.bf16.mxu1 %v8702_v46  ;;  %v8739_v44 = vld [vmem:[%s10785_s1 + $0x1108] sm:$0xff]   ;;  %v8741_v46 = vld [vmem:[%s10785_s1 + $0x1150] sm:$0xff]  }
 0x204   :  { %8013 = vmatpush3.bf16.msra.mxu0 %v8703_v47  ;;  %6480 = vmatprep.mubr.bf16.mxu0 %v1628_v34  ;;  %v8740_v47 = vld [vmem:[%s10785_s1 + $0x1188] sm:$0xff]  }
 0x205   :  { %6441 = vmatmul.mubr.bf16.vlgmr.msra.gmra.mrb[60].mxu1 %v1588_v49  ;;  %8014 = vmatprep.subr.bf16.mxu0 %v8705_v50  ;;  %v8743_v49 = vld [vmem:[%s10785_s1 + $0x1110] sm:$0xff]   ;;  %v8745_v50 = vld [vmem:[%s10785_s1 + $0x1158] sm:$0xff]  }
 0x206   :  { %8035 = vmatpush3.bf16.msra.mxu1 %v8704_v48  ;;  %6520 = vmatprep.mubr.bf16.mxu1 %v1638_v39  ;;  %v8742_v48 = vld [vmem:[%s10785_s1 + $0x11d0] sm:$0xff]  }
 0x207   :  { %8036 = vmatprep.subr.bf16.mxu1 %v8706_v51  ;;  %v8744_v51 = vld [vmem:[%s10785_s1 + $0x1190] sm:$0xff]  }
 0x208   :  { %8015 = vmatpush3.bf16.msra.mxu0 %v8707_v52  ;;  %v8746_v52 = vld [vmem:[%s10785_s1 + $0x11d8] sm:$0xff]  }
 0x209   :  { %8016 = vmatprep.subr.bf16.mxu0 %v8709_v54  ;;  %v8749_v54 = vld [vmem:[%s10785_s1 + $0x1160] sm:$0xff]  }
 0x20a   :  { %8037 = vmatpush3.bf16.msra.mxu1 %v8708_v53  ;;  %v8747_v53 = vld [vmem:[%s10785_s1 + $0x1118] sm:$0xff]  }
 0x20b   :  { %8038 = vmatprep.subr.bf16.mxu1 %v8710_v55  ;;  %v8748_v55 = vld [vmem:[%s10785_s1 + $0x1198] sm:$0xff]  }
 0x20c   :  { %8017 = vmatpush3.bf16.msra.mxu0 %v8711_v56  ;;  %v8750_v56 = vld [vmem:[%s10785_s1 + $0x11e0] sm:$0xff]  }
 0x20d   :  { %8018 = vmatprep.subr.bf16.mxu0 %v8713_v58  ;;  %v8753_v58 = vld [vmem:[%s10785_s1 + $0x1168] sm:$0xff]  }
 0x20e   :  { %8039 = vmatpush3.bf16.msra.mxu1 %v8712_v57  ;;  %v8751_v57 = vld [vmem:[%s10785_s1 + $0x1120] sm:$0xff]  }
 0x20f   :  { %8040 = vmatprep.subr.bf16.mxu1 %v8714_v59  ;;  %v8752_v59 = vld [vmem:[%s10785_s1 + $0x11a0] sm:$0xff]  }
 0x210   :  { %8019 = vmatpush3.bf16.msra.mxu0 %v8715_v60  ;;  %v8754_v60 = vld [vmem:[%s10785_s1 + $0x11e8] sm:$0xff]  }
 0x211   :  { %8020 = vmatprep.subr.bf16.mxu0 %v8717_v62  ;;  %v8757_v62 = vld [vmem:[%s10785_s1 + $0x1170] sm:$0xff]  }
 0x212   :  { %8041 = vmatpush3.bf16.msra.mxu1 %v8716_v61  ;;  %v8755_v61 = vld [vmem:[%s10785_s1 + $0x1128] sm:$0xff]  }
 0x213   :  { %8042 = vmatprep.subr.bf16.mxu1 %v8718_v63 }
 0x214   :  { %8021 = vmatpush3.bf16.msra.mxu0 %v8719_v0  ;;  %v8756_v0 = vld [vmem:[%s10785_s1 + $0x11a8] sm:$0xff]  }
 0x215   :  { %8022 = vmatprep.subr.bf16.mxu0 %v8721_v2  ;;  %v8758_v2 = vld [vmem:[%s10785_s1 + $0x11f0] sm:$0xff]  }
 0x216   :  { %8043 = vmatpush3.bf16.msra.mxu1 %v8720_v1  ;;  %v7720_v7 = vpop.f32.mrb[36].mxu0 }
 0x217   :  { %v7721_v9 = vpop.f32.mrb[37].mxu0  ;;  %8044 = vmatprep.subr.bf16.mxu1 %v8722_v3 }
 0x218   :  { %v7742_v11 = vpop.f32.mrb[36].mxu1  ;;  %v7722_v12 = vadd.f32 %v7721_v9, %v7720_v7  ;;  %v7723_v13 = vpop.f32.mrb[38].mxu0  ;;  %8023 = vmatpush3.bf16.msra.mxu0 %v8723_v4  ;;  %v8761_v7 = vld [vmem:[%s10785_s1 + $0x1178] sm:$0xff]  }
 0x219   :  { %v7743_v14 = vpop.f32.mrb[37].mxu1  ;;  %v7724_v15 = vpop.f32.mrb[39].mxu0  ;;  %8024 = vmatprep.subr.bf16.mxu0 %v8725_v6  ;;  %v8759_v6 = vld [vmem:[%s10785_s1 + $0x1130] sm:$0xff]  }
 0x21a   :  { %v5923_v18 = vadd.f32 %v7722_v12, %v10501_v42  ;;  %v7744_v19 = vadd.f32 %v7743_v14, %v7742_v11  ;;  %v7745_v20 = vpop.f32.mrb[38].mxu1  ;;  %8045 = vmatpush3.bf16.msra.mxu1 %v8724_v5  ;;  %v1635_v42 = vrot.slane %v1607_v36, %v8934_v41  ;;  %v8760_v13 = vld [vmem:[%s10785_s1 + $0x11b0] sm:$0xff]   ;;  %v8762_v15 = vld [vmem:[%s10785_s1 + $0x11f8] sm:$0xff]  }
 0x21b   :  { %v7746_v22 = vpop.f32.mrb[39].mxu1  ;;  %8046 = vmatprep.subr.bf16.mxu1 %v8726_v8 }
 0x21c   :  { %v10602_v24 = vadd.f32 %v7744_v19, %v5923_v18  ;;  %8025 = vmatpush3.bf16.msra.mxu0 %v8727_v10  ;;  %v1639_v45 = vcombine.high %v1635_v42, %v1635_v42 }
 0x21d   :  { %8026 = vmatprep.subr.bf16.mxu0 %v8729_v17  ;;  %v8763_v17 = vld [vmem:[%s10785_s1 + $0x1138] sm:$0xff]  }
 0x21e   :  { %8047 = vmatpush3.bf16.msra.mxu1 %v8728_v16 }
 0x21f   :  { %8048 = vmatprep.subr.bf16.mxu1 %v8730_v21 }
 0x220   :  { %8027 = vmatpush3.bf16.msra.mxu0 %v8731_v25 }
 0x221   :  { %8056 = vmatprep.subr.bf16.mxu0 %v8733_v28 }
 0x222   :  { %8049 = vmatpush3.bf16.msra.mxu1 %v8732_v29 }
 0x223   :  { %6481 = vmatmul.mubr.bf16.vlgmr.msra.gmra.mrb[64].mxu0 %v1614_v31  ;;  %8078 = vmatprep.subr.bf16.mxu1 %v8734_v33 }
 0x224   :  { %8057 = vmatpush3.bf16.msra.mxu0 %v8735_v35  ;;  %6560 = vmatprep.mubr.bf16.mxu0 %v1635_v42 }
 0x225   :  { %6521 = vmatmul.mubr.bf16.vlgmr.msra.gmra.mrb[64].mxu1 %v1636_v37  ;;  %8058 = vmatprep.subr.bf16.mxu0 %v8737_v38 }
 0x226   :  { %8079 = vmatpush3.bf16.msra.mxu1 %v8736_v40  ;;  %6600 = vmatprep.mubr.bf16.mxu1 %v1639_v45 }
 0x227   :  { %8080 = vmatprep.subr.bf16.mxu1 %v8738_v43 }
 0x228   :  { %8059 = vmatpush3.bf16.msra.mxu0 %v8739_v44 }
 0x229   :  { %8060 = vmatprep.subr.bf16.mxu0 %v8741_v46 }
 0x22a   :  { %8081 = vmatpush3.bf16.msra.mxu1 %v8740_v47 }
 0x22b   :  { %8082 = vmatprep.subr.bf16.mxu1 %v8742_v48 }
 0x22c   :  { %8061 = vmatpush3.bf16.msra.mxu0 %v8743_v49 }
 0x22d   :  { %8062 = vmatprep.subr.bf16.mxu0 %v8745_v50 }
 0x22e   :  { %8083 = vmatpush3.bf16.msra.mxu1 %v8744_v51 }
 0x22f   :  { %8084 = vmatprep.subr.bf16.mxu1 %v8746_v52 }
 0x230   :  { %8063 = vmatpush3.bf16.msra.mxu0 %v8747_v53 }
 0x231   :  { %8064 = vmatprep.subr.bf16.mxu0 %v8749_v54 }
 0x232   :  { %8085 = vmatpush3.bf16.msra.mxu1 %v8748_v55 }
 0x233   :  { %8086 = vmatprep.subr.bf16.mxu1 %v8750_v56 }
 0x234   :  { %8065 = vmatpush3.bf16.msra.mxu0 %v8751_v57 }
 0x235   :  { %8066 = vmatprep.subr.bf16.mxu0 %v8753_v58 }
 0x236   :  { %8087 = vmatpush3.bf16.msra.mxu1 %v8752_v59  ;;  %v7764_v63 = vpop.f32.mrb[40].mxu0 }
 0x237   :  { %v7765_v1 = vpop.f32.mrb[41].mxu0  ;;  %8088 = vmatprep.subr.bf16.mxu1 %v8754_v60 }
 0x238   :  { %v7786_v3 = vpop.f32.mrb[40].mxu1  ;;  %v7766_v4 = vadd.f32 %v7765_v1, %v7764_v63  ;;  %v7767_v5 = vpop.f32.mrb[42].mxu0  ;;  %8067 = vmatpush3.bf16.msra.mxu0 %v8755_v61 }
 0x239   :  { %v7787_v8 = vpop.f32.mrb[41].mxu1  ;;  %v7768_v9 = vpop.f32.mrb[43].mxu0  ;;  %8068 = vmatprep.subr.bf16.mxu0 %v8757_v62 }
 0x23a   :  { %v6003_v10 = vadd.f32 %v7766_v4, %v10602_v24  ;;  %v7788_v11 = vadd.f32 %v7787_v8, %v7786_v3  ;;  %v7789_v12 = vpop.f32.mrb[42].mxu1  ;;  %8089 = vmatpush3.bf16.msra.mxu1 %v8756_v0 }
 0x23b   :  { %v7790_v14 = vpop.f32.mrb[43].mxu1  ;;  %8090 = vmatprep.subr.bf16.mxu1 %v8758_v2 }
 0x23c   :  { %v6043_v16 = vadd.f32 %v7788_v11, %v6003_v10  ;;  %8069 = vmatpush3.bf16.msra.mxu0 %v8759_v6 }
 0x23d   :  { %10 = vsyncpa [#allocation3], 0  ;;  %8070 = vmatprep.subr.bf16.mxu0 %v8761_v7  ;;  %v1621_v18 = vrot.slane %v10616_v32, %v8934_v41  ;;  %v8764_v19 = vld [vmem:[%s10785_s1 + $0x11b8] sm:$0xff]   ;;  %v6609_v45 = vld [vmem:[%s10787_s3] sm:$0xff]  ;;  %v8795_v48 = vmov 0.0|0.0   ;;  %vm8796_vm0 = vmmov 0  }
 0x23e   :  { %8091 = vmatpush3.bf16.msra.mxu1 %v8760_v13  ;;  %v6610_v46 = vld [vmem:[%s10787_s3 + $0x8] sm:$0xff]  ;;  %v6611_v47 = vld [vmem:[%s10787_s3 + $0x10] sm:$0xff]  ;;  %v6612_v50 = vld [vmem:[%s10787_s3 + $0x18] sm:$0xff]  ;;  %vm6702_vm1 = vcmask 74752   ;;  %s8798_s15 = smov [#allocation2]  }
 0x23f   :  { %8092 = vmatprep.subr.bf16.mxu1 %v8762_v15  ;;  %v1637_v20 = vcombine.high %v1621_v18, %v1621_v18  ;;  %v8153_v49 = vpack.c.bf16 %v6610_v46, %v6609_v45  ;;  %v8156_v51 = vpack.c.bf16 %v6612_v50, %v6611_v47  ;;  %v6613_v52 = vld [vmem:[%s10787_s3 + $0x20] sm:$0xff]  ;;  %v6614_v53 = vld [vmem:[%s10787_s3 + $0x28] sm:$0xff]  ;;  %v6615_v55 = vld [vmem:[%s10787_s3 + $0x30] sm:$0xff] }
 0x240   :  { %8071 = vmatpush3.bf16.msra.mxu0 %v8763_v17  ;;  %v8159_v54 = vpack.c.bf16 %v6614_v53, %v6613_v52  ;;  %v6616_v56 = vld [vmem:[%s10787_s3 + $0x38] sm:$0xff]  ;;  %v6617_v58 = vld [vmem:[%s10787_s3 + $0x40] sm:$0xff]  ;;  %v6618_v59 = vld [vmem:[%s10787_s3 + $0x48] sm:$0xff] }
 0x241   :  { %8152 = vmatprep.subr.bf16.mxu0 %v8795_v48  ;;  %v8162_v57 = vpack.c.bf16 %v6616_v56, %v6615_v55  ;;  %v8165_v60 = vpack.c.bf16 %v6618_v59, %v6617_v58  ;;  %v6619_v61 = vld [vmem:[%s10787_s3 + $0x50] sm:$0xff]  ;;  %v6620_v62 = vld [vmem:[%s10787_s3 + $0x58] sm:$0xff]  ;;  %v6621_v5 = vld [vmem:[%s10787_s3 + $0x60] sm:$0xff] }
 0x242   :  { %8093 = vmatpush3.bf16.msra.mxu1 %v8764_v19  ;;  %v8168_v63 = vpack.c.bf16 %v6620_v62, %v6619_v61  ;;  %v6622_v6 = vld [vmem:[%s10787_s3 + $0x68] sm:$0xff]  ;;  %v6623_v15 = vld [vmem:[%s10787_s3 + $0x70] sm:$0xff] }
 0x243   :  { %6561 = vmatmul.mubr.bf16.vlgmr.msra.gmra.mrb[68].mxu0 %v1621_v18  ;;  %v8171_v9 = vpack.c.bf16 %v6622_v6, %v6621_v5  ;;  %v8797_v18 = vmov 0.0  }
 0x244   :  { %8154 = vmatpush3.bf16.msra.mxu0 %v8153_v49  ;;  %8149 = vmatprep.mubr.msk.f32.mxu0 %vm8796_vm0, %v8797_v18 }
 0x245   :  { %6601 = vmatmul.mubr.bf16.vlgmr.msra.gmra.mrb[68].mxu1 %v1637_v20  ;;  %8155 = vmatprep.subr.bf16.mxu0 %v8795_v48 }
 0x248   :  { %8157 = vmatpush3.bf16.msra.mxu0 %v8156_v51 }
 0x249   :  { %8158 = vmatprep.subr.bf16.mxu0 %v8795_v48 }
 0x24c   :  { %8160 = vmatpush3.bf16.msra.mxu0 %v8159_v54 }
 0x24d   :  { %8161 = vmatprep.subr.bf16.mxu0 %v8795_v48 }
 0x250   :  { %8163 = vmatpush3.bf16.msra.mxu0 %v8162_v57 }
 0x251   :  { %8164 = vmatprep.subr.bf16.mxu0 %v8795_v48 }
 0x254   :  { %8166 = vmatpush3.bf16.msra.mxu0 %v8165_v60 }
 0x255   :  { %8167 = vmatprep.subr.bf16.mxu0 %v8795_v48 }
 0x256   :  { %v7808_v21 = vpop.f32.mrb[44].mxu0 }
 0x257   :  { %v7809_v22 = vpop.f32.mrb[45].mxu0 }
 0x258   :  { %v7830_v23 = vpop.f32.mrb[44].mxu1  ;;  %v7810_v24 = vadd.f32 %v7809_v22, %v7808_v21  ;;  %v7811_v25 = vpop.f32.mrb[46].mxu0  ;;  %8169 = vmatpush3.bf16.msra.mxu0 %v8168_v63 }
 0x259   :  { %v7831_v26 = vpop.f32.mrb[45].mxu1  ;;  %v7812_v27 = vpop.f32.mrb[47].mxu0  ;;  %8170 = vmatprep.subr.bf16.mxu0 %v8795_v48 }
 0x25a   :  { %v6083_v28 = vadd.f32 %v7810_v24, %v6043_v16  ;;  %v7832_v41 = vadd.f32 %v7831_v26, %v7830_v23  ;;  %v7833_v29 = vpop.f32.mrb[46].mxu1  ;;  %v6624_v16 = vld [vmem:[%s10787_s3 + $0x78] sm:$0xff] }
 0x25b   :  { %v7834_v30 = vpop.f32.mrb[47].mxu1  ;;  %v8174_v17 = vpack.c.bf16 %v6624_v16, %v6623_v15 }
 0x25c   :  { %v6123_v31 = vadd.f32 %v7832_v41, %v6083_v28  ;;  %8172 = vmatpush3.bf16.msra.mxu0 %v8171_v9 }
 0x25d   :  { %8173 = vmatprep.subr.bf16.mxu0 %v8795_v48 }
 0x260   :  { %8175 = vmatpush3.bf16.msra.mxu0 %v8174_v17 }
 0x276   :  { %v7852_v32 = vpop.f32.mrb[48].mxu0 }
 0x277   :  { %v7853_v33 = vpop.f32.mrb[49].mxu0 }
 0x278   :  { %v7874_v34 = vpop.f32.mrb[48].mxu1  ;;  %v7854_v35 = vadd.f32 %v7853_v33, %v7852_v32  ;;  %v7855_v36 = vpop.f32.mrb[50].mxu0 }
 0x279   :  { %v7875_v37 = vpop.f32.mrb[49].mxu1  ;;  %v7856_v38 = vpop.f32.mrb[51].mxu0 }
 0x27a   :  { %v6163_v39 = vadd.f32 %v7854_v35, %v6123_v31  ;;  %v7876_v40 = vadd.f32 %v7875_v37, %v7874_v34  ;;  %v7877_v42 = vpop.f32.mrb[50].mxu1 }
 0x27b   :  { %v7878_v43 = vpop.f32.mrb[51].mxu1 }
 0x27c   :  { %v6203_v44 = vadd.f32 %v7876_v40, %v6163_v39 }
 0x296   :  { %v7896_v0 = vpop.f32.mrb[52].mxu0 }
 0x297   :  { %v7897_v1 = vpop.f32.mrb[53].mxu0 }
 0x298   :  { %v7918_v2 = vpop.f32.mrb[52].mxu1  ;;  %v7898_v3 = vadd.f32 %v7897_v1, %v7896_v0  ;;  %v7899_v4 = vpop.f32.mrb[54].mxu0 }
 0x299   :  { %v7919_v7 = vpop.f32.mrb[53].mxu1  ;;  %v7900_v8 = vpop.f32.mrb[55].mxu0  ;;  %v7307_v4 = vld [vmem:[%s10788_s4] ss:$0 sm:$0xff]  ;;  %s6722_s4 = sshll.u32 %s8798_s15, 4  ;;  %s6723_s4 = int_to_ptr.vmem [resolvable:$true] %s6722_s4 }
 0x29a   :  { %v6243_v10 = vadd.f32 %v7898_v3, %v6203_v44  ;;  %v7920_v11 = vadd.f32 %v7919_v7, %v7918_v2  ;;  %v7921_v12 = vpop.f32.mrb[54].mxu1  ;;  %s8770_s16 = scalar_lea.vmem %s6723_s4, 32  ;;  %p8775_p1 = scmp.lt.s32.totalorder %s6723_s4, %s6723_s4 }
 0x29b   :  { %v7922_v13 = vpop.f32.mrb[55].mxu1  ;;  %p8771_p0 = scmp.ne.s32.totalorder %s6723_s4, %s8770_s16  ;;  %p8776_p2 = scmp.lt.s32.totalorder %s8770_s16, %s8770_s16 }
 0x29c   :  { %v6283_v14 = vadd.f32 %v7920_v11, %v6243_v10 }
 0x29d   :  { %p8777_p3 = por %p8776_p2, %p8775_p1 }
 0x29f   :  { %p8778_p4 = pnand %p8777_p3, %p8771_p0 }
 0x2b6   :  { %v7940_v19 = vpop.f32.mrb[56].mxu0 }
 0x2b7   :  { %v7941_v20 = vpop.f32.mrb[57].mxu0 }
 0x2b8   :  { %v7962_v21 = vpop.f32.mrb[56].mxu1  ;;  %v7942_v22 = vadd.f32 %v7941_v20, %v7940_v19  ;;  %v7943_v23 = vpop.f32.mrb[58].mxu0 }
 0x2b9   :  { %v7963_v24 = vpop.f32.mrb[57].mxu1  ;;  %v7944_v25 = vpop.f32.mrb[59].mxu0 }
 0x2ba   :  { %v6323_v26 = vadd.f32 %v7942_v22, %v6283_v14  ;;  %v7964_v27 = vadd.f32 %v7963_v24, %v7962_v21  ;;  %v7965_v28 = vpop.f32.mrb[58].mxu1 }
 0x2bb   :  { %v7966_v41 = vpop.f32.mrb[59].mxu1 }
 0x2bc   :  { %v6363_v29 = vadd.f32 %v7964_v27, %v6323_v26 }
 0x2d6   :  { %v7984_v30 = vpop.f32.mrb[60].mxu0 }
 0x2d7   :  { %v7985_v31 = vpop.f32.mrb[61].mxu0 }
 0x2d8   :  { %v8006_v32 = vpop.f32.mrb[60].mxu1  ;;  %v7986_v33 = vadd.f32 %v7985_v31, %v7984_v30  ;;  %v7987_v34 = vpop.f32.mrb[62].mxu0 }
 0x2d9   :  { %v8007_v35 = vpop.f32.mrb[61].mxu1  ;;  %v7988_v36 = vpop.f32.mrb[63].mxu0 }
 0x2da   :  { %v6403_v37 = vadd.f32 %v7986_v33, %v6363_v29  ;;  %v8008_v38 = vadd.f32 %v8007_v35, %v8006_v32  ;;  %v8009_v39 = vpop.f32.mrb[62].mxu1 }
 0x2db   :  { %v8010_v40 = vpop.f32.mrb[63].mxu1 }
 0x2dc   :  { %v6443_v42 = vadd.f32 %v8008_v38, %v6403_v37 }
 0x2f6   :  { %v8028_v43 = vpop.f32.mrb[64].mxu0 }
 0x2f7   :  { %v8029_v44 = vpop.f32.mrb[65].mxu0 }
 0x2f8   :  { %v8050_v45 = vpop.f32.mrb[64].mxu1  ;;  %v8030_v46 = vadd.f32 %v8029_v44, %v8028_v43  ;;  %v8031_v47 = vpop.f32.mrb[66].mxu0 }
 0x2f9   :  { %v8051_v48 = vpop.f32.mrb[65].mxu1  ;;  %v8032_v49 = vpop.f32.mrb[67].mxu0 }
 0x2fa   :  { %v6483_v50 = vadd.f32 %v8030_v46, %v6443_v42  ;;  %v8052_v51 = vadd.f32 %v8051_v48, %v8050_v45  ;;  %v8053_v52 = vpop.f32.mrb[66].mxu1 }
 0x2fb   :  { %v8054_v53 = vpop.f32.mrb[67].mxu1 }
 0x2fc   :  { %v6523_v54 = vadd.f32 %v8052_v51, %v6483_v50 }
 0x316   :  { %v8072_v55 = vpop.f32.mrb[68].mxu0 }
 0x317   :  { %v8073_v56 = vpop.f32.mrb[69].mxu0 }
 0x318   :  { %v8094_v57 = vpop.f32.mrb[68].mxu1  ;;  %v8074_v58 = vadd.f32 %v8073_v56, %v8072_v55  ;;  %v8075_v59 = vpop.f32.mrb[70].mxu0 }
 0x319   :  { %v8095_v60 = vpop.f32.mrb[69].mxu1  ;;  %v8076_v61 = vpop.f32.mrb[71].mxu0 }
 0x31a   :  { %v6563_v62 = vadd.f32 %v8074_v58, %v6523_v54  ;;  %v8096_v63 = vadd.f32 %v8095_v60, %v8094_v57  ;;  %v8097_v0 = vpop.f32.mrb[70].mxu1 }
 0x31b   :  { %v8098_v1 = vpop.f32.mrb[71].mxu1 }
 0x31c   :  { %v6603_v2 = vadd.f32 %v8096_v63, %v6563_v62 }
 0x31e   :  { %v6608_v3 = vmax.f32 %v6603_v2, 0.0 }
 0x320   :  { %8150 = vmatmul.mubr.f32.vlgmr.msra.gmra.mrb[72].mxu0 %v6608_v3 }
 0x3f3   :  { %v6698_v5 = vpop.f32.mrb[72].mxu0 }
 0x3f4   :  { %v6699_v6 = vadd.f32 %v7307_v4, %v6698_v5  ;;  %v8151_v7 = vpop.f32.mrb[73].mxu0 }
 0x3f6   :  { %v6703_v8 = vsel %vm6702_vm1, %v6699_v6, -inf }
 0x3f7   :  { %6704 = vmax.xlane.f32.xlu0 %v6703_v8 }
 0x484   :  { %v6705_v9 = vpop.xlane.xlu0 %6704 }
 0x485   :  { %v6706_v10 = vsub.f32 %v6699_v6, %v6705_v9 }
 0x487   :  { %v6707_v11 = vmul.f32 1.442695, %v6706_v10 }
 0x489   :  { %8766 = vpow2.f32 %v6707_v11 }
 0x493   :  { %v8767_v12 = vpop.eup %8766 }
 0x494   :  { %v6709_v13 = vsel %vm6702_vm1, %v8767_v12, 0.0 }
 0x495   :  { %6710 = vadd.xlane.f32.xlu0 %v6709_v13 }
 0x522   :  { %v6711_v14 = vpop.xlane.xlu0 %6710 }
 0x523   :  { %8768 = vlog2.f32 %v6711_v14 }
 0x52d   :  { %v8769_v15 = vpop.eup %8768 }
 0x52e   :  { %v6713_v16 = vmul.f32 0.6931472, %v8769_v15 }
 0x530   :  { %v6714_v17 = vsub.f32 %v6706_v10, %v6713_v16 }
 0x532   :  { %6715 = vst.msk [vmem:[#allocation2] sm:$0x3] %vm6702_vm1, %v6714_v17 }
 0x533   :  { %8781 = shalt.err (!%p8778_p4)
}
 0x534   :  { %s8782_s19 = scalar_lea.hbm %s10789_s5, 32 }
 0x535   :  { %p8783_p5 = scmp.ne.s32.totalorder %s10789_s5, %s8782_s19  ;;  %p8786_p6 = scmp.lt.u32.totalorder %s8782_s19, %s10789_s5 }
 0x537   :  { %p8788_p7 = pnand %p8786_p6, %p8783_p5 }
 0x539   :  { %8791 = shalt.err (!%p8788_p7)
}
 0x53a   :  { %6725 = dma.vmem_to_hbm [thread:$0]  %s6723_s4, 32, %s10789_s5, [#allocation3]  }
 0x53b   :  { %8792 = dma.done.wait [#allocation3], 32  }
 0x53c   :  { %8793 = vsyncadd [#allocation3], 4294967264 }
 0x53d   :  { %6729 = vsyncpa [#allocation3], 1 }

</bundles_post_ra>
